<compile_context>
chip_gen: v7x
topology: tpu7x:2x2x1
jax: 0.10.0
libtpu: 0.0.40
codegen_flags: <defaults>
</compile_context>

<pallas_src>
import functools
import math

import jax
import jax.numpy as jnp
from jax.experimental import pallas as pl
from jax.experimental.pallas import tpu as pltpu


_NEG_BIG = -10000.0


# ----------------------------- hardware config --------------------------------

def _tpu_config():
    """Generation-aware tiling / VMEM / numeric choices (v5e / v6e / v7x)."""
    kind = ""
    try:
        kind = jax.devices()[0].device_kind.lower()
    except Exception:
        pass
    vmem_cap = None
    try:
        vmem_cap = int(pltpu.get_tpu_info().vmem_capacity_bytes)
    except Exception:
        vmem_cap = None
    if vmem_cap is None or vmem_cap <= 0:
        vmem_cap = (64 << 20) if "v7" in kind else (128 << 20)
    # Ask for ~80% of physical VMEM, always leaving >= 8 MiB of Mosaic headroom.
    vmem_limit = max(32 << 20, min(int(vmem_cap * 0.8), vmem_cap - (8 << 20)))
    # Bigger tiles amortize per-grid-step overhead where VMEM is plentiful
    # (v5e/v6e: 128 MiB); stay at 512 on v7x (64 MiB).
    max_tile = 1024 if vmem_cap >= (96 << 20) else 512
    # bf16 EUP (exp) exists on v6e/v7x only; keep f32 exp on v5e.
    exp_bf16 = ("v6" in kind) or ("v7" in kind)
    # Deeper K/V buffering helps hide exposed DMA on low-bandwidth v5 parts.
    kv_buffers = 3 if "v5" in kind else 2
    return {
        "vmem_limit": int(vmem_limit),
        "max_tile": int(max_tile),
        "exp_bf16": bool(exp_bf16),
        "kv_buffers": int(kv_buffers),
    }


def _seq_tile(S, max_tile):
    for t in (1024, 512, 256, 128):
        if t <= max_tile and S % t == 0:
            return t
    return S  # only reachable for unpadded S < 128 (wrapper pads to 128)


# --------------------------- quant helpers (shared) ---------------------------

def _weight_fake_quant(w, bits):
    """Symmetric per-tensor fake quantization (quantize-dequantize) for weights."""
    if bits >= 32:
        return w
    qmax = 2.0 ** (bits - 1) - 1.0
    scale = jnp.maximum(jnp.max(jnp.abs(w)) / qmax, 1e-8)
    return jnp.round(jnp.clip(w / scale, -qmax, qmax)) * scale


def _act_qparams(x, bits):
    """Per-batch-element symmetric quant params -> (B, 2) f32 of [scale, 1/scale]."""
    B = x.shape[0]
    if bits >= 32:
        return jnp.ones((B, 2), jnp.float32)
    qmax = 2.0 ** (bits - 1) - 1.0
    amax = jnp.max(jnp.abs(x.astype(jnp.float32).reshape(B, -1)), axis=1)
    scale = jnp.maximum(amax / qmax, 1e-8)
    return jnp.stack([scale, 1.0 / scale], axis=1)


def _fq_act(x, scale, inv_scale, bits):
    """Fake-quantize activations with precomputed (scale, inv_scale)."""
    if bits >= 32:
        return x
    qmax = 2.0 ** (bits - 1) - 1.0
    return jnp.round(jnp.clip(x * inv_scale, -qmax, qmax)) * scale


# --------------------------------- kernels -----------------------------------

def _qkv_proj_kernel(qp_ref, x_ref,
                     wq_ref, bq_ref, wk_ref, bk_ref, wv_ref, bv_ref,
                     q_ref, k_ref, v_ref, *, a_bits, num_heads, head_dim):
    b = pl.program_id(0)
    H, hd = num_heads, head_dim
    TS = x_ref.shape[1]

    x = x_ref[0].astype(jnp.float32)                              # (TS, D)
    xq = _fq_act(x, qp_ref[b, 0], qp_ref[b, 1], a_bits).astype(jnp.bfloat16)

    def proj(w_ref_, b_ref_, out_ref_):
        y = jnp.dot(xq, w_ref_[...], preferred_element_type=jnp.float32) + b_ref_[0]
        # Emit [H, TS, hd] so attention reads per-head tiles with no in-kernel relayout.
        out_ref_[0] = jnp.transpose(y.reshape(TS, H, hd), (1, 0, 2)).astype(out_ref_.dtype)

    # 1/sqrt(head_dim) is already folded into wq/bq by the wrapper.
    proj(wq_ref, bq_ref, q_ref)
    proj(wk_ref, bk_ref, k_ref)
    proj(wv_ref, bv_ref, v_ref)


def _flash_attn_kernel(q_ref, k_ref, v_ref, bias_ref, o_ref,
                       m_scr, l_scr, acc_scr, *, exp_bf16):
    ki = pl.program_id(3)

    @pl.when(ki == 0)
    def _init():
        m_scr[...] = jnp.full_like(m_scr, -jnp.inf)
        l_scr[...] = jnp.zeros_like(l_scr)
        acc_scr[...] = jnp.zeros_like(acc_scr)

    q = q_ref[0, 0]                                               # (TQ, hd) bf16
    k = k_ref[0, 0]                                               # (TK, hd) bf16
    v = v_ref[0, 0]                                               # (TK, hd) bf16

    # Scores (TQ, TK): contract over head_dim; q already carries 1/sqrt(hd).
    s = jax.lax.dot_general(q, k, (((1,), (1,)), ((), ())),
                            preferred_element_type=jnp.float32)
    s = s + bias_ref[0]                                           # (1, TK) mask bias

    m_prev = m_scr[...]                                           # (TQ, 1)
    m_new = jnp.maximum(m_prev, jnp.max(s, axis=-1, keepdims=True))
    alpha = jnp.exp(m_prev - m_new)                               # (TQ, 1)

    if exp_bf16:   # bf16 EUP path (v6e/v7x): exp is the binding unit at hd=64.
        p = jnp.exp((s - m_new).astype(jnp.bfloat16))             # (TQ, TK) bf16
        p_sum = jnp.sum(p.astype(jnp.float32), axis=-1, keepdims=True)
        p_mm = p
    else:          # v5e: keep f32 exp, cast only for the MXU matmul.
        p32 = jnp.exp(s - m_new)
        p_sum = jnp.sum(p32, axis=-1, keepdims=True)
        p_mm = p32.astype(jnp.bfloat16)

    l_scr[...] = alpha * l_scr[...] + p_sum
    m_scr[...] = m_new
    acc_scr[...] = alpha * acc_scr[...] + jnp.dot(
        p_mm, v, preferred_element_type=jnp.float32)              # (TQ, hd)

    @pl.when(ki == pl.num_programs(3) - 1)
    def _finalize():
        inv_l = pl.reciprocal(l_scr[...], approx=True)            # (TQ, 1), EUP
        o_ref[0, 0] = (acc_scr[...] * inv_l).astype(o_ref.dtype)  # bf16 context


def _out_proj_kernel(qp_ref, ctx_ref, w_ref, b_ref, o_ref, *, a_bits):
    b = pl.program_id(0)
    H, TS, hd = ctx_ref.shape[1], ctx_ref.shape[2], ctx_ref.shape[3]

    ctx = ctx_ref[0].astype(jnp.float32)                          # (H, TS, hd)
    ctx = jnp.transpose(ctx, (1, 0, 2)).reshape(TS, H * hd)       # lane-dense (TS, D)
    ctxq = _fq_act(ctx, qp_ref[b, 0], qp_ref[b, 1], a_bits).astype(jnp.bfloat16)
    out = jnp.dot(ctxq, w_ref[...], preferred_element_type=jnp.float32) + b_ref[0]
    o_ref[0] = out.astype(o_ref.dtype)


# --------------------------- pallas_call wrappers -----------------------------

def _const_spec(shape, single_buffer):
    """BlockSpec for a block that is constant across the grid (weights / biases)."""
    zeros = (0,) * len(shape)
    index_map = lambda *_: zeros
    if single_buffer:
        return pl.BlockSpec(shape, index_map, pipeline_mode=pl.Buffered(1))
    return pl.BlockSpec(shape, index_map)


def _call_with_fallback(build, args):
    # Prefer the hinted build (single-buffered weights / deeper K/V buffering);
    # if this Pallas version rejects pl.Buffered on these BlockSpecs, rebuild with
    # defaults.  The result is still validated against the JAX reference, so a
    # genuine kernel bug cannot be masked by this fallback.
    try:
        return build(True)(*args)
    except Exception:
        return build(False)(*args)


def _qkv_proj(x, qparams, wq, bq, wk, bk, wv, bv, *, a_bits, num_heads, head_dim, cfg):
    B, S, D = x.shape
    H, hd = num_heads, head_dim
    TS = _seq_tile(S, cfg["max_tile"])
    kernel = functools.partial(_qkv_proj_kernel, a_bits=a_bits,
                               num_heads=H, head_dim=hd)

    smem_spec = pl.BlockSpec(memory_space=pltpu.MemorySpace.SMEM)
    x_spec = pl.BlockSpec((1, TS, D), lambda b, s: (b, s, 0))
    qkv_spec = pl.BlockSpec((1, H, TS, hd), lambda b, s: (b, 0, s, 0))
    out_sds = jax.ShapeDtypeStruct((B, H, S, hd), jnp.bfloat16)

    cost = pl.CostEstimate(
        flops=int(6 * B * S * D * D),
        transcendentals=0,
        bytes_accessed=int(2 * B * S * D + 6 * D * D + 6 * B * S * D),
    )

    def build(use_hints):
        w_spec = _const_spec((D, D), use_hints)
        b_spec = _const_spec((1, D), use_hints)
        return pl.pallas_call(
            kernel,
            out_shape=(out_sds, out_sds, out_sds),
            grid_spec=pltpu.PrefetchScalarGridSpec(
                num_scalar_prefetch=0,
                grid=(B, S // TS),
                in_specs=[smem_spec, x_spec,
                          w_spec, b_spec, w_spec, b_spec, w_spec, b_spec],
                out_specs=[qkv_spec, qkv_spec, qkv_spec],
            ),
            compiler_params=pltpu.CompilerParams(
                dimension_semantics=("parallel", "parallel"),
                vmem_limit_bytes=cfg["vmem_limit"]),
            cost_estimate=cost,
        )

    return _call_with_fallback(build, (qparams, x, wq, bq, wk, bk, wv, bv))


def _flash_attention(q, k, v, mask_bias, *, cfg):
    B, H, S, hd = q.shape
    TQ = TK = _seq_tile(S, cfg["max_tile"])
    NQ, NK = S // TQ, S // TK
    kernel = functools.partial(_flash_attn_kernel, exp_bf16=cfg["exp_bf16"])

    cost = pl.CostEstimate(
        flops=int(4 * B * H * S * S * hd),
        transcendentals=int(B * H * S * S),
        bytes_accessed=int(2 * B * H * S * hd * (2 + 2 * NQ) + 4 * B * S * H * NQ),
    )

    def build(use_hints):
        kv_kwargs = {}
        if use_hints and cfg["kv_buffers"] != 2:
            kv_kwargs = dict(pipeline_mode=pl.Buffered(cfg["kv_buffers"]))
        q_spec = pl.BlockSpec((1, 1, TQ, hd), lambda b, h, qi, ki: (b, h, qi, 0))
        kv_spec = pl.BlockSpec((1, 1, TK, hd), lambda b, h, qi, ki: (b, h, ki, 0),
                               **kv_kwargs)
        bias_spec = pl.BlockSpec((1, 1, TK), lambda b, h, qi, ki: (b, 0, ki))
        o_spec = pl.BlockSpec((1, 1, TQ, hd), lambda b, h, qi, ki: (b, h, qi, 0))
        return pl.pallas_call(
            kernel,
            out_shape=jax.ShapeDtypeStruct((B, H, S, hd), jnp.bfloat16),
            grid_spec=pltpu.PrefetchScalarGridSpec(
                num_scalar_prefetch=0,
                grid=(B, H, NQ, NK),
                in_specs=[q_spec, kv_spec, kv_spec, bias_spec],
                out_specs=o_spec,
                scratch_shapes=[
                    pltpu.VMEM((TQ, 1), jnp.float32),    # running max m
                    pltpu.VMEM((TQ, 1), jnp.float32),    # running sum l
                    pltpu.VMEM((TQ, hd), jnp.float32),   # per-head context accumulator
                ],
            ),
            compiler_params=pltpu.CompilerParams(
                dimension_semantics=("parallel", "parallel", "parallel", "arbitrary"),
                vmem_limit_bytes=cfg["vmem_limit"]),
            cost_estimate=cost,
        )

    return _call_with_fallback(build, (q, k, v, mask_bias))


def _out_proj(ctx, qparams, w, b, *, a_bits, out_dtype, cfg):
    B, H, S, hd = ctx.shape
    D = H * hd
    TS = _seq_tile(S, cfg["max_tile"])
    kernel = functools.partial(_out_proj_kernel, a_bits=a_bits)

    cost = pl.CostEstimate(
        flops=int(2 * B * S * D * D),
        transcendentals=0,
        bytes_accessed=int(2 * B * S * D + 2 * D * D + 4 * B * S * D),
    )

    def build(use_hints):
        return pl.pallas_call(
            kernel,
            out_shape=jax.ShapeDtypeStruct((B, S, D), out_dtype),
            grid_spec=pltpu.PrefetchScalarGridSpec(
                num_scalar_prefetch=0,
                grid=(B, S // TS),
                in_specs=[pl.BlockSpec(memory_space=pltpu.MemorySpace.SMEM),
                          pl.BlockSpec((1, H, TS, hd), lambda bb, s: (bb, 0, s, 0)),
                          _const_spec((D, D), use_hints),
                          _const_spec((1, D), use_hints)],
                out_specs=pl.BlockSpec((1, TS, D), lambda bb, s: (bb, s, 0)),
            ),
            compiler_params=pltpu.CompilerParams(
                dimension_semantics=("parallel", "parallel"),
                vmem_limit_bytes=cfg["vmem_limit"]),
            cost_estimate=cost,
        )

    return _call_with_fallback(build, (qparams, ctx, w, b))


# ------------------------------ top-level module -----------------------------

def gpt2_quant_attention(hidden_states, attention_mask, params,
                         *, num_heads, w_bits=8, a_bits=8):
    """hidden_states: (B, S, D); attention_mask: (B, S) with 1 = attend (or None)."""
    B, S, D = hidden_states.shape
    assert D % num_heads == 0
    head_dim = D // num_heads
    cfg = _tpu_config()

    # Static weight prep: fake-quant once, fold 1/sqrt(hd) into wq/bq, cast to bf16.
    inv_sqrt_hd = 1.0 / math.sqrt(head_dim)

    def prep_w(w, scale=1.0):
        wq_ = _weight_fake_quant(w.astype(jnp.float32), w_bits) * scale
        return wq_.astype(jnp.bfloat16)

    def prep_b(b, scale=1.0):
        return (b.astype(jnp.float32) * scale).reshape(1, D)

    wq, bq = prep_w(params["wq"], inv_sqrt_hd), prep_b(params["bq"], inv_sqrt_hd)
    wk, bk = prep_w(params["wk"]), prep_b(params["bk"])
    wv, bv = prep_w(params["wv"]), prep_b(params["bv"])
    wo, bo = prep_w(params["wo"]), prep_b(params["bo"])

    # Pad the sequence to a multiple of 128 (lane-friendly tiling, real seq grid axis).
    S_pad = ((S + 127) // 128) * 128
    pad = S_pad - S

    x = hidden_states.astype(jnp.bfloat16)      # activations get 8-bit quantized anyway
    if attention_mask is None:
        mask = jnp.ones((B, S), jnp.float32)
    else:
        mask = attention_mask.astype(jnp.float32)
    if pad:
        x = jnp.pad(x, ((0, 0), (0, pad), (0, 0)))
        mask = jnp.pad(mask, ((0, 0), (0, pad)))          # padded keys fully masked
    mask_bias = ((1.0 - mask) * _NEG_BIG).reshape(B, 1, S_pad)

    # Per-batch activation quant scales over the full activation (zero padding does not
    # change the abs-max), so per-tensor semantics survive sequence tiling.
    x_qp = _act_qparams(x, a_bits)

    q, k, v = _qkv_proj(x, x_qp, wq, bq, wk, bk, wv, bv,
                        a_bits=a_bits, num_heads=num_heads, head_dim=head_dim, cfg=cfg)
    ctx = _flash_attention(q, k, v, mask_bias, cfg=cfg)           # (B, H, S_pad, hd) bf16

    # Exclude padded query rows from the context quant scale.
    ctx_qp = _act_qparams(ctx[:, :, :S, :], a_bits)
    out = _out_proj(ctx, ctx_qp, wo, bo, a_bits=a_bits,
                    out_dtype=hidden_states.dtype, cfg=cfg)       # (B, S_pad, D)
    return out[:, :S, :] if pad else out


# ----------------------------- pure-JAX reference ----------------------------

def _reference(hidden_states, attention_mask, params, *, num_heads,
               w_bits=8, a_bits=8):
    B, S, D = hidden_states.shape
    H = num_heads
    hd = D // H
    inv = 1.0 / math.sqrt(hd)

    def prep_w(w, scale=1.0):
        wq_ = _weight_fake_quant(w.astype(jnp.float32), w_bits) * scale
        return wq_.astype(jnp.bfloat16).astype(jnp.float32)

    wq = prep_w(params["wq"], inv)
    bq = params["bq"].astype(jnp.float32) * inv
    wk, bk = prep_w(params["wk"]), params["bk"].astype(jnp.float32)
    wv, bv = prep_w(params["wv"]), params["bv"].astype(jnp.float32)
    wo, bo = prep_w(params["wo"]), params["bo"].astype(jnp.float32)

    x = hidden_states.astype(jnp.bfloat16).astype(jnp.float32)
    qp = _act_qparams(x, a_bits)

    outs = []
    for b in range(B):
        xq = _fq_act(x[b], qp[b, 0], qp[b, 1], a_bits)
        q = (xq @ wq + bq).astype(jnp.bfloat16).astype(jnp.float32)
        k = (xq @ wk + bk).astype(jnp.bfloat16).astype(jnp.float32)
        v = (xq @ wv + bv).astype(jnp.bfloat16).astype(jnp.float32)
        q3, k3, v3 = (t.reshape(S, H, hd) for t in (q, k, v))
        s = jnp.einsum("qhd,khd->hqk", q3, k3)        # 1/sqrt(hd) folded into q
        if attention_mask is not None:
            s = s + (1.0 - attention_mask[b].astype(jnp.float32))[None, None, :] * _NEG_BIG
        p = jax.nn.softmax(s, axis=-1)
        ctx = jnp.einsum("hqk,khd->qhd", p, v3).reshape(S, D)
        ctx = ctx.astype(jnp.bfloat16).astype(jnp.float32)        # mirror bf16 storage
        cqp = _act_qparams(ctx[None], a_bits)[0]
        ctxq = _fq_act(ctx, cqp[0], cqp[1], a_bits)
        outs.append(ctxq @ wo + bo)
    return jnp.stack(outs).astype(hidden_states.dtype)


# ---------------------------------- main --------------------------------------

if __name__ == "__main__":
    B, S, D = 2, 8, 32          # batch, seq_len, embed_dim
    H = 4                       # num_heads -> head_dim = 8
    W_BITS, A_BITS = 8, 8

    key = jax.random.PRNGKey(0)
    ks = jax.random.split(key, 10)

    # Linear weights stored as [in_features, out_features] (pre-transposed).
    params = {
        "wq": jax.random.normal(ks[0], (D, D), jnp.float32) * 0.02,
        "bq": jax.random.normal(ks[1], (D,), jnp.float32) * 0.01,
        "wk": jax.random.normal(ks[2], (D, D), jnp.float32) * 0.02,
        "bk": jax.random.normal(ks[3], (D,), jnp.float32) * 0.01,
        "wv": jax.random.normal(ks[4], (D, D), jnp.float32) * 0.02,
        "bv": jax.random.normal(ks[5], (D,), jnp.float32) * 0.01,
        "wo": jax.random.normal(ks[6], (D, D), jnp.float32) * 0.02,
        "bo": jax.random.normal(ks[7], (D,), jnp.float32) * 0.01,
    }

    hidden_states = jax.random.normal(ks[8], (B, S, D), jnp.float32)
    # Exercise the mask path: last two key positions of batch 1 are masked out.
    attention_mask = jnp.ones((B, S), jnp.float32).at[1, -2:].set(0.0)

    out = gpt2_quant_attention(hidden_states, attention_mask, params,
                               num_heads=H, w_bits=W_BITS, a_bits=A_BITS)
    out = jax.block_until_ready(out)

    ref = _reference(hidden_states, attention_mask, params,
                     num_heads=H, w_bits=W_BITS, a_bits=A_BITS)
    assert out.shape == (B, S, D)
    max_err = float(jnp.max(jnp.abs(out - ref)))
    # Tolerance covers approx-reciprocal softmax normalization, bf16 exp (v6e/v7x)
    # and bf16 intermediate storage vs the exact-softmax f32 reference.
    assert jnp.allclose(out, ref, atol=5e-3, rtol=2e-2), \
        f"mismatch vs JAX reference, max|diff|={max_err}"

    print("KERNEL_OK")
</pallas_src>

<mosaic_0001>
module attributes {stable_mosaic.version = 11 : i64} {
  func.func @_qkv_proj_kernel(%arg0: i32, %arg1: i32, %arg2: memref<2x2xf32, #tpu.memory_space<smem>>, %arg3: memref<1x128x32xbf16, #tpu.memory_space<vmem>>, %arg4: memref<32x32xbf16, #tpu.memory_space<vmem>>, %arg5: memref<1x32xf32, #tpu.memory_space<vmem>>, %arg6: memref<32x32xbf16, #tpu.memory_space<vmem>>, %arg7: memref<1x32xf32, #tpu.memory_space<vmem>>, %arg8: memref<32x32xbf16, #tpu.memory_space<vmem>>, %arg9: memref<1x32xf32, #tpu.memory_space<vmem>>, %arg10: memref<1x4x128x8xbf16, #tpu.memory_space<vmem>>, %arg11: memref<1x4x128x8xbf16, #tpu.memory_space<vmem>>, %arg12: memref<1x4x128x8xbf16, #tpu.memory_space<vmem>>) attributes {dimension_semantics = [#tpu.dimension_semantics<parallel>, #tpu.dimension_semantics<parallel>], iteration_bounds = array<i64: 2, 1>, scalar_prefetch = 0 : i64, scratch_operands = 0 : i64, tpu.core_type = #tpu.core_type<tc>, window_params = [{transform_indices = @transform_0, window_bounds = array<i64: 2, 2>}, {transform_indices = @transform_1, window_bounds = array<i64: 1, 128, 32>}, {pipeline_mode = #tpu.pipeline_mode<synchronous>, transform_indices = @transform_2, window_bounds = array<i64: 32, 32>}, {pipeline_mode = #tpu.pipeline_mode<synchronous>, transform_indices = @transform_3, window_bounds = array<i64: 1, 32>}, {pipeline_mode = #tpu.pipeline_mode<synchronous>, transform_indices = @transform_4, window_bounds = array<i64: 32, 32>}, {pipeline_mode = #tpu.pipeline_mode<synchronous>, transform_indices = @transform_5, window_bounds = array<i64: 1, 32>}, {pipeline_mode = #tpu.pipeline_mode<synchronous>, transform_indices = @transform_6, window_bounds = array<i64: 32, 32>}, {pipeline_mode = #tpu.pipeline_mode<synchronous>, transform_indices = @transform_7, window_bounds = array<i64: 1, 32>}, {transform_indices = @transform_8, window_bounds = array<i64: 1, 4, 128, 8>}, {transform_indices = @transform_9, window_bounds = array<i64: 1, 4, 128, 8>}, {transform_indices = @transform_10, window_bounds = array<i64: 1, 4, 128, 8>}]} {
    %c0 = arith.constant 0 : index
    %c0_0 = arith.constant 0 : index
    %c0_1 = arith.constant 0 : index
    %0 = vector.load %arg3[%c0, %c0_0, %c0_1] : memref<1x128x32xbf16, #tpu.memory_space<vmem>>, vector<1x128x32xbf16>
    %1 = vector.shape_cast %0 : vector<1x128x32xbf16> to vector<128x32xbf16>
    %2 = arith.extf %1 : vector<128x32xbf16> to vector<128x32xf32>
    %3 = arith.index_cast %arg0 : i32 to index
    %c0_2 = arith.constant 0 : index
    %4 = memref.load %arg2[%3, %c0_2] : memref<2x2xf32, #tpu.memory_space<smem>>
    %5 = arith.index_cast %arg0 : i32 to index
    %c1 = arith.constant 1 : index
    %6 = memref.load %arg2[%5, %c1] : memref<2x2xf32, #tpu.memory_space<smem>>
    %7 = vector.broadcast %6 : f32 to vector<128x32xf32>
    %8 = arith.mulf %2, %7 : vector<128x32xf32>
    %cst = arith.constant -1.270000e+02 : f32
    %cst_3 = arith.constant 1.270000e+02 : f32
    %9 = vector.broadcast %cst : f32 to vector<128x32xf32>
    %10 = arith.maximumf %9, %8 : vector<128x32xf32>
    %11 = vector.broadcast %cst_3 : f32 to vector<128x32xf32>
    %12 = arith.minimumf %11, %10 : vector<128x32xf32>
    %13 = math.roundeven %12 : vector<128x32xf32>
    %14 = vector.broadcast %4 : f32 to vector<128x32xf32>
    %15 = arith.mulf %13, %14 : vector<128x32xf32>
    %16 = arith.truncf %15 : vector<128x32xf32> to vector<128x32xbf16>
    %c0_4 = arith.constant 0 : index
    %c0_5 = arith.constant 0 : index
    %17 = vector.load %arg4[%c0_4, %c0_5] : memref<32x32xbf16, #tpu.memory_space<vmem>>, vector<32x32xbf16>
    %cst_6 = arith.constant dense<0.000000e+00> : vector<128x32xf32>
    %18 = tpu.matmul %16, %17, %cst_6 {dimension_numbers = #tpu.dot_dimension_numbers<[1], [0], [0], [1], [0, 0, 1, 1], [], []>} : vector<128x32xbf16>, vector<32x32xbf16>, vector<128x32xf32> -> vector<128x32xf32>
    %c0_7 = arith.constant 0 : index
    %c0_8 = arith.constant 0 : index
    %19 = vector.load %arg5[%c0_7, %c0_8] : memref<1x32xf32, #tpu.memory_space<vmem>>, vector<1x32xf32>
    %20 = vector.shape_cast %19 : vector<1x32xf32> to vector<32xf32>
    %21 = vector.shape_cast %20 : vector<32xf32> to vector<1x32xf32>
    %22 = vector.broadcast %21 : vector<1x32xf32> to vector<128x32xf32>
    %23 = arith.addf %18, %22 : vector<128x32xf32>
    %24 = vector.shape_cast %23 : vector<128x32xf32> to vector<128x4x8xf32>
    %25 = tpu.transpose %24, [1, 0, 2] : vector<128x4x8xf32> -> vector<4x128x8xf32>
    %26 = arith.truncf %25 : vector<4x128x8xf32> to vector<4x128x8xbf16>
    %c0_9 = arith.constant 0 : index
    %c0_10 = arith.constant 0 : index
    %c0_11 = arith.constant 0 : index
    %c0_12 = arith.constant 0 : index
    %27 = vector.load %arg10[%c0_9, %c0_10, %c0_11, %c0_12] : memref<1x4x128x8xbf16, #tpu.memory_space<vmem>>, vector<1x4x128x8xbf16>
    %28 = vector.shape_cast %27 : vector<1x4x128x8xbf16> to vector<4x128x8xbf16>
    %29 = vector.shape_cast %26 : vector<4x128x8xbf16> to vector<1x4x128x8xbf16>
    tpu.vector_store %arg10[%c0_9, %c0_10, %c0_11, %c0_12], %29 {strides = array<i32>} : memref<1x4x128x8xbf16, #tpu.memory_space<vmem>>, vector<1x4x128x8xbf16>,
    %c0_13 = arith.constant 0 : index
    %c0_14 = arith.constant 0 : index
    %30 = vector.load %arg6[%c0_13, %c0_14] : memref<32x32xbf16, #tpu.memory_space<vmem>>, vector<32x32xbf16>
    %cst_15 = arith.constant dense<0.000000e+00> : vector<128x32xf32>
    %31 = tpu.matmul %16, %30, %cst_15 {dimension_numbers = #tpu.dot_dimension_numbers<[1], [0], [0], [1], [0, 0, 1, 1], [], []>} : vector<128x32xbf16>, vector<32x32xbf16>, vector<128x32xf32> -> vector<128x32xf32>
    %c0_16 = arith.constant 0 : index
    %c0_17 = arith.constant 0 : index
    %32 = vector.load %arg7[%c0_16, %c0_17] : memref<1x32xf32, #tpu.memory_space<vmem>>, vector<1x32xf32>
    %33 = vector.shape_cast %32 : vector<1x32xf32> to vector<32xf32>
    %34 = vector.shape_cast %33 : vector<32xf32> to vector<1x32xf32>
    %35 = vector.broadcast %34 : vector<1x32xf32> to vector<128x32xf32>
    %36 = arith.addf %31, %35 : vector<128x32xf32>
    %37 = vector.shape_cast %36 : vector<128x32xf32> to vector<128x4x8xf32>
    %38 = tpu.transpose %37, [1, 0, 2] : vector<128x4x8xf32> -> vector<4x128x8xf32>
    %39 = arith.truncf %38 : vector<4x128x8xf32> to vector<4x128x8xbf16>
    %c0_18 = arith.constant 0 : index
    %c0_19 = arith.constant 0 : index
    %c0_20 = arith.constant 0 : index
    %c0_21 = arith.constant 0 : index
    %40 = vector.load %arg11[%c0_18, %c0_19, %c0_20, %c0_21] : memref<1x4x128x8xbf16, #tpu.memory_space<vmem>>, vector<1x4x128x8xbf16>
    %41 = vector.shape_cast %40 : vector<1x4x128x8xbf16> to vector<4x128x8xbf16>
    %42 = vector.shape_cast %39 : vector<4x128x8xbf16> to vector<1x4x128x8xbf16>
    tpu.vector_store %arg11[%c0_18, %c0_19, %c0_20, %c0_21], %42 {strides = array<i32>} : memref<1x4x128x8xbf16, #tpu.memory_space<vmem>>, vector<1x4x128x8xbf16>,
    %c0_22 = arith.constant 0 : index
    %c0_23 = arith.constant 0 : index
    %43 = vector.load %arg8[%c0_22, %c0_23] : memref<32x32xbf16, #tpu.memory_space<vmem>>, vector<32x32xbf16>
    %cst_24 = arith.constant dense<0.000000e+00> : vector<128x32xf32>
    %44 = tpu.matmul %16, %43, %cst_24 {dimension_numbers = #tpu.dot_dimension_numbers<[1], [0], [0], [1], [0, 0, 1, 1], [], []>} : vector<128x32xbf16>, vector<32x32xbf16>, vector<128x32xf32> -> vector<128x32xf32>
    %c0_25 = arith.constant 0 : index
    %c0_26 = arith.constant 0 : index
    %45 = vector.load %arg9[%c0_25, %c0_26] : memref<1x32xf32, #tpu.memory_space<vmem>>, vector<1x32xf32>
    %46 = vector.shape_cast %45 : vector<1x32xf32> to vector<32xf32>
    %47 = vector.shape_cast %46 : vector<32xf32> to vector<1x32xf32>
    %48 = vector.broadcast %47 : vector<1x32xf32> to vector<128x32xf32>
    %49 = arith.addf %44, %48 : vector<128x32xf32>
    %50 = vector.shape_cast %49 : vector<128x32xf32> to vector<128x4x8xf32>
    %51 = tpu.transpose %50, [1, 0, 2] : vector<128x4x8xf32> -> vector<4x128x8xf32>
    %52 = arith.truncf %51 : vector<4x128x8xf32> to vector<4x128x8xbf16>
    %c0_27 = arith.constant 0 : index
    %c0_28 = arith.constant 0 : index
    %c0_29 = arith.constant 0 : index
    %c0_30 = arith.constant 0 : index
    %53 = vector.load %arg12[%c0_27, %c0_28, %c0_29, %c0_30] : memref<1x4x128x8xbf16, #tpu.memory_space<vmem>>, vector<1x4x128x8xbf16>
    %54 = vector.shape_cast %53 : vector<1x4x128x8xbf16> to vector<4x128x8xbf16>
    %55 = vector.shape_cast %52 : vector<4x128x8xbf16> to vector<1x4x128x8xbf16>
    tpu.vector_store %arg12[%c0_27, %c0_28, %c0_29, %c0_30], %55 {strides = array<i32>} : memref<1x4x128x8xbf16, #tpu.memory_space<vmem>>, vector<1x4x128x8xbf16>,
    return
  }
  func.func @transform_0(%arg0: i32, %arg1: i32) -> (i32, i32) {
    %c0_i32 = arith.constant 0 : i32
    %c0_i32_0 = arith.constant 0 : i32
    %c0_i32_1 = arith.constant 0 : i32
    return %c0_i32, %c0_i32_0 : i32, i32
  }
  func.func @transform_1(%arg0: i32, %arg1: i32) -> (i32, i32, i32) {
    %c0_i32 = arith.constant 0 : i32
    %c0_i32_0 = arith.constant 0 : i32
    return %arg0, %arg1, %c0_i32 : i32, i32, i32
  }
  func.func @transform_2(%arg0: i32, %arg1: i32) -> (i32, i32) {
    %c0_i32 = arith.constant 0 : i32
    %c0_i32_0 = arith.constant 0 : i32
    %c0_i32_1 = arith.constant 0 : i32
    return %c0_i32, %c0_i32_0 : i32, i32
  }
  func.func @transform_3(%arg0: i32, %arg1: i32) -> (i32, i32) {
    %c0_i32 = arith.constant 0 : i32
    %c0_i32_0 = arith.constant 0 : i32
    %c0_i32_1 = arith.constant 0 : i32
    return %c0_i32, %c0_i32_0 : i32, i32
  }
  func.func @transform_4(%arg0: i32, %arg1: i32) -> (i32, i32) {
    %c0_i32 = arith.constant 0 : i32
    %c0_i32_0 = arith.constant 0 : i32
    %c0_i32_1 = arith.constant 0 : i32
    return %c0_i32, %c0_i32_0 : i32, i32
  }
  func.func @transform_5(%arg0: i32, %arg1: i32) -> (i32, i32) {
    %c0_i32 = arith.constant 0 : i32
    %c0_i32_0 = arith.constant 0 : i32
    %c0_i32_1 = arith.constant 0 : i32
    return %c0_i32, %c0_i32_0 : i32, i32
  }
  func.func @transform_6(%arg0: i32, %arg1: i32) -> (i32, i32) {
    %c0_i32 = arith.constant 0 : i32
    %c0_i32_0 = arith.constant 0 : i32
    %c0_i32_1 = arith.constant 0 : i32
    return %c0_i32, %c0_i32_0 : i32, i32
  }
  func.func @transform_7(%arg0: i32, %arg1: i32) -> (i32, i32) {
    %c0_i32 = arith.constant 0 : i32
    %c0_i32_0 = arith.constant 0 : i32
    %c0_i32_1 = arith.constant 0 : i32
    return %c0_i32, %c0_i32_0 : i32, i32
  }
  func.func @transform_8(%arg0: i32, %arg1: i32) -> (i32, i32, i32, i32) {
    %c0_i32 = arith.constant 0 : i32
    %c0_i32_0 = arith.constant 0 : i32
    %c0_i32_1 = arith.constant 0 : i32
    return %arg0, %c0_i32, %arg1, %c0_i32_0 : i32, i32, i32, i32
  }
  func.func @transform_9(%arg0: i32, %arg1: i32) -> (i32, i32, i32, i32) {
    %c0_i32 = arith.constant 0 : i32
    %c0_i32_0 = arith.constant 0 : i32
    %c0_i32_1 = arith.constant 0 : i32
    return %arg0, %c0_i32, %arg1, %c0_i32_0 : i32, i32, i32, i32
  }
  func.func @transform_10(%arg0: i32, %arg1: i32) -> (i32, i32, i32, i32) {
    %c0_i32 = arith.constant 0 : i32
    %c0_i32_0 = arith.constant 0 : i32
    %c0_i32_1 = arith.constant 0 : i32
    return %arg0, %c0_i32, %arg1, %c0_i32_0 : i32, i32, i32, i32
  }
}

module attributes {stable_mosaic.version = 11 : i64} {
  func.func @_qkv_proj_kernel(%arg0: i32, %arg1: i32, %arg2: memref<2x2xf32, #tpu.memory_space<smem>>, %arg3: memref<1x128x32xbf16, #tpu.memory_space<vmem>>, %arg4: memref<32x32xbf16, #tpu.memory_space<vmem>>, %arg5: memref<1x32xf32, #tpu.memory_space<vmem>>, %arg6: memref<32x32xbf16, #tpu.memory_space<vmem>>, %arg7: memref<1x32xf32, #tpu.memory_space<vmem>>, %arg8: memref<32x32xbf16, #tpu.memory_space<vmem>>, %arg9: memref<1x32xf32, #tpu.memory_space<vmem>>, %arg10: memref<1x4x128x8xbf16, #tpu.memory_space<vmem>>, %arg11: memref<1x4x128x8xbf16, #tpu.memory_space<vmem>>, %arg12: memref<1x4x128x8xbf16, #tpu.memory_space<vmem>>) attributes {dimension_semantics = [#tpu.dimension_semantics<parallel>, #tpu.dimension_semantics<parallel>], iteration_bounds = array<i64: 2, 1>, scalar_prefetch = 0 : i64, scratch_operands = 0 : i64, tpu.core_type = #tpu.core_type<tc>, window_params = [{transform_indices = @transform_0, window_bounds = array<i64: 2, 2>}, {transform_indices = @transform_1, window_bounds = array<i64: 1, 128, 32>}, {pipeline_mode = #tpu.pipeline_mode<synchronous>, transform_indices = @transform_2, window_bounds = array<i64: 32, 32>}, {pipeline_mode = #tpu.pipeline_mode<synchronous>, transform_indices = @transform_3, window_bounds = array<i64: 1, 32>}, {pipeline_mode = #tpu.pipeline_mode<synchronous>, transform_indices = @transform_4, window_bounds = array<i64: 32, 32>}, {pipeline_mode = #tpu.pipeline_mode<synchronous>, transform_indices = @transform_5, window_bounds = array<i64: 1, 32>}, {pipeline_mode = #tpu.pipeline_mode<synchronous>, transform_indices = @transform_6, window_bounds = array<i64: 32, 32>}, {pipeline_mode = #tpu.pipeline_mode<synchronous>, transform_indices = @transform_7, window_bounds = array<i64: 1, 32>}, {transform_indices = @transform_8, window_bounds = array<i64: 1, 4, 128, 8>}, {transform_indices = @transform_9, window_bounds = array<i64: 1, 4, 128, 8>}, {transform_indices = @transform_10, window_bounds = array<i64: 1, 4, 128, 8>}]} {
    %c0 = arith.constant 0 : index
    %c0_0 = arith.constant 0 : index
    %c0_1 = arith.constant 0 : index
    %0 = vector.load %arg3[%c0, %c0_0, %c0_1] : memref<1x128x32xbf16, #tpu.memory_space<vmem>>, vector<1x128x32xbf16>
    %1 = vector.shape_cast %0 : vector<1x128x32xbf16> to vector<128x32xbf16>
    %2 = arith.extf %1 : vector<128x32xbf16> to vector<128x32xf32>
    %3 = arith.index_cast %arg0 : i32 to index
    %c0_2 = arith.constant 0 : index
    %4 = memref.load %arg2[%3, %c0_2] : memref<2x2xf32, #tpu.memory_space<smem>>
    %5 = arith.index_cast %arg0 : i32 to index
    %c1 = arith.constant 1 : index
    %6 = memref.load %arg2[%5, %c1] : memref<2x2xf32, #tpu.memory_space<smem>>
    %7 = vector.broadcast %6 : f32 to vector<128x32xf32>
    %8 = arith.mulf %2, %7 : vector<128x32xf32>
    %cst = arith.constant -1.270000e+02 : f32
    %cst_3 = arith.constant 1.270000e+02 : f32
    %9 = vector.broadcast %cst : f32 to vector<128x32xf32>
    %10 = arith.maximumf %9, %8 : vector<128x32xf32>
    %11 = vector.broadcast %cst_3 : f32 to vector<128x32xf32>
    %12 = arith.minimumf %11, %10 : vector<128x32xf32>
    %13 = math.roundeven %12 : vector<128x32xf32>
    %14 = vector.broadcast %4 : f32 to vector<128x32xf32>
    %15 = arith.mulf %13, %14 : vector<128x32xf32>
    %16 = arith.truncf %15 : vector<128x32xf32> to vector<128x32xbf16>
    %c0_4 = arith.constant 0 : index
    %c0_5 = arith.constant 0 : index
    %17 = vector.load %arg4[%c0_4, %c0_5] : memref<32x32xbf16, #tpu.memory_space<vmem>>, vector<32x32xbf16>
    %cst_6 = arith.constant dense<0.000000e+00> : vector<128x32xf32>
    %18 = tpu.matmul %16, %17, %cst_6 {dimension_numbers = #tpu.dot_dimension_numbers<[1], [0], [0], [1], [0, 0, 1, 1], [], []>} : vector<128x32xbf16>, vector<32x32xbf16>, vector<128x32xf32> -> vector<128x32xf32>
    %c0_7 = arith.constant 0 : index
    %c0_8 = arith.constant 0 : index
    %19 = vector.load %arg5[%c0_7, %c0_8] : memref<1x32xf32, #tpu.memory_space<vmem>>, vector<1x32xf32>
    %20 = vector.shape_cast %19 : vector<1x32xf32> to vector<32xf32>
    %21 = vector.shape_cast %20 : vector<32xf32> to vector<1x32xf32>
    %22 = vector.broadcast %21 : vector<1x32xf32> to vector<128x32xf32>
    %23 = arith.addf %18, %22 : vector<128x32xf32>
    %24 = vector.shape_cast %23 : vector<128x32xf32> to vector<128x4x8xf32>
    %25 = tpu.transpose %24, [1, 0, 2] : vector<128x4x8xf32> -> vector<4x128x8xf32>
    %26 = arith.truncf %25 : vector<4x128x8xf32> to vector<4x128x8xbf16>
    %c0_9 = arith.constant 0 : index
    %c0_10 = arith.constant 0 : index
    %c0_11 = arith.constant 0 : index
    %c0_12 = arith.constant 0 : index
    %27 = vector.load %arg10[%c0_9, %c0_10, %c0_11, %c0_12] : memref<1x4x128x8xbf16, #tpu.memory_space<vmem>>, vector<1x4x128x8xbf16>
    %28 = vector.shape_cast %27 : vector<1x4x128x8xbf16> to vector<4x128x8xbf16>
    %29 = vector.shape_cast %26 : vector<4x128x8xbf16> to vector<1x4x128x8xbf16>
    tpu.vector_store %arg10[%c0_9, %c0_10, %c0_11, %c0_12], %29 {strides = array<i32>} : memref<1x4x128x8xbf16, #tpu.memory_space<vmem>>, vector<1x4x128x8xbf16>,
    %c0_13 = arith.constant 0 : index
    %c0_14 = arith.constant 0 : index
    %30 = vector.load %arg6[%c0_13, %c0_14] : memref<32x32xbf16, #tpu.memory_space<vmem>>, vector<32x32xbf16>
    %cst_15 = arith.constant dense<0.000000e+00> : vector<128x32xf32>
    %31 = tpu.matmul %16, %30, %cst_15 {dimension_numbers = #tpu.dot_dimension_numbers<[1], [0], [0], [1], [0, 0, 1, 1], [], []>} : vector<128x32xbf16>, vector<32x32xbf16>, vector<128x32xf32> -> vector<128x32xf32>
    %c0_16 = arith.constant 0 : index
    %c0_17 = arith.constant 0 : index
    %32 = vector.load %arg7[%c0_16, %c0_17] : memref<1x32xf32, #tpu.memory_space<vmem>>, vector<1x32xf32>
    %33 = vector.shape_cast %32 : vector<1x32xf32> to vector<32xf32>
    %34 = vector.shape_cast %33 : vector<32xf32> to vector<1x32xf32>
    %35 = vector.broadcast %34 : vector<1x32xf32> to vector<128x32xf32>
    %36 = arith.addf %31, %35 : vector<128x32xf32>
    %37 = vector.shape_cast %36 : vector<128x32xf32> to vector<128x4x8xf32>
    %38 = tpu.transpose %37, [1, 0, 2] : vector<128x4x8xf32> -> vector<4x128x8xf32>
    %39 = arith.truncf %38 : vector<4x128x8xf32> to vector<4x128x8xbf16>
    %c0_18 = arith.constant 0 : index
    %c0_19 = arith.constant 0 : index
    %c0_20 = arith.constant 0 : index
    %c0_21 = arith.constant 0 : index
    %40 = vector.load %arg11[%c0_18, %c0_19, %c0_20, %c0_21] : memref<1x4x128x8xbf16, #tpu.memory_space<vmem>>, vector<1x4x128x8xbf16>
    %41 = vector.shape_cast %40 : vector<1x4x128x8xbf16> to vector<4x128x8xbf16>
    %42 = vector.shape_cast %39 : vector<4x128x8xbf16> to vector<1x4x128x8xbf16>
    tpu.vector_store %arg11[%c0_18, %c0_19, %c0_20, %c0_21], %42 {strides = array<i32>} : memref<1x4x128x8xbf16, #tpu.memory_space<vmem>>, vector<1x4x128x8xbf16>,
    %c0_22 = arith.constant 0 : index
    %c0_23 = arith.constant 0 : index
    %43 = vector.load %arg8[%c0_22, %c0_23] : memref<32x32xbf16, #tpu.memory_space<vmem>>, vector<32x32xbf16>
    %cst_24 = arith.constant dense<0.000000e+00> : vector<128x32xf32>
    %44 = tpu.matmul %16, %43, %cst_24 {dimension_numbers = #tpu.dot_dimension_numbers<[1], [0], [0], [1], [0, 0, 1, 1], [], []>} : vector<128x32xbf16>, vector<32x32xbf16>, vector<128x32xf32> -> vector<128x32xf32>
    %c0_25 = arith.constant 0 : index
    %c0_26 = arith.constant 0 : index
    %45 = vector.load %arg9[%c0_25, %c0_26] : memref<1x32xf32, #tpu.memory_space<vmem>>, vector<1x32xf32>
    %46 = vector.shape_cast %45 : vector<1x32xf32> to vector<32xf32>
    %47 = vector.shape_cast %46 : vector<32xf32> to vector<1x32xf32>
    %48 = vector.broadcast %47 : vector<1x32xf32> to vector<128x32xf32>
    %49 = arith.addf %44, %48 : vector<128x32xf32>
    %50 = vector.shape_cast %49 : vector<128x32xf32> to vector<128x4x8xf32>
    %51 = tpu.transpose %50, [1, 0, 2] : vector<128x4x8xf32> -> vector<4x128x8xf32>
    %52 = arith.truncf %51 : vector<4x128x8xf32> to vector<4x128x8xbf16>
    %c0_27 = arith.constant 0 : index
    %c0_28 = arith.constant 0 : index
    %c0_29 = arith.constant 0 : index
    %c0_30 = arith.constant 0 : index
    %53 = vector.load %arg12[%c0_27, %c0_28, %c0_29, %c0_30] : memref<1x4x128x8xbf16, #tpu.memory_space<vmem>>, vector<1x4x128x8xbf16>
    %54 = vector.shape_cast %53 : vector<1x4x128x8xbf16> to vector<4x128x8xbf16>
    %55 = vector.shape_cast %52 : vector<4x128x8xbf16> to vector<1x4x128x8xbf16>
    tpu.vector_store %arg12[%c0_27, %c0_28, %c0_29, %c0_30], %55 {strides = array<i32>} : memref<1x4x128x8xbf16, #tpu.memory_space<vmem>>, vector<1x4x128x8xbf16>,
    return
  }
  func.func @transform_0(%arg0: i32, %arg1: i32) -> (i32, i32) {
    %c0_i32 = arith.constant 0 : i32
    %c0_i32_0 = arith.constant 0 : i32
    %c0_i32_1 = arith.constant 0 : i32
    return %c0_i32, %c0_i32_0 : i32, i32
  }
  func.func @transform_1(%arg0: i32, %arg1: i32) -> (i32, i32, i32) {
    %c0_i32 = arith.constant 0 : i32
    %c0_i32_0 = arith.constant 0 : i32
    return %arg0, %arg1, %c0_i32 : i32, i32, i32
  }
  func.func @transform_2(%arg0: i32, %arg1: i32) -> (i32, i32) {
    %c0_i32 = arith.constant 0 : i32
    %c0_i32_0 = arith.constant 0 : i32
    %c0_i32_1 = arith.constant 0 : i32
    return %c0_i32, %c0_i32_0 : i32, i32
  }
  func.func @transform_3(%arg0: i32, %arg1: i32) -> (i32, i32) {
    %c0_i32 = arith.constant 0 : i32
    %c0_i32_0 = arith.constant 0 : i32
    %c0_i32_1 = arith.constant 0 : i32
    return %c0_i32, %c0_i32_0 : i32, i32
  }
  func.func @transform_4(%arg0: i32, %arg1: i32) -> (i32, i32) {
    %c0_i32 = arith.constant 0 : i32
    %c0_i32_0 = arith.constant 0 : i32
    %c0_i32_1 = arith.constant 0 : i32
    return %c0_i32, %c0_i32_0 : i32, i32
  }
  func.func @transform_5(%arg0: i32, %arg1: i32) -> (i32, i32) {
    %c0_i32 = arith.constant 0 : i32
    %c0_i32_0 = arith.constant 0 : i32
    %c0_i32_1 = arith.constant 0 : i32
    return %c0_i32, %c0_i32_0 : i32, i32
  }
  func.func @transform_6(%arg0: i32, %arg1: i32) -> (i32, i32) {
    %c0_i32 = arith.constant 0 : i32
    %c0_i32_0 = arith.constant 0 : i32
    %c0_i32_1 = arith.constant 0 : i32
    return %c0_i32, %c0_i32_0 : i32, i32
  }
  func.func @transform_7(%arg0: i32, %arg1: i32) -> (i32, i32) {
    %c0_i32 = arith.constant 0 : i32
    %c0_i32_0 = arith.constant 0 : i32
    %c0_i32_1 = arith.constant 0 : i32
    return %c0_i32, %c0_i32_0 : i32, i32
  }
  func.func @transform_8(%arg0: i32, %arg1: i32) -> (i32, i32, i32, i32) {
    %c0_i32 = arith.constant 0 : i32
    %c0_i32_0 = arith.constant 0 : i32
    %c0_i32_1 = arith.constant 0 : i32
    return %arg0, %c0_i32, %arg1, %c0_i32_0 : i32, i32, i32, i32
  }
  func.func @transform_9(%arg0: i32, %arg1: i32) -> (i32, i32, i32, i32) {
    %c0_i32 = arith.constant 0 : i32
    %c0_i32_0 = arith.constant 0 : i32
    %c0_i32_1 = arith.constant 0 : i32
    return %arg0, %c0_i32, %arg1, %c0_i32_0 : i32, i32, i32, i32
  }
  func.func @transform_10(%arg0: i32, %arg1: i32) -> (i32, i32, i32, i32) {
    %c0_i32 = arith.constant 0 : i32
    %c0_i32_0 = arith.constant 0 : i32
    %c0_i32_1 = arith.constant 0 : i32
    return %arg0, %c0_i32, %arg1, %c0_i32_0 : i32, i32, i32, i32
  }
}

</mosaic_0001>

<bundles_post_ra>
// kernel: tpu_custom_call.1
= control target key start
LH: loop header
LB: loop body
LE: loop exit
PB: predicated region body
PF: predicated region fallthrough
CT: control target
= control target key end

     0   :  { %s13636_s0 = inlined_call_operand.hbm [shape: f32[2,2], index: 0, kind: input, shape index: {}]   ;;  %s13637_s1 = inlined_call_operand.hbm [shape: bf16[2,128,32], index: 1, kind: input, shape index: {}]   ;;  %s13638_s2 = inlined_call_operand.hbm [shape: bf16[32,32], index: 2, kind: input, shape index: {}]   ;;  %s13639_s3 = inlined_call_operand.hbm [shape: f32[1,32], index: 3, kind: input, shape index: {}]   ;;  %s13640_s4 = inlined_call_operand.hbm [shape: bf16[32,32], index: 4, kind: input, shape index: {}]   ;;  %s13641_s5 = inlined_call_operand.hbm [shape: f32[1,32], index: 5, kind: input, shape index: {}]   ;;  %s13642_s6 = inlined_call_operand.hbm [shape: bf16[32,32], index: 6, kind: input, shape index: {}]   ;;  %s13643_s7 = inlined_call_operand.hbm [shape: f32[1,32], index: 7, kind: input, shape index: {}]   ;;  %s13644_s8 = inlined_call_operand.hbm [shape: bf16[2,4,128,8], index: 8, kind: output, shape index: {0}]   ;;  %s13645_s9 = inlined_call_operand.hbm [shape: bf16[2,4,128,8], index: 9, kind: output, shape index: {1}]   ;;  %s13646_s10 = inlined_call_operand.hbm [shape: bf16[2,4,128,8], index: 10, kind: output, shape index: {2}]  }
   0x1   :  { %13673 = sst [smem:[#allocation35_spill]] %s13636_s0 }
   0x2   :  { %13674 = sst [smem:[#allocation36_spill]] %s13637_s1 }
   0x3   :  { %13675 = sst [smem:[#allocation37_spill]] %s13644_s8 }
   0x4   :  { %13676 = sst [smem:[#allocation38_spill]] %s13645_s9 }
   0x5   :  { %13677 = sst [smem:[#allocation39_spill]] %s13646_s10 }
   0x6   :  { %16 = vsyncpa [#allocation5], 0 }
   0x7   :  { %17 = vsyncpa [#allocation3], 0 }
   0x8   :  { %19 = vsyncpa [#allocation3 + $0x1], 0 }
   0x9   :  { %20 = vsyncpa [#allocation8], 0 }
   0xa   :  { %21 = vsyncpa [#allocation11], 0 }
   0xb   :  { %22 = vsyncpa [#allocation14], 0 }
   0xc   :  { %23 = vsyncpa [#allocation4], 0 }
   0xd   :  { %25 = vsyncpa [#allocation4 + $0x1], 0 }
   0xe   :  { %26 = vsyncpa [#allocation18], 0 }
   0xf   :  { %28 = vsyncpa [#allocation18 + $0x1], 0  ;;  %s10607_s13 = smov 0   ;;  %s10609_s14 = smov 0  }
  0x10   :  { %s10611_s15 = smov 0   ;;  %s10613_s16 = smov 0  }
  0x11   :  { %s10615_s17 = smov 0   ;;  %s10617_s18 = smov 0  }
  0x12 LB: > { %13678 = sst [smem:[#allocation27_spill]] %s10522_s16  ;;  %s10532_s19 = smov [#allocation7]   ;;  %s10530_s18 = sphi %s10617_s18, %s34_s18   ;;  %s10526_s17 = sphi %s10615_s17, %s13732_s17   ;;  %s10522_s16 = sphi %s10613_s16, %s13731_s16   ;;  %s10518_s15 = sphi %s10611_s15, %s13730_s15   ;;  %s10514_s14 = sphi %s10609_s14, %s13729_s14   ;;  %s10510_s13 = sphi %s10607_s13, %s13728_s13  }
  0x13   : > { %s331_s20 = sshll.u32 %s10532_s19, 4  ;;  %s10638_s21 = sadd.s32 4294967295, %s10530_s18   ;;  %s10643_s20 = int_to_ptr.vmem [resolvable:$true] %s331_s20 }
  0x14   : > { %p9283_p0 = scmp.ge.s32.totalorder %s10530_s18, 1  ;;  %p13651_p1 = scmp.eq.s32.totalorder %s10638_s21, 0 }
  0x15   : > { %p310_p2 = scmp.lt.s32.totalorder %s10530_s18, 3  ;;  %s10533_s23 = smov [#allocation10]  }
  0x16   : > { %s355_s24 = sshll.u32 %s10533_s23, 4  ;;  %s10534_s26 = smov [#allocation13]   ;;  %s10658_s24 = int_to_ptr.vmem [resolvable:$true] %s355_s24 }
  0x17   : > { %p10645_p3 = pnand %p9283_p0, %p310_p2  ;;  %s379_s27 = sshll.u32 %s10534_s26, 4  ;;  %s10660_s27 = int_to_ptr.vmem [resolvable:$true] %s379_s27 }
  0x18   : > { %s10161_s30 = scalar_lea.hbm %s13638_s2, 256 }
  0x19   : > { %s13679_s22 = scalar_select %p10645_p3, 1, 0 }
  0x1a   : > { %p10037_p5 = pneg %p10645_p3  ;;  %p10162_p7 = scmp.ne.s32.totalorder %s13638_s2, %s10161_s30 }
  0x1b   : > { %p10168_p11 = scmp.lt.u32.totalorder %s10161_s30, %s13638_s2 }
  0x1c   : > { %p10654_p6 = pnand %p10037_p5, %p13651_p1 }
  0x1e   : > { %p10670_p8 = pneg %p10654_p6 }
  0x20   : > { %p10164_p9 = pnand %p10670_p8, %p10162_p7 }
  0x22   : > { %p10165_p10 = pneg %p10164_p9 }
  0x24   : > { %p10170_p12 = pnand %p10168_p11, %p10165_p10 }
  0x26   : > { %10173 = shalt.err (!%p10170_p12)
}
  0x27   : > { %s10174_s28 = scalar_lea.vmem %s10643_s20, 256  ;;  %p10182_p5 = scmp.lt.s32.totalorder %s10643_s20, %s10643_s20 }
  0x28   : > { %p10175_p13 = scmp.ne.s32.totalorder %s10643_s20, %s10174_s28  ;;  %p10183_p4 = scmp.lt.s32.totalorder %s10174_s28, %s10174_s28 }
  0x2a   : > { %p10177_p0 = pnand %p10175_p13, %p10670_p8  ;;  %p10184_p7 = por %p10183_p4, %p10182_p5 }
  0x2c   : > { %p10178_p2 = pneg %p10177_p0 }
  0x2e   : > { %p10185_p9 = pnand %p10184_p7, %p10178_p2 }
  0x30   : > { %10188 = shalt.err (!%p10185_p9)
}
  0x31   : > { %s13654_s29 = smov 64   ;;  %s13655_s30 = smov 4  }
  0x32   : > { %10043 = dma.hbm_to_vmem [thread:$0]  (!%p10654_p6), %s13638_s2, 256, %s10643_s20, [#allocation8], %s13654_s29, %s13654_s29, %s13655_s30  }
  0x33   : > { %s10189_s28 = scalar_lea.hbm %s13640_s4, 256 }
  0x34   : > { %p10190_p4 = scmp.ne.s32.totalorder %s13640_s4, %s10189_s28  ;;  %p10196_p12 = scmp.lt.u32.totalorder %s10189_s28, %s13640_s4 }
  0x36   : > { %p10192_p10 = pnand %p10190_p4, %p10670_p8 }
  0x38   : > { %p10193_p11 = pneg %p10192_p10 }
  0x3a   : > { %p10198_p13 = pnand %p10196_p12, %p10193_p11 }
  0x3c   : > { %10201 = shalt.err (!%p10198_p13)
}
  0x3d   : > { %s10202_s20 = scalar_lea.vmem %s10658_s24, 256  ;;  %p10210_p7 = scmp.lt.s32.totalorder %s10658_s24, %s10658_s24 }
  0x3e   : > { %p10203_p0 = scmp.ne.s32.totalorder %s10658_s24, %s10202_s20  ;;  %p10211_p9 = scmp.lt.s32.totalorder %s10202_s20, %s10202_s20 }
  0x40   : > { %p10205_p2 = pnand %p10203_p0, %p10670_p8  ;;  %p10212_p4 = por %p10211_p9, %p10210_p7 }
  0x42   : > { %p10206_p5 = pneg %p10205_p2 }
  0x44   : > { %p10213_p10 = pnand %p10212_p4, %p10206_p5 }
  0x46   : > { %10216 = shalt.err (!%p10213_p10)
}
  0x47   : > { %10049 = dma.hbm_to_vmem [thread:$0]  (!%p10654_p6), %s13640_s4, 256, %s10658_s24, [#allocation11], %s13654_s29, %s13654_s29, %s13655_s30  }
  0x48   : > { %s10217_s11 = scalar_lea.hbm %s13642_s6, 256 }
  0x49   : > { %p10218_p11 = scmp.ne.s32.totalorder %s13642_s6, %s10217_s11  ;;  %p10224_p0 = scmp.lt.u32.totalorder %s10217_s11, %s13642_s6 }
  0x4b   : > { %p10220_p12 = pnand %p10218_p11, %p10670_p8 }
  0x4d   : > { %p10221_p13 = pneg %p10220_p12 }
  0x4f   : > { %p10226_p2 = pnand %p10224_p0, %p10221_p13 }
  0x51   : > { %10229 = shalt.err (!%p10226_p2)
}
  0x52   : > { %s10230_s24 = scalar_lea.vmem %s10660_s27, 256  ;;  %p10238_p4 = scmp.lt.s32.totalorder %s10660_s27, %s10660_s27 }
  0x53   : > { %p10231_p5 = scmp.ne.s32.totalorder %s10660_s27, %s10230_s24  ;;  %p10239_p10 = scmp.lt.s32.totalorder %s10230_s24, %s10230_s24 }
  0x55   : > { %p10233_p7 = pnand %p10231_p5, %p10670_p8  ;;  %p10240_p11 = por %p10239_p10, %p10238_p4 }
  0x57   : > { %p10234_p9 = pneg %p10233_p7 }
  0x59   : > { %p10241_p12 = pnand %p10240_p11, %p10234_p9 }
  0x5b   : > { %10244 = shalt.err (!%p10241_p12)
}
  0x5c   : > { %10055 = dma.hbm_to_vmem [thread:$0]  (!%p10654_p6), %s13642_s6, 256, %s10660_s27, [#allocation14], %s13654_s29, %s13654_s29, %s13655_s30  }
  0x5d   : > { %s13682_s0 = sld [smem:[#allocation35_spill]] }
  0x63   : > { %s10245_s16 = scalar_lea.hbm %s13682_s0, 32 }
  0x64   : > { %p10246_p13 = scmp.ne.s32.totalorder %s13682_s0, %s10245_s16  ;;  %p10252_p5 = scmp.lt.u32.totalorder %s10245_s16, %s13682_s0 }
  0x66   : > { %p10248_p0 = pnand %p10246_p13, %p10670_p8 }
  0x68   : > { %p10249_p2 = pneg %p10248_p0 }
  0x6a   : > { %p10254_p7 = pnand %p10252_p5, %p10249_p2 }
  0x6c   : > { %10257 = shalt.err (!%p10254_p7)
}
  0x6d   : > { %s10537_s28 = smov [#allocation2]   ;;  %s10538_s20 = smov [#allocation9]  }
  0x6e   : > { %10040 = dma.hbm_to_smem (!%p10654_p6), %s13682_s0, 32, %s10537_s28, [#allocation5]  }
  0x6f   : > { %s345_s8 = sshll.u32 %s10538_s20, 4  ;;  %s10539_s9 = smov [#allocation12]   ;;  %s346_s8 = int_to_ptr.vmem [resolvable:$true] %s345_s8 }
  0x70   : > { %s369_s10 = sshll.u32 %s10539_s9, 4  ;;  %s10258_s16 = scalar_lea.hbm %s13639_s3, 16  ;;  %s10762_s10 = int_to_ptr.vmem [resolvable:$true] %s369_s10 }
  0x71   : > { %p10259_p9 = scmp.ne.s32.totalorder %s13639_s3, %s10258_s16  ;;  %p10265_p11 = scmp.lt.u32.totalorder %s10258_s16, %s13639_s3 }
  0x73   : > { %p10261_p4 = pnand %p10259_p9, %p10670_p8 }
  0x75   : > { %p10262_p10 = pneg %p10261_p4 }
  0x77   : > { %p10267_p12 = pnand %p10265_p11, %p10262_p10 }
  0x79   : > { %10270 = shalt.err (!%p10267_p12)
}
  0x7a   : > { %s10271_s24 = scalar_lea.vmem %s346_s8, 16  ;;  %s10278_s20 = scalar_lea.vmem %s346_s8, 32 }
  0x7b   : > { %p10272_p13 = scmp.ne.s32.totalorder %s346_s8, %s10271_s24  ;;  %p10279_p5 = scmp.lt.s32.totalorder %s346_s8, %s346_s8 }
  0x7c   : > { %p10280_p7 = scmp.lt.s32.totalorder %s10278_s20, %s10271_s24 }
  0x7d   : > { %p10274_p0 = pnand %p10272_p13, %p10670_p8 }
  0x7e   : > { %p10281_p1 = por %p10280_p7, %p10279_p5 }
  0x7f   : > { %p10275_p2 = pneg %p10274_p0 }
  0x81   : > { %p10282_p3 = pnand %p10281_p1, %p10275_p2 }
  0x83   : > { %10285 = shalt.err (!%p10282_p3)
}
  0x84   : > { %10046 = dma.hbm_to_vmem [thread:$0]  (!%p10654_p6), %s13639_s3, 16, %s346_s8, [#allocation8]  }
  0x85   : > { %s10286_s23 = scalar_lea.hbm %s13641_s5, 16 }
  0x86   : > { %p10287_p9 = scmp.ne.s32.totalorder %s13641_s5, %s10286_s23  ;;  %p10293_p1 = scmp.lt.u32.totalorder %s10286_s23, %s13641_s5 }
  0x88   : > { %p10289_p4 = pnand %p10287_p9, %p10670_p8 }
  0x8a   : > { %p10290_p10 = pneg %p10289_p4 }
  0x8c   : > { %p10295_p3 = pnand %p10293_p1, %p10290_p10 }
  0x8e   : > { %10298 = shalt.err (!%p10295_p3)
}
  0x8f   : > { %s10299_s8 = scalar_lea.vmem %s10762_s10, 16  ;;  %s10306_s20 = scalar_lea.vmem %s10762_s10, 32 }
  0x90   : > { %p10300_p11 = scmp.ne.s32.totalorder %s10762_s10, %s10299_s8  ;;  %p10307_p0 = scmp.lt.s32.totalorder %s10762_s10, %s10762_s10 }
  0x91   : > { %p10308_p2 = scmp.lt.s32.totalorder %s10306_s20, %s10299_s8 }
  0x92   : > { %p10302_p12 = pnand %p10300_p11, %p10670_p8 }
  0x93   : > { %p10309_p5 = por %p10308_p2, %p10307_p0 }
  0x94   : > { %p10303_p13 = pneg %p10302_p12 }
  0x96   : > { %p10310_p7 = pnand %p10309_p5, %p10303_p13 }
  0x98   : > { %10313 = shalt.err (!%p10310_p7)
}
  0x99   : > { %10052 = dma.hbm_to_vmem [thread:$0]  (!%p10654_p6), %s13641_s5, 16, %s10762_s10, [#allocation11]  }
  0x9a   : > { %s10540_s12 = smov [#allocation15]   ;;  %s10314_s27 = scalar_lea.hbm %s13643_s7, 16 }
  0x9b   : > { %s393_s16 = sshll.u32 %s10540_s12, 4  ;;  %p10315_p9 = scmp.ne.s32.totalorder %s13643_s7, %s10314_s27  ;;  %s394_s16 = int_to_ptr.vmem [resolvable:$true] %s393_s16 }
  0x9c   : > { %p10321_p1 = scmp.lt.u32.totalorder %s10314_s27, %s13643_s7 }
  0x9d   : > { %p10317_p4 = pnand %p10315_p9, %p10670_p8 }
  0x9f   : > { %p10318_p10 = pneg %p10317_p4 }
  0xa1   : > { %p10323_p3 = pnand %p10321_p1, %p10318_p10 }
  0xa3   : > { %10326 = shalt.err (!%p10323_p3)
}
  0xa4   : > { %s10327_s10 = scalar_lea.vmem %s394_s16, 16  ;;  %s10334_s9 = scalar_lea.vmem %s394_s16, 32 }
  0xa5   : > { %p10328_p11 = scmp.ne.s32.totalorder %s394_s16, %s10327_s10  ;;  %p10335_p0 = scmp.lt.s32.totalorder %s394_s16, %s394_s16 }
  0xa6   : > { %p10336_p2 = scmp.lt.s32.totalorder %s10334_s9, %s10327_s10 }
  0xa7   : > { %p10330_p12 = pnand %p10328_p11, %p10670_p8 }
  0xa8   : > { %p10337_p5 = por %p10336_p2, %p10335_p0 }
  0xa9   : > { %p10331_p13 = pneg %p10330_p12 }
  0xab   : > { %p10338_p7 = pnand %p10337_p5, %p10331_p13 }
  0xad   : > { %10341 = shalt.err (!%p10338_p7)
}
  0xae   : > { %10058 = dma.hbm_to_vmem [thread:$0]  (!%p10654_p6), %s13643_s7, 16, %s394_s16, [#allocation14]  }
  0xaf   : > { %s13653_s19 = sadd.s32 4294967294, %s10530_s18   ;;  %s46_s25 = sadd.s32 1, %s10526_s17 }
  0xb0   : > { %s76_s23 = sadd.s32 1, %s10518_s15  ;;  %p48_p8 = scmp.ge.s32.totalorder %s46_s25, 2 }
  0xb1   : > { %p83_p9 = scmp.ne.s32.totalorder %s10518_s15, %s10514_s14  ;;  %p84_p4 = scmp.eq.s32.totalorder %s10530_s18, 0 }
  0xb2   : > { %p89_p10 = scmp.ne.s32.totalorder %s10514_s14, %s10510_s13  ;;  %s13734_s25 = smov (%p48_p8, %s46_s25), 0 }
  0xb3   : > { %p10834_p1 = por %p84_p4, %p83_p9  ;;  %p13684_p3 = scmp.eq.s32.totalorder %s10638_s21, 0 }
  0xb4   : > { %s71_s27 = ssub.s32 %s10526_s17, %s13734_s25  ;;  %p241_p11 = scmp.eq.s32.totalorder %s10638_s21, 1 }
  0xb5   : > { %p10840_p6 = por %p13684_p3, %p89_p10  ;;  %p74_p12 = scmp.eq.s32.totalorder %s71_s27, 0 }
  0xb6   : > { %p247_p13 = scmp.eq.s32.totalorder %s13653_s19, 1  ;;  %p10849_p0 = por %p241_p11, %p83_p9 }
  0xb7   : > { %p10080_p2 = scmp.lt.s32.totalorder %s10530_s18, 2  ;;  %s404_s20 = sand.u32 1, %s10518_s15  }
  0xb8   : > { %s13686_s28 = scalar_select %p10849_p0, 1, 0 }
  0xb9   : > { %s10855_s24 = scalar_select %p74_p12, %s10518_s15, %s76_s23  }
  0xba   : > { %p10857_p5 = por %p247_p13, %p89_p10  ;;  %s9292_s10 = sshll.u32 %s404_s20, 6 }
  0xbb   : > { %s9656_s9 = sshll.u32 %s10526_s17, 10  ;;  %s13688_s1 = sld [smem:[#allocation36_spill]] }
  0xbc   : > { %s13687_s8 = scalar_select %p10857_p5, 1, 0 }
  0xbd   : > { %s408_s19 = scalar_lea.vmem [#allocation6], %s9292_s10  ;;  %p10872_p7 = pnand %p10080_p2, %p10834_p1 }
  0xbe   : > { %s417_s29 = sshll.u32 %s408_s19, 4  ;;  %s10876_s30 = scalar_lea.sflag [#allocation3], %s404_s20  ;;  %s10868_s29 = int_to_ptr.vmem [resolvable:$true] %s417_s29 }
  0xbf   : > { %p10344_p9 = pneg %p10872_p7 }
  0xc1   : > { %s10866_s27 = scalar_lea.hbm %s13688_s1, %s9656_s9  ;;  %s10347_s26 = scalar_lea.hbm %s13688_s1, 2048 }
  0xc2   : > { %s10342_s11 = scalar_lea.hbm %s10866_s27, 1024  ;;  %p10348_p1 = scmp.lt.u32.totalorder %s10866_s27, %s13688_s1 }
  0xc3   : > { %p10343_p8 = scmp.ne.s32.totalorder %s10866_s27, %s10342_s11  ;;  %p10349_p3 = scmp.lt.u32.totalorder %s10347_s26, %s10342_s11 }
  0xc4   : > { %p10351_p12 = scmp.lt.u32.totalorder %s10342_s11, %s10866_s27 }
  0xc5   : > { %p10345_p4 = pnand %p10344_p9, %p10343_p8  ;;  %p10350_p11 = por %p10349_p3, %p10348_p1 }
  0xc7   : > { %p10346_p10 = pneg %p10345_p4  ;;  %p10352_p13 = por %p10351_p12, %p10350_p11 }
  0xc9   : > { %p10353_p2 = pnand %p10352_p13, %p10346_p10 }
  0xcb   : > { %10356 = shalt.err (!%p10353_p2)
}
  0xcc   : > { %s10357_s20 = scalar_lea.vmem %s10868_s29, 1024  ;;  %s10541_s19 = smov [#allocation6]  }
  0xcd   : > { %p10358_p8 = scmp.ne.s32.totalorder %s10868_s29, %s10357_s20  ;;  %s10362_s10 = sshll.u32 %s10541_s19, 4  ;;  %s10363_s10 = int_to_ptr.vmem [resolvable:$false] %s10362_s10 }
  0xce   : > { %s10364_s9 = scalar_lea.vmem %s10363_s10, 2048  ;;  %p10365_p0 = scmp.lt.s32.totalorder %s10868_s29, %s10363_s10 }
  0xcf   : > { %p10360_p4 = pnand %p10358_p8, %p10344_p9  ;;  %p10366_p1 = scmp.lt.s32.totalorder %s10364_s9, %s10357_s20 }
  0xd1   : > { %p10361_p5 = pneg %p10360_p4  ;;  %p10367_p3 = por %p10366_p1, %p10365_p0 }
  0xd3   : > { %p10368_p11 = pnand %p10367_p3, %p10361_p5 }
  0xd5   : > { %10371 = shalt.err (!%p10368_p11)
}
  0xd6   : > { %s13690_s11 = smov 4   ;;  %s13691_s26 = smov 64  }
  0xd7   : > { %10062 = dma.hbm_to_vmem [thread:$0]  (!%p10872_p7), %s10866_s27, 1024, %s10868_s29, %s10876_s30, %s13691_s26, %s13691_s26, %s13690_s11  }
  0xd8   : > { %p13692_p9 = scmp.ne.s32.totalorder %s13679_s22, 0 }
  0xda   : > { %429 = sbr.rel (%p13692_p9) target bundleno = 1167 (0x48f), region = 52 }
  0xe1   : > { %p13693_p10 = scmp.eq.s32.totalorder %s10638_s21, 0 }
  0xe3   : > { %10481 = dma.done.wait (%p13693_p10), [#allocation5], 32   ;;  %p13694_p12 = pmov %p13693_p10 }
  0xe4   : > { %s10914_s12 = sand.u32 1, %s10514_s14  }
  0xe5   : > { %10483 = vsyncadd (%p13694_p12), [#allocation5], 4294967264  ;;  %s9297_s23 = sshll.u32 %s10914_s12, 6  ;;  %s436_s20 = scalar_lea.sflag [#allocation3], %s10914_s12 }
  0xe6   : > { %s10918_s19 = scalar_lea.vmem [#allocation6], %s9297_s23 }
  0xe7   : > { %10485 = dma.done.wait (%p10840_p6), %s436_s20, 1024  }
  0xe8   : > { %10487 = vsyncadd (%p10840_p6), %s436_s20, 4294966272  ;;  %p13695_p0 = pmov %p13693_p10 }
  0xea   : > { %10489 = dma.done.wait (%p13695_p0), [#allocation8], 272   ;;  %p13696_p5 = pmov %p13695_p0 }
  0xeb   : > { %p13697_p7 = pmov %p13695_p0 }
  0xec   : > { %10491 = vsyncadd (%p13696_p5), [#allocation8], 4294967024 }
  0xed   : > { %10493 = dma.done.wait (%p13697_p7), [#allocation11], 272   ;;  %p13698_p13 = pmov %p13695_p0 }
  0xee   : > { %p13699_p2 = pmov %p13695_p0 }
  0xef   : > { %10495 = vsyncadd (%p13698_p13), [#allocation11], 4294967024 }
  0xf0   : > { %10497 = dma.done.wait (%p13699_p2), [#allocation14], 272   ;;  %p13700_p8 = pmov %p13695_p0 }
  0xf2   : > { %10499 = vsyncadd (%p13700_p8), [#allocation14], 4294967024 }
  0xf3   : > { %468 = sfence }
  0xf4   : > { %v10153_v0 = vld [vmem:[#allocation7] sm:$0xff]   ;;  %s13701_s22 = sld [smem:[#allocation27_spill]]  ;;  %v10154_v1 = vld [vmem:[#allocation7 + $0x8] sm:$0xff]   ;;  %v10944_v6 = vld [vmem:[%s10918_s19 + $0x10] sm:$0xff]   ;;  %vm665_vm0 = vcmask 261120   ;;  %s10542_s10 = smov 120  }
  0xf5   : > { %9921 = vmatprep.subr.bf16.mxu0 %v10153_v0  ;;  %9981 = vmatprep.subr.bf16.mxu1 %v10153_v0  ;;  %v9853_v2 = vld [vmem:[%s10918_s19] sm:$0xff]   ;;  %v9884_v4 = vld [vmem:[%s10918_s19 + $0x8] sm:$0xff]   ;;  %v10947_v7 = vld [vmem:[%s10918_s19 + $0x18] sm:$0xff]   ;;  %v9862_v19 = vunpack.c.l.bf16 %v10944_v6  ;;  %v9863_v20 = vunpack.c.h.bf16 %v10944_v6  ;;  %s10543_s9 = smov 112   ;;  %s10544_s11 = smov 104   ;;  %vm3379_vm1 = vcmask 60416  }
  0xf6   : > { %v9887_v3 = vld [vmem:[%s10918_s19 + $0x20] sm:$0xff]   ;;  %9922 = vmatpush3.bf16.msra.mxu0 %v10153_v0  ;;  %9983 = vmatpush3.bf16.msra.mxu1 %v10153_v0  ;;  %v9888_v5 = vld [vmem:[%s10918_s19 + $0x28] sm:$0xff]   ;;  %v10950_v8 = vld [vmem:[%s10918_s19 + $0x30] sm:$0xff]   ;;  %v9854_v9 = vunpack.c.l.bf16 %v9853_v2  ;;  %v9855_v10 = vunpack.c.h.bf16 %v9853_v2  ;;  %v9858_v14 = vunpack.c.l.bf16 %v9884_v4  ;;  %v9859_v15 = vunpack.c.h.bf16 %v9884_v4  ;;  %s11396_s26 = sshll.u32 %s10914_s12, 8  ;;  %p13720_p4 = scmp.ne.s32.totalorder %s13686_s28, 0 }
  0xf7   : > { %9923 = vmatprep.subr.bf16.mxu0 %v10154_v1  ;;  %9982 = vmatprep.subr.bf16.mxu1 %v10154_v1  ;;  %v10952_v11 = vld [vmem:[#allocation10] sm:$0xff]   ;;  %v9870_v12 = vunpack.c.l.bf16 %v9887_v3  ;;  %v9871_v13 = vunpack.c.h.bf16 %v9887_v3  ;;  %v9874_v17 = vunpack.c.l.bf16 %v9888_v5  ;;  %v9875_v18 = vunpack.c.h.bf16 %v9888_v5  ;;  %v10959_v21 = vld [vmem:[#allocation13] sm:$0xff]   ;;  %v10156_v6 = vld [vmem:[#allocation10 + $0x8] sm:$0xff]   ;;  %s11421_s23 = scalar_lea.vmem [#allocation16], %s11396_s26  ;;  %s12188_s20 = scalar_lea.vmem [#allocation17], %s11396_s26 }
  0xf8   : > { %v10955_v16 = vld [vmem:[%s10918_s19 + $0x38] sm:$0xff]   ;;  %v9866_v22 = vunpack.c.l.bf16 %v10947_v7  ;;  %v9867_v23 = vunpack.c.h.bf16 %v10947_v7  ;;  %v9878_v24 = vunpack.c.l.bf16 %v10950_v8  ;;  %v9879_v25 = vunpack.c.h.bf16 %v10950_v8  ;;  %v10158_v7 = vld [vmem:[#allocation13 + $0x8] sm:$0xff]   ;;  %s12303_s19 = scalar_lea.vmem [#allocation19], %s11396_s26 }
  0xf9   : > { %v9882_v28 = vunpack.c.l.bf16 %v10955_v16  ;;  %v9883_v29 = vunpack.c.h.bf16 %v10955_v16 }
  0xfa   : > { %s9307_s29 = sshll.u32 %s13701_s22, 7  ;;  %9924 = vmatpush3.bf16.msra.mxu0 %v10154_v1  ;;  %9984 = vmatpush3.bf16.msra.mxu1 %v10154_v1 }
  0xfb   : > { %s10937_s30 = sld [smem:[#allocation2 + %s9307_s29]]  ;;  %s550_s16 = sadd.s32 1, %s9307_s29  ;;  %9941 = vmatprep.subr.bf16.mxu1 %v10952_v11  ;;  %9961 = vmatprep.subr.bf16.mxu0 %v10959_v21 }
  0xfc   : > { %s551_s27 = sld [smem:[#allocation2 + %s550_s16]]  ;;  %s13030_s29 = sshll.u32 %s13701_s22, 12 }
  0xfd   : > { %s13718_s16 = sld [smem:[#allocation37_spill]] }
 0x101   : > { %v10967_v27 = vstv %s10937_s30 }
 0x102   : > { %v552_v26 = vstv %s551_s27 }
 0x103   : > { %v553_v30 = vmul.f32 %v9854_v9, %v552_v26  ;;  %v554_v31 = vmul.f32 %v9855_v10, %v552_v26  ;;  %v561_v32 = vmul.f32 %v9870_v12, %v552_v26  ;;  %v562_v33 = vmul.f32 %v9871_v13, %v552_v26  ;;  %s13719_s27 = smov %s13718_s16 }
 0x104   : > { %v555_v34 = vmul.f32 %v9858_v14, %v552_v26  ;;  %v556_v35 = vmul.f32 %v9859_v15, %v552_v26  ;;  %v563_v36 = vmul.f32 %v9874_v17, %v552_v26  ;;  %v564_v37 = vmul.f32 %v9875_v18, %v552_v26 }
 0x105   : > { %v9308_v38 = vclamps-f32 %v553_v30, 127.0  ;;  %v9309_v39 = vclamps-f32 %v554_v31, 127.0  ;;  %v9316_v40 = vclamps-f32 %v561_v32, 127.0  ;;  %v9317_v41 = vclamps-f32 %v562_v33, 127.0 }
 0x106   : > { %v9310_v42 = vclamps-f32 %v555_v34, 127.0  ;;  %v9311_v43 = vclamps-f32 %v556_v35, 127.0  ;;  %v9318_v44 = vclamps-f32 %v563_v36, 127.0  ;;  %v9319_v45 = vclamps-f32 %v564_v37, 127.0 }
 0x107   : > { %v9985_v46 = vround.rtne.f32 %v9308_v38  ;;  %v9986_v47 = vround.rtne.f32 %v9309_v39  ;;  %v9993_v48 = vround.rtne.f32 %v9316_v40  ;;  %v9994_v49 = vround.rtne.f32 %v9317_v41 }
 0x108   : > { %v9987_v50 = vround.rtne.f32 %v9310_v42  ;;  %v9988_v51 = vround.rtne.f32 %v9311_v43  ;;  %v9995_v52 = vround.rtne.f32 %v9318_v44  ;;  %v9996_v53 = vround.rtne.f32 %v9319_v45 }
 0x109   : > { %v618_v54 = vmul.f32 %v9985_v46, %v10967_v27  ;;  %v619_v55 = vmul.f32 %v9986_v47, %v10967_v27  ;;  %v626_v56 = vmul.f32 %v9993_v48, %v10967_v27  ;;  %v627_v57 = vmul.f32 %v9994_v49, %v10967_v27 }
 0x10a   : > { %v620_v58 = vmul.f32 %v9987_v50, %v10967_v27  ;;  %v621_v59 = vmul.f32 %v9988_v51, %v10967_v27  ;;  %v628_v60 = vmul.f32 %v9995_v52, %v10967_v27  ;;  %v629_v61 = vmul.f32 %v9996_v53, %v10967_v27 }
 0x10b   : > { %v634_v62 = vpack.c.bf16 %v619_v55, %v618_v54  ;;  %v10980_v63 = vpack.c.bf16 %v627_v57, %v626_v56  ;;  %v557_v0 = vmul.f32 %v9862_v19, %v552_v26  ;;  %v558_v1 = vmul.f32 %v9863_v20, %v552_v26 }
 0x10c   : > { %v635_v2 = vpack.c.bf16 %v621_v59, %v620_v58  ;;  %v10982_v3 = vpack.c.bf16 %v629_v61, %v628_v60  ;;  %v559_v4 = vmul.f32 %v9866_v22, %v552_v26  ;;  %v560_v5 = vmul.f32 %v9867_v23, %v552_v26 }
 0x10d   : > { %9925 = vmatprep.mubr.msk.bf16.mxu0 %vm665_vm0, %v634_v62  ;;  %9933 = vmatprep.mubr.msk.bf16.mxu1 %vm665_vm0, %v10980_v63  ;;  %v9312_v8 = vclamps-f32 %v557_v0, 127.0  ;;  %v9313_v9 = vclamps-f32 %v558_v1, 127.0  ;;  %v565_v10 = vmul.f32 %v9878_v24, %v552_v26  ;;  %v566_v12 = vmul.f32 %v9879_v25, %v552_v26 }
 0x10e   : > { %9926 = vmatmul.mubr.msk.bf16.vlgmr.msra.gmra.mrb[0].mxu0 %vm665_vm0, %v635_v2  ;;  %9934 = vmatmul.mubr.msk.bf16.vlgmr.msra.gmra.mrb[0].mxu1 %vm665_vm0, %v10982_v3  ;;  %v9314_v13 = vclamps-f32 %v559_v4, 127.0  ;;  %v9315_v14 = vclamps-f32 %v560_v5, 127.0  ;;  %v567_v15 = vmul.f32 %v9882_v28, %v552_v26  ;;  %v568_v16 = vmul.f32 %v9883_v29, %v552_v26 }
 0x10f   : > { %v9989_v17 = vround.rtne.f32 %v9312_v8  ;;  %v9990_v18 = vround.rtne.f32 %v9313_v9  ;;  %v9320_v19 = vclamps-f32 %v565_v10, 127.0  ;;  %v9321_v20 = vclamps-f32 %v566_v12, 127.0  ;;  %9942 = vmatpush3.bf16.msra.mxu1 %v10952_v11  ;;  %9962 = vmatpush3.bf16.msra.mxu0 %v10959_v21 }
 0x110   : > { %v9991_v22 = vround.rtne.f32 %v9314_v13  ;;  %v9992_v23 = vround.rtne.f32 %v9315_v14  ;;  %v9322_v24 = vclamps-f32 %v567_v15, 127.0  ;;  %v9323_v25 = vclamps-f32 %v568_v16, 127.0  ;;  %9943 = vmatprep.subr.bf16.mxu1 %v10156_v6  ;;  %9963 = vmatprep.subr.bf16.mxu0 %v10158_v7 }
 0x111   : > { %v622_v30 = vmul.f32 %v9989_v17, %v10967_v27  ;;  %v623_v31 = vmul.f32 %v9990_v18, %v10967_v27  ;;  %v9997_v28 = vround.rtne.f32 %v9320_v19  ;;  %v9998_v26 = vround.rtne.f32 %v9321_v20 }
 0x112   : > { %v624_v29 = vmul.f32 %v9991_v22, %v10967_v27  ;;  %v625_v32 = vmul.f32 %v9992_v23, %v10967_v27  ;;  %v9999_v33 = vround.rtne.f32 %v9322_v24  ;;  %v10000_v11 = vround.rtne.f32 %v9323_v25 }
 0x113   : > { %v636_v34 = vpack.c.bf16 %v623_v31, %v622_v30  ;;  %v630_v21 = vmul.f32 %v9997_v28, %v10967_v27  ;;  %v631_v35 = vmul.f32 %v9998_v26, %v10967_v27  ;;  %9944 = vmatpush3.bf16.msra.mxu1 %v10156_v6  ;;  %9964 = vmatpush3.bf16.msra.mxu0 %v10158_v7  ;;  %v11196_v31 = vld [vmem:[#allocation12] ss:$0 sm:$0xff] }
 0x114   : > { %v637_v36 = vpack.c.bf16 %v625_v32, %v624_v29  ;;  %v632_v37 = vmul.f32 %v9999_v33, %v10967_v27  ;;  %v633_v38 = vmul.f32 %v10000_v11, %v10967_v27  ;;  %v11024_v27 = vld [vmem:[#allocation9] ss:$0 sm:$0xff]  ;;  %v11217_v33 = vld [vmem:[#allocation15] ss:$0 sm:$0xff] }
 0x115   : > { %9929 = vmatprep.mubr.msk.bf16.mxu0 %vm665_vm0, %v636_v34  ;;  %v640_v39 = vpack.c.bf16 %v631_v35, %v630_v21 }
 0x116   : > { %9930 = vmatmul.mubr.msk.bf16.gmra.mrb[4].mxu0 %vm665_vm0, %v637_v36  ;;  %v641_v40 = vpack.c.bf16 %v633_v38, %v632_v37  ;;  %v952_v38 = vlaneseq }
 0x117   : > { %9937 = vmatprep.mubr.msk.bf16.mxu1 %vm665_vm0, %v640_v39  ;;  %9965 = vmatprep.mubr.msk.bf16.mxu0 %vm665_vm0, %v634_v62 }
 0x118   : > { %9938 = vmatmul.mubr.msk.bf16.gmra.mrb[4].mxu1 %vm665_vm0, %v641_v40 }
 0x119   : > { %9945 = vmatprep.mubr.msk.bf16.mxu1 %vm665_vm0, %v634_v62 }
 0x11e   : > { %9966 = vmatmul.mubr.msk.bf16.vlgmr.msra.gmra.mrb[8].mxu0 %vm665_vm0, %v635_v2 }
 0x11f   : > { %9969 = vmatprep.mubr.msk.bf16.mxu0 %vm665_vm0, %v636_v34 }
 0x120   : > { %9946 = vmatmul.mubr.msk.bf16.vlgmr.msra.gmra.mrb[8].mxu1 %vm665_vm0, %v635_v2 }
 0x121   : > { %9949 = vmatprep.mubr.msk.bf16.mxu1 %vm665_vm0, %v636_v34 }
 0x126   : > { %9970 = vmatmul.mubr.msk.bf16.gmra.mrb[12].mxu0 %vm665_vm0, %v637_v36 }
 0x127   : > { %9973 = vmatprep.mubr.msk.bf16.mxu0 %vm665_vm0, %v10980_v63 }
 0x128   : > { %9950 = vmatmul.mubr.msk.bf16.gmra.mrb[12].mxu1 %vm665_vm0, %v637_v36  ;;  %v10545_v36 = vmov 1983009808  }
 0x129   : > { %9953 = vmatprep.mubr.msk.bf16.mxu1 %vm665_vm0, %v10980_v63  ;;  %v950_v37 = vunpack.c.l.s4 %v10545_v36 }
 0x12e   : > { %9974 = vmatmul.mubr.msk.bf16.gmra.mrb[16].mxu0 %vm665_vm0, %v10982_v3 }
 0x12f   : > { %9977 = vmatprep.mubr.msk.bf16.mxu0 %vm665_vm0, %v640_v39 }
 0x130   : > { %9954 = vmatmul.mubr.msk.bf16.gmra.mrb[16].mxu1 %vm665_vm0, %v10982_v3 }
 0x131   : > { %9957 = vmatprep.mubr.msk.bf16.mxu1 %vm665_vm0, %v640_v39  ;;  %v10546_v39 = vmov 1934713408  }
 0x136   : > { %9978 = vmatmul.mubr.msk.bf16.gmra.mrb[20].mxu0 %vm665_vm0, %v641_v40 }
 0x138   : > { %9958 = vmatmul.mubr.msk.bf16.gmra.mrb[20].mxu1 %vm665_vm0, %v641_v40  ;;  %v982_v40 = vunpack.c.l.s4 %v10546_v39 }
 0x1e1   : > { %v9927_v41 = vpop.f32.mrb[0].mxu0  ;;  %v9935_v42 = vpop.f32.mrb[0].mxu1 }
 0x1e2   : > { %v11027_v43 = vadd.f32 %v9927_v41, %v11024_v27  ;;  %v11030_v44 = vadd.f32 %v9935_v42, %v11024_v27  ;;  %v724_v45 = vpop.f32.mrb[1].mxu0  ;;  %v756_v46 = vpop.f32.mrb[1].mxu1  ;;  %v951_v42 = vunpack.c.0.s8 %v950_v37 }
 0x1e3   : > { %v9928_v47 = vpop.f32.mrb[2].mxu0  ;;  %v9936_v48 = vpop.f32.mrb[2].mxu1  ;;  %v11083_v8 = vadd.f32 %v11024_v27, %v724_v45  ;;  %v11092_v10 = vadd.f32 %v11024_v27, %v756_v46  ;;  %v953_v45 = vshrl.u32 %v952_v38, 7  ;;  %v983_v46 = vunpack.c.0.s8 %v982_v40 }
 0x1e4   : > { %823 = vrot.lane.b32.xlu0 %v11030_v44, %s10542_s10  ;;  %v759_v49 = vpop.f32.mrb[3].mxu1  ;;  %807 = vrot.lane.b32.xlu1 %v11027_v43, %s10542_s10  ;;  %v727_v50 = vpop.f32.mrb[3].mxu0  ;;  %v11037_v51 = vadd.f32 %v9928_v47, %v11024_v27  ;;  %v11044_v53 = vadd.f32 %v9936_v48, %v11024_v27 }
 0x1e5   : > { %v11105_v15 = vadd.f32 %v11024_v27, %v759_v49  ;;  %v11114_v17 = vadd.f32 %v11024_v27, %v727_v50 }
 0x1e8   : > { %855 = vrot.lane.b32.xlu0 %v11027_v43, %s10543_s9  ;;  %809 = vrot.lane.b32.xlu1 %v11037_v51, %s10542_s10 }
 0x1e9   : > { %v9931_v52 = vpop.f32.mrb[4].mxu0 }
 0x1ea   : > { %v740_v54 = vpop.f32.mrb[5].mxu0  ;;  %v11139_v22 = vadd.f32 %v9931_v52, %v11024_v27 }
 0x1eb   : > { %v11047_v55 = vadd.f32 %v11024_v27, %v740_v54  ;;  %v9932_v56 = vpop.f32.mrb[6].mxu0  ;;  %v9939_v57 = vpop.f32.mrb[4].mxu1  ;;  %v11259_v54 = vsub.s32 %v951_v42, %v953_v45 }
 0x1ec   : > { %871 = vrot.lane.b32.xlu0 %v11030_v44, %s10543_s9  ;;  %825 = vrot.lane.b32.xlu1 %v11044_v53, %s10542_s10  ;;  %v743_v58 = vpop.f32.mrb[7].mxu0  ;;  %v772_v59 = vpop.f32.mrb[5].mxu1  ;;  %v11142_v23 = vadd.f32 %v9932_v56, %v11024_v27  ;;  %v11151_v25 = vadd.f32 %v9939_v57, %v11024_v27  ;;  %v11261_v56 = vsub.s32 %v983_v46, %v953_v45 }
 0x1ed   : > { %v11054_v60 = vadd.f32 %v11024_v27, %v743_v58  ;;  %v11057_v61 = vadd.f32 %v11024_v27, %v772_v59  ;;  %v9940_v62 = vpop.f32.mrb[6].mxu1 }
 0x1ee   : > { %v775_v63 = vpop.f32.mrb[7].mxu1  ;;  %v11154_v30 = vadd.f32 %v9940_v62, %v11024_v27 }
 0x1ef   : > { %v11060_v0 = vadd.f32 %v11024_v27, %v775_v63 }
 0x1f0   : > { %903 = vrot.lane.b32.xlu0 %v11027_v43, %s10544_s11  ;;  %857 = vrot.lane.b32.xlu1 %v11037_v51, %s10543_s9 }
 0x1f1   : > { %v11066_v1 = vpop.f32.mrb[8].mxu0 }
 0x1f2   : > { %v11068_v2 = vpop.f32.mrb[9].mxu0  ;;  %v11225_v21 = vadd.f32 %v11066_v1, %v11217_v33 }
 0x1f3   : > { %v11070_v3 = vpop.f32.mrb[8].mxu1  ;;  %v11072_v4 = vpop.f32.mrb[10].mxu0  ;;  %v11265_v58 = vadd.f32 %v11217_v33, %v11068_v2 }
 0x1f4   : > { %919 = vrot.lane.b32.xlu0 %v11030_v44, %s10544_s11  ;;  %873 = vrot.lane.b32.xlu1 %v11044_v53, %s10543_s9  ;;  %v11078_v5 = vpop.f32.mrb[9].mxu1  ;;  %v11080_v6 = vpop.f32.mrb[11].mxu0  ;;  %v11204_v28 = vadd.f32 %v11070_v3, %v11196_v31  ;;  %13703 = vst [vmem:[#allocation29_spill] sm:$0xff] %v11225_v21  ;;  %v11229_v35 = vadd.f32 %v11072_v4, %v11217_v33 }
 0x1f5   : > { %v9948_v7 = vpop.f32.mrb[10].mxu1  ;;  %v11247_v47 = vadd.f32 %v11196_v31, %v11078_v5  ;;  %13707 = vst [vmem:[#allocation33_spill] sm:$0xff] %v11265_v58  ;;  %v11269_v59 = vadd.f32 %v11217_v33, %v11080_v6 }
 0x1f6   : > { %v11085_v9 = vpop.f32.mrb[11].mxu1  ;;  %13702 = vst [vmem:[#allocation28_spill] sm:$0xff] %v11204_v28  ;;  %v11207_v26 = vadd.f32 %v9948_v7, %v11196_v31  ;;  %13704 = vst [vmem:[#allocation30_spill] sm:$0xff] %v11229_v35 }
 0x1f7   : > { %13705 = vst [vmem:[#allocation31_spill] sm:$0xff] %v11247_v47  ;;  %v11251_v48 = vadd.f32 %v11196_v31, %v11085_v9  ;;  %13708 = vst [vmem:[#allocation34_spill] sm:$0xff] %v11269_v59 }
 0x1f8   : > { %905 = vrot.lane.b32.xlu1 %v11037_v51, %s10544_s11  ;;  %803 = vrot.lane.b32.xlu0 %v11083_v8, %s10542_s10 }
 0x1f9   : > { %v11128_v18 = vpop.f32.mrb[12].mxu0  ;;  %13706 = vst [vmem:[#allocation32_spill] sm:$0xff] %v11251_v48 }
 0x1fa   : > { %v11130_v19 = vpop.f32.mrb[13].mxu0  ;;  %v11292_v6 = vadd.f32 %v11128_v18, %v11217_v33 }
 0x1fb   : > { %v11094_v12 = vpop.f32.mrb[12].mxu1  ;;  %v11136_v20 = vpop.f32.mrb[14].mxu0 }
 0x1fc   : > { %921 = vrot.lane.b32.xlu1 %v11044_v53, %s10544_s11  ;;  %819 = vrot.lane.b32.xlu0 %v11092_v10, %s10542_s10  ;;  %v11100_v13 = vpop.f32.mrb[13].mxu1  ;;  %v11144_v24 = vpop.f32.mrb[15].mxu0  ;;  %v11276_v3 = vadd.f32 %v11094_v12, %v11196_v31  ;;  %v11301_v12 = vadd.f32 %v11217_v33, %v11130_v19 }
 0x1fd   : > { %v11102_v14 = vpop.f32.mrb[14].mxu1  ;;  %v11280_v4 = vadd.f32 %v11196_v31, %v11100_v13  ;;  %v11305_v13 = vadd.f32 %v11136_v20, %v11217_v33 }
 0x1fe   : > { %v11107_v16 = vpop.f32.mrb[15].mxu1  ;;  %v11284_v2 = vadd.f32 %v11102_v14, %v11196_v31 }
 0x1ff   : > { %v11288_v5 = vadd.f32 %v11196_v31, %v11107_v16 }
 0x200   : > { %821 = vrot.lane.b32.xlu1 %v11105_v15, %s10542_s10  ;;  %851 = vrot.lane.b32.xlu0 %v11083_v8, %s10543_s9 }
 0x201   : > { %v9975_v52 = vpop.f32.mrb[16].mxu0 }
 0x202   : > { %v6309_v57 = vpop.f32.mrb[17].mxu0 }
 0x203   : > { %v9955_v29 = vpop.f32.mrb[16].mxu1  ;;  %v9976_v7 = vpop.f32.mrb[18].mxu0 }
 0x204   : > { %853 = vrot.lane.b32.xlu1 %v11114_v17, %s10543_s9  ;;  %867 = vrot.lane.b32.xlu0 %v11092_v10, %s10543_s9  ;;  %v3533_v32 = vpop.f32.mrb[17].mxu1  ;;  %v6312_v14 = vpop.f32.mrb[19].mxu0  ;;  %v11313_v18 = vadd.f32 %v9955_v29, %v11196_v31 }
 0x205   : > { %v9956_v11 = vpop.f32.mrb[18].mxu1  ;;  %v11316_v36 = vadd.f32 %v11196_v31, %v3533_v32 }
 0x206   : > { %v3536_v34 = vpop.f32.mrb[19].mxu1  ;;  %v11321_v39 = vadd.f32 %v9956_v11, %v11196_v31 }
 0x207   : > { %v11324_v40 = vadd.f32 %v11196_v31, %v3536_v34  ;;  %v11337_v31 = vadd.f32 %v11217_v33, %v6309_v57 }
 0x208   : > { %869 = vrot.lane.b32.xlu1 %v11105_v15, %s10543_s9  ;;  %899 = vrot.lane.b32.xlu0 %v11083_v8, %s10544_s11 }
 0x20c   : > { %901 = vrot.lane.b32.xlu1 %v11114_v17, %s10544_s11  ;;  %915 = vrot.lane.b32.xlu0 %v11092_v10, %s10544_s11 }
 0x210   : > { %917 = vrot.lane.b32.xlu1 %v11105_v15, %s10544_s11  ;;  %805 = vrot.lane.b32.xlu0 %v11114_v17, %s10542_s10 }
 0x214   : > { %817 = vrot.lane.b32.xlu1 %v11142_v23, %s10542_s10  ;;  %815 = vrot.lane.b32.xlu0 %v11139_v22, %s10542_s10 }
 0x218   : > { %833 = vrot.lane.b32.xlu1 %v11154_v30, %s10542_s10  ;;  %831 = vrot.lane.b32.xlu0 %v11151_v25, %s10542_s10 }
 0x21c   : > { %865 = vrot.lane.b32.xlu1 %v11142_v23, %s10543_s9  ;;  %863 = vrot.lane.b32.xlu0 %v11139_v22, %s10543_s9 }
 0x220   : > { %881 = vrot.lane.b32.xlu1 %v11154_v30, %s10543_s9  ;;  %879 = vrot.lane.b32.xlu0 %v11151_v25, %s10543_s9 }
 0x224   : > { %913 = vrot.lane.b32.xlu1 %v11142_v23, %s10544_s11  ;;  %911 = vrot.lane.b32.xlu0 %v11139_v22, %s10544_s11 }
 0x228   : > { %929 = vrot.lane.b32.xlu1 %v11154_v30, %s10544_s11  ;;  %927 = vrot.lane.b32.xlu0 %v11151_v25, %s10544_s11 }
 0x22c   : > { %813 = vrot.lane.b32.xlu1 %v11054_v60, %s10542_s10  ;;  %811 = vrot.lane.b32.xlu0 %v11047_v55, %s10542_s10 }
 0x230   : > { %829 = vrot.lane.b32.xlu1 %v11060_v0, %s10542_s10  ;;  %827 = vrot.lane.b32.xlu0 %v11057_v61, %s10542_s10 }
 0x234   : > { %861 = vrot.lane.b32.xlu1 %v11054_v60, %s10543_s9  ;;  %859 = vrot.lane.b32.xlu0 %v11047_v55, %s10543_s9 }
 0x238   : > { %877 = vrot.lane.b32.xlu1 %v11060_v0, %s10543_s9  ;;  %875 = vrot.lane.b32.xlu0 %v11057_v61, %s10543_s9 }
 0x23c   : > { %909 = vrot.lane.b32.xlu1 %v11054_v60, %s10544_s11  ;;  %907 = vrot.lane.b32.xlu0 %v11047_v55, %s10544_s11 }
 0x240   : > { %925 = vrot.lane.b32.xlu1 %v11060_v0, %s10544_s11  ;;  %923 = vrot.lane.b32.xlu0 %v11057_v61, %s10544_s11 }
 0x244   : > { %3586 = vrot.lane.b32.xlu1 %v11207_v26, %s10542_s10  ;;  %3584 = vrot.lane.b32.xlu0 %v11204_v28, %s10542_s10 }
 0x248   : > { %3634 = vrot.lane.b32.xlu1 %v11207_v26, %s10543_s9  ;;  %3632 = vrot.lane.b32.xlu0 %v11204_v28, %s10543_s9 }
 0x24c   : > { %3682 = vrot.lane.b32.xlu1 %v11207_v26, %s10544_s11  ;;  %3680 = vrot.lane.b32.xlu0 %v11204_v28, %s10544_s11 }
 0x250   : > { %6362 = vrot.lane.b32.xlu1 %v11229_v35, %s10542_s10  ;;  %6360 = vrot.lane.b32.xlu0 %v11225_v21, %s10542_s10 }
 0x254   : > { %6410 = vrot.lane.b32.xlu1 %v11229_v35, %s10543_s9  ;;  %6408 = vrot.lane.b32.xlu0 %v11225_v21, %s10543_s9 }
 0x256   : > { %v11239_v27 = vpop.permute.xlu0 %823  ;;  %v808_v41 = vpop.permute.xlu1 %807 }
 0x258   : > { %6458 = vrot.lane.b32.xlu1 %v11229_v35, %s10544_s11  ;;  %6456 = vrot.lane.b32.xlu0 %v11225_v21, %s10544_s11 }
 0x25a   : > { %v856_v49 = vpop.permute.xlu0 %855  ;;  %v11253_v50 = vpop.permute.xlu1 %809 }
 0x25b   : > { %v1083_v62 = vcombine.low %v11027_v43, %v856_v49  ;;  %v1084_v9 = vcombine.high %v11027_v43, %v856_v49  ;;  %v11310_v43 = vadd.f32 %v11217_v33, %v11144_v24 }
 0x25c   : > { %3582 = vrot.lane.b32.xlu1 %v11251_v48, %s10542_s10  ;;  %3580 = vrot.lane.b32.xlu0 %v11247_v47, %s10542_s10 }
 0x25d   : > { %v1091_v19 = vrot.slane %v1083_v62, %v11259_v54  ;;  %v1098_v32 = vrot.slane %v1084_v9, %v11259_v54 }
 0x25e   : > { %v872_v63 = vpop.permute.xlu0 %871  ;;  %v11272_v1 = vpop.permute.xlu1 %825 }
 0x25f   : > { %v1627_v16 = vcombine.low %v11030_v44, %v872_v63  ;;  %v1628_v37 = vcombine.high %v11030_v44, %v872_v63  ;;  %v11334_v44 = vadd.f32 %v9975_v52, %v11217_v33  ;;  %v11353_v63 = vadd.f32 %v11217_v33, %v6312_v14 }
 0x260   : > { %3630 = vrot.lane.b32.xlu1 %v11251_v48, %s10543_s9  ;;  %3628 = vrot.lane.b32.xlu0 %v11247_v47, %s10543_s9 }
 0x261   : > { %v1635_v11 = vrot.slane %v1627_v16, %v11259_v54  ;;  %v1642_v46 = vrot.slane %v1628_v37, %v11259_v54 }
 0x262   : > { %v904_v38 = vpop.permute.xlu0 %903  ;;  %v858_v20 = vpop.permute.xlu1 %857 }
 0x263   : > { %v1099_v24 = vcombine.low %v808_v41, %v904_v38  ;;  %v1100_v42 = vcombine.high %v808_v41, %v904_v38  ;;  %v1151_v29 = vcombine.low %v11037_v51, %v858_v20  ;;  %v1152_v45 = vcombine.high %v11037_v51, %v858_v20 }
 0x264   : > { %3678 = vrot.lane.b32.xlu1 %v11251_v48, %s10544_s11  ;;  %3676 = vrot.lane.b32.xlu0 %v11247_v47, %s10544_s11  ;;  %v11343_v41 = vadd.f32 %v9976_v7, %v11217_v33 }
 0x265   : > { %v1107_v34 = vrot.slane %v1099_v24, %v11259_v54  ;;  %v1114_v51 = vrot.slane %v1100_v42, %v11259_v54  ;;  %v11347_v49 = vrot.slane %v1151_v29, %v11259_v54  ;;  %v11350_v52 = vrot.slane %v1152_v45, %v11259_v54 }
 0x266   : > { %v920_v62 = vpop.permute.xlu0 %919  ;;  %v874_v57 = vpop.permute.xlu1 %873 }
 0x267   : > { %v1115_v9 = vcombine.low %v1091_v19, %v1107_v34  ;;  %v1116_v16 = vcombine.high %v1091_v19, %v1107_v34  ;;  %v1131_v38 = vcombine.low %v1098_v32, %v1114_v51  ;;  %v1132_v20 = vcombine.high %v1098_v32, %v1114_v51 }
 0x268   : > { %v1643_v7 = vcombine.low %v11239_v27, %v920_v62  ;;  %v1644_v24 = vcombine.high %v11239_v27, %v920_v62  ;;  %v1695_v37 = vcombine.low %v11044_v53, %v874_v57  ;;  %v1696_v42 = vcombine.high %v11044_v53, %v874_v57  ;;  %6358 = vrot.lane.b32.xlu1 %v11269_v59, %s10542_s10 }
 0x269   : > { %v1123_v29 = vrot.slane %v1115_v9, %v11261_v56  ;;  %v1130_v33 = vrot.slane %v1116_v16, %v11261_v56  ;;  %v1139_v14 = vrot.slane %v1131_v38, %v11261_v56  ;;  %v1146_v19 = vrot.slane %v1132_v20, %v11261_v56  ;;  %6356 = vrot.lane.b32.xlu0 %v11265_v58, %s10542_s10 }
 0x26a   : > { %v1651_v27 = vrot.slane %v1643_v7, %v11259_v54  ;;  %v1658_v45 = vrot.slane %v1644_v24, %v11259_v54  ;;  %v11370_v53 = vrot.slane %v1695_v37, %v11259_v54  ;;  %v11373_v32 = vrot.slane %v1696_v42, %v11259_v54  ;;  %v11375_v34 = vpop.permute.xlu1 %905  ;;  %v11377_v51 = vpop.permute.xlu0 %803 }
 0x26b   : > { %v2171_v62 = vcombine.low %v1123_v29, %v1130_v33  ;;  %v9339_v57 = vcombine.high %v1123_v29, %v1130_v33  ;;  %v2187_v9 = vcombine.low %v1139_v14, %v1146_v19  ;;  %v9340_v16 = vcombine.high %v1139_v14, %v1146_v19 }
 0x26c   : > { %v1659_v38 = vcombine.low %v1635_v11, %v1651_v27  ;;  %v1660_v20 = vcombine.high %v1635_v11, %v1651_v27  ;;  %v1675_v7 = vcombine.low %v1642_v46, %v1658_v45  ;;  %v1676_v47 = vcombine.high %v1642_v46, %v1658_v45  ;;  %6406 = vrot.lane.b32.xlu1 %v11269_v59, %s10543_s9 }
 0x26d   : > { %v2178_v24 = vrot.slane %v2171_v62, %v11259_v54  ;;  %v2186_v37 = vrot.slane %v9339_v57, %v11259_v54  ;;  %v2194_v42 = vrot.slane %v2187_v9, %v11259_v54  ;;  %v2202_v48 = vrot.slane %v9340_v16, %v11259_v54  ;;  %6404 = vrot.lane.b32.xlu0 %v11265_v58, %s10543_s9 }
 0x26e   : > { %v1667_v29 = vrot.slane %v1659_v38, %v11261_v56  ;;  %v1674_v11 = vrot.slane %v1660_v20, %v11261_v56  ;;  %v1683_v46 = vrot.slane %v1675_v7, %v11261_v56  ;;  %v1690_v33 = vrot.slane %v1676_v47, %v11261_v56  ;;  %v922_v62 = vpop.permute.xlu1 %921  ;;  %v11391_v57 = vpop.permute.xlu0 %819 }
 0x26f   : > { %v2203_v14 = vcombine.low %v2178_v24, %v2186_v37  ;;  %v2204_v19 = vcombine.high %v2178_v24, %v2186_v37  ;;  %v2219_v27 = vcombine.low %v2194_v42, %v2202_v48  ;;  %v2220_v45 = vcombine.high %v2194_v42, %v2202_v48 }
 0x270   : > { %v2715_v9 = vcombine.low %v1667_v29, %v1674_v11  ;;  %v9355_v16 = vcombine.high %v1667_v29, %v1674_v11  ;;  %v2731_v21 = vcombine.low %v1683_v46, %v1690_v33  ;;  %v9356_v35 = vcombine.high %v1683_v46, %v1690_v33  ;;  %6454 = vrot.lane.b32.xlu1 %v11269_v59, %s10544_s11 }
 0x271   : > { %v2211_v38 = vrot.slane %v2203_v14, %v11261_v56  ;;  %v2218_v47 = vrot.slane %v2204_v19, %v11261_v56  ;;  %v2227_v20 = vrot.slane %v2219_v27, %v11261_v56  ;;  %v2234_v48 = vrot.slane %v2220_v45, %v11261_v56  ;;  %6452 = vrot.lane.b32.xlu0 %v11265_v58, %s10544_s11 }
 0x272   : > { %v2722_v7 = vrot.slane %v2715_v9, %v11259_v54  ;;  %v2730_v24 = vrot.slane %v9355_v16, %v11259_v54  ;;  %v2738_v37 = vrot.slane %v2731_v21, %v11259_v54  ;;  %v2746_v42 = vrot.slane %v9356_v35, %v11259_v54  ;;  %v11410_v28 = vpop.permute.xlu1 %821  ;;  %v11412_v21 = vpop.permute.xlu0 %851 }
 0x273   : > { %v2235_v29 = vcombine.low %v2211_v38, %v2227_v20  ;;  %v2236_v11 = vcombine.high %v2211_v38, %v2227_v20  ;;  %v2237_v46 = vcombine.low %v2218_v47, %v2234_v48  ;;  %v2238_v33 = vcombine.high %v2218_v47, %v2234_v48 }
 0x274   : > { %v2747_v14 = vcombine.low %v2722_v7, %v2730_v24  ;;  %v2748_v19 = vcombine.high %v2722_v7, %v2730_v24  ;;  %v2763_v27 = vcombine.low %v2738_v37, %v2746_v42  ;;  %v2764_v45 = vcombine.high %v2738_v37, %v2746_v42  ;;  %3594 = vrot.lane.b32.xlu1 %v11284_v2, %s10542_s10 }
 0x275   : > { %v9659_v58 = vpack.c.bf16 %v2235_v29, %v2235_v29  ;;  %v9675_v9 = vpack.c.bf16 %v2236_v11, %v2236_v11  ;;  %v9691_v59 = vpack.c.bf16 %v2237_v46, %v2237_v46  ;;  %v9707_v16 = vpack.c.bf16 %v2238_v33, %v2238_v33  ;;  %3592 = vrot.lane.b32.xlu0 %v11276_v3, %s10542_s10 }
 0x276   : > { %v2755_v35 = vrot.slane %v2747_v14, %v11261_v56  ;;  %v2762_v38 = vrot.slane %v2748_v19, %v11261_v56  ;;  %v2771_v47 = vrot.slane %v2763_v27, %v11261_v56  ;;  %v2778_v20 = vrot.slane %v2764_v45, %v11261_v56 }
 0x277   : > { %3382 = vst.msk [vmem:[%s11421_s23 + $0x8] sm:$0xf] %vm3379_vm1, %v9659_v58  ;;  %3398 = vst.msk [vmem:[%s11421_s23 + $0x48] sm:$0xf] %vm3379_vm1, %v9675_v9  ;;  %v1167_v48 = vcombine.low %v11253_v50, %v11375_v34  ;;  %v1168_v7 = vcombine.high %v11253_v50, %v11375_v34  ;;  %v1711_v24 = vcombine.low %v11272_v1, %v922_v62 }
 0x278   : > { %3414 = vst.msk [vmem:[%s11421_s23 + $0x88] sm:$0xf] %vm3379_vm1, %v9691_v59  ;;  %3430 = vst.msk [vmem:[%s11421_s23 + $0xc8] sm:$0xf] %vm3379_vm1, %v9707_v16  ;;  %v1712_v37 = vcombine.high %v11272_v1, %v922_v62  ;;  %v2779_v42 = vcombine.low %v2755_v35, %v2771_v47  ;;  %v2780_v29 = vcombine.high %v2755_v35, %v2771_v47  ;;  %3642 = vrot.lane.b32.xlu1 %v11284_v2, %s10543_s9  ;;  %v11449_v16 = vpop.permute.xlu1 %853  ;;  %v11451_v35 = vpop.permute.xlu0 %867 }
 0x279   : > { %v2781_v11 = vcombine.low %v2762_v38, %v2778_v20  ;;  %v2782_v58 = vcombine.high %v2762_v38, %v2778_v20  ;;  %v1175_v59 = vrot.slane %v1167_v48, %v11259_v54  ;;  %v1182_v46 = vrot.slane %v1168_v7, %v11259_v54  ;;  %3640 = vrot.lane.b32.xlu0 %v11276_v3, %s10543_s9 }
 0x27a   : > { %v1719_v50 = vrot.slane %v1711_v24, %v11259_v54  ;;  %v1726_v34 = vrot.slane %v1712_v37, %v11259_v54  ;;  %v9667_v1 = vpack.c.bf16 %v2779_v42, %v2779_v42  ;;  %v9683_v62 = vpack.c.bf16 %v2780_v29, %v2780_v29 }
 0x27b   : > { %v9699_v33 = vpack.c.bf16 %v2781_v11, %v2781_v11  ;;  %v9715_v14 = vpack.c.bf16 %v2782_v58, %v2782_v58  ;;  %v1183_v19 = vcombine.low %v11347_v49, %v1175_v59  ;;  %v1184_v27 = vcombine.high %v11347_v49, %v1175_v59 }
 0x27c   : > { %v1199_v45 = vcombine.low %v11350_v52, %v1182_v46  ;;  %v1200_v9 = vcombine.high %v11350_v52, %v1182_v46  ;;  %3390 = vst.msk [vmem:[%s11421_s23 + $0x28] sm:$0xf] %vm3379_vm1, %v9667_v1  ;;  %3406 = vst.msk [vmem:[%s11421_s23 + $0x68] sm:$0xf] %vm3379_vm1, %v9683_v62  ;;  %v1727_v38 = vcombine.low %v11370_v53, %v1719_v50  ;;  %3690 = vrot.lane.b32.xlu1 %v11284_v2, %s10544_s11 }
 0x27d   : > { %3422 = vst.msk [vmem:[%s11421_s23 + $0xa8] sm:$0xf] %vm3379_vm1, %v9699_v33  ;;  %3438 = vst.msk [vmem:[%s11421_s23 + $0xe8] sm:$0xf] %vm3379_vm1, %v9715_v14  ;;  %v1728_v49 = vcombine.high %v11370_v53, %v1719_v50  ;;  %v1743_v47 = vcombine.low %v11373_v32, %v1726_v34  ;;  %v1744_v52 = vcombine.high %v11373_v32, %v1726_v34  ;;  %3688 = vrot.lane.b32.xlu0 %v11276_v3, %s10544_s11 }
 0x27e   : > { %v1191_v20 = vrot.slane %v1183_v19, %v11261_v56  ;;  %v1198_v48 = vrot.slane %v1184_v27, %v11261_v56  ;;  %v1207_v7 = vrot.slane %v1199_v45, %v11261_v56  ;;  %v1214_v24 = vrot.slane %v1200_v9, %v11261_v56  ;;  %v11483_v27 = vpop.permute.xlu1 %869  ;;  %v11485_v45 = vpop.permute.xlu0 %899 }
 0x27f   : > { %v1735_v53 = vrot.slane %v1727_v38, %v11261_v56  ;;  %v1742_v37 = vrot.slane %v1728_v49, %v11261_v56  ;;  %v1751_v32 = vrot.slane %v1743_v47, %v11261_v56  ;;  %v1758_v42 = vrot.slane %v1744_v52, %v11261_v56 }
 0x280   : > { %v2239_v29 = vcombine.low %v1191_v20, %v1198_v48  ;;  %v9341_v11 = vcombine.high %v1191_v20, %v1198_v48  ;;  %v2255_v58 = vcombine.low %v1207_v7, %v1214_v24  ;;  %v9342_v59 = vcombine.high %v1207_v7, %v1214_v24  ;;  %6370 = vrot.lane.b32.xlu1 %v11305_v13, %s10542_s10 }
 0x281   : > { %v2783_v46 = vcombine.low %v1735_v53, %v1742_v37  ;;  %v9357_v50 = vcombine.high %v1735_v53, %v1742_v37  ;;  %v2799_v34 = vcombine.low %v1751_v32, %v1758_v42  ;;  %v9358_v1 = vcombine.high %v1751_v32, %v1758_v42  ;;  %6368 = vrot.lane.b32.xlu0 %v11292_v6, %s10542_s10 }
 0x282   : > { %v2246_v62 = vrot.slane %v2239_v29, %v11259_v54  ;;  %v2254_v33 = vrot.slane %v9341_v11, %v11259_v54  ;;  %v2262_v14 = vrot.slane %v2255_v58, %v11259_v54  ;;  %v2270_v19 = vrot.slane %v9342_v59, %v11259_v54 }
 0x283   : > { %v2790_v9 = vrot.slane %v2783_v46, %v11259_v54  ;;  %v2798_v38 = vrot.slane %v9357_v50, %v11259_v54  ;;  %v2806_v49 = vrot.slane %v2799_v34, %v11259_v54  ;;  %v2814_v47 = vrot.slane %v9358_v1, %v11259_v54 }
 0x284   : > { %v2271_v52 = vcombine.low %v2246_v62, %v2254_v33  ;;  %v2272_v20 = vcombine.high %v2246_v62, %v2254_v33  ;;  %v2287_v48 = vcombine.low %v2262_v14, %v2270_v19  ;;  %v2288_v7 = vcombine.high %v2262_v14, %v2270_v19  ;;  %6418 = vrot.lane.b32.xlu1 %v11305_v13, %s10543_s9  ;;  %v902_v19 = vpop.permute.xlu1 %901 }
 0x285   : > { %v2815_v24 = vcombine.low %v2790_v9, %v2798_v38  ;;  %v2816_v53 = vcombine.high %v2790_v9, %v2798_v38  ;;  %v2831_v37 = vcombine.low %v2806_v49, %v2814_v47  ;;  %v2832_v32 = vcombine.high %v2806_v49, %v2814_v47  ;;  %6416 = vrot.lane.b32.xlu0 %v11292_v6, %s10543_s9  ;;  %v916_v9 = vpop.permute.xlu0 %915 }
 0x286   : > { %v2279_v42 = vrot.slane %v2271_v52, %v11261_v56  ;;  %v2286_v29 = vrot.slane %v2272_v20, %v11261_v56  ;;  %v2295_v11 = vrot.slane %v2287_v48, %v11261_v56  ;;  %v2302_v58 = vrot.slane %v2288_v7, %v11261_v56 }
 0x287   : > { %v2823_v59 = vrot.slane %v2815_v24, %v11261_v56  ;;  %v2830_v46 = vrot.slane %v2816_v53, %v11261_v56  ;;  %v2839_v50 = vrot.slane %v2831_v37, %v11261_v56  ;;  %v2846_v34 = vrot.slane %v2832_v32, %v11261_v56 }
 0x288   : > { %v2303_v1 = vcombine.low %v2279_v42, %v2295_v11  ;;  %v2304_v62 = vcombine.high %v2279_v42, %v2295_v11  ;;  %v2305_v33 = vcombine.low %v2286_v29, %v2302_v58  ;;  %v2306_v14 = vcombine.high %v2286_v29, %v2302_v58  ;;  %6466 = vrot.lane.b32.xlu1 %v11305_v13, %s10544_s11 }
 0x289   : > { %v2847_v38 = vcombine.low %v2823_v59, %v2839_v50  ;;  %v2848_v49 = vcombine.high %v2823_v59, %v2839_v50  ;;  %v2849_v47 = vcombine.low %v2830_v46, %v2846_v34  ;;  %v2850_v52 = vcombine.high %v2830_v46, %v2846_v34  ;;  %6464 = vrot.lane.b32.xlu0 %v11292_v6, %s10544_s11 }
 0x28a   : > { %v9660_v20 = vpack.c.bf16 %v2303_v1, %v2303_v1  ;;  %v9676_v48 = vpack.c.bf16 %v2304_v62, %v2304_v62  ;;  %v9692_v7 = vpack.c.bf16 %v2305_v33, %v2305_v33  ;;  %v9708_v24 = vpack.c.bf16 %v2306_v14, %v2306_v14 }
 0x28b   : > { %v9668_v53 = vpack.c.bf16 %v2847_v38, %v2847_v38  ;;  %v9684_v37 = vpack.c.bf16 %v2848_v49, %v2848_v49  ;;  %v9700_v32 = vpack.c.bf16 %v2849_v47, %v2849_v47  ;;  %v9716_v42 = vpack.c.bf16 %v2850_v52, %v2850_v52 }
 0x28c   : > { %3383 = vst.msk [vmem:[%s11421_s23 + $0xc] sm:$0xf] %vm3379_vm1, %v9660_v20  ;;  %3399 = vst.msk [vmem:[%s11421_s23 + $0x4c] sm:$0xf] %vm3379_vm1, %v9676_v48  ;;  %v947_v29 = vcombine.low %v11083_v8, %v11412_v21  ;;  %v948_v11 = vcombine.high %v11083_v8, %v11412_v21  ;;  %v1015_v58 = vcombine.low %v11114_v17, %v11449_v16  ;;  %3590 = vrot.lane.b32.xlu1 %v11288_v5, %s10542_s10 }
 0x28d   : > { %3415 = vst.msk [vmem:[%s11421_s23 + $0x8c] sm:$0xf] %vm3379_vm1, %v9692_v7  ;;  %3431 = vst.msk [vmem:[%s11421_s23 + $0xcc] sm:$0xf] %vm3379_vm1, %v9708_v24  ;;  %v1016_v59 = vcombine.high %v11114_v17, %v11449_v16  ;;  %v1491_v46 = vcombine.low %v11092_v10, %v11451_v35  ;;  %v1492_v8 = vcombine.high %v11092_v10, %v11451_v35  ;;  %v918_v10 = vpop.permute.xlu1 %917  ;;  %v806_v35 = vpop.permute.xlu0 %805  ;;  %3588 = vrot.lane.b32.xlu0 %v11280_v4, %s10542_s10 }
 0x28e   : > { %3391 = vst.msk [vmem:[%s11421_s23 + $0x2c] sm:$0xf] %vm3379_vm1, %v9668_v53  ;;  %3407 = vst.msk [vmem:[%s11421_s23 + $0x6c] sm:$0xf] %vm3379_vm1, %v9684_v37  ;;  %v1559_v21 = vcombine.low %v11105_v15, %v11483_v27  ;;  %v1560_v17 = vcombine.high %v11105_v15, %v11483_v27  ;;  %v955_v16 = vrot.slane %v947_v29, %v11259_v54 }
 0x28f   : > { %3423 = vst.msk [vmem:[%s11421_s23 + $0xac] sm:$0xf] %vm3379_vm1, %v9700_v32  ;;  %3439 = vst.msk [vmem:[%s11421_s23 + $0xec] sm:$0xf] %vm3379_vm1, %v9716_v42  ;;  %v962_v50 = vrot.slane %v948_v11, %v11259_v54  ;;  %v11546_v34 = vrot.slane %v1015_v58, %v11259_v54  ;;  %v11549_v1 = vrot.slane %v1016_v59, %v11259_v54 }
 0x290   : > { %v1499_v15 = vrot.slane %v1491_v46, %v11259_v54  ;;  %v1506_v27 = vrot.slane %v1492_v8, %v11259_v54  ;;  %v11556_v62 = vrot.slane %v1559_v21, %v11259_v54  ;;  %v11559_v33 = vrot.slane %v1560_v17, %v11259_v54  ;;  %3638 = vrot.lane.b32.xlu1 %v11288_v5, %s10543_s9 }
 0x291   : > { %v963_v14 = vcombine.low %v11377_v51, %v11485_v45  ;;  %v964_v38 = vcombine.high %v11377_v51, %v11485_v45  ;;  %v1507_v49 = vcombine.low %v11391_v57, %v916_v9  ;;  %v1508_v47 = vcombine.high %v11391_v57, %v916_v9  ;;  %3636 = vrot.lane.b32.xlu0 %v11280_v4, %s10543_s9 }
 0x292   : > { %v1575_v52 = vcombine.low %v11410_v28, %v918_v10  ;;  %v1576_v20 = vcombine.high %v11410_v28, %v918_v10  ;;  %v1031_v48 = vcombine.low %v806_v35, %v902_v19  ;;  %v1032_v7 = vcombine.high %v806_v35, %v902_v19 }
 0x293   : > { %v971_v24 = vrot.slane %v963_v14, %v11259_v54  ;;  %v978_v53 = vrot.slane %v964_v38, %v11259_v54  ;;  %v1515_v37 = vrot.slane %v1507_v49, %v11259_v54  ;;  %v1522_v51 = vrot.slane %v1508_v47, %v11259_v54 }
 0x294   : > { %v11578_v57 = vrot.slane %v1575_v52, %v11259_v54  ;;  %v11581_v28 = vrot.slane %v1576_v20, %v11259_v54  ;;  %v11584_v45 = vrot.slane %v1031_v48, %v11259_v54  ;;  %v11587_v19 = vrot.slane %v1032_v7, %v11259_v54  ;;  %3686 = vrot.lane.b32.xlu1 %v11288_v5, %s10544_s11  ;;  %v11603_v52 = vpop.permute.xlu0 %815 }
 0x295   : > { %v979_v9 = vcombine.low %v955_v16, %v971_v24  ;;  %v980_v32 = vcombine.high %v955_v16, %v971_v24  ;;  %v995_v42 = vcombine.low %v962_v50, %v978_v53  ;;  %v996_v29 = vcombine.high %v962_v50, %v978_v53  ;;  %3684 = vrot.lane.b32.xlu0 %v11280_v4, %s10544_s11 }
 0x296   : > { %v1523_v11 = vcombine.low %v1499_v15, %v1515_v37  ;;  %v1524_v58 = vcombine.high %v1499_v15, %v1515_v37  ;;  %v1539_v59 = vcombine.low %v1506_v27, %v1522_v51  ;;  %v1540_v46 = vcombine.high %v1506_v27, %v1522_v51  ;;  %v11601_v27 = vpop.permute.xlu1 %817 }
 0x297   : > { %v987_v8 = vrot.slane %v979_v9, %v11261_v56  ;;  %v994_v21 = vrot.slane %v980_v32, %v11261_v56  ;;  %v1003_v17 = vrot.slane %v995_v42, %v11261_v56  ;;  %v1010_v10 = vrot.slane %v996_v29, %v11261_v56  ;;  %v11613_v32 = vpop.f32.mrb[20].mxu1 }
 0x298   : > { %v1531_v16 = vrot.slane %v1523_v11, %v11261_v56  ;;  %v1538_v50 = vrot.slane %v1524_v58, %v11261_v56  ;;  %v1547_v35 = vrot.slane %v1539_v59, %v11261_v56  ;;  %v1554_v15 = vrot.slane %v1540_v46, %v11261_v56  ;;  %6366 = vrot.lane.b32.xlu1 %v11310_v43, %s10542_s10 }
 0x299   : > { %v2035_v14 = vcombine.low %v987_v8, %v994_v21  ;;  %v9335_v38 = vcombine.high %v987_v8, %v994_v21  ;;  %v2051_v49 = vcombine.low %v1003_v17, %v1010_v10  ;;  %v9336_v47 = vcombine.high %v1003_v17, %v1010_v10  ;;  %6364 = vrot.lane.b32.xlu0 %v11301_v12, %s10542_s10  ;;  %v11619_v17 = vpop.f32.mrb[21].mxu1 }
 0x29a   : > { %v2579_v20 = vcombine.low %v1531_v16, %v1538_v50  ;;  %v9351_v48 = vcombine.high %v1531_v16, %v1538_v50  ;;  %v2595_v7 = vcombine.low %v1547_v35, %v1554_v15  ;;  %v9352_v24 = vcombine.high %v1547_v35, %v1554_v15  ;;  %v11621_v15 = vpop.permute.xlu1 %833 }
 0x29b   : > { %v2042_v53 = vrot.slane %v2035_v14, %v11259_v54  ;;  %v2050_v37 = vrot.slane %v9335_v38, %v11259_v54  ;;  %v2058_v51 = vrot.slane %v2051_v49, %v11259_v54  ;;  %v2066_v9 = vrot.slane %v9336_v47, %v11259_v54  ;;  %v11625_v14 = vpop.f32.mrb[22].mxu1 }
 0x29c   : > { %v2586_v42 = vrot.slane %v2579_v20, %v11259_v54  ;;  %v2594_v29 = vrot.slane %v9351_v48, %v11259_v54  ;;  %v2602_v11 = vrot.slane %v2595_v7, %v11259_v54  ;;  %v2610_v58 = vrot.slane %v9352_v24, %v11259_v54  ;;  %6414 = vrot.lane.b32.xlu1 %v11310_v43, %s10543_s9  ;;  %v11631_v48 = vpop.permute.xlu0 %831  ;;  %v11635_v7 = vpop.f32.mrb[23].mxu1 }
 0x29d   : > { %v2067_v59 = vcombine.low %v2042_v53, %v2050_v37  ;;  %v2068_v46 = vcombine.high %v2042_v53, %v2050_v37  ;;  %v2083_v8 = vcombine.low %v2058_v51, %v2066_v9  ;;  %v2084_v21 = vcombine.high %v2058_v51, %v2066_v9  ;;  %6412 = vrot.lane.b32.xlu0 %v11301_v12, %s10543_s9 }
 0x29e   : > { %v2611_v10 = vcombine.low %v2586_v42, %v2594_v29  ;;  %v2612_v16 = vcombine.high %v2586_v42, %v2594_v29  ;;  %v2627_v50 = vcombine.low %v2602_v11, %v2610_v58  ;;  %v2628_v35 = vcombine.high %v2602_v11, %v2610_v58 }
 0x29f   : > { %v2075_v38 = vrot.slane %v2067_v59, %v11261_v56  ;;  %v2082_v49 = vrot.slane %v2068_v46, %v11261_v56  ;;  %v2091_v47 = vrot.slane %v2083_v8, %v11261_v56  ;;  %v2098_v20 = vrot.slane %v2084_v21, %v11261_v56 }
 0x2a0   : > { %v2619_v24 = vrot.slane %v2611_v10, %v11261_v56  ;;  %v2626_v53 = vrot.slane %v2612_v16, %v11261_v56  ;;  %v2635_v37 = vrot.slane %v2627_v50, %v11261_v56  ;;  %v2642_v51 = vrot.slane %v2628_v35, %v11261_v56  ;;  %6462 = vrot.lane.b32.xlu1 %v11310_v43, %s10544_s11 }
 0x2a1   : > { %v2099_v9 = vcombine.low %v2075_v38, %v2091_v47  ;;  %v2100_v42 = vcombine.high %v2075_v38, %v2091_v47  ;;  %v2101_v29 = vcombine.low %v2082_v49, %v2098_v20  ;;  %v2102_v11 = vcombine.high %v2082_v49, %v2098_v20  ;;  %6460 = vrot.lane.b32.xlu0 %v11301_v12, %s10544_s11  ;;  %v11645_v20 = vpop.permute.xlu1 %865 }
 0x2a2   : > { %v2643_v58 = vcombine.low %v2619_v24, %v2635_v37  ;;  %v2644_v59 = vcombine.high %v2619_v24, %v2635_v37  ;;  %v2645_v46 = vcombine.low %v2626_v53, %v2642_v51  ;;  %v2646_v8 = vcombine.high %v2626_v53, %v2642_v51 }
 0x2a3   : > { %v9657_v21 = vpack.c.bf16 %v2099_v9, %v2099_v9  ;;  %v9673_v10 = vpack.c.bf16 %v2100_v42, %v2100_v42  ;;  %v9689_v16 = vpack.c.bf16 %v2101_v29, %v2101_v29  ;;  %v9705_v50 = vpack.c.bf16 %v2102_v11, %v2102_v11  ;;  %v11663_v9 = vpop.permute.xlu0 %863 }
 0x2a4   : > { %v9665_v35 = vpack.c.bf16 %v2643_v58, %v2643_v58  ;;  %v9681_v38 = vpack.c.bf16 %v2644_v59, %v2644_v59  ;;  %v9697_v49 = vpack.c.bf16 %v2645_v46, %v2645_v46  ;;  %v9713_v47 = vpack.c.bf16 %v2646_v8, %v2646_v8  ;;  %3602 = vrot.lane.b32.xlu1 %v11321_v39, %s10542_s10 }
 0x2a5   : > { %3380 = vst.msk [vmem:[%s11421_s23] sm:$0xf] %vm3379_vm1, %v9657_v21  ;;  %3396 = vst.msk [vmem:[%s11421_s23 + $0x40] sm:$0xf] %vm3379_vm1, %v9673_v10  ;;  %v1591_v24 = vcombine.low %v11556_v62, %v11578_v57  ;;  %v1592_v53 = vcombine.high %v11556_v62, %v11578_v57  ;;  %v1607_v37 = vcombine.low %v11559_v33, %v11581_v28  ;;  %3600 = vrot.lane.b32.xlu0 %v11313_v18, %s10542_s10 }
 0x2a6   : > { %3412 = vst.msk [vmem:[%s11421_s23 + $0x80] sm:$0xf] %vm3379_vm1, %v9689_v16  ;;  %3428 = vst.msk [vmem:[%s11421_s23 + $0xc0] sm:$0xf] %vm3379_vm1, %v9705_v50  ;;  %v1608_v51 = vcombine.high %v11559_v33, %v11581_v28  ;;  %v1047_v42 = vcombine.low %v11546_v34, %v11584_v45  ;;  %v1048_v62 = vcombine.high %v11546_v34, %v11584_v45 }
 0x2a7   : > { %3388 = vst.msk [vmem:[%s11421_s23 + $0x20] sm:$0xf] %vm3379_vm1, %v9665_v35  ;;  %3404 = vst.msk [vmem:[%s11421_s23 + $0x60] sm:$0xf] %vm3379_vm1, %v9681_v38  ;;  %v1063_v57 = vcombine.low %v11549_v1, %v11587_v19  ;;  %v1064_v33 = vcombine.high %v11549_v1, %v11587_v19  ;;  %v1599_v28 = vrot.slane %v1591_v24, %v11261_v56  ;;  %v11693_v38 = vpop.permute.xlu1 %881 }
 0x2a8   : > { %3420 = vst.msk [vmem:[%s11421_s23 + $0xa0] sm:$0xf] %vm3379_vm1, %v9697_v49  ;;  %3436 = vst.msk [vmem:[%s11421_s23 + $0xe0] sm:$0xf] %vm3379_vm1, %v9713_v47  ;;  %v1606_v29 = vrot.slane %v1592_v53, %v11261_v56  ;;  %v1615_v11 = vrot.slane %v1607_v37, %v11261_v56  ;;  %v1622_v58 = vrot.slane %v1608_v51, %v11261_v56  ;;  %3650 = vrot.lane.b32.xlu1 %v11321_v39, %s10543_s9  ;;  %v11701_v37 = vpop.permute.xlu0 %879 }
 0x2a9   : > { %v1055_v34 = vrot.slane %v1047_v42, %v11261_v56  ;;  %v1062_v45 = vrot.slane %v1048_v62, %v11261_v56  ;;  %v1071_v1 = vrot.slane %v1063_v57, %v11261_v56  ;;  %v1078_v19 = vrot.slane %v1064_v33, %v11261_v56  ;;  %3648 = vrot.lane.b32.xlu0 %v11313_v18, %s10543_s9 }
 0x2aa   : > { %v2647_v59 = vcombine.low %v1599_v28, %v1606_v29  ;;  %v9353_v46 = vcombine.high %v1599_v28, %v1606_v29  ;;  %v2663_v8 = vcombine.low %v1615_v11, %v1622_v58  ;;  %v9354_v21 = vcombine.high %v1615_v11, %v1622_v58 }
 0x2ab   : > { %v2103_v10 = vcombine.low %v1055_v34, %v1062_v45  ;;  %v9337_v16 = vcombine.high %v1055_v34, %v1062_v45  ;;  %v2119_v50 = vcombine.low %v1071_v1, %v1078_v19  ;;  %v9338_v35 = vcombine.high %v1071_v1, %v1078_v19 }
 0x2ac   : > { %v2654_v49 = vrot.slane %v2647_v59, %v11259_v54  ;;  %v2662_v47 = vrot.slane %v9353_v46, %v11259_v54  ;;  %v2670_v24 = vrot.slane %v2663_v8, %v11259_v54  ;;  %v2678_v53 = vrot.slane %v9354_v21, %v11259_v54  ;;  %3698 = vrot.lane.b32.xlu1 %v11321_v39, %s10544_s11 }
 0x2ad   : > { %v2110_v51 = vrot.slane %v2103_v10, %v11259_v54  ;;  %v2118_v42 = vrot.slane %v9337_v16, %v11259_v54  ;;  %v2126_v62 = vrot.slane %v2119_v50, %v11259_v54  ;;  %v2134_v57 = vrot.slane %v9338_v35, %v11259_v54  ;;  %3696 = vrot.lane.b32.xlu0 %v11313_v18, %s10544_s11  ;;  %v11721_v35 = vpop.permute.xlu1 %913 }
 0x2ae   : > { %v2679_v33 = vcombine.low %v2654_v49, %v2662_v47  ;;  %v2680_v28 = vcombine.high %v2654_v49, %v2662_v47  ;;  %v2695_v29 = vcombine.low %v2670_v24, %v2678_v53  ;;  %v2696_v11 = vcombine.high %v2670_v24, %v2678_v53 }
 0x2af   : > { %v2135_v58 = vcombine.low %v2110_v51, %v2118_v42  ;;  %v2136_v34 = vcombine.high %v2110_v51, %v2118_v42  ;;  %v2151_v45 = vcombine.low %v2126_v62, %v2134_v57  ;;  %v2152_v1 = vcombine.high %v2126_v62, %v2134_v57  ;;  %v912_v51 = vpop.permute.xlu0 %911  ;;  %v11723_v42 = vpop.f32.mrb[20].mxu0 }
 0x2b0   : > { %v2687_v19 = vrot.slane %v2679_v33, %v11261_v56  ;;  %v2694_v59 = vrot.slane %v2680_v28, %v11261_v56  ;;  %v2703_v46 = vrot.slane %v2695_v29, %v11261_v56  ;;  %v2710_v8 = vrot.slane %v2696_v11, %v11261_v56  ;;  %6378 = vrot.lane.b32.xlu1 %v11343_v41, %s10542_s10  ;;  %v11727_v29 = vpop.f32.mrb[21].mxu0 }
 0x2b1   : > { %v2143_v21 = vrot.slane %v2135_v58, %v11261_v56  ;;  %v2150_v10 = vrot.slane %v2136_v34, %v11261_v56  ;;  %v2159_v16 = vrot.slane %v2151_v45, %v11261_v56  ;;  %v2166_v50 = vrot.slane %v2152_v1, %v11261_v56  ;;  %6376 = vrot.lane.b32.xlu0 %v11334_v44, %s10542_s10  ;;  %v11731_v1 = vpop.f32.mrb[22].mxu0 }
 0x2b2   : > { %v2711_v49 = vcombine.low %v2687_v19, %v2703_v46  ;;  %v2712_v47 = vcombine.high %v2687_v19, %v2703_v46  ;;  %v2713_v24 = vcombine.low %v2694_v59, %v2710_v8  ;;  %v2714_v53 = vcombine.high %v2694_v59, %v2710_v8 }
 0x2b3   : > { %v2167_v62 = vcombine.low %v2143_v21, %v2159_v16  ;;  %v2168_v57 = vcombine.high %v2143_v21, %v2159_v16  ;;  %v2169_v33 = vcombine.low %v2150_v10, %v2166_v50  ;;  %v2170_v28 = vcombine.high %v2150_v10, %v2166_v50 }
 0x2b4   : > { %v9666_v11 = vpack.c.bf16 %v2711_v49, %v2711_v49  ;;  %v9682_v58 = vpack.c.bf16 %v2712_v47, %v2712_v47  ;;  %v9698_v34 = vpack.c.bf16 %v2713_v24, %v2713_v24  ;;  %v9714_v45 = vpack.c.bf16 %v2714_v53, %v2714_v53  ;;  %v11749_v49 = vpop.f32.mrb[23].mxu0  ;;  %6426 = vrot.lane.b32.xlu1 %v11343_v41, %s10543_s9 }
 0x2b5   : > { %v9658_v19 = vpack.c.bf16 %v2167_v62, %v2167_v62  ;;  %v9674_v59 = vpack.c.bf16 %v2168_v57, %v2168_v57  ;;  %v9690_v46 = vpack.c.bf16 %v2169_v33, %v2169_v33  ;;  %v9706_v8 = vpack.c.bf16 %v2170_v28, %v2170_v28  ;;  %v930_v57 = vpop.permute.xlu1 %929  ;;  %v928_v33 = vpop.permute.xlu0 %927  ;;  %6424 = vrot.lane.b32.xlu0 %v11334_v44, %s10543_s9 }
 0x2b6   : > { %3389 = vst.msk [vmem:[%s11421_s23 + $0x24] sm:$0xf] %vm3379_vm1, %v9666_v11  ;;  %3405 = vst.msk [vmem:[%s11421_s23 + $0x64] sm:$0xf] %vm3379_vm1, %v9682_v58  ;;  %v1423_v21 = vcombine.low %v11142_v23, %v11645_v20  ;;  %v1424_v10 = vcombine.high %v11142_v23, %v11645_v20  ;;  %v1355_v16 = vcombine.low %v11139_v22, %v11663_v9 }
 0x2b7   : > { %3421 = vst.msk [vmem:[%s11421_s23 + $0xa4] sm:$0xf] %vm3379_vm1, %v9698_v34  ;;  %3437 = vst.msk [vmem:[%s11421_s23 + $0xe4] sm:$0xf] %vm3379_vm1, %v9714_v45  ;;  %v1356_v50 = vcombine.high %v11139_v22, %v11663_v9  ;;  %v1967_v47 = vcombine.low %v11154_v30, %v11693_v38  ;;  %v1968_v23 = vcombine.high %v11154_v30, %v11693_v38 }
 0x2b8   : > { %3381 = vst.msk [vmem:[%s11421_s23 + $0x4] sm:$0xf] %vm3379_vm1, %v9658_v19  ;;  %3397 = vst.msk [vmem:[%s11421_s23 + $0x44] sm:$0xf] %vm3379_vm1, %v9674_v59  ;;  %v1899_v20 = vcombine.low %v11151_v25, %v11701_v37  ;;  %v1900_v22 = vcombine.high %v11151_v25, %v11701_v37  ;;  %v1431_v9 = vrot.slane %v1423_v21, %v11259_v54  ;;  %3598 = vrot.lane.b32.xlu1 %v11324_v40, %s10542_s10 }
 0x2b9   : > { %3413 = vst.msk [vmem:[%s11421_s23 + $0x84] sm:$0xf] %vm3379_vm1, %v9690_v46  ;;  %3429 = vst.msk [vmem:[%s11421_s23 + $0xc4] sm:$0xf] %vm3379_vm1, %v9706_v8  ;;  %v1438_v24 = vrot.slane %v1424_v10, %v11259_v54  ;;  %v1363_v53 = vrot.slane %v1355_v16, %v11259_v54  ;;  %v1370_v62 = vrot.slane %v1356_v50, %v11259_v54  ;;  %3596 = vrot.lane.b32.xlu0 %v11316_v36, %s10542_s10 }
 0x2ba   : > { %v11776_v30 = vrot.slane %v1967_v47, %v11259_v54  ;;  %v11779_v25 = vrot.slane %v1968_v23, %v11259_v54  ;;  %v11782_v38 = vrot.slane %v1899_v20, %v11259_v54  ;;  %v11785_v37 = vrot.slane %v1900_v22, %v11259_v54 }
 0x2bb   : > { %v1439_v28 = vcombine.low %v11601_v27, %v11721_v35  ;;  %v1440_v11 = vcombine.high %v11601_v27, %v11721_v35  ;;  %v1371_v58 = vcombine.low %v11603_v52, %v912_v51  ;;  %v1372_v34 = vcombine.high %v11603_v52, %v912_v51 }
 0x2bc   : > { %v1983_v45 = vcombine.low %v11621_v15, %v930_v57  ;;  %v1984_v19 = vcombine.high %v11621_v15, %v930_v57  ;;  %v1915_v59 = vcombine.low %v11631_v48, %v928_v33  ;;  %v1916_v46 = vcombine.high %v11631_v48, %v928_v33  ;;  %3646 = vrot.lane.b32.xlu1 %v11324_v40, %s10543_s9 }
 0x2bd   : > { %v1447_v8 = vrot.slane %v1439_v28, %v11259_v54  ;;  %v1454_v21 = vrot.slane %v1440_v11, %v11259_v54  ;;  %v1379_v27 = vrot.slane %v1371_v58, %v11259_v54  ;;  %v1386_v35 = vrot.slane %v1372_v34, %v11259_v54  ;;  %3644 = vrot.lane.b32.xlu0 %v11316_v36, %s10543_s9 }
 0x2be   : > { %v11806_v52 = vrot.slane %v1983_v45, %v11259_v54  ;;  %v11809_v15 = vrot.slane %v1984_v19, %v11259_v54  ;;  %v11812_v48 = vrot.slane %v1915_v59, %v11259_v54  ;;  %v11815_v51 = vrot.slane %v1916_v46, %v11259_v54  ;;  %v11829_v46 = vpop.permute.xlu1 %813 }
 0x2bf   : > { %v1455_v10 = vcombine.low %v1431_v9, %v1447_v8  ;;  %v1456_v16 = vcombine.high %v1431_v9, %v1447_v8  ;;  %v1471_v50 = vcombine.low %v1438_v24, %v1454_v21  ;;  %v1472_v47 = vcombine.high %v1438_v24, %v1454_v21  ;;  %v11831_v8 = vpop.permute.xlu0 %811 }
 0x2c0   : > { %v1387_v23 = vcombine.low %v1363_v53, %v1379_v27  ;;  %v1388_v20 = vcombine.high %v1363_v53, %v1379_v27  ;;  %v1403_v22 = vcombine.low %v1370_v62, %v1386_v35  ;;  %v1404_v57 = vcombine.high %v1370_v62, %v1386_v35  ;;  %3694 = vrot.lane.b32.xlu1 %v11324_v40, %s10544_s11 }
 0x2c1   : > { %v1463_v33 = vrot.slane %v1455_v10, %v11261_v56  ;;  %v1470_v28 = vrot.slane %v1456_v16, %v11261_v56  ;;  %v1479_v11 = vrot.slane %v1471_v50, %v11261_v56  ;;  %v1486_v58 = vrot.slane %v1472_v47, %v11261_v56  ;;  %3692 = vrot.lane.b32.xlu0 %v11316_v36, %s10544_s11 }
 0x2c2   : > { %v1395_v9 = vrot.slane %v1387_v23, %v11261_v56  ;;  %v1402_v24 = vrot.slane %v1388_v20, %v11261_v56  ;;  %v1411_v53 = vrot.slane %v1403_v22, %v11261_v56  ;;  %v1418_v62 = vrot.slane %v1404_v57, %v11261_v56 }
 0x2c3   : > { %v2511_v34 = vcombine.low %v1463_v33, %v1470_v28  ;;  %v9349_v45 = vcombine.high %v1463_v33, %v1470_v28  ;;  %v2527_v19 = vcombine.low %v1479_v11, %v1486_v58  ;;  %v9350_v59 = vcombine.high %v1479_v11, %v1486_v58 }
 0x2c4   : > { %v2443_v21 = vcombine.low %v1395_v9, %v1402_v24  ;;  %v9347_v27 = vcombine.high %v1395_v9, %v1402_v24  ;;  %v2459_v35 = vcombine.low %v1411_v53, %v1418_v62  ;;  %v9348_v10 = vcombine.high %v1411_v53, %v1418_v62  ;;  %6374 = vrot.lane.b32.xlu1 %v11353_v63, %s10542_s10 }
 0x2c5   : > { %v2518_v16 = vrot.slane %v2511_v34, %v11259_v54  ;;  %v2526_v50 = vrot.slane %v9349_v45, %v11259_v54  ;;  %v2534_v47 = vrot.slane %v2527_v19, %v11259_v54  ;;  %v2542_v23 = vrot.slane %v9350_v59, %v11259_v54  ;;  %6372 = vrot.lane.b32.xlu0 %v11337_v31, %s10542_s10 }
 0x2c6   : > { %v2450_v20 = vrot.slane %v2443_v21, %v11259_v54  ;;  %v2458_v22 = vrot.slane %v9347_v27, %v11259_v54  ;;  %v2466_v57 = vrot.slane %v2459_v35, %v11259_v54  ;;  %v2474_v33 = vrot.slane %v9348_v10, %v11259_v54  ;;  %v11851_v27 = vpop.permute.xlu1 %829  ;;  %v11853_v35 = vpop.permute.xlu0 %827 }
 0x2c7   : > { %v2543_v28 = vcombine.low %v2518_v16, %v2526_v50  ;;  %v2544_v11 = vcombine.high %v2518_v16, %v2526_v50  ;;  %v2559_v58 = vcombine.low %v2534_v47, %v2542_v23  ;;  %v2560_v9 = vcombine.high %v2534_v47, %v2542_v23 }
 0x2c8   : > { %v2475_v24 = vcombine.low %v2450_v20, %v2458_v22  ;;  %v2476_v53 = vcombine.high %v2450_v20, %v2458_v22  ;;  %v2491_v62 = vcombine.low %v2466_v57, %v2474_v33  ;;  %v2492_v34 = vcombine.high %v2466_v57, %v2474_v33  ;;  %6422 = vrot.lane.b32.xlu1 %v11353_v63, %s10543_s9 }
 0x2c9   : > { %v2551_v45 = vrot.slane %v2543_v28, %v11261_v56  ;;  %v2558_v19 = vrot.slane %v2544_v11, %v11261_v56  ;;  %v2567_v59 = vrot.slane %v2559_v58, %v11261_v56  ;;  %v2574_v21 = vrot.slane %v2560_v9, %v11261_v56  ;;  %6420 = vrot.lane.b32.xlu0 %v11337_v31, %s10543_s9 }
 0x2ca   : > { %v2483_v10 = vrot.slane %v2475_v24, %v11261_v56  ;;  %v2490_v16 = vrot.slane %v2476_v53, %v11261_v56  ;;  %v2499_v50 = vrot.slane %v2491_v62, %v11261_v56  ;;  %v2506_v47 = vrot.slane %v2492_v34, %v11261_v56 }
 0x2cb   : > { %v2575_v23 = vcombine.low %v2551_v45, %v2567_v59  ;;  %v2576_v20 = vcombine.high %v2551_v45, %v2567_v59  ;;  %v2577_v22 = vcombine.low %v2558_v19, %v2574_v21  ;;  %v2578_v57 = vcombine.high %v2558_v19, %v2574_v21 }
 0x2cc   : > { %v2507_v33 = vcombine.low %v2483_v10, %v2499_v50  ;;  %v2508_v28 = vcombine.high %v2483_v10, %v2499_v50  ;;  %v2509_v11 = vcombine.low %v2490_v16, %v2506_v47  ;;  %v2510_v58 = vcombine.high %v2490_v16, %v2506_v47  ;;  %v11881_v47 = vpop.permute.xlu1 %861  ;;  %6470 = vrot.lane.b32.xlu1 %v11353_v63, %s10544_s11 }
 0x2cd   : > { %v9664_v9 = vpack.c.bf16 %v2575_v23, %v2575_v23  ;;  %v9680_v24 = vpack.c.bf16 %v2576_v20, %v2576_v20  ;;  %v9696_v53 = vpack.c.bf16 %v2577_v22, %v2577_v22  ;;  %v9712_v62 = vpack.c.bf16 %v2578_v57, %v2578_v57  ;;  %v11883_v23 = vpop.permute.xlu0 %859  ;;  %6468 = vrot.lane.b32.xlu0 %v11337_v31, %s10544_s11 }
 0x2ce   : > { %v9663_v34 = vpack.c.bf16 %v2507_v33, %v2507_v33  ;;  %v9679_v45 = vpack.c.bf16 %v2508_v28, %v2508_v28  ;;  %v9695_v19 = vpack.c.bf16 %v2509_v11, %v2509_v11  ;;  %v9711_v59 = vpack.c.bf16 %v2510_v58, %v2510_v58 }
 0x2cf   : > { %3387 = vst.msk [vmem:[%s11421_s23 + $0x1c] sm:$0xf] %vm3379_vm1, %v9664_v9  ;;  %3403 = vst.msk [vmem:[%s11421_s23 + $0x5c] sm:$0xf] %vm3379_vm1, %v9680_v24  ;;  %v1999_v21 = vcombine.low %v11776_v30, %v11806_v52  ;;  %v2000_v10 = vcombine.high %v11776_v30, %v11806_v52  ;;  %v2015_v16 = vcombine.low %v11779_v25, %v11809_v15 }
 0x2d0   : > { %3419 = vst.msk [vmem:[%s11421_s23 + $0x9c] sm:$0xf] %vm3379_vm1, %v9696_v53  ;;  %3435 = vst.msk [vmem:[%s11421_s23 + $0xdc] sm:$0xf] %vm3379_vm1, %v9712_v62  ;;  %v2016_v50 = vcombine.high %v11779_v25, %v11809_v15  ;;  %v1931_v30 = vcombine.low %v11782_v38, %v11812_v48  ;;  %v1932_v52 = vcombine.high %v11782_v38, %v11812_v48  ;;  %6474 = vrot.lane.b32.xlu1 %v11343_v41, %s10544_s11 }
 0x2d1   : > { %3386 = vst.msk [vmem:[%s11421_s23 + $0x18] sm:$0xf] %vm3379_vm1, %v9663_v34  ;;  %3402 = vst.msk [vmem:[%s11421_s23 + $0x58] sm:$0xf] %vm3379_vm1, %v9679_v45  ;;  %v1947_v25 = vcombine.low %v11785_v37, %v11815_v51  ;;  %v1948_v15 = vcombine.high %v11785_v37, %v11815_v51  ;;  %v2007_v20 = vrot.slane %v1999_v21, %v11261_v56 }
 0x2d2   : > { %3418 = vst.msk [vmem:[%s11421_s23 + $0x98] sm:$0xf] %vm3379_vm1, %v9695_v19  ;;  %3434 = vst.msk [vmem:[%s11421_s23 + $0xd8] sm:$0xf] %vm3379_vm1, %v9711_v59  ;;  %v2014_v22 = vrot.slane %v2000_v10, %v11261_v56  ;;  %v2023_v57 = vrot.slane %v2015_v16, %v11261_v56  ;;  %v2030_v33 = vrot.slane %v2016_v50, %v11261_v56  ;;  %v11919_v10 = vpop.permute.xlu1 %877  ;;  %v11921_v16 = vpop.permute.xlu0 %875 }
 0x2d3   : > { %v1939_v38 = vrot.slane %v1931_v30, %v11261_v56  ;;  %v1946_v48 = vrot.slane %v1932_v52, %v11261_v56  ;;  %v1955_v37 = vrot.slane %v1947_v25, %v11261_v56  ;;  %v1962_v51 = vrot.slane %v1948_v15, %v11261_v56 }
 0x2d4   : > { %v3055_v28 = vcombine.low %v2007_v20, %v2014_v22  ;;  %v9365_v11 = vcombine.high %v2007_v20, %v2014_v22  ;;  %v3071_v58 = vcombine.low %v2023_v57, %v2030_v33  ;;  %v9366_v9 = vcombine.high %v2023_v57, %v2030_v33 }
 0x2d5   : > { %v2987_v24 = vcombine.low %v1939_v38, %v1946_v48  ;;  %v9363_v53 = vcombine.high %v1939_v38, %v1946_v48  ;;  %v3003_v62 = vcombine.low %v1955_v37, %v1962_v51  ;;  %v9364_v34 = vcombine.high %v1955_v37, %v1962_v51 }
 0x2d6   : > { %v3062_v45 = vrot.slane %v3055_v28, %v11259_v54  ;;  %v3070_v19 = vrot.slane %v9365_v11, %v11259_v54  ;;  %v3078_v59 = vrot.slane %v3071_v58, %v11259_v54  ;;  %v3086_v21 = vrot.slane %v9366_v9, %v11259_v54 }
 0x2d7   : > { %v2994_v50 = vrot.slane %v2987_v24, %v11259_v54  ;;  %v3002_v30 = vrot.slane %v9363_v53, %v11259_v54  ;;  %v3010_v52 = vrot.slane %v3003_v62, %v11259_v54  ;;  %v3018_v25 = vrot.slane %v9364_v34, %v11259_v54 }
 0x2d8   : > { %v3087_v15 = vcombine.low %v3062_v45, %v3070_v19  ;;  %v3088_v20 = vcombine.high %v3062_v45, %v3070_v19  ;;  %v3103_v22 = vcombine.low %v3078_v59, %v3086_v21  ;;  %v3104_v57 = vcombine.high %v3078_v59, %v3086_v21  ;;  %v910_v21 = vpop.permute.xlu1 %909 }
 0x2d9   : > { %v3019_v33 = vcombine.low %v2994_v50, %v3002_v30  ;;  %v3020_v38 = vcombine.high %v2994_v50, %v3002_v30  ;;  %v3035_v48 = vcombine.low %v3010_v52, %v3018_v25  ;;  %v3036_v37 = vcombine.high %v3010_v52, %v3018_v25  ;;  %v908_v50 = vpop.permute.xlu0 %907 }
 0x2da   : > { %v3095_v51 = vrot.slane %v3087_v15, %v11261_v56  ;;  %v3102_v28 = vrot.slane %v3088_v20, %v11261_v56  ;;  %v3111_v11 = vrot.slane %v3103_v22, %v11261_v56  ;;  %v3118_v58 = vrot.slane %v3104_v57, %v11261_v56 }
 0x2db   : > { %v3027_v9 = vrot.slane %v3019_v33, %v11261_v56  ;;  %v3034_v24 = vrot.slane %v3020_v38, %v11261_v56  ;;  %v3043_v53 = vrot.slane %v3035_v48, %v11261_v56  ;;  %v3050_v62 = vrot.slane %v3036_v37, %v11261_v56 }
 0x2dc   : > { %v3119_v34 = vcombine.low %v3095_v51, %v3111_v11  ;;  %v3120_v45 = vcombine.high %v3095_v51, %v3111_v11  ;;  %v3121_v19 = vcombine.low %v3102_v28, %v3118_v58  ;;  %v3122_v59 = vcombine.high %v3102_v28, %v3118_v58 }
 0x2dd   : > { %v3051_v30 = vcombine.low %v3027_v9, %v3043_v53  ;;  %v3052_v52 = vcombine.high %v3027_v9, %v3043_v53  ;;  %v3053_v25 = vcombine.low %v3034_v24, %v3050_v62  ;;  %v3054_v15 = vcombine.high %v3034_v24, %v3050_v62 }
 0x2de   : > { %v9672_v20 = vpack.c.bf16 %v3119_v34, %v3119_v34  ;;  %v9688_v22 = vpack.c.bf16 %v3120_v45, %v3120_v45  ;;  %v9704_v57 = vpack.c.bf16 %v3121_v19, %v3121_v19  ;;  %v9720_v33 = vpack.c.bf16 %v3122_v59, %v3122_v59  ;;  %v926_v45 = vpop.permute.xlu1 %925  ;;  %v924_v19 = vpop.permute.xlu0 %923 }
 0x2df   : > { %v9671_v38 = vpack.c.bf16 %v3051_v30, %v3051_v30  ;;  %v9687_v48 = vpack.c.bf16 %v3052_v52, %v3052_v52  ;;  %v9703_v37 = vpack.c.bf16 %v3053_v25, %v3053_v25  ;;  %v9719_v51 = vpack.c.bf16 %v3054_v15, %v3054_v15 }
 0x2e0   : > { %3395 = vst.msk [vmem:[%s11421_s23 + $0x3c] sm:$0xf] %vm3379_vm1, %v9672_v20  ;;  %3411 = vst.msk [vmem:[%s11421_s23 + $0x7c] sm:$0xf] %vm3379_vm1, %v9688_v22  ;;  %v1287_v28 = vcombine.low %v11054_v60, %v11881_v47  ;;  %v1288_v11 = vcombine.high %v11054_v60, %v11881_v47  ;;  %v1219_v58 = vcombine.low %v11047_v55, %v11883_v23 }
 0x2e1   : > { %3427 = vst.msk [vmem:[%s11421_s23 + $0xbc] sm:$0xf] %vm3379_vm1, %v9704_v57  ;;  %3443 = vst.msk [vmem:[%s11421_s23 + $0xfc] sm:$0xf] %vm3379_vm1, %v9720_v33  ;;  %v1220_v9 = vcombine.high %v11047_v55, %v11883_v23  ;;  %v1831_v24 = vcombine.low %v11060_v0, %v11919_v10  ;;  %v1832_v60 = vcombine.high %v11060_v0, %v11919_v10 }
 0x2e2   : > { %3394 = vst.msk [vmem:[%s11421_s23 + $0x38] sm:$0xf] %vm3379_vm1, %v9671_v38  ;;  %3410 = vst.msk [vmem:[%s11421_s23 + $0x78] sm:$0xf] %vm3379_vm1, %v9687_v48  ;;  %v1763_v47 = vcombine.low %v11057_v61, %v11921_v16  ;;  %v1764_v55 = vcombine.high %v11057_v61, %v11921_v16  ;;  %v1295_v23 = vrot.slane %v1287_v28, %v11259_v54 }
 0x2e3   : > { %3426 = vst.msk [vmem:[%s11421_s23 + $0xb8] sm:$0xf] %vm3379_vm1, %v9703_v37  ;;  %3442 = vst.msk [vmem:[%s11421_s23 + $0xf8] sm:$0xf] %vm3379_vm1, %v9719_v51  ;;  %v1302_v53 = vrot.slane %v1288_v11, %v11259_v54  ;;  %v1227_v62 = vrot.slane %v1219_v58, %v11259_v54  ;;  %v1234_v34 = vrot.slane %v1220_v9, %v11259_v54 }
 0x2e4   : > { %v11972_v59 = vrot.slane %v1831_v24, %v11259_v54  ;;  %v11975_v0 = vrot.slane %v1832_v60, %v11259_v54  ;;  %v11978_v10 = vrot.slane %v1763_v47, %v11259_v54  ;;  %v11981_v61 = vrot.slane %v1764_v55, %v11259_v54 }
 0x2e5   : > { %v1303_v16 = vcombine.low %v11829_v46, %v910_v21  ;;  %v1304_v30 = vcombine.high %v11829_v46, %v910_v21  ;;  %v1235_v52 = vcombine.low %v11831_v8, %v908_v50  ;;  %v1236_v25 = vcombine.high %v11831_v8, %v908_v50 }
 0x2e6   : > { %v1847_v15 = vcombine.low %v11851_v27, %v926_v45  ;;  %v1848_v20 = vcombine.high %v11851_v27, %v926_v45  ;;  %v1779_v22 = vcombine.low %v11853_v35, %v924_v19  ;;  %v1780_v57 = vcombine.high %v11853_v35, %v924_v19 }
 0x2e7   : > { %v1311_v33 = vrot.slane %v1303_v16, %v11259_v54  ;;  %v1318_v38 = vrot.slane %v1304_v30, %v11259_v54  ;;  %v1243_v48 = vrot.slane %v1235_v52, %v11259_v54  ;;  %v1250_v46 = vrot.slane %v1236_v25, %v11259_v54 }
 0x2e8   : > { %v11996_v21 = vrot.slane %v1847_v15, %v11259_v54  ;;  %v11999_v8 = vrot.slane %v1848_v20, %v11259_v54  ;;  %v12002_v27 = vrot.slane %v1779_v22, %v11259_v54  ;;  %v12005_v50 = vrot.slane %v1780_v57, %v11259_v54 }
 0x2e9   : > { %v1319_v35 = vcombine.low %v1295_v23, %v1311_v33  ;;  %v1320_v37 = vcombine.high %v1295_v23, %v1311_v33  ;;  %v1335_v51 = vcombine.low %v1302_v53, %v1318_v38  ;;  %v1336_v28 = vcombine.high %v1302_v53, %v1318_v38 }
 0x2ea   : > { %v1251_v11 = vcombine.low %v1227_v62, %v1243_v48  ;;  %v1252_v58 = vcombine.high %v1227_v62, %v1243_v48  ;;  %v1267_v9 = vcombine.low %v1234_v34, %v1250_v46  ;;  %v1268_v24 = vcombine.high %v1234_v34, %v1250_v46 }
 0x2eb   : > { %v1327_v60 = vrot.slane %v1319_v35, %v11261_v56  ;;  %v1334_v47 = vrot.slane %v1320_v37, %v11261_v56  ;;  %v1343_v55 = vrot.slane %v1335_v51, %v11261_v56  ;;  %v1350_v45 = vrot.slane %v1336_v28, %v11261_v56 }
 0x2ec   : > { %v1259_v19 = vrot.slane %v1251_v11, %v11261_v56  ;;  %v1266_v16 = vrot.slane %v1252_v58, %v11261_v56  ;;  %v1275_v23 = vrot.slane %v1267_v9, %v11261_v56  ;;  %v1282_v53 = vrot.slane %v1268_v24, %v11261_v56 }
 0x2ed   : > { %v2375_v30 = vcombine.low %v1327_v60, %v1334_v47  ;;  %v9345_v62 = vcombine.high %v1327_v60, %v1334_v47  ;;  %v2391_v52 = vcombine.low %v1343_v55, %v1350_v45  ;;  %v9346_v34 = vcombine.high %v1343_v55, %v1350_v45  ;;  %v12023_v45 = vpop.permute.xlu1 %3586 }
 0x2ee   : > { %v2307_v25 = vcombine.low %v1259_v19, %v1266_v16  ;;  %v9343_v15 = vcombine.high %v1259_v19, %v1266_v16  ;;  %v2323_v20 = vcombine.low %v1275_v23, %v1282_v53  ;;  %v9344_v22 = vcombine.high %v1275_v23, %v1282_v53  ;;  %v12025_v19 = vpop.permute.xlu0 %3584 }
 0x2ef   : > { %v2382_v57 = vrot.slane %v2375_v30, %v11259_v54  ;;  %v2390_v33 = vrot.slane %v9345_v62, %v11259_v54  ;;  %v2398_v38 = vrot.slane %v2391_v52, %v11259_v54  ;;  %v2406_v48 = vrot.slane %v9346_v34, %v11259_v54 }
 0x2f0   : > { %v2314_v46 = vrot.slane %v2307_v25, %v11259_v54  ;;  %v2322_v35 = vrot.slane %v9343_v15, %v11259_v54  ;;  %v2330_v37 = vrot.slane %v2323_v20, %v11259_v54  ;;  %v2338_v51 = vrot.slane %v9344_v22, %v11259_v54 }
 0x2f1   : > { %v2407_v28 = vcombine.low %v2382_v57, %v2390_v33  ;;  %v2408_v11 = vcombine.high %v2382_v57, %v2390_v33  ;;  %v2423_v58 = vcombine.low %v2398_v38, %v2406_v48  ;;  %v2424_v9 = vcombine.high %v2398_v38, %v2406_v48 }
 0x2f2   : > { %v2339_v24 = vcombine.low %v2314_v46, %v2322_v35  ;;  %v2340_v60 = vcombine.high %v2314_v46, %v2322_v35  ;;  %v2355_v47 = vcombine.low %v2330_v37, %v2338_v51  ;;  %v2356_v55 = vcombine.high %v2330_v37, %v2338_v51 }
 0x2f3   : > { %v2415_v16 = vrot.slane %v2407_v28, %v11261_v56  ;;  %v2422_v23 = vrot.slane %v2408_v11, %v11261_v56  ;;  %v2431_v53 = vrot.slane %v2423_v58, %v11261_v56  ;;  %v2438_v30 = vrot.slane %v2424_v9, %v11261_v56 }
 0x2f4   : > { %v2347_v62 = vrot.slane %v2339_v24, %v11261_v56  ;;  %v2354_v52 = vrot.slane %v2340_v60, %v11261_v56  ;;  %v2363_v34 = vrot.slane %v2355_v47, %v11261_v56  ;;  %v2370_v25 = vrot.slane %v2356_v55, %v11261_v56  ;;  %v12035_v60 = vpop.permute.xlu1 %3634  ;;  %v12037_v47 = vpop.permute.xlu0 %3632 }
 0x2f5   : > { %v2439_v15 = vcombine.low %v2415_v16, %v2431_v53  ;;  %v2440_v20 = vcombine.high %v2415_v16, %v2431_v53  ;;  %v2441_v22 = vcombine.low %v2422_v23, %v2438_v30  ;;  %v2442_v57 = vcombine.high %v2422_v23, %v2438_v30 }
 0x2f6   : > { %v2371_v33 = vcombine.low %v2347_v62, %v2363_v34  ;;  %v2372_v38 = vcombine.high %v2347_v62, %v2363_v34  ;;  %v2373_v48 = vcombine.low %v2354_v52, %v2370_v25  ;;  %v2374_v46 = vcombine.high %v2354_v52, %v2370_v25 }
 0x2f7   : > { %v9662_v35 = vpack.c.bf16 %v2439_v15, %v2439_v15  ;;  %v9678_v37 = vpack.c.bf16 %v2440_v20, %v2440_v20  ;;  %v9694_v51 = vpack.c.bf16 %v2441_v22, %v2441_v22  ;;  %v9710_v28 = vpack.c.bf16 %v2442_v57, %v2442_v57 }
 0x2f8   : > { %v9661_v11 = vpack.c.bf16 %v2371_v33, %v2371_v33  ;;  %v9677_v58 = vpack.c.bf16 %v2372_v38, %v2372_v38  ;;  %v9693_v9 = vpack.c.bf16 %v2373_v48, %v2373_v48  ;;  %v9709_v24 = vpack.c.bf16 %v2374_v46, %v2374_v46  ;;  %v12079_v46 = vpop.permute.xlu1 %3682 }
 0x2f9   : > { %3385 = vst.msk [vmem:[%s11421_s23 + $0x14] sm:$0xf] %vm3379_vm1, %v9662_v35  ;;  %3401 = vst.msk [vmem:[%s11421_s23 + $0x54] sm:$0xf] %vm3379_vm1, %v9678_v37  ;;  %v1863_v55 = vcombine.low %v11972_v59, %v11996_v21  ;;  %v1864_v16 = vcombine.high %v11972_v59, %v11996_v21  ;;  %v1879_v23 = vcombine.low %v11975_v0, %v11999_v8  ;;  %v12081_v35 = vpop.permute.xlu0 %3680 }
 0x2fa   : > { %3417 = vst.msk [vmem:[%s11421_s23 + $0x94] sm:$0xf] %vm3379_vm1, %v9694_v51  ;;  %3433 = vst.msk [vmem:[%s11421_s23 + $0xd4] sm:$0xf] %vm3379_vm1, %v9710_v28  ;;  %v1880_v53 = vcombine.high %v11975_v0, %v11999_v8  ;;  %v1795_v30 = vcombine.low %v11978_v10, %v12002_v27  ;;  %v1796_v59 = vcombine.high %v11978_v10, %v12002_v27 }
 0x2fb   : > { %3384 = vst.msk [vmem:[%s11421_s23 + $0x10] sm:$0xf] %vm3379_vm1, %v9661_v11  ;;  %3400 = vst.msk [vmem:[%s11421_s23 + $0x50] sm:$0xf] %vm3379_vm1, %v9677_v58  ;;  %v1811_v21 = vcombine.low %v11981_v61, %v12005_v50  ;;  %v1812_v0 = vcombine.high %v11981_v61, %v12005_v50  ;;  %v1871_v8 = vrot.slane %v1863_v55, %v11261_v56 }
 0x2fc   : > { %3416 = vst.msk [vmem:[%s11421_s23 + $0x90] sm:$0xf] %vm3379_vm1, %v9693_v9  ;;  %3432 = vst.msk [vmem:[%s11421_s23 + $0xd0] sm:$0xf] %vm3379_vm1, %v9709_v24  ;;  %v1878_v62 = vrot.slane %v1864_v16, %v11261_v56  ;;  %v1887_v52 = vrot.slane %v1879_v23, %v11261_v56  ;;  %v1894_v34 = vrot.slane %v1880_v53, %v11261_v56 }
 0x2fd   : > { %v1803_v25 = vrot.slane %v1795_v30, %v11261_v56  ;;  %v1810_v15 = vrot.slane %v1796_v59, %v11261_v56  ;;  %v1819_v10 = vrot.slane %v1811_v21, %v11261_v56  ;;  %v1826_v27 = vrot.slane %v1812_v0, %v11261_v56 }
 0x2fe   : > { %v2919_v20 = vcombine.low %v1871_v8, %v1878_v62  ;;  %v9361_v22 = vcombine.high %v1871_v8, %v1878_v62  ;;  %v2935_v57 = vcombine.low %v1887_v52, %v1894_v34  ;;  %v9362_v61 = vcombine.high %v1887_v52, %v1894_v34 }
 0x2ff   : > { %v2851_v50 = vcombine.low %v1803_v25, %v1810_v15  ;;  %v9359_v33 = vcombine.high %v1803_v25, %v1810_v15  ;;  %v2867_v38 = vcombine.low %v1819_v10, %v1826_v27  ;;  %v9360_v48 = vcombine.high %v1819_v10, %v1826_v27 }
 0x300   : > { %v2926_v37 = vrot.slane %v2919_v20, %v11259_v54  ;;  %v2934_v51 = vrot.slane %v9361_v22, %v11259_v54  ;;  %v2942_v28 = vrot.slane %v2935_v57, %v11259_v54  ;;  %v2950_v11 = vrot.slane %v9362_v61, %v11259_v54  ;;  %v12099_v22 = vpop.permute.xlu1 %6362  ;;  %v12101_v57 = vpop.permute.xlu0 %6360 }
 0x301   : > { %v2858_v58 = vrot.slane %v2851_v50, %v11259_v54  ;;  %v2866_v9 = vrot.slane %v9359_v33, %v11259_v54  ;;  %v2874_v24 = vrot.slane %v2867_v38, %v11259_v54  ;;  %v2882_v55 = vrot.slane %v9360_v48, %v11259_v54 }
 0x302   : > { %v2951_v16 = vcombine.low %v2926_v37, %v2934_v51  ;;  %v2952_v23 = vcombine.high %v2926_v37, %v2934_v51  ;;  %v2967_v53 = vcombine.low %v2942_v28, %v2950_v11  ;;  %v2968_v30 = vcombine.high %v2942_v28, %v2950_v11 }
 0x303   : > { %v2883_v59 = vcombine.low %v2858_v58, %v2866_v9  ;;  %v2884_v21 = vcombine.high %v2858_v58, %v2866_v9  ;;  %v2899_v0 = vcombine.low %v2874_v24, %v2882_v55  ;;  %v2900_v8 = vcombine.high %v2874_v24, %v2882_v55 }
 0x304   : > { %v2959_v62 = vrot.slane %v2951_v16, %v11261_v56  ;;  %v2966_v52 = vrot.slane %v2952_v23, %v11261_v56  ;;  %v2975_v34 = vrot.slane %v2967_v53, %v11261_v56  ;;  %v2982_v25 = vrot.slane %v2968_v30, %v11261_v56 }
 0x305   : > { %v2891_v15 = vrot.slane %v2883_v59, %v11261_v56  ;;  %v2898_v10 = vrot.slane %v2884_v21, %v11261_v56  ;;  %v2907_v27 = vrot.slane %v2899_v0, %v11261_v56  ;;  %v2914_v20 = vrot.slane %v2900_v8, %v11261_v56  ;;  %v13709_v21 = vld [vmem:[#allocation28_spill] sm:$0xff] }
 0x306   : > { %v2983_v61 = vcombine.low %v2959_v62, %v2975_v34  ;;  %v2984_v50 = vcombine.high %v2959_v62, %v2975_v34  ;;  %v2985_v33 = vcombine.low %v2966_v52, %v2982_v25  ;;  %v2986_v38 = vcombine.high %v2966_v52, %v2982_v25  ;;  %v12135_v52 = vpop.permute.xlu1 %6410  ;;  %v12137_v34 = vpop.permute.xlu0 %6408 }
 0x307   : > { %v2915_v48 = vcombine.low %v2891_v15, %v2907_v27  ;;  %v2916_v37 = vcombine.high %v2891_v15, %v2907_v27  ;;  %v2917_v51 = vcombine.low %v2898_v10, %v2914_v20  ;;  %v2918_v28 = vcombine.high %v2898_v10, %v2914_v20 }
 0x308   : > { %v9670_v11 = vpack.c.bf16 %v2983_v61, %v2983_v61  ;;  %v9686_v58 = vpack.c.bf16 %v2984_v50, %v2984_v50  ;;  %v9702_v9 = vpack.c.bf16 %v2985_v33, %v2985_v33  ;;  %v9718_v24 = vpack.c.bf16 %v2986_v38, %v2986_v38  ;;  %v13711_v33 = vld [vmem:[#allocation29_spill] sm:$0xff] }
 0x309   : > { %v9669_v55 = vpack.c.bf16 %v2915_v48, %v2915_v48  ;;  %v9685_v16 = vpack.c.bf16 %v2916_v37, %v2916_v37  ;;  %v9701_v23 = vpack.c.bf16 %v2917_v51, %v2917_v51  ;;  %v9717_v53 = vpack.c.bf16 %v2918_v28, %v2918_v28 }
 0x30a   : > { %3393 = vst.msk [vmem:[%s11421_s23 + $0x34] sm:$0xf] %vm3379_vm1, %v9670_v11  ;;  %3409 = vst.msk [vmem:[%s11421_s23 + $0x74] sm:$0xf] %vm3379_vm1, %v9686_v58  ;;  %v3928_v30 = vcombine.low %v11207_v26, %v12035_v60  ;;  %v3929_v59 = vcombine.high %v11207_v26, %v12035_v60  ;;  %v3860_v0 = vcombine.low %v13709_v21, %v12037_v47 }
 0x30b   : > { %3425 = vst.msk [vmem:[%s11421_s23 + $0xb4] sm:$0xf] %vm3379_vm1, %v9702_v9  ;;  %3441 = vst.msk [vmem:[%s11421_s23 + $0xf4] sm:$0xf] %vm3379_vm1, %v9718_v24  ;;  %v3861_v8 = vcombine.high %v13709_v21, %v12037_v47  ;;  %v3944_v62 = vcombine.low %v12023_v45, %v12079_v46  ;;  %v3945_v26 = vcombine.high %v12023_v45, %v12079_v46 }
 0x30c   : > { %3392 = vst.msk [vmem:[%s11421_s23 + $0x30] sm:$0xf] %vm3379_vm1, %v9669_v55  ;;  %3408 = vst.msk [vmem:[%s11421_s23 + $0x70] sm:$0xf] %vm3379_vm1, %v9685_v16  ;;  %v3876_v60 = vcombine.low %v12025_v19, %v12081_v35  ;;  %v3877_v47 = vcombine.high %v12025_v19, %v12081_v35  ;;  %v3936_v25 = vrot.slane %v3928_v30, %v11259_v54  ;;  %v13710_v35 = vld [vmem:[#allocation30_spill] sm:$0xff] }
 0x30d   : > { %3424 = vst.msk [vmem:[%s11421_s23 + $0xb0] sm:$0xf] %vm3379_vm1, %v9701_v23  ;;  %3440 = vst.msk [vmem:[%s11421_s23 + $0xf0] sm:$0xf] %vm3379_vm1, %v9717_v53  ;;  %v3943_v15 = vrot.slane %v3929_v59, %v11259_v54  ;;  %v3868_v10 = vrot.slane %v3860_v0, %v11259_v54  ;;  %v3875_v27 = vrot.slane %v3861_v8, %v11259_v54 }
 0x30e   : > { %v3952_v45 = vrot.slane %v3944_v62, %v11259_v54  ;;  %v3959_v46 = vrot.slane %v3945_v26, %v11259_v54  ;;  %v3884_v20 = vrot.slane %v3876_v60, %v11259_v54  ;;  %v3891_v19 = vrot.slane %v3877_v47, %v11259_v54 }
 0x30f   : > { %v6704_v61 = vcombine.low %v13710_v35, %v12135_v52  ;;  %v6705_v50 = vcombine.high %v13710_v35, %v12135_v52  ;;  %v6636_v38 = vcombine.low %v13711_v33, %v12137_v34  ;;  %v10159_v52 = vld [vmem:[#allocation12] ss:$0 sm:$0xff] }
 0x310   : > { %v3960_v37 = vcombine.low %v3936_v25, %v3952_v45  ;;  %v3961_v51 = vcombine.high %v3936_v25, %v3952_v45  ;;  %v3976_v28 = vcombine.low %v3943_v15, %v3959_v46  ;;  %v3977_v11 = vcombine.high %v3943_v15, %v3959_v46  ;;  %v12163_v25 = vpop.permute.xlu1 %6458  ;;  %v12165_v46 = vpop.permute.xlu0 %6456 }
 0x311   : > { %v3892_v58 = vcombine.low %v3868_v10, %v3884_v20  ;;  %v3893_v9 = vcombine.high %v3868_v10, %v3884_v20  ;;  %v3908_v24 = vcombine.low %v3875_v27, %v3891_v19  ;;  %v3909_v55 = vcombine.high %v3875_v27, %v3891_v19 }
 0x312   : > { %v3968_v16 = vrot.slane %v3960_v37, %v11261_v56  ;;  %v3975_v23 = vrot.slane %v3961_v51, %v11261_v56  ;;  %v3984_v53 = vrot.slane %v3976_v28, %v11261_v56  ;;  %v3991_v30 = vrot.slane %v3977_v11, %v11261_v56 }
 0x313   : > { %v3900_v59 = vrot.slane %v3892_v58, %v11261_v56  ;;  %v3907_v21 = vrot.slane %v3893_v9, %v11261_v56  ;;  %v3916_v0 = vrot.slane %v3908_v24, %v11261_v56  ;;  %v3923_v8 = vrot.slane %v3909_v55, %v11261_v56 }
 0x314   : > { %v5016_v62 = vcombine.low %v3968_v16, %v3975_v23  ;;  %v9448_v26 = vcombine.high %v3968_v16, %v3975_v23  ;;  %v5032_v60 = vcombine.low %v3984_v53, %v3991_v30  ;;  %v9449_v47 = vcombine.high %v3984_v53, %v3991_v30 }
 0x315   : > { %v4948_v15 = vcombine.low %v3900_v59, %v3907_v21  ;;  %v9446_v10 = vcombine.high %v3900_v59, %v3907_v21  ;;  %v4964_v27 = vcombine.low %v3916_v0, %v3923_v8  ;;  %v9447_v45 = vcombine.high %v3916_v0, %v3923_v8 }
 0x316   : > { %v5023_v20 = vrot.slane %v5016_v62, %v11259_v54  ;;  %v5031_v19 = vrot.slane %v9448_v26, %v11259_v54  ;;  %v5039_v37 = vrot.slane %v5032_v60, %v11259_v54  ;;  %v5047_v51 = vrot.slane %v9449_v47, %v11259_v54  ;;  %v12179_v60 = vpop.permute.xlu1 %3582 }
 0x317   : > { %v4955_v28 = vrot.slane %v4948_v15, %v11259_v54  ;;  %v4963_v11 = vrot.slane %v9446_v10, %v11259_v54  ;;  %v4971_v58 = vrot.slane %v4964_v27, %v11259_v54  ;;  %v4979_v9 = vrot.slane %v9447_v45, %v11259_v54  ;;  %v12185_v45 = vpop.permute.xlu0 %3580 }
 0x318   : > { %v5048_v24 = vcombine.low %v5023_v20, %v5031_v19  ;;  %v5049_v55 = vcombine.high %v5023_v20, %v5031_v19  ;;  %v5064_v16 = vcombine.low %v5039_v37, %v5047_v51  ;;  %v5065_v23 = vcombine.high %v5039_v37, %v5047_v51 }
 0x319   : > { %v4980_v53 = vcombine.low %v4955_v28, %v4963_v11  ;;  %v4981_v30 = vcombine.high %v4955_v28, %v4963_v11  ;;  %v4996_v59 = vcombine.low %v4971_v58, %v4979_v9  ;;  %v4997_v21 = vcombine.high %v4971_v58, %v4979_v9 }
 0x31a   : > { %v5056_v0 = vrot.slane %v5048_v24, %v11261_v56  ;;  %v5063_v8 = vrot.slane %v5049_v55, %v11261_v56  ;;  %v5072_v62 = vrot.slane %v5064_v16, %v11261_v56  ;;  %v5079_v26 = vrot.slane %v5065_v23, %v11261_v56 }
 0x31b   : > { %v4988_v47 = vrot.slane %v4980_v53, %v11261_v56  ;;  %v4995_v15 = vrot.slane %v4981_v30, %v11261_v56  ;;  %v5004_v10 = vrot.slane %v4996_v59, %v11261_v56  ;;  %v5011_v27 = vrot.slane %v4997_v21, %v11261_v56 }
 0x31c   : > { %v5080_v20 = vcombine.low %v5056_v0, %v5072_v62  ;;  %v5081_v19 = vcombine.high %v5056_v0, %v5072_v62  ;;  %v5082_v37 = vcombine.low %v5063_v8, %v5079_v26  ;;  %v5083_v51 = vcombine.high %v5063_v8, %v5079_v26 }
 0x31d   : > { %v5012_v28 = vcombine.low %v4988_v47, %v5004_v10  ;;  %v5013_v11 = vcombine.high %v4988_v47, %v5004_v10  ;;  %v5014_v58 = vcombine.low %v4995_v15, %v5011_v27  ;;  %v5015_v9 = vcombine.high %v4995_v15, %v5011_v27  ;;  %v12214_v47 = vpop.permute.xlu1 %3630 }
 0x31e   : > { %v9724_v24 = vpack.c.bf16 %v5080_v20, %v5080_v20  ;;  %v9740_v55 = vpack.c.bf16 %v5081_v19, %v5081_v19  ;;  %v9756_v16 = vpack.c.bf16 %v5082_v37, %v5082_v37  ;;  %v9772_v23 = vpack.c.bf16 %v5083_v51, %v5083_v51 }
 0x31f   : > { %v9723_v53 = vpack.c.bf16 %v5012_v28, %v5012_v28  ;;  %v9739_v30 = vpack.c.bf16 %v5013_v11, %v5013_v11  ;;  %v9755_v59 = vpack.c.bf16 %v5014_v58, %v5014_v58  ;;  %v9771_v48 = vpack.c.bf16 %v5015_v9, %v5015_v9 }
 0x320   : > { %6159 = vst.msk [vmem:[%s12188_s20 + $0xc] sm:$0xf] %vm3379_vm1, %v9724_v24  ;;  %6175 = vst.msk [vmem:[%s12188_s20 + $0x4c] sm:$0xf] %vm3379_vm1, %v9740_v55  ;;  %v6712_v21 = vrot.slane %v6704_v61, %v11259_v54  ;;  %v6719_v0 = vrot.slane %v6705_v50, %v11259_v54  ;;  %v6644_v8 = vrot.slane %v6636_v38, %v11259_v54 }
 0x321   : > { %6191 = vst.msk [vmem:[%s12188_s20 + $0x8c] sm:$0xf] %vm3379_vm1, %v9756_v16  ;;  %6207 = vst.msk [vmem:[%s12188_s20 + $0xcc] sm:$0xf] %vm3379_vm1, %v9772_v23  ;;  %v13712_v62 = vcombine.high %v13711_v33, %v12137_v34  ;;  %v12225_v35 = vadd.f32 %v10159_v52, %v11613_v32  ;;  %v6720_v61 = vcombine.low %v12099_v22, %v12163_v25  ;;  %v12233_v33 = vpop.permute.xlu0 %3628 }
 0x322   : > { %6158 = vst.msk [vmem:[%s12188_s20 + $0x8] sm:$0xf] %vm3379_vm1, %v9723_v53  ;;  %6174 = vst.msk [vmem:[%s12188_s20 + $0x48] sm:$0xf] %vm3379_vm1, %v9739_v30  ;;  %v6721_v34 = vcombine.high %v12099_v22, %v12163_v25  ;;  %v6652_v50 = vcombine.low %v12101_v57, %v12165_v46  ;;  %v6653_v38 = vcombine.high %v12101_v57, %v12165_v46  ;;  %v13713_v57 = vld [vmem:[#allocation32_spill] sm:$0xff] }
 0x323   : > { %v6651_v26 = vrot.slane %v13712_v62, %v11259_v54  ;;  %6190 = vst.msk [vmem:[%s12188_s20 + $0x88] sm:$0xf] %vm3379_vm1, %v9755_v59  ;;  %6206 = vst.msk [vmem:[%s12188_s20 + $0xc8] sm:$0xf] %vm3379_vm1, %v9771_v48  ;;  %v12238_v48 = vadd.f32 %v10159_v52, %v11619_v17  ;;  %v12241_v32 = vadd.f32 %v10159_v52, %v11625_v14  ;;  %3608 = vrot.lane.b32.xlu0 %v12225_v35, %s10542_s10 }
 0x324   : > { %v12244_v15 = vadd.f32 %v10159_v52, %v11635_v7  ;;  %v6728_v10 = vrot.slane %v6720_v61, %v11259_v54  ;;  %v6735_v22 = vrot.slane %v6721_v34, %v11259_v54  ;;  %v6660_v25 = vrot.slane %v6652_v50, %v11259_v54  ;;  %v13714_v7 = vld [vmem:[#allocation31_spill] sm:$0xff]  ;;  %v12274_v61 = vpop.permute.xlu1 %3678 }
 0x325   : > { %v3792_v46 = vcombine.low %v13713_v57, %v12214_v47  ;;  %v6667_v17 = vrot.slane %v6653_v38, %v11259_v54  ;;  %v3793_v14 = vcombine.high %v13713_v57, %v12214_v47  ;;  %v3724_v27 = vcombine.low %v13714_v7, %v12233_v33  ;;  %3610 = vrot.lane.b32.xlu1 %v12241_v32, %s10542_s10  ;;  %v10160_v47 = vld [vmem:[#allocation15] ss:$0 sm:$0xff] }
 0x326   : > { %v6736_v19 = vcombine.low %v6712_v21, %v6728_v10  ;;  %v6737_v37 = vcombine.high %v6712_v21, %v6728_v10  ;;  %v6752_v51 = vcombine.low %v6719_v0, %v6735_v22  ;;  %v6753_v28 = vcombine.high %v6719_v0, %v6735_v22  ;;  %v12276_v22 = vpop.permute.xlu0 %3676 }
 0x327   : > { %v6668_v11 = vcombine.low %v6644_v8, %v6660_v25  ;;  %v6669_v58 = vcombine.high %v6644_v8, %v6660_v25  ;;  %v6684_v9 = vcombine.low %v6651_v26, %v6667_v17  ;;  %v6685_v24 = vcombine.high %v6651_v26, %v6667_v17  ;;  %3656 = vrot.lane.b32.xlu0 %v12225_v35, %s10543_s9 }
 0x328   : > { %v6744_v55 = vrot.slane %v6736_v19, %v11261_v56  ;;  %v6751_v16 = vrot.slane %v6737_v37, %v11261_v56  ;;  %v6760_v23 = vrot.slane %v6752_v51, %v11261_v56  ;;  %v6767_v53 = vrot.slane %v6753_v28, %v11261_v56 }
 0x329   : > { %v6676_v30 = vrot.slane %v6668_v11, %v11261_v56  ;;  %v6683_v59 = vrot.slane %v6669_v58, %v11261_v56  ;;  %v6692_v21 = vrot.slane %v6684_v9, %v11261_v56  ;;  %v6699_v0 = vrot.slane %v6685_v24, %v11261_v56  ;;  %3658 = vrot.lane.b32.xlu1 %v12241_v32, %s10543_s9 }
 0x32a   : > { %v7792_v8 = vcombine.low %v6744_v55, %v6751_v16  ;;  %v9555_v62 = vcombine.high %v6744_v55, %v6751_v16  ;;  %v7808_v26 = vcombine.low %v6760_v23, %v6767_v53  ;;  %v9556_v52 = vcombine.high %v6760_v23, %v6767_v53 }
 0x32b   : > { %v7724_v34 = vcombine.low %v6676_v30, %v6683_v59  ;;  %v9553_v50 = vcombine.high %v6676_v30, %v6683_v59  ;;  %v7740_v38 = vcombine.low %v6692_v21, %v6699_v0  ;;  %v9554_v10 = vcombine.high %v6692_v21, %v6699_v0  ;;  %3704 = vrot.lane.b32.xlu0 %v12225_v35, %s10544_s11 }
 0x32c   : > { %v7799_v25 = vrot.slane %v7792_v8, %v11259_v54  ;;  %v7807_v17 = vrot.slane %v9555_v62, %v11259_v54  ;;  %v7815_v19 = vrot.slane %v7808_v26, %v11259_v54  ;;  %v7823_v37 = vrot.slane %v9556_v52, %v11259_v54  ;;  %v12294_v26 = vpop.permute.xlu1 %6358 }
 0x32d   : > { %v7731_v51 = vrot.slane %v7724_v34, %v11259_v54  ;;  %v7739_v28 = vrot.slane %v9553_v50, %v11259_v54  ;;  %v7747_v11 = vrot.slane %v7740_v38, %v11259_v54  ;;  %v7755_v58 = vrot.slane %v9554_v10, %v11259_v54  ;;  %3706 = vrot.lane.b32.xlu1 %v12241_v32, %s10544_s11  ;;  %v12300_v10 = vpop.permute.xlu0 %6356 }
 0x32e   : > { %v7824_v9 = vcombine.low %v7799_v25, %v7807_v17  ;;  %v7825_v24 = vcombine.high %v7799_v25, %v7807_v17  ;;  %v7840_v55 = vcombine.low %v7815_v19, %v7823_v37  ;;  %v7841_v16 = vcombine.high %v7815_v19, %v7823_v37 }
 0x32f   : > { %v7756_v23 = vcombine.low %v7731_v51, %v7739_v28  ;;  %v7757_v53 = vcombine.high %v7731_v51, %v7739_v28  ;;  %v7772_v30 = vcombine.low %v7747_v11, %v7755_v58  ;;  %v7773_v59 = vcombine.high %v7747_v11, %v7755_v58 }
 0x330   : > { %v7832_v21 = vrot.slane %v7824_v9, %v11261_v56  ;;  %v7839_v0 = vrot.slane %v7825_v24, %v11261_v56  ;;  %v7848_v8 = vrot.slane %v7840_v55, %v11261_v56  ;;  %v7855_v62 = vrot.slane %v7841_v16, %v11261_v56 }
 0x331   : > { %v7764_v52 = vrot.slane %v7756_v23, %v11261_v56  ;;  %v7771_v34 = vrot.slane %v7757_v53, %v11261_v56  ;;  %v7780_v50 = vrot.slane %v7772_v30, %v11261_v56  ;;  %v7787_v38 = vrot.slane %v7773_v59, %v11261_v56 }
 0x332   : > { %v7856_v25 = vcombine.low %v7832_v21, %v7848_v8  ;;  %v7857_v17 = vcombine.high %v7832_v21, %v7848_v8  ;;  %v7858_v19 = vcombine.low %v7839_v0, %v7855_v62  ;;  %v7859_v37 = vcombine.high %v7839_v0, %v7855_v62 }
 0x333   : > { %v7788_v51 = vcombine.low %v7764_v52, %v7780_v50  ;;  %v7789_v28 = vcombine.high %v7764_v52, %v7780_v50  ;;  %v7790_v11 = vcombine.low %v7771_v34, %v7787_v38  ;;  %v7791_v58 = vcombine.high %v7771_v34, %v7787_v38  ;;  %v12329_v52 = vpop.permute.xlu1 %6406 }
 0x334   : > { %v9788_v9 = vpack.c.bf16 %v7856_v25, %v7856_v25  ;;  %v9804_v24 = vpack.c.bf16 %v7857_v17, %v7857_v17  ;;  %v9820_v55 = vpack.c.bf16 %v7858_v19, %v7858_v19  ;;  %v9836_v16 = vpack.c.bf16 %v7859_v37, %v7859_v37 }
 0x335   : > { %v9787_v23 = vpack.c.bf16 %v7788_v51, %v7788_v51  ;;  %v9803_v53 = vpack.c.bf16 %v7789_v28, %v7789_v28  ;;  %v9819_v30 = vpack.c.bf16 %v7790_v11, %v7790_v11  ;;  %v9835_v20 = vpack.c.bf16 %v7791_v58, %v7791_v58 }
 0x336   : > { %8935 = vst.msk [vmem:[%s12303_s19 + $0xc] sm:$0xf] %vm3379_vm1, %v9788_v9  ;;  %8951 = vst.msk [vmem:[%s12303_s19 + $0x4c] sm:$0xf] %vm3379_vm1, %v9804_v24  ;;  %v3800_v59 = vrot.slane %v3792_v46, %v11259_v54  ;;  %v3807_v21 = vrot.slane %v3793_v14, %v11259_v54  ;;  %v3732_v0 = vrot.slane %v3724_v27, %v11259_v54 }
 0x337   : > { %8967 = vst.msk [vmem:[%s12303_s19 + $0x8c] sm:$0xf] %vm3379_vm1, %v9820_v55  ;;  %8983 = vst.msk [vmem:[%s12303_s19 + $0xcc] sm:$0xf] %vm3379_vm1, %v9836_v16  ;;  %v13715_v8 = vcombine.high %v13714_v7, %v12233_v33  ;;  %v12340_v57 = vadd.f32 %v10160_v47, %v11723_v42  ;;  %v3808_v46 = vcombine.low %v12179_v60, %v12274_v61  ;;  %v12348_v7 = vpop.permute.xlu0 %6404 }
 0x338   : > { %8934 = vst.msk [vmem:[%s12303_s19 + $0x8] sm:$0xf] %vm3379_vm1, %v9787_v23  ;;  %8950 = vst.msk [vmem:[%s12303_s19 + $0x48] sm:$0xf] %vm3379_vm1, %v9803_v53  ;;  %v3809_v33 = vcombine.high %v12179_v60, %v12274_v61  ;;  %v3740_v14 = vcombine.low %v12185_v45, %v12276_v22  ;;  %v3741_v27 = vcombine.high %v12185_v45, %v12276_v22  ;;  %v13716_v45 = vld [vmem:[#allocation34_spill] sm:$0xff] }
 0x339   : > { %v3739_v62 = vrot.slane %v13715_v8, %v11259_v54  ;;  %8966 = vst.msk [vmem:[%s12303_s19 + $0x88] sm:$0xf] %vm3379_vm1, %v9819_v30  ;;  %8982 = vst.msk [vmem:[%s12303_s19 + $0xc8] sm:$0xf] %vm3379_vm1, %v9835_v20  ;;  %v12353_v20 = vadd.f32 %v10160_v47, %v11727_v29  ;;  %v12356_v42 = vadd.f32 %v10160_v47, %v11731_v1  ;;  %6384 = vrot.lane.b32.xlu0 %v12340_v57, %s10542_s10 }
 0x33a   : > { %v12359_v34 = vadd.f32 %v10160_v47, %v11749_v49  ;;  %v3816_v50 = vrot.slane %v3808_v46, %v11259_v54  ;;  %v3823_v60 = vrot.slane %v3809_v33, %v11259_v54  ;;  %v3748_v61 = vrot.slane %v3740_v14, %v11259_v54  ;;  %v13717_v49 = vld [vmem:[#allocation33_spill] sm:$0xff] }
 0x33b   : > { %v6568_v22 = vcombine.low %v13716_v45, %v12329_v52  ;;  %v3755_v29 = vrot.slane %v3741_v27, %v11259_v54  ;;  %v6569_v1 = vcombine.high %v13716_v45, %v12329_v52  ;;  %v6500_v38 = vcombine.low %v13717_v49, %v12348_v7  ;;  %6386 = vrot.lane.b32.xlu1 %v12356_v42, %s10542_s10  ;;  %v12389_v8 = vpop.permute.xlu0 %6452 }
 0x33c   : > { %v6501_v25 = vcombine.high %v13717_v49, %v12348_v7  ;;  %v3824_v17 = vcombine.low %v3800_v59, %v3816_v50  ;;  %v3825_v19 = vcombine.high %v3800_v59, %v3816_v50  ;;  %v3840_v37 = vcombine.low %v3807_v21, %v3823_v60 }
 0x33d   : > { %v3841_v51 = vcombine.high %v3807_v21, %v3823_v60  ;;  %v3756_v28 = vcombine.low %v3732_v0, %v3748_v61  ;;  %v3757_v11 = vcombine.high %v3732_v0, %v3748_v61  ;;  %v3772_v58 = vcombine.low %v3739_v62, %v3755_v29  ;;  %6432 = vrot.lane.b32.xlu0 %v12340_v57, %s10543_s9  ;;  %v12387_v0 = vpop.permute.xlu1 %6454 }
 0x33e   : > { %v3773_v9 = vcombine.high %v3739_v62, %v3755_v29  ;;  %v3832_v24 = vrot.slane %v3824_v17, %v11261_v56  ;;  %v3839_v55 = vrot.slane %v3825_v19, %v11261_v56  ;;  %v3848_v16 = vrot.slane %v3840_v37, %v11261_v56 }
 0x33f   : > { %v3855_v23 = vrot.slane %v3841_v51, %v11261_v56  ;;  %v3764_v53 = vrot.slane %v3756_v28, %v11261_v56  ;;  %v3771_v30 = vrot.slane %v3757_v11, %v11261_v56  ;;  %v3780_v59 = vrot.slane %v3772_v58, %v11261_v56  ;;  %6434 = vrot.lane.b32.xlu1 %v12356_v42, %s10543_s9 }
 0x340   : > { %v3787_v21 = vrot.slane %v3773_v9, %v11261_v56  ;;  %v4880_v62 = vcombine.low %v3832_v24, %v3839_v55  ;;  %v9444_v47 = vcombine.high %v3832_v24, %v3839_v55  ;;  %v6584_v52 = vcombine.low %v12294_v26, %v12387_v0 }
 0x341   : > { %v4896_v46 = vcombine.low %v3848_v16, %v3855_v23  ;;  %v9445_v33 = vcombine.high %v3848_v16, %v3855_v23  ;;  %v4812_v14 = vcombine.low %v3764_v53, %v3771_v30  ;;  %v9442_v27 = vcombine.high %v3764_v53, %v3771_v30  ;;  %3604 = vrot.lane.b32.xlu0 %v12238_v48, %s10542_s10 }
 0x342   : > { %v4828_v50 = vcombine.low %v3780_v59, %v3787_v21  ;;  %v9443_v60 = vcombine.high %v3780_v59, %v3787_v21  ;;  %v4887_v61 = vrot.slane %v4880_v62, %v11259_v54  ;;  %v4895_v29 = vrot.slane %v9444_v47, %v11259_v54  ;;  %v12405_v59 = vpop.permute.xlu1 %3594  ;;  %v12407_v21 = vpop.permute.xlu0 %3592 }
 0x343   : > { %v4903_v17 = vrot.slane %v4896_v46, %v11259_v54  ;;  %v4911_v19 = vrot.slane %v9445_v33, %v11259_v54  ;;  %v4819_v37 = vrot.slane %v4812_v14, %v11259_v54  ;;  %v4827_v51 = vrot.slane %v9442_v27, %v11259_v54  ;;  %3606 = vrot.lane.b32.xlu1 %v12244_v15, %s10542_s10 }
 0x344   : > { %v4835_v28 = vrot.slane %v4828_v50, %v11259_v54  ;;  %v4843_v11 = vrot.slane %v9443_v60, %v11259_v54  ;;  %v4912_v58 = vcombine.low %v4887_v61, %v4895_v29  ;;  %v4913_v9 = vcombine.high %v4887_v61, %v4895_v29 }
 0x345   : > { %v4928_v24 = vcombine.low %v4903_v17, %v4911_v19  ;;  %v4929_v55 = vcombine.high %v4903_v17, %v4911_v19  ;;  %v4844_v16 = vcombine.low %v4819_v37, %v4827_v51  ;;  %v4845_v23 = vcombine.high %v4819_v37, %v4827_v51  ;;  %3652 = vrot.lane.b32.xlu0 %v12238_v48, %s10543_s9 }
 0x346   : > { %v4860_v53 = vcombine.low %v4835_v28, %v4843_v11  ;;  %v4861_v30 = vcombine.high %v4835_v28, %v4843_v11  ;;  %v4920_v62 = vrot.slane %v4912_v58, %v11261_v56  ;;  %v4927_v47 = vrot.slane %v4913_v9, %v11261_v56 }
 0x347   : > { %v4936_v46 = vrot.slane %v4928_v24, %v11261_v56  ;;  %v4943_v33 = vrot.slane %v4929_v55, %v11261_v56  ;;  %v4852_v14 = vrot.slane %v4844_v16, %v11261_v56  ;;  %v4859_v27 = vrot.slane %v4845_v23, %v11261_v56  ;;  %3654 = vrot.lane.b32.xlu1 %v12244_v15, %s10543_s9 }
 0x348   : > { %v4868_v50 = vrot.slane %v4860_v53, %v11261_v56  ;;  %v4875_v60 = vrot.slane %v4861_v30, %v11261_v56  ;;  %v6585_v45 = vcombine.high %v12294_v26, %v12387_v0  ;;  %v6517_v7 = vcombine.high %v12300_v10, %v12389_v8 }
 0x349   : > { %v4944_v61 = vcombine.low %v4920_v62, %v4936_v46  ;;  %v4945_v29 = vcombine.high %v4920_v62, %v4936_v46  ;;  %v4946_v17 = vcombine.low %v4927_v47, %v4943_v33  ;;  %v4947_v19 = vcombine.high %v4927_v47, %v4943_v33  ;;  %3700 = vrot.lane.b32.xlu0 %v12238_v48, %s10544_s11  ;;  %v3643_v62 = vpop.permute.xlu1 %3642  ;;  %v3641_v47 = vpop.permute.xlu0 %3640 }
 0x34a   : > { %v4876_v37 = vcombine.low %v4852_v14, %v4868_v50  ;;  %v4877_v51 = vcombine.high %v4852_v14, %v4868_v50  ;;  %v4878_v28 = vcombine.low %v4859_v27, %v4875_v60  ;;  %v4879_v11 = vcombine.high %v4859_v27, %v4875_v60 }
 0x34b   : > { %v9722_v58 = vpack.c.bf16 %v4944_v61, %v4944_v61  ;;  %v9738_v9 = vpack.c.bf16 %v4945_v29, %v4945_v29  ;;  %v9754_v24 = vpack.c.bf16 %v4946_v17, %v4946_v17  ;;  %v9770_v55 = vpack.c.bf16 %v4947_v19, %v4947_v19  ;;  %3702 = vrot.lane.b32.xlu1 %v12244_v15, %s10544_s11 }
 0x34c   : > { %v9721_v16 = vpack.c.bf16 %v4876_v37, %v4876_v37  ;;  %v9737_v23 = vpack.c.bf16 %v4877_v51, %v4877_v51  ;;  %v9753_v53 = vpack.c.bf16 %v4878_v28, %v4878_v28  ;;  %v9769_v30 = vpack.c.bf16 %v4879_v11, %v4879_v11 }
 0x34d   : > { %6157 = vst.msk [vmem:[%s12188_s20 + $0x4] sm:$0xf] %vm3379_vm1, %v9722_v58  ;;  %6173 = vst.msk [vmem:[%s12188_s20 + $0x44] sm:$0xf] %vm3379_vm1, %v9738_v9  ;;  %v6576_v46 = vrot.slane %v6568_v22, %v11259_v54  ;;  %v6583_v33 = vrot.slane %v6569_v1, %v11259_v54  ;;  %v6508_v14 = vrot.slane %v6500_v38, %v11259_v54  ;;  %6380 = vrot.lane.b32.xlu0 %v12353_v20, %s10542_s10 }
 0x34e   : > { %6189 = vst.msk [vmem:[%s12188_s20 + $0x84] sm:$0xf] %vm3379_vm1, %v9754_v24  ;;  %6205 = vst.msk [vmem:[%s12188_s20 + $0xc4] sm:$0xf] %vm3379_vm1, %v9770_v55  ;;  %v6515_v27 = vrot.slane %v6501_v25, %v11259_v54  ;;  %v6516_v22 = vcombine.low %v12300_v10, %v12389_v8  ;;  %v4200_v1 = vcombine.low %v11284_v2, %v3643_v62 }
 0x34f   : > { %6156 = vst.msk [vmem:[%s12188_s20] sm:$0xf] %vm3379_vm1, %v9721_v16  ;;  %6172 = vst.msk [vmem:[%s12188_s20 + $0x40] sm:$0xf] %vm3379_vm1, %v9737_v23  ;;  %v4201_v49 = vcombine.high %v11284_v2, %v3643_v62  ;;  %v4132_v38 = vcombine.low %v11276_v3, %v3641_v47  ;;  %v4133_v25 = vcombine.high %v11276_v3, %v3641_v47  ;;  %6382 = vrot.lane.b32.xlu1 %v12359_v34, %s10542_s10  ;;  %v12495_v16 = vpop.permute.xlu1 %3690  ;;  %v12497_v23 = vpop.permute.xlu0 %3688  ;;  %s13044_s10 = scalar_lea.hbm %s13718_s16, %s13030_s29 }
 0x350   : > { %6188 = vst.msk [vmem:[%s12188_s20 + $0x80] sm:$0xf] %vm3379_vm1, %v9753_v53  ;;  %6204 = vst.msk [vmem:[%s12188_s20 + $0xc0] sm:$0xf] %vm3379_vm1, %v9769_v30  ;;  %v6592_v50 = vrot.slane %v6584_v52, %v11259_v54  ;;  %v6599_v26 = vrot.slane %v6585_v45, %v11259_v54  ;;  %v6524_v0 = vrot.slane %v6516_v22, %v11259_v54 }
 0x351   : > { %v6531_v60 = vrot.slane %v6517_v7, %v11259_v54  ;;  %v12478_v2 = vrot.slane %v4200_v1, %v11259_v54  ;;  %v12481_v10 = vrot.slane %v4201_v49, %v11259_v54  ;;  %v12484_v3 = vrot.slane %v4132_v38, %v11259_v54  ;;  %6428 = vrot.lane.b32.xlu0 %v12353_v20, %s10543_s9 }
 0x352   : > { %v12487_v8 = vrot.slane %v4133_v25, %v11259_v54  ;;  %v6600_v61 = vcombine.low %v6576_v46, %v6592_v50  ;;  %v6601_v29 = vcombine.high %v6576_v46, %v6592_v50  ;;  %v6616_v17 = vcombine.low %v6583_v33, %v6599_v26 }
 0x353   : > { %v6617_v19 = vcombine.high %v6583_v33, %v6599_v26  ;;  %v6532_v37 = vcombine.low %v6508_v14, %v6524_v0  ;;  %v6533_v51 = vcombine.high %v6508_v14, %v6524_v0  ;;  %v6548_v28 = vcombine.low %v6515_v27, %v6531_v60  ;;  %6430 = vrot.lane.b32.xlu1 %v12359_v34, %s10543_s9  ;;  %s9022_s9 = sshll.u32 %s11421_s23, 4  ;;  %s10547_s23 = smov [#allocation16]   ;;  %s13051_s9 = int_to_ptr.vmem [resolvable:$true] %s9022_s9 }
 0x354   : > { %v6549_v11 = vcombine.high %v6515_v27, %v6531_v60  ;;  %v6608_v58 = vrot.slane %v6600_v61, %v11261_v56  ;;  %v6615_v9 = vrot.slane %v6601_v29, %v11261_v56  ;;  %v6624_v24 = vrot.slane %v6616_v17, %v11261_v56  ;;  %s10372_s26 = scalar_lea.vmem %s13051_s9, 4096  ;;  %s10376_s22 = sshll.u32 %s10547_s23, 4  ;;  %s10377_s22 = int_to_ptr.vmem [resolvable:$false] %s10376_s22 }
 0x355   : > { %v6631_v55 = vrot.slane %v6617_v19, %v11261_v56  ;;  %v6540_v53 = vrot.slane %v6532_v37, %v11261_v56  ;;  %v6547_v30 = vrot.slane %v6533_v51, %v11261_v56  ;;  %v6556_v62 = vrot.slane %v6548_v28, %v11261_v56  ;;  %6472 = vrot.lane.b32.xlu0 %v11334_v44, %s10544_s11  ;;  %v12517_v37 = vpop.permute.xlu1 %6370  ;;  %v12519_v51 = vpop.permute.xlu0 %6368  ;;  %p10373_p6 = scmp.ne.s32.totalorder %s13051_s9, %s10372_s26  ;;  %s10378_s30 = scalar_lea.vmem %s10377_s22, 8192 }
 0x356   : > { %v6563_v47 = vrot.slane %v6549_v11, %v11261_v56  ;;  %v7656_v46 = vcombine.low %v6608_v58, %v6615_v9  ;;  %v9551_v33 = vcombine.high %v6608_v58, %v6615_v9  ;;  %p10379_p11 = scmp.lt.s32.totalorder %s13051_s9, %s10377_s22  ;;  %p10380_p9 = scmp.lt.s32.totalorder %s10378_s30, %s10372_s26 }
 0x357   : > { %v7672_v14 = vcombine.low %v6624_v24, %v6631_v55  ;;  %v9552_v27 = vcombine.high %v6624_v24, %v6631_v55  ;;  %v7588_v52 = vcombine.low %v6540_v53, %v6547_v30  ;;  %v9549_v45 = vcombine.high %v6540_v53, %v6547_v30  ;;  %6478 = vrot.lane.b32.xlu1 %v12359_v34, %s10544_s11  ;;  %p10374_p1 = pnand %p10373_p6, %p13720_p4 }
 0x358   : > { %v7604_v22 = vcombine.low %v6556_v62, %v6563_v47  ;;  %v9550_v7 = vcombine.high %v6556_v62, %v6563_v47  ;;  %v7663_v1 = vrot.slane %v7656_v46, %v11259_v54  ;;  %v7671_v49 = vrot.slane %v9551_v33, %v11259_v54  ;;  %p10381_p10 = por %p10380_p9, %p10379_p11 }
 0x359   : > { %v7679_v38 = vrot.slane %v7672_v14, %v11259_v54  ;;  %v7687_v25 = vrot.slane %v9552_v27, %v11259_v54  ;;  %v7595_v50 = vrot.slane %v7588_v52, %v11259_v54  ;;  %v7603_v26 = vrot.slane %v9549_v45, %v11259_v54  ;;  %6476 = vrot.lane.b32.xlu0 %v12353_v20, %s10544_s11  ;;  %p10375_p3 = pneg %p10374_p1 }
 0x35a   : > { %v7611_v0 = vrot.slane %v7604_v22, %v11259_v54  ;;  %v7619_v60 = vrot.slane %v9550_v7, %v11259_v54  ;;  %v7688_v61 = vcombine.low %v7663_v1, %v7671_v49  ;;  %v7689_v29 = vcombine.high %v7663_v1, %v7671_v49 }
 0x35b   : > { %v7704_v17 = vcombine.low %v7679_v38, %v7687_v25  ;;  %v7705_v19 = vcombine.high %v7679_v38, %v7687_v25  ;;  %v7620_v28 = vcombine.low %v7595_v50, %v7603_v26  ;;  %v7621_v11 = vcombine.high %v7595_v50, %v7603_v26  ;;  %6482 = vrot.lane.b32.xlu1 %v12356_v42, %s10544_s11  ;;  %p10382_p12 = pnand %p10381_p10, %p10375_p3 }
 0x35c   : > { %v7636_v58 = vcombine.low %v7611_v0, %v7619_v60  ;;  %v7637_v9 = vcombine.high %v7611_v0, %v7619_v60  ;;  %v7696_v24 = vrot.slane %v7688_v61, %v11261_v56  ;;  %v7703_v55 = vrot.slane %v7689_v29, %v11261_v56  ;;  %v6419_v0 = vpop.permute.xlu1 %6418  ;;  %v6417_v60 = vpop.permute.xlu0 %6416 }
 0x35d   : > { %v7712_v53 = vrot.slane %v7704_v17, %v11261_v56  ;;  %v7719_v30 = vrot.slane %v7705_v19, %v11261_v56  ;;  %v7628_v62 = vrot.slane %v7620_v28, %v11261_v56  ;;  %v7635_v47 = vrot.slane %v7621_v11, %v11261_v56  ;;  %6480 = vrot.lane.b32.xlu0 %v12340_v57, %s10544_s11 }
 0x35e   : > { %v7644_v46 = vrot.slane %v7636_v58, %v11261_v56  ;;  %v7651_v33 = vrot.slane %v7637_v9, %v11261_v56  ;;  %v4216_v28 = vcombine.low %v12405_v59, %v12495_v16  ;;  %v4217_v11 = vcombine.high %v12405_v59, %v12495_v16 }
 0x35f   : > { %v7720_v14 = vcombine.low %v7696_v24, %v7712_v53  ;;  %v7721_v27 = vcombine.high %v7696_v24, %v7712_v53  ;;  %v7722_v52 = vcombine.low %v7703_v55, %v7719_v30  ;;  %v7723_v45 = vcombine.high %v7703_v55, %v7719_v30 }
 0x360   : > { %v7652_v22 = vcombine.low %v7628_v62, %v7644_v46  ;;  %v7653_v7 = vcombine.high %v7628_v62, %v7644_v46  ;;  %v7654_v1 = vcombine.low %v7635_v47, %v7651_v33  ;;  %v7655_v49 = vcombine.high %v7635_v47, %v7651_v33 }
 0x361   : > { %v9786_v38 = vpack.c.bf16 %v7720_v14, %v7720_v14  ;;  %v9802_v25 = vpack.c.bf16 %v7721_v27, %v7721_v27  ;;  %v9818_v50 = vpack.c.bf16 %v7722_v52, %v7722_v52  ;;  %v9834_v26 = vpack.c.bf16 %v7723_v45, %v7723_v45 }
 0x362   : > { %v9785_v61 = vpack.c.bf16 %v7652_v22, %v7652_v22  ;;  %v9801_v29 = vpack.c.bf16 %v7653_v7, %v7653_v7  ;;  %v9817_v17 = vpack.c.bf16 %v7654_v1, %v7654_v1  ;;  %v9833_v19 = vpack.c.bf16 %v7655_v49, %v7655_v49  ;;  %v12587_v1 = vpop.permute.xlu1 %6466  ;;  %v12589_v49 = vpop.permute.xlu0 %6464 }
 0x363   : > { %8933 = vst.msk [vmem:[%s12303_s19 + $0x4] sm:$0xf] %vm3379_vm1, %v9786_v38  ;;  %8949 = vst.msk [vmem:[%s12303_s19 + $0x44] sm:$0xf] %vm3379_vm1, %v9802_v25  ;;  %v4148_v58 = vcombine.low %v12407_v21, %v12497_v23  ;;  %v4149_v9 = vcombine.high %v12407_v21, %v12497_v23  ;;  %v6976_v24 = vcombine.low %v11305_v13, %v6419_v0 }
 0x364   : > { %8965 = vst.msk [vmem:[%s12303_s19 + $0x84] sm:$0xf] %vm3379_vm1, %v9818_v50  ;;  %8981 = vst.msk [vmem:[%s12303_s19 + $0xc4] sm:$0xf] %vm3379_vm1, %v9834_v26  ;;  %v6977_v55 = vcombine.high %v11305_v13, %v6419_v0  ;;  %v6908_v59 = vcombine.low %v11292_v6, %v6417_v60  ;;  %v6909_v16 = vcombine.high %v11292_v6, %v6417_v60 }
 0x365   : > { %8932 = vst.msk [vmem:[%s12303_s19] sm:$0xf] %vm3379_vm1, %v9785_v61  ;;  %8948 = vst.msk [vmem:[%s12303_s19 + $0x40] sm:$0xf] %vm3379_vm1, %v9801_v29  ;;  %v4224_v53 = vrot.slane %v4216_v28, %v11259_v54  ;;  %v4231_v21 = vrot.slane %v4217_v11, %v11259_v54  ;;  %v4156_v23 = vrot.slane %v4148_v58, %v11259_v54 }
 0x366   : > { %8964 = vst.msk [vmem:[%s12303_s19 + $0x80] sm:$0xf] %vm3379_vm1, %v9817_v17  ;;  %8980 = vst.msk [vmem:[%s12303_s19 + $0xc0] sm:$0xf] %vm3379_vm1, %v9833_v19  ;;  %v4163_v30 = vrot.slane %v4149_v9, %v11259_v54  ;;  %v12568_v62 = vrot.slane %v6976_v24, %v11259_v54  ;;  %v12571_v47 = vrot.slane %v6977_v55, %v11259_v54 }
 0x367   : > { %v12574_v13 = vrot.slane %v6908_v59, %v11259_v54  ;;  %v12577_v46 = vrot.slane %v6909_v16, %v11259_v54  ;;  %v4232_v6 = vcombine.low %v12478_v2, %v4224_v53  ;;  %v4233_v33 = vcombine.high %v12478_v2, %v4224_v53 }
 0x368   : > { %v4248_v14 = vcombine.low %v12481_v10, %v4231_v21  ;;  %v4249_v27 = vcombine.high %v12481_v10, %v4231_v21  ;;  %v4164_v52 = vcombine.low %v12484_v3, %v4156_v23  ;;  %v4165_v45 = vcombine.high %v12484_v3, %v4156_v23  ;;  %v12607_v23 = vpop.permute.xlu1 %3590 }
 0x369   : > { %v4180_v22 = vcombine.low %v12487_v8, %v4163_v30  ;;  %v4181_v7 = vcombine.high %v12487_v8, %v4163_v30  ;;  %v4240_v38 = vrot.slane %v4232_v6, %v11261_v56  ;;  %v4247_v2 = vrot.slane %v4233_v33, %v11261_v56  ;;  %v12609_v30 = vpop.permute.xlu0 %3588 }
 0x36a   : > { %v4256_v25 = vrot.slane %v4248_v14, %v11261_v56  ;;  %v4263_v10 = vrot.slane %v4249_v27, %v11261_v56  ;;  %v4172_v50 = vrot.slane %v4164_v52, %v11261_v56  ;;  %v4179_v3 = vrot.slane %v4165_v45, %v11261_v56 }
 0x36b   : > { %v4188_v26 = vrot.slane %v4180_v22, %v11261_v56  ;;  %v4195_v8 = vrot.slane %v4181_v7, %v11261_v56  ;;  %v5288_v0 = vcombine.low %v4240_v38, %v4247_v2  ;;  %v9456_v60 = vcombine.high %v4240_v38, %v4247_v2 }
 0x36c   : > { %v5304_v61 = vcombine.low %v4256_v25, %v4263_v10  ;;  %v9457_v29 = vcombine.high %v4256_v25, %v4263_v10  ;;  %v5220_v17 = vcombine.low %v4172_v50, %v4179_v3  ;;  %v9454_v19 = vcombine.high %v4172_v50, %v4179_v3 }
 0x36d   : > { %v5236_v28 = vcombine.low %v4188_v26, %v4195_v8  ;;  %v9455_v11 = vcombine.high %v4188_v26, %v4195_v8  ;;  %v5295_v58 = vrot.slane %v5288_v0, %v11259_v54  ;;  %v5303_v9 = vrot.slane %v9456_v60, %v11259_v54 }
 0x36e   : > { %v5311_v24 = vrot.slane %v5304_v61, %v11259_v54  ;;  %v5319_v55 = vrot.slane %v9457_v29, %v11259_v54  ;;  %v5227_v59 = vrot.slane %v5220_v17, %v11259_v54  ;;  %v5235_v16 = vrot.slane %v9454_v19, %v11259_v54 }
 0x36f   : > { %v5243_v53 = vrot.slane %v5236_v28, %v11259_v54  ;;  %v5251_v21 = vrot.slane %v9455_v11, %v11259_v54  ;;  %v5320_v6 = vcombine.low %v5295_v58, %v5303_v9  ;;  %v5321_v33 = vcombine.high %v5295_v58, %v5303_v9  ;;  %v3639_v58 = vpop.permute.xlu1 %3638  ;;  %v3637_v9 = vpop.permute.xlu0 %3636 }
 0x370   : > { %v5336_v14 = vcombine.low %v5311_v24, %v5319_v55  ;;  %v5337_v27 = vcombine.high %v5311_v24, %v5319_v55  ;;  %v5252_v52 = vcombine.low %v5227_v59, %v5235_v16  ;;  %v5253_v45 = vcombine.high %v5227_v59, %v5235_v16 }
 0x371   : > { %v5268_v22 = vcombine.low %v5243_v53, %v5251_v21  ;;  %v5269_v7 = vcombine.high %v5243_v53, %v5251_v21  ;;  %v5328_v38 = vrot.slane %v5320_v6, %v11261_v56  ;;  %v5335_v2 = vrot.slane %v5321_v33, %v11261_v56 }
 0x372   : > { %v5344_v25 = vrot.slane %v5336_v14, %v11261_v56  ;;  %v5351_v10 = vrot.slane %v5337_v27, %v11261_v56  ;;  %v5260_v50 = vrot.slane %v5252_v52, %v11261_v56  ;;  %v5267_v3 = vrot.slane %v5253_v45, %v11261_v56 }
 0x373   : > { %v5276_v26 = vrot.slane %v5268_v22, %v11261_v56  ;;  %v5283_v8 = vrot.slane %v5269_v7, %v11261_v56  ;;  %v6992_v14 = vcombine.low %v12517_v37, %v12587_v1  ;;  %v6993_v27 = vcombine.high %v12517_v37, %v12587_v1 }
 0x374   : > { %v5352_v0 = vcombine.low %v5328_v38, %v5344_v25  ;;  %v5353_v60 = vcombine.high %v5328_v38, %v5344_v25  ;;  %v5354_v61 = vcombine.low %v5335_v2, %v5351_v10  ;;  %v5355_v29 = vcombine.high %v5335_v2, %v5351_v10 }
 0x375   : > { %v5284_v17 = vcombine.low %v5260_v50, %v5276_v26  ;;  %v5285_v19 = vcombine.high %v5260_v50, %v5276_v26  ;;  %v5286_v28 = vcombine.low %v5267_v3, %v5283_v8  ;;  %v5287_v11 = vcombine.high %v5267_v3, %v5283_v8  ;;  %v12665_v3 = vpop.permute.xlu0 %3684 }
 0x376   : > { %v9728_v24 = vpack.c.bf16 %v5352_v0, %v5352_v0  ;;  %v9744_v55 = vpack.c.bf16 %v5353_v60, %v5353_v60  ;;  %v9760_v59 = vpack.c.bf16 %v5354_v61, %v5354_v61  ;;  %v9776_v16 = vpack.c.bf16 %v5355_v29, %v5355_v29 }
 0x377   : > { %v9727_v53 = vpack.c.bf16 %v5284_v17, %v5284_v17  ;;  %v9743_v21 = vpack.c.bf16 %v5285_v19, %v5285_v19  ;;  %v9759_v6 = vpack.c.bf16 %v5286_v28, %v5286_v28  ;;  %v9775_v33 = vpack.c.bf16 %v5287_v11, %v5287_v11 }
 0x378   : > { %6163 = vst.msk [vmem:[%s12188_s20 + $0x1c] sm:$0xf] %vm3379_vm1, %v9728_v24  ;;  %6179 = vst.msk [vmem:[%s12188_s20 + $0x5c] sm:$0xf] %vm3379_vm1, %v9744_v55  ;;  %v6924_v52 = vcombine.low %v12519_v51, %v12589_v49  ;;  %v6925_v45 = vcombine.high %v12519_v51, %v12589_v49  ;;  %v4064_v22 = vcombine.low %v11288_v5, %v3639_v58 }
 0x379   : > { %6195 = vst.msk [vmem:[%s12188_s20 + $0x9c] sm:$0xf] %vm3379_vm1, %v9760_v59  ;;  %6211 = vst.msk [vmem:[%s12188_s20 + $0xdc] sm:$0xf] %vm3379_vm1, %v9776_v16  ;;  %v4065_v7 = vcombine.high %v11288_v5, %v3639_v58  ;;  %v3996_v37 = vcombine.low %v11280_v4, %v3637_v9  ;;  %v3997_v1 = vcombine.high %v11280_v4, %v3637_v9  ;;  %v12663_v4 = vpop.permute.xlu1 %3686 }
 0x37a   : > { %6162 = vst.msk [vmem:[%s12188_s20 + $0x18] sm:$0xf] %vm3379_vm1, %v9727_v53  ;;  %6178 = vst.msk [vmem:[%s12188_s20 + $0x58] sm:$0xf] %vm3379_vm1, %v9743_v21  ;;  %v7000_v38 = vrot.slane %v6992_v14, %v11259_v54  ;;  %v7007_v51 = vrot.slane %v6993_v27, %v11259_v54  ;;  %v6932_v49 = vrot.slane %v6924_v52, %v11259_v54  ;;  %v12685_v27 = vpop.permute.xlu0 %6364 }
 0x37b   : > { %6194 = vst.msk [vmem:[%s12188_s20 + $0x98] sm:$0xf] %vm3379_vm1, %v9759_v6  ;;  %6210 = vst.msk [vmem:[%s12188_s20 + $0xd8] sm:$0xf] %vm3379_vm1, %v9775_v33  ;;  %v6939_v2 = vrot.slane %v6925_v45, %v11259_v54  ;;  %v12652_v25 = vrot.slane %v4064_v22, %v11259_v54  ;;  %v12655_v10 = vrot.slane %v4065_v7, %v11259_v54 }
 0x37c   : > { %v12658_v5 = vrot.slane %v3996_v37, %v11259_v54  ;;  %v12661_v50 = vrot.slane %v3997_v1, %v11259_v54  ;;  %v7008_v26 = vcombine.low %v12568_v62, %v7000_v38  ;;  %v7009_v8 = vcombine.high %v12568_v62, %v7000_v38 }
 0x37d   : > { %v7024_v0 = vcombine.low %v12571_v47, %v7007_v51  ;;  %v7025_v60 = vcombine.high %v12571_v47, %v7007_v51  ;;  %v6940_v61 = vcombine.low %v12574_v13, %v6932_v49  ;;  %v6941_v29 = vcombine.high %v12574_v13, %v6932_v49  ;;  %v12683_v14 = vpop.permute.xlu1 %6366 }
 0x37e   : > { %v6956_v17 = vcombine.low %v12577_v46, %v6939_v2  ;;  %v6957_v19 = vcombine.high %v12577_v46, %v6939_v2  ;;  %v7016_v28 = vrot.slane %v7008_v26, %v11261_v56  ;;  %v7023_v11 = vrot.slane %v7009_v8, %v11261_v56 }
 0x37f   : > { %v7032_v58 = vrot.slane %v7024_v0, %v11261_v56  ;;  %v7039_v62 = vrot.slane %v7025_v60, %v11261_v56  ;;  %v6948_v9 = vrot.slane %v6940_v61, %v11261_v56  ;;  %v6955_v47 = vrot.slane %v6941_v29, %v11261_v56 }
 0x380   : > { %v6964_v24 = vrot.slane %v6956_v17, %v11261_v56  ;;  %v6971_v13 = vrot.slane %v6957_v19, %v11261_v56  ;;  %v8064_v55 = vcombine.low %v7016_v28, %v7023_v11  ;;  %v9563_v59 = vcombine.high %v7016_v28, %v7023_v11 }
 0x381   : > { %v8080_v16 = vcombine.low %v7032_v58, %v7039_v62  ;;  %v9564_v46 = vcombine.high %v7032_v58, %v7039_v62  ;;  %v7996_v53 = vcombine.low %v6948_v9, %v6955_v47  ;;  %v9561_v21 = vcombine.high %v6948_v9, %v6955_v47 }
 0x382   : > { %v8012_v6 = vcombine.low %v6964_v24, %v6971_v13  ;;  %v9562_v33 = vcombine.high %v6964_v24, %v6971_v13  ;;  %v8071_v52 = vrot.slane %v8064_v55, %v11259_v54  ;;  %v8079_v45 = vrot.slane %v9563_v59, %v11259_v54  ;;  %v6415_v24 = vpop.permute.xlu1 %6414  ;;  %v6413_v13 = vpop.permute.xlu0 %6412 }
 0x383   : > { %v8087_v22 = vrot.slane %v8080_v16, %v11259_v54  ;;  %v8095_v7 = vrot.slane %v9564_v46, %v11259_v54  ;;  %v8003_v37 = vrot.slane %v7996_v53, %v11259_v54  ;;  %v8011_v1 = vrot.slane %v9561_v21, %v11259_v54 }
 0x384   : > { %v8019_v38 = vrot.slane %v8012_v6, %v11259_v54  ;;  %v8027_v51 = vrot.slane %v9562_v33, %v11259_v54  ;;  %v8096_v49 = vcombine.low %v8071_v52, %v8079_v45  ;;  %v8097_v2 = vcombine.high %v8071_v52, %v8079_v45 }
 0x385   : > { %v8112_v26 = vcombine.low %v8087_v22, %v8095_v7  ;;  %v8113_v8 = vcombine.high %v8087_v22, %v8095_v7  ;;  %v8028_v0 = vcombine.low %v8003_v37, %v8011_v1  ;;  %v8029_v60 = vcombine.high %v8003_v37, %v8011_v1 }
 0x386   : > { %v8044_v61 = vcombine.low %v8019_v38, %v8027_v51  ;;  %v8045_v29 = vcombine.high %v8019_v38, %v8027_v51  ;;  %v8104_v17 = vrot.slane %v8096_v49, %v11261_v56  ;;  %v8111_v19 = vrot.slane %v8097_v2, %v11261_v56 }
 0x387   : > { %v8120_v28 = vrot.slane %v8112_v26, %v11261_v56  ;;  %v8127_v11 = vrot.slane %v8113_v8, %v11261_v56  ;;  %v8036_v58 = vrot.slane %v8028_v0, %v11261_v56  ;;  %v8043_v62 = vrot.slane %v8029_v60, %v11261_v56 }
 0x388   : > { %v8052_v9 = vrot.slane %v8044_v61, %v11261_v56  ;;  %v8059_v47 = vrot.slane %v8045_v29, %v11261_v56  ;;  %v4080_v49 = vcombine.low %v12607_v23, %v12663_v4  ;;  %v4081_v2 = vcombine.high %v12607_v23, %v12663_v4  ;;  %v12731_v61 = vpop.permute.xlu1 %6462  ;;  %v12733_v29 = vpop.permute.xlu0 %6460 }
 0x389   : > { %v8128_v55 = vcombine.low %v8104_v17, %v8120_v28  ;;  %v8129_v59 = vcombine.high %v8104_v17, %v8120_v28  ;;  %v8130_v16 = vcombine.low %v8111_v19, %v8127_v11  ;;  %v8131_v46 = vcombine.high %v8111_v19, %v8127_v11 }
 0x38a   : > { %v8060_v53 = vcombine.low %v8036_v58, %v8052_v9  ;;  %v8061_v21 = vcombine.high %v8036_v58, %v8052_v9  ;;  %v8062_v6 = vcombine.low %v8043_v62, %v8059_v47  ;;  %v8063_v33 = vcombine.high %v8043_v62, %v8059_v47 }
 0x38b   : > { %v9792_v52 = vpack.c.bf16 %v8128_v55, %v8128_v55  ;;  %v9808_v45 = vpack.c.bf16 %v8129_v59, %v8129_v59  ;;  %v9824_v22 = vpack.c.bf16 %v8130_v16, %v8130_v16  ;;  %v9840_v7 = vpack.c.bf16 %v8131_v46, %v8131_v46 }
 0x38c   : > { %v9791_v37 = vpack.c.bf16 %v8060_v53, %v8060_v53  ;;  %v9807_v1 = vpack.c.bf16 %v8061_v21, %v8061_v21  ;;  %v9823_v38 = vpack.c.bf16 %v8062_v6, %v8062_v6  ;;  %v9839_v51 = vpack.c.bf16 %v8063_v33, %v8063_v33  ;;  %v12767_v33 = vpop.permute.xlu1 %3602 }
 0x38d   : > { %8939 = vst.msk [vmem:[%s12303_s19 + $0x1c] sm:$0xf] %vm3379_vm1, %v9792_v52  ;;  %8955 = vst.msk [vmem:[%s12303_s19 + $0x5c] sm:$0xf] %vm3379_vm1, %v9808_v45  ;;  %v4012_v26 = vcombine.low %v12609_v30, %v12665_v3  ;;  %v4013_v8 = vcombine.high %v12609_v30, %v12665_v3  ;;  %v6840_v0 = vcombine.low %v11310_v43, %v6415_v24  ;;  %v12769_v52 = vpop.permute.xlu0 %3600 }
 0x38e   : > { %8971 = vst.msk [vmem:[%s12303_s19 + $0x9c] sm:$0xf] %vm3379_vm1, %v9824_v22  ;;  %8987 = vst.msk [vmem:[%s12303_s19 + $0xdc] sm:$0xf] %vm3379_vm1, %v9840_v7  ;;  %v6841_v60 = vcombine.high %v11310_v43, %v6415_v24  ;;  %v6772_v23 = vcombine.low %v11301_v12, %v6413_v13  ;;  %v6773_v4 = vcombine.high %v11301_v12, %v6413_v13 }
 0x38f   : > { %8938 = vst.msk [vmem:[%s12303_s19 + $0x18] sm:$0xf] %vm3379_vm1, %v9791_v37  ;;  %8954 = vst.msk [vmem:[%s12303_s19 + $0x58] sm:$0xf] %vm3379_vm1, %v9807_v1  ;;  %v4088_v30 = vrot.slane %v4080_v49, %v11259_v54  ;;  %v4095_v3 = vrot.slane %v4081_v2, %v11259_v54  ;;  %v4020_v17 = vrot.slane %v4012_v26, %v11259_v54 }
 0x390   : > { %8970 = vst.msk [vmem:[%s12303_s19 + $0x98] sm:$0xf] %vm3379_vm1, %v9823_v38  ;;  %8986 = vst.msk [vmem:[%s12303_s19 + $0xd8] sm:$0xf] %vm3379_vm1, %v9839_v51  ;;  %v4027_v19 = vrot.slane %v4013_v8, %v11259_v54  ;;  %v12740_v28 = vrot.slane %v6840_v0, %v11259_v54  ;;  %v12743_v43 = vrot.slane %v6841_v60, %v11259_v54 }
 0x391   : > { %v12746_v12 = vrot.slane %v6772_v23, %v11259_v54  ;;  %v12749_v11 = vrot.slane %v6773_v4, %v11259_v54  ;;  %v4096_v58 = vcombine.low %v12652_v25, %v4088_v30  ;;  %v4097_v62 = vcombine.high %v12652_v25, %v4088_v30 }
 0x392   : > { %v4112_v9 = vcombine.low %v12655_v10, %v4095_v3  ;;  %v4113_v47 = vcombine.high %v12655_v10, %v4095_v3  ;;  %v4028_v24 = vcombine.low %v12658_v5, %v4020_v17  ;;  %v4029_v13 = vcombine.high %v12658_v5, %v4020_v17 }
 0x393   : > { %v4044_v55 = vcombine.low %v12661_v50, %v4027_v19  ;;  %v4045_v59 = vcombine.high %v12661_v50, %v4027_v19  ;;  %v4104_v16 = vrot.slane %v4096_v58, %v11261_v56  ;;  %v4111_v46 = vrot.slane %v4097_v62, %v11261_v56 }
 0x394   : > { %v4120_v53 = vrot.slane %v4112_v9, %v11261_v56  ;;  %v4127_v25 = vrot.slane %v4113_v47, %v11261_v56  ;;  %v4036_v21 = vrot.slane %v4028_v24, %v11261_v56  ;;  %v4043_v10 = vrot.slane %v4029_v13, %v11261_v56  ;;  %v3651_v24 = vpop.permute.xlu1 %3650  ;;  %v3649_v13 = vpop.permute.xlu0 %3648 }
 0x395   : > { %v4052_v6 = vrot.slane %v4044_v55, %v11261_v56  ;;  %v4059_v5 = vrot.slane %v4045_v59, %v11261_v56  ;;  %v5152_v50 = vcombine.low %v4104_v16, %v4111_v46  ;;  %v9452_v45 = vcombine.high %v4104_v16, %v4111_v46 }
 0x396   : > { %v5168_v22 = vcombine.low %v4120_v53, %v4127_v25  ;;  %v9453_v7 = vcombine.high %v4120_v53, %v4127_v25  ;;  %v5084_v37 = vcombine.low %v4036_v21, %v4043_v10  ;;  %v9450_v1 = vcombine.high %v4036_v21, %v4043_v10 }
 0x397   : > { %v5100_v38 = vcombine.low %v4052_v6, %v4059_v5  ;;  %v9451_v51 = vcombine.high %v4052_v6, %v4059_v5  ;;  %v5159_v49 = vrot.slane %v5152_v50, %v11259_v54  ;;  %v5167_v2 = vrot.slane %v9452_v45, %v11259_v54 }
 0x398   : > { %v5175_v26 = vrot.slane %v5168_v22, %v11259_v54  ;;  %v5183_v8 = vrot.slane %v9453_v7, %v11259_v54  ;;  %v5091_v0 = vrot.slane %v5084_v37, %v11259_v54  ;;  %v5099_v60 = vrot.slane %v9450_v1, %v11259_v54 }
 0x399   : > { %v5107_v23 = vrot.slane %v5100_v38, %v11259_v54  ;;  %v5115_v4 = vrot.slane %v9451_v51, %v11259_v54  ;;  %v5184_v30 = vcombine.low %v5159_v49, %v5167_v2  ;;  %v5185_v3 = vcombine.high %v5159_v49, %v5167_v2 }
 0x39a   : > { %v5200_v17 = vcombine.low %v5175_v26, %v5183_v8  ;;  %v5201_v19 = vcombine.high %v5175_v26, %v5183_v8  ;;  %v5116_v58 = vcombine.low %v5091_v0, %v5099_v60  ;;  %v5117_v62 = vcombine.high %v5091_v0, %v5099_v60 }
 0x39b   : > { %v5132_v9 = vcombine.low %v5107_v23, %v5115_v4  ;;  %v5133_v47 = vcombine.high %v5107_v23, %v5115_v4  ;;  %v5192_v55 = vrot.slane %v5184_v30, %v11261_v56  ;;  %v5199_v59 = vrot.slane %v5185_v3, %v11261_v56  ;;  %v12787_v23 = vpop.permute.xlu1 %3698  ;;  %v12789_v4 = vpop.permute.xlu0 %3696 }
 0x39c   : > { %v5208_v16 = vrot.slane %v5200_v17, %v11261_v56  ;;  %v5215_v46 = vrot.slane %v5201_v19, %v11261_v56  ;;  %v5124_v53 = vrot.slane %v5116_v58, %v11261_v56  ;;  %v5131_v25 = vrot.slane %v5117_v62, %v11261_v56 }
 0x39d   : > { %v5140_v21 = vrot.slane %v5132_v9, %v11261_v56  ;;  %v5147_v10 = vrot.slane %v5133_v47, %v11261_v56  ;;  %v6856_v30 = vcombine.low %v12683_v14, %v12731_v61  ;;  %v6857_v3 = vcombine.high %v12683_v14, %v12731_v61 }
 0x39e   : > { %v5216_v6 = vcombine.low %v5192_v55, %v5208_v16  ;;  %v5217_v5 = vcombine.high %v5192_v55, %v5208_v16  ;;  %v5218_v50 = vcombine.low %v5199_v59, %v5215_v46  ;;  %v5219_v45 = vcombine.high %v5199_v59, %v5215_v46 }
 0x39f   : > { %v5148_v22 = vcombine.low %v5124_v53, %v5140_v21  ;;  %v5149_v7 = vcombine.high %v5124_v53, %v5140_v21  ;;  %v5150_v37 = vcombine.low %v5131_v25, %v5147_v10  ;;  %v5151_v1 = vcombine.high %v5131_v25, %v5147_v10 }
 0x3a0   : > { %v9726_v38 = vpack.c.bf16 %v5216_v6, %v5216_v6  ;;  %v9742_v51 = vpack.c.bf16 %v5217_v5, %v5217_v5  ;;  %v9758_v49 = vpack.c.bf16 %v5218_v50, %v5218_v50  ;;  %v9774_v2 = vpack.c.bf16 %v5219_v45, %v5219_v45  ;;  %v12843_v6 = vpop.permute.xlu1 %6378  ;;  %v12845_v5 = vpop.permute.xlu0 %6376 }
 0x3a1   : > { %v9725_v26 = vpack.c.bf16 %v5148_v22, %v5148_v22  ;;  %v9741_v8 = vpack.c.bf16 %v5149_v7, %v5149_v7  ;;  %v9757_v0 = vpack.c.bf16 %v5150_v37, %v5150_v37  ;;  %v9773_v60 = vpack.c.bf16 %v5151_v1, %v5151_v1 }
 0x3a2   : > { %6161 = vst.msk [vmem:[%s12188_s20 + $0x14] sm:$0xf] %vm3379_vm1, %v9726_v38  ;;  %6177 = vst.msk [vmem:[%s12188_s20 + $0x54] sm:$0xf] %vm3379_vm1, %v9742_v51  ;;  %v6788_v17 = vcombine.low %v12685_v27, %v12733_v29  ;;  %v6789_v19 = vcombine.high %v12685_v27, %v12733_v29  ;;  %v4472_v58 = vcombine.low %v11321_v39, %v3651_v24 }
 0x3a3   : > { %6193 = vst.msk [vmem:[%s12188_s20 + $0x94] sm:$0xf] %vm3379_vm1, %v9758_v49  ;;  %6209 = vst.msk [vmem:[%s12188_s20 + $0xd4] sm:$0xf] %vm3379_vm1, %v9774_v2  ;;  %v4473_v62 = vcombine.high %v11321_v39, %v3651_v24  ;;  %v4404_v14 = vcombine.low %v11313_v18, %v3649_v13  ;;  %v4405_v61 = vcombine.high %v11313_v18, %v3649_v13 }
 0x3a4   : > { %6160 = vst.msk [vmem:[%s12188_s20 + $0x10] sm:$0xf] %vm3379_vm1, %v9725_v26  ;;  %6176 = vst.msk [vmem:[%s12188_s20 + $0x50] sm:$0xf] %vm3379_vm1, %v9741_v8  ;;  %v6864_v9 = vrot.slane %v6856_v30, %v11259_v54  ;;  %v6871_v27 = vrot.slane %v6857_v3, %v11259_v54  ;;  %v6796_v29 = vrot.slane %v6788_v17, %v11259_v54 }
 0x3a5   : > { %6192 = vst.msk [vmem:[%s12188_s20 + $0x90] sm:$0xf] %vm3379_vm1, %v9757_v0  ;;  %6208 = vst.msk [vmem:[%s12188_s20 + $0xd0] sm:$0xf] %vm3379_vm1, %v9773_v60  ;;  %v6803_v47 = vrot.slane %v6789_v19, %v11259_v54  ;;  %v12824_v55 = vrot.slane %v4472_v58, %v11259_v54  ;;  %v12827_v59 = vrot.slane %v4473_v62, %v11259_v54 }
 0x3a6   : > { %v12830_v39 = vrot.slane %v4404_v14, %v11259_v54  ;;  %v12833_v24 = vrot.slane %v4405_v61, %v11259_v54  ;;  %v6872_v18 = vcombine.low %v12740_v28, %v6864_v9  ;;  %v6873_v13 = vcombine.high %v12740_v28, %v6864_v9  ;;  %v6427_v14 = vpop.permute.xlu1 %6426  ;;  %v6425_v61 = vpop.permute.xlu0 %6424 }
 0x3a7   : > { %v6888_v16 = vcombine.low %v12743_v43, %v6871_v27  ;;  %v6889_v46 = vcombine.high %v12743_v43, %v6871_v27  ;;  %v6804_v53 = vcombine.low %v12746_v12, %v6796_v29  ;;  %v6805_v25 = vcombine.high %v12746_v12, %v6796_v29 }
 0x3a8   : > { %v6820_v21 = vcombine.low %v12749_v11, %v6803_v47  ;;  %v6821_v10 = vcombine.high %v12749_v11, %v6803_v47  ;;  %v6880_v50 = vrot.slane %v6872_v18, %v11261_v56  ;;  %v6887_v28 = vrot.slane %v6873_v13, %v11261_v56 }
 0x3a9   : > { %v6896_v45 = vrot.slane %v6888_v16, %v11261_v56  ;;  %v6903_v43 = vrot.slane %v6889_v46, %v11261_v56  ;;  %v6812_v22 = vrot.slane %v6804_v53, %v11261_v56  ;;  %v6819_v12 = vrot.slane %v6805_v25, %v11261_v56 }
 0x3aa   : > { %v6828_v7 = vrot.slane %v6820_v21, %v11261_v56  ;;  %v6835_v11 = vrot.slane %v6821_v10, %v11261_v56  ;;  %v7928_v37 = vcombine.low %v6880_v50, %v6887_v28  ;;  %v9559_v1 = vcombine.high %v6880_v50, %v6887_v28 }
 0x3ab   : > { %v7944_v38 = vcombine.low %v6896_v45, %v6903_v43  ;;  %v9560_v51 = vcombine.high %v6896_v45, %v6903_v43  ;;  %v7860_v49 = vcombine.low %v6812_v22, %v6819_v12  ;;  %v9557_v2 = vcombine.high %v6812_v22, %v6819_v12 }
 0x3ac   : > { %v7876_v26 = vcombine.low %v6828_v7, %v6835_v11  ;;  %v9558_v8 = vcombine.high %v6828_v7, %v6835_v11  ;;  %v7935_v0 = vrot.slane %v7928_v37, %v11259_v54  ;;  %v7943_v60 = vrot.slane %v9559_v1, %v11259_v54 }
 0x3ad   : > { %v7951_v30 = vrot.slane %v7944_v38, %v11259_v54  ;;  %v7959_v3 = vrot.slane %v9560_v51, %v11259_v54  ;;  %v7867_v17 = vrot.slane %v7860_v49, %v11259_v54  ;;  %v7875_v19 = vrot.slane %v9557_v2, %v11259_v54  ;;  %v12871_v49 = vpop.permute.xlu1 %3598  ;;  %v12873_v2 = vpop.permute.xlu0 %3596 }
 0x3ae   : > { %v7883_v58 = vrot.slane %v7876_v26, %v11259_v54  ;;  %v7891_v62 = vrot.slane %v9558_v8, %v11259_v54  ;;  %v7960_v9 = vcombine.low %v7935_v0, %v7943_v60  ;;  %v7961_v27 = vcombine.high %v7935_v0, %v7943_v60 }
 0x3af   : > { %v7976_v29 = vcombine.low %v7951_v30, %v7959_v3  ;;  %v7977_v47 = vcombine.high %v7951_v30, %v7959_v3  ;;  %v7892_v18 = vcombine.low %v7867_v17, %v7875_v19  ;;  %v7893_v13 = vcombine.high %v7867_v17, %v7875_v19 }
 0x3b0   : > { %v7908_v16 = vcombine.low %v7883_v58, %v7891_v62  ;;  %v7909_v46 = vcombine.high %v7883_v58, %v7891_v62  ;;  %v7968_v53 = vrot.slane %v7960_v9, %v11261_v56  ;;  %v7975_v25 = vrot.slane %v7961_v27, %v11261_v56 }
 0x3b1   : > { %v7984_v21 = vrot.slane %v7976_v29, %v11261_v56  ;;  %v7991_v10 = vrot.slane %v7977_v47, %v11261_v56  ;;  %v7900_v50 = vrot.slane %v7892_v18, %v11261_v56  ;;  %v7907_v28 = vrot.slane %v7893_v13, %v11261_v56 }
 0x3b2   : > { %v7916_v45 = vrot.slane %v7908_v16, %v11261_v56  ;;  %v7923_v43 = vrot.slane %v7909_v46, %v11261_v56  ;;  %v4488_v58 = vcombine.low %v12767_v33, %v12787_v23  ;;  %v4489_v62 = vcombine.high %v12767_v33, %v12787_v23 }
 0x3b3   : > { %v7992_v22 = vcombine.low %v7968_v53, %v7984_v21  ;;  %v7993_v12 = vcombine.high %v7968_v53, %v7984_v21  ;;  %v7994_v7 = vcombine.low %v7975_v25, %v7991_v10  ;;  %v7995_v11 = vcombine.high %v7975_v25, %v7991_v10 }
 0x3b4   : > { %v7924_v37 = vcombine.low %v7900_v50, %v7916_v45  ;;  %v7925_v1 = vcombine.high %v7900_v50, %v7916_v45  ;;  %v7926_v38 = vcombine.low %v7907_v28, %v7923_v43  ;;  %v7927_v51 = vcombine.high %v7907_v28, %v7923_v43 }
 0x3b5   : > { %v9790_v26 = vpack.c.bf16 %v7992_v22, %v7992_v22  ;;  %v9806_v8 = vpack.c.bf16 %v7993_v12, %v7993_v12  ;;  %v9822_v0 = vpack.c.bf16 %v7994_v7, %v7994_v7  ;;  %v9838_v60 = vpack.c.bf16 %v7995_v11, %v7995_v11 }
 0x3b6   : > { %v9789_v30 = vpack.c.bf16 %v7924_v37, %v7924_v37  ;;  %v9805_v3 = vpack.c.bf16 %v7925_v1, %v7925_v1  ;;  %v9821_v17 = vpack.c.bf16 %v7926_v38, %v7926_v38  ;;  %v9837_v19 = vpack.c.bf16 %v7927_v51, %v7927_v51 }
 0x3b7   : > { %8937 = vst.msk [vmem:[%s12303_s19 + $0x14] sm:$0xf] %vm3379_vm1, %v9790_v26  ;;  %8953 = vst.msk [vmem:[%s12303_s19 + $0x54] sm:$0xf] %vm3379_vm1, %v9806_v8  ;;  %v4420_v9 = vcombine.low %v12769_v52, %v12789_v4  ;;  %v4421_v27 = vcombine.high %v12769_v52, %v12789_v4  ;;  %v7248_v29 = vcombine.low %v11343_v41, %v6427_v14 }
 0x3b8   : > { %8969 = vst.msk [vmem:[%s12303_s19 + $0x94] sm:$0xf] %vm3379_vm1, %v9822_v0  ;;  %8985 = vst.msk [vmem:[%s12303_s19 + $0xd4] sm:$0xf] %vm3379_vm1, %v9838_v60  ;;  %v7249_v47 = vcombine.high %v11343_v41, %v6427_v14  ;;  %v7180_v33 = vcombine.low %v11334_v44, %v6425_v61  ;;  %v7181_v23 = vcombine.high %v11334_v44, %v6425_v61  ;;  %v12919_v44 = vpop.permute.xlu1 %3646  ;;  %v12921_v61 = vpop.permute.xlu0 %3644 }
 0x3b9   : > { %8936 = vst.msk [vmem:[%s12303_s19 + $0x10] sm:$0xf] %vm3379_vm1, %v9789_v30  ;;  %8952 = vst.msk [vmem:[%s12303_s19 + $0x50] sm:$0xf] %vm3379_vm1, %v9805_v3  ;;  %v4496_v18 = vrot.slane %v4488_v58, %v11259_v54  ;;  %v4503_v52 = vrot.slane %v4489_v62, %v11259_v54  ;;  %v4428_v4 = vrot.slane %v4420_v9, %v11259_v54 }
 0x3ba   : > { %8968 = vst.msk [vmem:[%s12303_s19 + $0x90] sm:$0xf] %vm3379_vm1, %v9821_v17  ;;  %8984 = vst.msk [vmem:[%s12303_s19 + $0xd0] sm:$0xf] %vm3379_vm1, %v9837_v19  ;;  %v4435_v13 = vrot.slane %v4421_v27, %v11259_v54  ;;  %v12908_v16 = vrot.slane %v7248_v29, %v11259_v54  ;;  %v12911_v46 = vrot.slane %v7249_v47, %v11259_v54 }
 0x3bb   : > { %v12914_v41 = vrot.slane %v7180_v33, %v11259_v54  ;;  %v12917_v14 = vrot.slane %v7181_v23, %v11259_v54  ;;  %v4504_v53 = vcombine.low %v12824_v55, %v4496_v18  ;;  %v4505_v25 = vcombine.high %v12824_v55, %v4496_v18 }
 0x3bc   : > { %v4520_v21 = vcombine.low %v12827_v59, %v4503_v52  ;;  %v4521_v10 = vcombine.high %v12827_v59, %v4503_v52  ;;  %v4436_v50 = vcombine.low %v12830_v39, %v4428_v4  ;;  %v4437_v28 = vcombine.high %v12830_v39, %v4428_v4  ;;  %v12939_v30 = vpop.permute.xlu1 %3694  ;;  %v12941_v3 = vpop.permute.xlu0 %3692 }
 0x3bd   : > { %v4452_v45 = vcombine.low %v12833_v24, %v4435_v13  ;;  %v4453_v43 = vcombine.high %v12833_v24, %v4435_v13  ;;  %v4512_v22 = vrot.slane %v4504_v53, %v11261_v56  ;;  %v4519_v12 = vrot.slane %v4505_v25, %v11261_v56 }
 0x3be   : > { %v4528_v7 = vrot.slane %v4520_v21, %v11261_v56  ;;  %v4535_v55 = vrot.slane %v4521_v10, %v11261_v56  ;;  %v4444_v11 = vrot.slane %v4436_v50, %v11261_v56  ;;  %v4451_v59 = vrot.slane %v4437_v28, %v11261_v56 }
 0x3bf   : > { %v4460_v37 = vrot.slane %v4452_v45, %v11261_v56  ;;  %v4467_v39 = vrot.slane %v4453_v43, %v11261_v56  ;;  %v5560_v1 = vcombine.low %v4512_v22, %v4519_v12  ;;  %v9464_v38 = vcombine.high %v4512_v22, %v4519_v12 }
 0x3c0   : > { %v5576_v51 = vcombine.low %v4528_v7, %v4535_v55  ;;  %v9465_v24 = vcombine.high %v4528_v7, %v4535_v55  ;;  %v5492_v26 = vcombine.low %v4444_v11, %v4451_v59  ;;  %v9462_v8 = vcombine.high %v4444_v11, %v4451_v59  ;;  %v12959_v7 = vpop.permute.xlu1 %6374  ;;  %v12961_v55 = vpop.permute.xlu0 %6372 }
 0x3c1   : > { %v5508_v0 = vcombine.low %v4460_v37, %v4467_v39  ;;  %v9463_v60 = vcombine.high %v4460_v37, %v4467_v39  ;;  %v5567_v17 = vrot.slane %v5560_v1, %v11259_v54  ;;  %v5575_v19 = vrot.slane %v9464_v38, %v11259_v54 }
 0x3c2   : > { %v5583_v58 = vrot.slane %v5576_v51, %v11259_v54  ;;  %v5591_v62 = vrot.slane %v9465_v24, %v11259_v54  ;;  %v5499_v9 = vrot.slane %v5492_v26, %v11259_v54  ;;  %v5507_v27 = vrot.slane %v9462_v8, %v11259_v54 }
 0x3c3   : > { %v5515_v29 = vrot.slane %v5508_v0, %v11259_v54  ;;  %v5523_v47 = vrot.slane %v9463_v60, %v11259_v54  ;;  %v5592_v33 = vcombine.low %v5567_v17, %v5575_v19  ;;  %v5593_v23 = vcombine.high %v5567_v17, %v5575_v19 }
 0x3c4   : > { %v5608_v18 = vcombine.low %v5583_v58, %v5591_v62  ;;  %v5609_v52 = vcombine.high %v5583_v58, %v5591_v62  ;;  %v5524_v4 = vcombine.low %v5499_v9, %v5507_v27  ;;  %v5525_v13 = vcombine.high %v5499_v9, %v5507_v27 }
 0x3c5   : > { %v5540_v53 = vcombine.low %v5515_v29, %v5523_v47  ;;  %v5541_v25 = vcombine.high %v5515_v29, %v5523_v47  ;;  %v5600_v21 = vrot.slane %v5592_v33, %v11261_v56  ;;  %v5607_v10 = vrot.slane %v5593_v23, %v11261_v56  ;;  %v12997_v23 = vpop.permute.xlu0 %6420 }
 0x3c6   : > { %v5616_v50 = vrot.slane %v5608_v18, %v11261_v56  ;;  %v5623_v28 = vrot.slane %v5609_v52, %v11261_v56  ;;  %v5532_v45 = vrot.slane %v5524_v4, %v11261_v56  ;;  %v5539_v43 = vrot.slane %v5525_v13, %v11261_v56 }
 0x3c7   : > { %v5548_v22 = vrot.slane %v5540_v53, %v11261_v56  ;;  %v5555_v12 = vrot.slane %v5541_v25, %v11261_v56  ;;  %v4336_v9 = vcombine.low %v11324_v40, %v12919_v44  ;;  %v4337_v27 = vcombine.high %v11324_v40, %v12919_v44 }
 0x3c8   : > { %v5624_v11 = vcombine.low %v5600_v21, %v5616_v50  ;;  %v5625_v59 = vcombine.high %v5600_v21, %v5616_v50  ;;  %v5626_v37 = vcombine.low %v5607_v10, %v5623_v28  ;;  %v5627_v39 = vcombine.high %v5607_v10, %v5623_v28 }
 0x3c9   : > { %v5556_v1 = vcombine.low %v5532_v45, %v5548_v22  ;;  %v5557_v38 = vcombine.high %v5532_v45, %v5548_v22  ;;  %v5558_v51 = vcombine.low %v5539_v43, %v5555_v12  ;;  %v5559_v24 = vcombine.high %v5539_v43, %v5555_v12 }
 0x3ca   : > { %v9732_v26 = vpack.c.bf16 %v5624_v11, %v5624_v11  ;;  %v9748_v8 = vpack.c.bf16 %v5625_v59, %v5625_v59  ;;  %v9764_v0 = vpack.c.bf16 %v5626_v37, %v5626_v37  ;;  %v9780_v60 = vpack.c.bf16 %v5627_v39, %v5627_v39 }
 0x3cb   : > { %v9731_v17 = vpack.c.bf16 %v5556_v1, %v5556_v1  ;;  %v9747_v19 = vpack.c.bf16 %v5557_v38, %v5557_v38  ;;  %v9763_v58 = vpack.c.bf16 %v5558_v51, %v5558_v51  ;;  %v9779_v62 = vpack.c.bf16 %v5559_v24, %v5559_v24 }
 0x3cc   : > { %6167 = vst.msk [vmem:[%s12188_s20 + $0x2c] sm:$0xf] %vm3379_vm1, %v9732_v26  ;;  %6183 = vst.msk [vmem:[%s12188_s20 + $0x6c] sm:$0xf] %vm3379_vm1, %v9748_v8  ;;  %v4268_v29 = vcombine.low %v11316_v36, %v12921_v61  ;;  %v4269_v47 = vcombine.high %v11316_v36, %v12921_v61  ;;  %v4352_v33 = vcombine.low %v12871_v49, %v12939_v30  ;;  %v12995_v61 = vpop.permute.xlu1 %6422 }
 0x3cd   : > { %6199 = vst.msk [vmem:[%s12188_s20 + $0xac] sm:$0xf] %vm3379_vm1, %v9764_v0  ;;  %6215 = vst.msk [vmem:[%s12188_s20 + $0xec] sm:$0xf] %vm3379_vm1, %v9780_v60  ;;  %v4353_v40 = vcombine.high %v12871_v49, %v12939_v30  ;;  %v4284_v44 = vcombine.low %v12873_v2, %v12941_v3  ;;  %v4285_v36 = vcombine.high %v12873_v2, %v12941_v3  ;;  %v13023_v0 = vpop.permute.xlu0 %6468 }
 0x3ce   : > { %6166 = vst.msk [vmem:[%s12188_s20 + $0x28] sm:$0xf] %vm3379_vm1, %v9731_v17  ;;  %6182 = vst.msk [vmem:[%s12188_s20 + $0x68] sm:$0xf] %vm3379_vm1, %v9747_v19  ;;  %v4344_v18 = vrot.slane %v4336_v9, %v11259_v54  ;;  %v4351_v52 = vrot.slane %v4337_v27, %v11259_v54  ;;  %v4276_v4 = vrot.slane %v4268_v29, %v11259_v54 }
 0x3cf   : > { %6198 = vst.msk [vmem:[%s12188_s20 + $0xa8] sm:$0xf] %vm3379_vm1, %v9763_v58  ;;  %6214 = vst.msk [vmem:[%s12188_s20 + $0xe8] sm:$0xf] %vm3379_vm1, %v9779_v62  ;;  %v4283_v13 = vrot.slane %v4269_v47, %v11259_v54  ;;  %v4360_v49 = vrot.slane %v4352_v33, %v11259_v54  ;;  %v4367_v30 = vrot.slane %v4353_v40, %v11259_v54 }
 0x3d0   : > { %v4292_v53 = vrot.slane %v4284_v44, %v11259_v54  ;;  %v4299_v2 = vrot.slane %v4285_v36, %v11259_v54  ;;  %v7112_v3 = vcombine.low %v11353_v63, %v12995_v61  ;;  %v7113_v25 = vcombine.high %v11353_v63, %v12995_v61 }
 0x3d1   : > { %v7044_v21 = vcombine.low %v11337_v31, %v12997_v23  ;;  %v7045_v10 = vcombine.high %v11337_v31, %v12997_v23  ;;  %v4368_v50 = vcombine.low %v4344_v18, %v4360_v49  ;;  %v4369_v28 = vcombine.high %v4344_v18, %v4360_v49 }
 0x3d2   : > { %v4384_v45 = vcombine.low %v4351_v52, %v4367_v30  ;;  %v4385_v43 = vcombine.high %v4351_v52, %v4367_v30  ;;  %v4300_v22 = vcombine.low %v4276_v4, %v4292_v53  ;;  %v4301_v12 = vcombine.high %v4276_v4, %v4292_v53 }
 0x3d3   : > { %v4316_v11 = vcombine.low %v4283_v13, %v4299_v2  ;;  %v4317_v59 = vcombine.high %v4283_v13, %v4299_v2  ;;  %v4376_v37 = vrot.slane %v4368_v50, %v11261_v56  ;;  %v4383_v39 = vrot.slane %v4369_v28, %v11261_v56 }
 0x3d4   : > { %v4392_v1 = vrot.slane %v4384_v45, %v11261_v56  ;;  %v4399_v38 = vrot.slane %v4385_v43, %v11261_v56  ;;  %v4308_v51 = vrot.slane %v4300_v22, %v11261_v56  ;;  %v4315_v24 = vrot.slane %v4301_v12, %v11261_v56  ;;  %v13036_v43 = vpop.permute.xlu1 %6470  ;;  %v13038_v22 = vpop.permute.xlu0 %3608 }
 0x3d5   : > { %v4324_v26 = vrot.slane %v4316_v11, %v11261_v56  ;;  %v4331_v8 = vrot.slane %v4317_v59, %v11261_v56  ;;  %v5424_v60 = vcombine.low %v4376_v37, %v4383_v39  ;;  %v9460_v17 = vcombine.high %v4376_v37, %v4383_v39 }
 0x3d6   : > { %v5440_v19 = vcombine.low %v4392_v1, %v4399_v38  ;;  %v9461_v58 = vcombine.high %v4392_v1, %v4399_v38  ;;  %v5356_v62 = vcombine.low %v4308_v51, %v4315_v24  ;;  %v9458_v9 = vcombine.high %v4308_v51, %v4315_v24 }
 0x3d7   : > { %v5372_v27 = vcombine.low %v4324_v26, %v4331_v8  ;;  %v9459_v29 = vcombine.high %v4324_v26, %v4331_v8  ;;  %v5431_v47 = vrot.slane %v5424_v60, %v11259_v54  ;;  %v5439_v33 = vrot.slane %v9460_v17, %v11259_v54 }
 0x3d8   : > { %v5447_v40 = vrot.slane %v5440_v19, %v11259_v54  ;;  %v5455_v44 = vrot.slane %v9461_v58, %v11259_v54  ;;  %v5363_v36 = vrot.slane %v5356_v62, %v11259_v54  ;;  %v5371_v18 = vrot.slane %v9458_v9, %v11259_v54 }
 0x3d9   : > { %v5379_v52 = vrot.slane %v5372_v27, %v11259_v54  ;;  %v5387_v4 = vrot.slane %v9459_v29, %v11259_v54  ;;  %v5456_v13 = vcombine.low %v5431_v47, %v5439_v33  ;;  %v5457_v49 = vcombine.high %v5431_v47, %v5439_v33 }
 0x3da   : > { %v5472_v30 = vcombine.low %v5447_v40, %v5455_v44  ;;  %v5473_v53 = vcombine.high %v5447_v40, %v5455_v44  ;;  %v5388_v2 = vcombine.low %v5363_v36, %v5371_v18  ;;  %v5389_v50 = vcombine.high %v5363_v36, %v5371_v18 }
 0x3db   : > { %v5404_v28 = vcombine.low %v5379_v52, %v5387_v4  ;;  %v5405_v45 = vcombine.high %v5379_v52, %v5387_v4  ;;  %v5464_v12 = vrot.slane %v5456_v13, %v11261_v56  ;;  %v5471_v11 = vrot.slane %v5457_v49, %v11261_v56 }
 0x3dc   : > { %v5480_v59 = vrot.slane %v5472_v30, %v11261_v56  ;;  %v5487_v37 = vrot.slane %v5473_v53, %v11261_v56  ;;  %v5396_v39 = vrot.slane %v5388_v2, %v11261_v56  ;;  %v5403_v1 = vrot.slane %v5389_v50, %v11261_v56 }
 0x3dd   : > { %v5412_v38 = vrot.slane %v5404_v28, %v11261_v56  ;;  %v5419_v51 = vrot.slane %v5405_v45, %v11261_v56 }
 0x3de   : > { %10385 = shalt.err (!%p10382_p12)
}
 0x3df   : > { %s10386_s16 = scalar_lea.hbm %s13044_s10, 4096  ;;  %s10390_s23 = scalar_lea.hbm %s13719_s27, 8192 }
 0x3e0   : > { %p10387_p0 = scmp.ne.s32.totalorder %s13044_s10, %s10386_s16  ;;  %p10391_p13 = scmp.lt.u32.totalorder %s13044_s10, %s13719_s27 }
 0x3e1   : > { %p10392_p2 = scmp.lt.u32.totalorder %s10390_s23, %s10386_s16  ;;  %p10394_p6 = scmp.lt.u32.totalorder %s10386_s16, %s13044_s10 }
 0x3e2   : > { %p10388_p5 = pnand %p10387_p0, %p13720_p4 }
 0x3e3   : > { %p10393_p8 = por %p10392_p2, %p10391_p13 }
 0x3e4   : > { %p10389_p7 = pneg %p10388_p5 }
 0x3e5   : > { %p10395_p1 = por %p10394_p6, %p10393_p8 }
 0x3e7   : > { %p10396_p3 = pnand %p10395_p1, %p10389_p7 }
 0x3e9   : > { %10399 = shalt.err (!%p10396_p3)
}
 0x3ea   : > { %s13671_s26 = smov 64   ;;  %s10549_s30 = smov 4   ;;  %v5488_v24 = vcombine.low %v5464_v12, %v5480_v59  ;;  %v5489_v26 = vcombine.high %v5464_v12, %v5480_v59  ;;  %v5490_v8 = vcombine.low %v5471_v11, %v5487_v37  ;;  %v5491_v60 = vcombine.high %v5471_v11, %v5487_v37  ;;  %v6475_v18 = vpop.permute.xlu1 %6474  ;;  %v3657_v52 = vpop.permute.xlu0 %3656 }
 0x3eb   : > { %s13721_s0 = scalar_lea.sflag [#allocation4], %s10914_s12  ;;  %v5420_v17 = vcombine.low %v5396_v39, %v5412_v38  ;;  %v5421_v19 = vcombine.high %v5396_v39, %v5412_v38  ;;  %v5422_v58 = vcombine.low %v5403_v1, %v5419_v51  ;;  %v5423_v62 = vcombine.high %v5403_v1, %v5419_v51  ;;  %s9001_s1 = sand.u32 1, %s10638_s21  }
 0x3ec   : > { %10031 = dma.vmem_to_hbm [thread:$0]  (%p13720_p4), %s13051_s9, 4096, %s13044_s10, %s13721_s0, %s13671_s26, %s13671_s26, %s10549_s30   ;;  %v9730_v9 = vpack.c.bf16 %v5488_v24, %v5488_v24  ;;  %v9746_v27 = vpack.c.bf16 %v5489_v26, %v5489_v26  ;;  %v9762_v29 = vpack.c.bf16 %v5490_v8, %v5490_v8  ;;  %v9778_v47 = vpack.c.bf16 %v5491_v60, %v5491_v60 }
 0x3ed   : > { %v9729_v33 = vpack.c.bf16 %v5420_v17, %v5420_v17  ;;  %v9745_v40 = vpack.c.bf16 %v5421_v19, %v5421_v19  ;;  %v9761_v44 = vpack.c.bf16 %v5422_v58, %v5422_v58  ;;  %v9777_v36 = vpack.c.bf16 %v5423_v62, %v5423_v62  ;;  %s9040_s12 = sshll.u32 %s12188_s20, 4  ;;  %s13722_s11 = sld [smem:[#allocation38_spill]]  ;;  %s13410_s12 = int_to_ptr.vmem [resolvable:$true] %s9040_s12 }
 0x3ee   : > { %6165 = vst.msk [vmem:[%s12188_s20 + $0x24] sm:$0xf] %vm3379_vm1, %v9730_v9  ;;  %6181 = vst.msk [vmem:[%s12188_s20 + $0x64] sm:$0xf] %vm3379_vm1, %v9746_v27  ;;  %v7120_v4 = vrot.slane %v7112_v3, %v11259_v54  ;;  %v7127_v13 = vrot.slane %v7113_v25, %v11259_v54  ;;  %v7052_v49 = vrot.slane %v7044_v21, %v11259_v54  ;;  %v13148_v26 = vpop.permute.xlu1 %3610  ;;  %s13430_s23 = scalar_lea.sflag [#allocation18], %s9001_s1  ;;  %s10400_s22 = scalar_lea.vmem %s13410_s12, 4096 }
 0x3ef   : > { %6197 = vst.msk [vmem:[%s12188_s20 + $0xa4] sm:$0xf] %vm3379_vm1, %v9762_v29  ;;  %6213 = vst.msk [vmem:[%s12188_s20 + $0xe4] sm:$0xf] %vm3379_vm1, %v9778_v47  ;;  %v7059_v30 = vrot.slane %v7045_v10, %v11259_v54  ;;  %v7128_v63 = vcombine.low %v12959_v7, %v13036_v43  ;;  %v7129_v61 = vcombine.high %v12959_v7, %v13036_v43  ;;  %p10401_p11 = scmp.ne.s32.totalorder %s13410_s12, %s10400_s22 }
 0x3f0   : > { %6164 = vst.msk [vmem:[%s12188_s20 + $0x20] sm:$0xf] %vm3379_vm1, %v9729_v33  ;;  %6180 = vst.msk [vmem:[%s12188_s20 + $0x60] sm:$0xf] %vm3379_vm1, %v9745_v40  ;;  %v7060_v3 = vcombine.low %v12961_v55, %v13023_v0  ;;  %v7061_v31 = vcombine.high %v12961_v55, %v13023_v0  ;;  %v7264_v23 = vcombine.low %v12843_v6, %v6475_v18 }
 0x3f1   : > { %6196 = vst.msk [vmem:[%s12188_s20 + $0xa0] sm:$0xf] %vm3379_vm1, %v9761_v44  ;;  %6212 = vst.msk [vmem:[%s12188_s20 + $0xe0] sm:$0xf] %vm3379_vm1, %v9777_v36  ;;  %v7265_v25 = vcombine.high %v12843_v6, %v6475_v18  ;;  %v4676_v21 = vcombine.low %v12225_v35, %v3657_v52  ;;  %v4677_v10 = vcombine.high %v12225_v35, %v3657_v52  ;;  %p10402_p9 = pnand %p10401_p11, %p13720_p4 }
 0x3f2   : > { %v7136_v53 = vrot.slane %v7128_v63, %v11259_v54  ;;  %v7143_v2 = vrot.slane %v7129_v61, %v11259_v54  ;;  %v7068_v7 = vrot.slane %v7060_v3, %v11259_v54  ;;  %v7075_v50 = vrot.slane %v7061_v31, %v11259_v54  ;;  %v3705_v63 = vpop.permute.xlu0 %3704 }
 0x3f3   : > { %v13133_v28 = vrot.slane %v7264_v23, %v11259_v54  ;;  %v13136_v55 = vrot.slane %v7265_v25, %v11259_v54  ;;  %v13139_v6 = vrot.slane %v4676_v21, %v11259_v54  ;;  %v13142_v0 = vrot.slane %v4677_v10, %v11259_v54  ;;  %v3659_v25 = vpop.permute.xlu1 %3658  ;;  %s13408_s16 = scalar_lea.hbm %s13722_s11, %s13030_s29  ;;  %p10403_p10 = pneg %p10402_p9 }
 0x3f4   : > { %v7144_v35 = vcombine.low %v7120_v4, %v7136_v53  ;;  %v7145_v45 = vcombine.high %v7120_v4, %v7136_v53  ;;  %v7160_v43 = vcombine.low %v7127_v13, %v7143_v2  ;;  %v7161_v12 = vcombine.high %v7127_v13, %v7143_v2 }
 0x3f5   : > { %v7076_v11 = vcombine.low %v7052_v49, %v7068_v7  ;;  %v7077_v59 = vcombine.high %v7052_v49, %v7068_v7  ;;  %v7092_v37 = vcombine.low %v7059_v30, %v7075_v50  ;;  %v7093_v39 = vcombine.high %v7059_v30, %v7075_v50 }
 0x3f6   : > { %v7152_v1 = vrot.slane %v7144_v35, %v11261_v56  ;;  %v7159_v38 = vrot.slane %v7145_v45, %v11261_v56  ;;  %v7168_v51 = vrot.slane %v7160_v43, %v11261_v56  ;;  %v7175_v24 = vrot.slane %v7161_v12, %v11261_v56 }
 0x3f7   : > { %v7084_v8 = vrot.slane %v7076_v11, %v11261_v56  ;;  %v7091_v60 = vrot.slane %v7077_v59, %v11261_v56  ;;  %v7100_v17 = vrot.slane %v7092_v37, %v11261_v56  ;;  %v7107_v19 = vrot.slane %v7093_v39, %v11261_v56 }
 0x3f8   : > { %v8200_v58 = vcombine.low %v7152_v1, %v7159_v38  ;;  %v9567_v62 = vcombine.high %v7152_v1, %v7159_v38  ;;  %v8216_v9 = vcombine.low %v7168_v51, %v7175_v24  ;;  %v9568_v27 = vcombine.high %v7168_v51, %v7175_v24 }
 0x3f9   : > { %v8132_v29 = vcombine.low %v7084_v8, %v7091_v60  ;;  %v9565_v47 = vcombine.high %v7084_v8, %v7091_v60  ;;  %v8148_v33 = vcombine.low %v7100_v17, %v7107_v19  ;;  %v9566_v40 = vcombine.high %v7100_v17, %v7107_v19  ;;  %v13170_v17 = vpop.permute.xlu0 %6384 }
 0x3fa   : > { %v8207_v44 = vrot.slane %v8200_v58, %v11259_v54  ;;  %v8215_v36 = vrot.slane %v9567_v62, %v11259_v54  ;;  %v8223_v18 = vrot.slane %v8216_v9, %v11259_v54  ;;  %v8231_v52 = vrot.slane %v9568_v27, %v11259_v54  ;;  %v13172_v27 = vpop.permute.xlu1 %3706 }
 0x3fb   : > { %v8139_v4 = vrot.slane %v8132_v29, %v11259_v54  ;;  %v8147_v13 = vrot.slane %v9565_v47, %v11259_v54  ;;  %v8155_v49 = vrot.slane %v8148_v33, %v11259_v54  ;;  %v8163_v30 = vrot.slane %v9566_v40, %v11259_v54 }
 0x3fc   : > { %v8232_v61 = vcombine.low %v8207_v44, %v8215_v36  ;;  %v8233_v3 = vcombine.high %v8207_v44, %v8215_v36  ;;  %v8248_v31 = vcombine.low %v8223_v18, %v8231_v52  ;;  %v8249_v23 = vcombine.high %v8223_v18, %v8231_v52 }
 0x3fd   : > { %v8164_v21 = vcombine.low %v8139_v4, %v8147_v13  ;;  %v8165_v10 = vcombine.high %v8139_v4, %v8147_v13  ;;  %v8180_v53 = vcombine.low %v8155_v49, %v8163_v30  ;;  %v8181_v2 = vcombine.high %v8155_v49, %v8163_v30 }
 0x3fe   : > { %v8240_v7 = vrot.slane %v8232_v61, %v11261_v56  ;;  %v8247_v50 = vrot.slane %v8233_v3, %v11261_v56  ;;  %v8256_v35 = vrot.slane %v8248_v31, %v11261_v56  ;;  %v8263_v45 = vrot.slane %v8249_v23, %v11261_v56  ;;  %v13214_v23 = vpop.permute.xlu0 %6432 }
 0x3ff   : > { %v8172_v43 = vrot.slane %v8164_v21, %v11261_v56  ;;  %v8179_v12 = vrot.slane %v8165_v10, %v11261_v56  ;;  %v8188_v11 = vrot.slane %v8180_v53, %v11261_v56  ;;  %v8195_v59 = vrot.slane %v8181_v2, %v11261_v56  ;;  %v13216_v10 = vpop.permute.xlu1 %6386 }
 0x400   : > { %v8264_v37 = vcombine.low %v8240_v7, %v8256_v35  ;;  %v8265_v39 = vcombine.high %v8240_v7, %v8256_v35  ;;  %v8266_v1 = vcombine.low %v8247_v50, %v8263_v45  ;;  %v8267_v38 = vcombine.high %v8247_v50, %v8263_v45 }
 0x401   : > { %v8196_v51 = vcombine.low %v8172_v43, %v8188_v11  ;;  %v8197_v24 = vcombine.high %v8172_v43, %v8188_v11  ;;  %v8198_v8 = vcombine.low %v8179_v12, %v8195_v59  ;;  %v8199_v60 = vcombine.high %v8179_v12, %v8195_v59 }
 0x402   : > { %v9794_v19 = vpack.c.bf16 %v8264_v37, %v8264_v37  ;;  %v9810_v58 = vpack.c.bf16 %v8265_v39, %v8265_v39  ;;  %v9826_v62 = vpack.c.bf16 %v8266_v1, %v8266_v1  ;;  %v9842_v9 = vpack.c.bf16 %v8267_v38, %v8267_v38 }
 0x403   : > { %v9793_v29 = vpack.c.bf16 %v8196_v51, %v8196_v51  ;;  %v9809_v47 = vpack.c.bf16 %v8197_v24, %v8197_v24  ;;  %v9825_v33 = vpack.c.bf16 %v8198_v8, %v8198_v8  ;;  %v9841_v40 = vpack.c.bf16 %v8199_v60, %v8199_v60 }
 0x404   : > { %8941 = vst.msk [vmem:[%s12303_s19 + $0x24] sm:$0xf] %vm3379_vm1, %v9794_v19  ;;  %8957 = vst.msk [vmem:[%s12303_s19 + $0x64] sm:$0xf] %vm3379_vm1, %v9810_v58  ;;  %v7280_v44 = vcombine.low %v12908_v16, %v13133_v28  ;;  %v7281_v36 = vcombine.high %v12908_v16, %v13133_v28  ;;  %v7296_v18 = vcombine.low %v12911_v46, %v13136_v55  ;;  %v13230_v19 = vpop.permute.xlu0 %3604 }
 0x405   : > { %8973 = vst.msk [vmem:[%s12303_s19 + $0xa4] sm:$0xf] %vm3379_vm1, %v9826_v62  ;;  %8989 = vst.msk [vmem:[%s12303_s19 + $0xe4] sm:$0xf] %vm3379_vm1, %v9842_v9  ;;  %v7297_v52 = vcombine.high %v12911_v46, %v13136_v55  ;;  %v4744_v4 = vcombine.low %v12241_v32, %v3659_v25  ;;  %v4745_v13 = vcombine.high %v12241_v32, %v3659_v25 }
 0x406   : > { %8940 = vst.msk [vmem:[%s12303_s19 + $0x20] sm:$0xf] %vm3379_vm1, %v9793_v29  ;;  %8956 = vst.msk [vmem:[%s12303_s19 + $0x60] sm:$0xf] %vm3379_vm1, %v9809_v47  ;;  %v4692_v16 = vcombine.low %v13038_v22, %v3705_v63  ;;  %v4693_v28 = vcombine.high %v13038_v22, %v3705_v63  ;;  %v7288_v49 = vrot.slane %v7280_v44, %v11261_v56  ;;  %v13236_v47 = vpop.permute.xlu1 %6434 }
 0x407   : > { %8972 = vst.msk [vmem:[%s12303_s19 + $0xa0] sm:$0xf] %vm3379_vm1, %v9825_v33  ;;  %8988 = vst.msk [vmem:[%s12303_s19 + $0xe0] sm:$0xf] %vm3379_vm1, %v9841_v40  ;;  %v7295_v46 = vrot.slane %v7281_v36, %v11261_v56  ;;  %v7304_v55 = vrot.slane %v7296_v18, %v11261_v56  ;;  %v7311_v30 = vrot.slane %v7297_v52, %v11261_v56 }
 0x408   : > { %v13207_v61 = vrot.slane %v4744_v4, %v11259_v54  ;;  %v13210_v3 = vrot.slane %v4745_v13, %v11259_v54  ;;  %v4700_v32 = vrot.slane %v4692_v16, %v11259_v54  ;;  %v4707_v31 = vrot.slane %v4693_v28, %v11259_v54 }
 0x409   : > { %v8336_v22 = vcombine.low %v7288_v49, %v7295_v46  ;;  %v9571_v63 = vcombine.high %v7288_v49, %v7295_v46  ;;  %v8352_v25 = vcombine.low %v7304_v55, %v7311_v30  ;;  %v9572_v21 = vcombine.high %v7304_v55, %v7311_v30 }
 0x40a   : > { %v4708_v53 = vcombine.low %v13139_v6, %v4700_v32  ;;  %v4709_v2 = vcombine.high %v13139_v6, %v4700_v32  ;;  %v4724_v7 = vcombine.low %v13142_v0, %v4707_v31  ;;  %v4725_v50 = vcombine.high %v13142_v0, %v4707_v31 }
 0x40b   : > { %v8343_v35 = vrot.slane %v8336_v22, %v11259_v54  ;;  %v8351_v45 = vrot.slane %v9571_v63, %v11259_v54  ;;  %v8359_v43 = vrot.slane %v8352_v25, %v11259_v54  ;;  %v8367_v12 = vrot.slane %v9572_v21, %v11259_v54 }
 0x40c   : > { %v4716_v11 = vrot.slane %v4708_v53, %v11261_v56  ;;  %v4723_v59 = vrot.slane %v4709_v2, %v11261_v56  ;;  %v4732_v37 = vrot.slane %v4724_v7, %v11261_v56  ;;  %v4739_v6 = vrot.slane %v4725_v50, %v11261_v56  ;;  %v3653_v53 = vpop.permute.xlu0 %3652 }
 0x40d   : > { %v8368_v39 = vcombine.low %v8343_v35, %v8351_v45  ;;  %v8369_v1 = vcombine.high %v8343_v35, %v8351_v45  ;;  %v8384_v38 = vcombine.low %v8359_v43, %v8367_v12  ;;  %v8385_v0 = vcombine.high %v8359_v43, %v8367_v12  ;;  %v13262_v45 = vpop.permute.xlu1 %3606 }
 0x40e   : > { %v5764_v51 = vcombine.low %v4716_v11, %v4723_v59  ;;  %v9470_v24 = vcombine.high %v4716_v11, %v4723_v59  ;;  %v5780_v8 = vcombine.low %v4732_v37, %v4739_v6  ;;  %v9471_v60 = vcombine.high %v4732_v37, %v4739_v6 }
 0x40f   : > { %v8376_v58 = vrot.slane %v8368_v39, %v11261_v56  ;;  %v8383_v62 = vrot.slane %v8369_v1, %v11261_v56  ;;  %v8392_v9 = vrot.slane %v8384_v38, %v11261_v56  ;;  %v8399_v29 = vrot.slane %v8385_v0, %v11261_v56 }
 0x410   : > { %v5771_v33 = vrot.slane %v5764_v51, %v11259_v54  ;;  %v5779_v40 = vrot.slane %v9470_v24, %v11259_v54  ;;  %v5787_v44 = vrot.slane %v5780_v8, %v11259_v54  ;;  %v5795_v36 = vrot.slane %v9471_v60, %v11259_v54 }
 0x411   : > { %v8400_v18 = vcombine.low %v8376_v58, %v8392_v9  ;;  %v8401_v52 = vcombine.high %v8376_v58, %v8392_v9  ;;  %v8402_v4 = vcombine.low %v8383_v62, %v8399_v29  ;;  %v8403_v13 = vcombine.high %v8383_v62, %v8399_v29  ;;  %v3701_v62 = vpop.permute.xlu0 %3700 }
 0x412   : > { %v5796_v16 = vcombine.low %v5771_v33, %v5779_v40  ;;  %v5797_v28 = vcombine.high %v5771_v33, %v5779_v40  ;;  %v5812_v49 = vcombine.low %v5787_v44, %v5795_v36  ;;  %v5813_v46 = vcombine.high %v5787_v44, %v5795_v36  ;;  %v3655_v40 = vpop.permute.xlu1 %3654 }
 0x413   : > { %v9796_v55 = vpack.c.bf16 %v8400_v18, %v8400_v18  ;;  %v9812_v30 = vpack.c.bf16 %v8401_v52, %v8401_v52  ;;  %v9828_v32 = vpack.c.bf16 %v8402_v4, %v8402_v4  ;;  %v9844_v31 = vpack.c.bf16 %v8403_v13, %v8403_v13 }
 0x414   : > { %v5804_v22 = vrot.slane %v5796_v16, %v11261_v56  ;;  %v5811_v63 = vrot.slane %v5797_v28, %v11261_v56  ;;  %v5820_v25 = vrot.slane %v5812_v49, %v11261_v56  ;;  %v5827_v21 = vrot.slane %v5813_v46, %v11261_v56 }
 0x415   : > { %8943 = vst.msk [vmem:[%s12303_s19 + $0x2c] sm:$0xf] %vm3379_vm1, %v9796_v55  ;;  %8959 = vst.msk [vmem:[%s12303_s19 + $0x6c] sm:$0xf] %vm3379_vm1, %v9812_v30  ;;  %v4760_v2 = vcombine.low %v13148_v26, %v13172_v27  ;;  %v4761_v7 = vcombine.high %v13148_v26, %v13172_v27  ;;  %v7452_v50 = vcombine.low %v12340_v57, %v13214_v23 }
 0x416   : > { %8975 = vst.msk [vmem:[%s12303_s19 + $0xac] sm:$0xf] %vm3379_vm1, %v9828_v32  ;;  %8991 = vst.msk [vmem:[%s12303_s19 + $0xec] sm:$0xf] %vm3379_vm1, %v9844_v31  ;;  %v7453_v35 = vcombine.high %v12340_v57, %v13214_v23  ;;  %v5828_v43 = vcombine.low %v5804_v22, %v5820_v25  ;;  %v5829_v12 = vcombine.high %v5804_v22, %v5820_v25  ;;  %v13318_v25 = vpop.permute.xlu0 %6380 }
 0x417   : > { %v5830_v11 = vcombine.low %v5811_v63, %v5827_v21  ;;  %v5831_v59 = vcombine.high %v5811_v63, %v5827_v21  ;;  %v4768_v37 = vrot.slane %v4760_v2, %v11259_v54  ;;  %v4775_v26 = vrot.slane %v4761_v7, %v11259_v54 }
 0x418   : > { %v13267_v27 = vrot.slane %v7452_v50, %v11259_v54  ;;  %v13270_v6 = vrot.slane %v7453_v35, %v11259_v54  ;;  %v9735_v57 = vpack.c.bf16 %v5828_v43, %v5828_v43  ;;  %v9751_v23 = vpack.c.bf16 %v5829_v12, %v5829_v12 }
 0x419   : > { %v9767_v39 = vpack.c.bf16 %v5830_v11, %v5830_v11  ;;  %v9783_v1 = vpack.c.bf16 %v5831_v59, %v5831_v59  ;;  %v4776_v38 = vcombine.low %v13207_v61, %v4768_v37  ;;  %v4777_v0 = vcombine.high %v13207_v61, %v4768_v37 }
 0x41a   : > { %v4792_v51 = vcombine.low %v13210_v3, %v4775_v26  ;;  %v4793_v24 = vcombine.high %v13210_v3, %v4775_v26  ;;  %6170 = vst.msk [vmem:[%s12188_s20 + $0x38] sm:$0xf] %vm3379_vm1, %v9735_v57  ;;  %6186 = vst.msk [vmem:[%s12188_s20 + $0x78] sm:$0xf] %vm3379_vm1, %v9751_v23  ;;  %v7520_v8 = vcombine.low %v12356_v42, %v13236_v47  ;;  %v3703_v26 = vpop.permute.xlu1 %3702 }
 0x41b   : > { %6202 = vst.msk [vmem:[%s12188_s20 + $0xb8] sm:$0xf] %vm3379_vm1, %v9767_v39  ;;  %6218 = vst.msk [vmem:[%s12188_s20 + $0xf8] sm:$0xf] %vm3379_vm1, %v9783_v1  ;;  %v7521_v60 = vcombine.high %v12356_v42, %v13236_v47  ;;  %v4540_v61 = vcombine.low %v12238_v48, %v3653_v53  ;;  %v4541_v58 = vcombine.high %v12238_v48, %v3653_v53 }
 0x41c   : > { %v4784_v3 = vrot.slane %v4776_v38, %v11261_v56  ;;  %v4791_v9 = vrot.slane %v4777_v0, %v11261_v56  ;;  %v4800_v29 = vrot.slane %v4792_v51, %v11261_v56  ;;  %v4807_v33 = vrot.slane %v4793_v24, %v11261_v56 }
 0x41d   : > { %v13295_v44 = vrot.slane %v7520_v8, %v11259_v54  ;;  %v13298_v36 = vrot.slane %v7521_v60, %v11259_v54  ;;  %v4548_v42 = vrot.slane %v4540_v61, %v11259_v54  ;;  %v4555_v48 = vrot.slane %v4541_v58, %v11259_v54 }
 0x41e   : > { %v5832_v47 = vcombine.low %v4784_v3, %v4791_v9  ;;  %v9472_v18 = vcombine.high %v4784_v3, %v4791_v9  ;;  %v5848_v52 = vcombine.low %v4800_v29, %v4807_v33  ;;  %v9473_v4 = vcombine.high %v4800_v29, %v4807_v33 }
 0x41f   : > { %v4608_v13 = vcombine.low %v12244_v15, %v3655_v40  ;;  %v4609_v16 = vcombine.high %v12244_v15, %v3655_v40  ;;  %v4556_v28 = vcombine.low %v13230_v19, %v3701_v62  ;;  %v4557_v49 = vcombine.high %v13230_v19, %v3701_v62  ;;  %v6429_v62 = vpop.permute.xlu0 %6428 }
 0x420   : > { %v5839_v46 = vrot.slane %v5832_v47, %v11259_v54  ;;  %v5847_v55 = vrot.slane %v9472_v18, %v11259_v54  ;;  %v5855_v30 = vrot.slane %v5848_v52, %v11259_v54  ;;  %v5863_v32 = vrot.slane %v9473_v4, %v11259_v54  ;;  %v13342_v4 = vpop.permute.xlu1 %6382 }
 0x421   : > { %v13311_v31 = vrot.slane %v4608_v13, %v11259_v54  ;;  %v13314_v22 = vrot.slane %v4609_v16, %v11259_v54  ;;  %v4564_v15 = vrot.slane %v4556_v28, %v11259_v54  ;;  %v4571_v63 = vrot.slane %v4557_v49, %v11259_v54 }
 0x422   : > { %v5864_v19 = vcombine.low %v5839_v46, %v5847_v55  ;;  %v5865_v21 = vcombine.high %v5839_v46, %v5847_v55  ;;  %v5880_v53 = vcombine.low %v5855_v30, %v5863_v32  ;;  %v5881_v2 = vcombine.high %v5855_v30, %v5863_v32 }
 0x423   : > { %v4572_v7 = vcombine.low %v4548_v42, %v4564_v15  ;;  %v4573_v50 = vcombine.high %v4548_v42, %v4564_v15  ;;  %v4588_v35 = vcombine.low %v4555_v48, %v4571_v63  ;;  %v4589_v43 = vcombine.high %v4555_v48, %v4571_v63 }
 0x424   : > { %v5872_v12 = vrot.slane %v5864_v19, %v11261_v56  ;;  %v5879_v11 = vrot.slane %v5865_v21, %v11261_v56  ;;  %v5888_v59 = vrot.slane %v5880_v53, %v11261_v56  ;;  %v5895_v37 = vrot.slane %v5881_v2, %v11261_v56 }
 0x425   : > { %v4580_v57 = vrot.slane %v4572_v7, %v11261_v56  ;;  %v4587_v23 = vrot.slane %v4573_v50, %v11261_v56  ;;  %v4596_v39 = vrot.slane %v4588_v35, %v11261_v56  ;;  %v4603_v1 = vrot.slane %v4589_v43, %v11261_v56 }
 0x426   : > { %v5896_v38 = vcombine.low %v5872_v12, %v5888_v59  ;;  %v5897_v0 = vcombine.high %v5872_v12, %v5888_v59  ;;  %v5898_v51 = vcombine.low %v5879_v11, %v5895_v37  ;;  %v5899_v24 = vcombine.high %v5879_v11, %v5895_v37 }
 0x427   : > { %v5628_v8 = vcombine.low %v4580_v57, %v4587_v23  ;;  %v9466_v60 = vcombine.high %v4580_v57, %v4587_v23  ;;  %v5644_v61 = vcombine.low %v4596_v39, %v4603_v1  ;;  %v9467_v58 = vcombine.high %v4596_v39, %v4603_v1  ;;  %v6431_v57 = vpop.permute.xlu1 %6430  ;;  %v6473_v23 = vpop.permute.xlu0 %6472 }
 0x428   : > { %v9736_v3 = vpack.c.bf16 %v5896_v38, %v5896_v38  ;;  %v9752_v9 = vpack.c.bf16 %v5897_v0, %v5897_v0  ;;  %v9768_v29 = vpack.c.bf16 %v5898_v51, %v5898_v51  ;;  %v9784_v33 = vpack.c.bf16 %v5899_v24, %v5899_v24 }
 0x429   : > { %v5635_v40 = vrot.slane %v5628_v8, %v11259_v54  ;;  %v5643_v42 = vrot.slane %v9466_v60, %v11259_v54  ;;  %v5651_v48 = vrot.slane %v5644_v61, %v11259_v54  ;;  %v5659_v47 = vrot.slane %v9467_v58, %v11259_v54 }
 0x42a   : > { %6171 = vst.msk [vmem:[%s12188_s20 + $0x3c] sm:$0xf] %vm3379_vm1, %v9736_v3  ;;  %6187 = vst.msk [vmem:[%s12188_s20 + $0x7c] sm:$0xf] %vm3379_vm1, %v9752_v9  ;;  %v4624_v18 = vcombine.low %v13262_v45, %v3703_v26  ;;  %v4625_v52 = vcombine.high %v13262_v45, %v3703_v26  ;;  %v7316_v13 = vcombine.low %v12353_v20, %v6429_v62 }
 0x42b   : > { %6203 = vst.msk [vmem:[%s12188_s20 + $0xbc] sm:$0xf] %vm3379_vm1, %v9768_v29  ;;  %6219 = vst.msk [vmem:[%s12188_s20 + $0xfc] sm:$0xf] %vm3379_vm1, %v9784_v33  ;;  %v7317_v16 = vcombine.high %v12353_v20, %v6429_v62  ;;  %v5660_v28 = vcombine.low %v5635_v40, %v5643_v42  ;;  %v5661_v49 = vcombine.high %v5635_v40, %v5643_v42 }
 0x42c   : > { %v5676_v46 = vcombine.low %v5651_v48, %v5659_v47  ;;  %v5677_v55 = vcombine.high %v5651_v48, %v5659_v47  ;;  %v4632_v30 = vrot.slane %v4624_v18, %v11259_v54  ;;  %v4639_v32 = vrot.slane %v4625_v52, %v11259_v54 }
 0x42d   : > { %v13349_v15 = vrot.slane %v7316_v13, %v11259_v54  ;;  %v13352_v63 = vrot.slane %v7317_v16, %v11259_v54  ;;  %v5668_v45 = vrot.slane %v5660_v28, %v11261_v56  ;;  %v5675_v19 = vrot.slane %v5661_v49, %v11261_v56 }
 0x42e   : > { %v5684_v20 = vrot.slane %v5676_v46, %v11261_v56  ;;  %v5691_v21 = vrot.slane %v5677_v55, %v11261_v56  ;;  %v4640_v53 = vcombine.low %v13311_v31, %v4632_v30  ;;  %v4641_v2 = vcombine.high %v13311_v31, %v4632_v30 }
 0x42f   : > { %v4656_v7 = vcombine.low %v13314_v22, %v4639_v32  ;;  %v4657_v50 = vcombine.high %v13314_v22, %v4639_v32  ;;  %v7384_v60 = vcombine.low %v12359_v34, %v6431_v57  ;;  %v7385_v61 = vcombine.high %v12359_v34, %v6431_v57 }
 0x430   : > { %v5692_v35 = vcombine.low %v5668_v45, %v5684_v20  ;;  %v5693_v43 = vcombine.high %v5668_v45, %v5684_v20  ;;  %v5694_v12 = vcombine.low %v5675_v19, %v5691_v21  ;;  %v5695_v11 = vcombine.high %v5675_v19, %v5691_v21 }
 0x431   : > { %v4648_v59 = vrot.slane %v4640_v53, %v11261_v56  ;;  %v4655_v37 = vrot.slane %v4641_v2, %v11261_v56  ;;  %v4664_v26 = vrot.slane %v4656_v7, %v11261_v56  ;;  %v4671_v31 = vrot.slane %v4657_v50, %v11261_v56 }
 0x432   : > { %v9733_v39 = vpack.c.bf16 %v5692_v35, %v5692_v35  ;;  %v9749_v22 = vpack.c.bf16 %v5693_v43, %v5693_v43  ;;  %v9765_v1 = vpack.c.bf16 %v5694_v12, %v5694_v12  ;;  %v9781_v38 = vpack.c.bf16 %v5695_v11, %v5695_v11  ;;  %v6479_v12 = vpop.permute.xlu1 %6478  ;;  %v6477_v11 = vpop.permute.xlu0 %6476 }
 0x433   : > { %v5696_v0 = vcombine.low %v4648_v59, %v4655_v37  ;;  %v9468_v51 = vcombine.high %v4648_v59, %v4655_v37  ;;  %v5712_v24 = vcombine.low %v4664_v26, %v4671_v31  ;;  %v9469_v8 = vcombine.high %v4664_v26, %v4671_v31 }
 0x434   : > { %6168 = vst.msk [vmem:[%s12188_s20 + $0x30] sm:$0xf] %vm3379_vm1, %v9733_v39  ;;  %6184 = vst.msk [vmem:[%s12188_s20 + $0x70] sm:$0xf] %vm3379_vm1, %v9749_v22  ;;  %v7196_v58 = vcombine.low %v12845_v5, %v6473_v23  ;;  %v7197_v62 = vcombine.high %v12845_v5, %v6473_v23  ;;  %v13383_v40 = vrot.slane %v7384_v60, %v11259_v54 }
 0x435   : > { %6200 = vst.msk [vmem:[%s12188_s20 + $0xb0] sm:$0xf] %vm3379_vm1, %v9765_v1  ;;  %6216 = vst.msk [vmem:[%s12188_s20 + $0xf0] sm:$0xf] %vm3379_vm1, %v9781_v38  ;;  %v5703_v3 = vrot.slane %v5696_v0, %v11259_v54  ;;  %v5711_v9 = vrot.slane %v9468_v51, %v11259_v54  ;;  %v5719_v29 = vrot.slane %v5712_v24, %v11259_v54 }
 0x436   : > { %v5727_v33 = vrot.slane %v9469_v8, %v11259_v54  ;;  %v13386_v42 = vrot.slane %v7385_v61, %v11259_v54  ;;  %v7204_v34 = vrot.slane %v7196_v58, %v11259_v54  ;;  %v7211_v48 = vrot.slane %v7197_v62, %v11259_v54 }
 0x437   : > { %v5728_v5 = vcombine.low %v5703_v3, %v5711_v9  ;;  %v5729_v47 = vcombine.high %v5703_v3, %v5711_v9  ;;  %v7400_v1 = vcombine.low %v13342_v4, %v6479_v12  ;;  %v7401_v38 = vcombine.high %v13342_v4, %v6479_v12 }
 0x438   : > { %v5744_v18 = vcombine.low %v5719_v29, %v5727_v33  ;;  %v5745_v52 = vcombine.high %v5719_v29, %v5727_v33  ;;  %v7212_v13 = vcombine.low %v12914_v41, %v7204_v34  ;;  %v7213_v16 = vcombine.high %v12914_v41, %v7204_v34 }
 0x439   : > { %v7228_v28 = vcombine.low %v12917_v14, %v7211_v48  ;;  %v7229_v49 = vcombine.high %v12917_v14, %v7211_v48  ;;  %v5736_v46 = vrot.slane %v5728_v5, %v11261_v56  ;;  %v5743_v55 = vrot.slane %v5729_v47, %v11261_v56 }
 0x43a   : > { %v5752_v30 = vrot.slane %v5744_v18, %v11261_v56  ;;  %v5759_v32 = vrot.slane %v5745_v52, %v11261_v56  ;;  %v7220_v45 = vrot.slane %v7212_v13, %v11261_v56  ;;  %v7227_v19 = vrot.slane %v7213_v16, %v11261_v56 }
 0x43b   : > { %v7236_v20 = vrot.slane %v7228_v28, %v11261_v56  ;;  %v7243_v41 = vrot.slane %v7229_v49, %v11261_v56  ;;  %v7332_v0 = vcombine.low %v13318_v25, %v6477_v11  ;;  %v7333_v51 = vcombine.high %v13318_v25, %v6477_v11 }
 0x43c   : > { %v5760_v14 = vcombine.low %v5736_v46, %v5752_v30  ;;  %v5761_v21 = vcombine.high %v5736_v46, %v5752_v30  ;;  %v5762_v53 = vcombine.low %v5743_v55, %v5759_v32  ;;  %v5763_v2 = vcombine.high %v5743_v55, %v5759_v32 }
 0x43d   : > { %v8268_v7 = vcombine.low %v7220_v45, %v7227_v19  ;;  %v9569_v50 = vcombine.high %v7220_v45, %v7227_v19  ;;  %v8284_v35 = vcombine.low %v7236_v20, %v7243_v41  ;;  %v9570_v43 = vcombine.high %v7236_v20, %v7243_v41 }
 0x43e   : > { %v9734_v59 = vpack.c.bf16 %v5760_v14, %v5760_v14  ;;  %v9750_v37 = vpack.c.bf16 %v5761_v21, %v5761_v21  ;;  %v9766_v26 = vpack.c.bf16 %v5762_v53, %v5762_v53  ;;  %v9782_v31 = vpack.c.bf16 %v5763_v2, %v5763_v2 }
 0x43f   : > { %v8275_v57 = vrot.slane %v8268_v7, %v11259_v54  ;;  %v8283_v23 = vrot.slane %v9569_v50, %v11259_v54  ;;  %v8291_v39 = vrot.slane %v8284_v35, %v11259_v54  ;;  %v8299_v22 = vrot.slane %v9570_v43, %v11259_v54 }
 0x440   : > { %6169 = vst.msk [vmem:[%s12188_s20 + $0x34] sm:$0xf] %vm3379_vm1, %v9734_v59  ;;  %6185 = vst.msk [vmem:[%s12188_s20 + $0x74] sm:$0xf] %vm3379_vm1, %v9750_v37 }
 0x441   : > { %6201 = vst.msk [vmem:[%s12188_s20 + $0xb4] sm:$0xf] %vm3379_vm1, %v9766_v26  ;;  %6217 = vst.msk [vmem:[%s12188_s20 + $0xf4] sm:$0xf] %vm3379_vm1, %v9782_v31  ;;  %v8300_v24 = vcombine.low %v8275_v57, %v8283_v23  ;;  %v8301_v8 = vcombine.high %v8275_v57, %v8283_v23  ;;  %v8316_v60 = vcombine.low %v8291_v39, %v8299_v22  ;;  %s10550_s20 = smov [#allocation17]  }
 0x442   : > { %v8317_v61 = vcombine.high %v8291_v39, %v8299_v22  ;;  %s10404_s0 = sshll.u32 %s10550_s20, 4  ;;  %s10405_s0 = int_to_ptr.vmem [resolvable:$false] %s10404_s0 }
 0x443   : > { %s10406_s10 = scalar_lea.vmem %s10405_s0, 8192  ;;  %p10407_p12 = scmp.lt.s32.totalorder %s13410_s12, %s10405_s0 }
 0x444   : > { %p10408_p0 = scmp.lt.s32.totalorder %s10406_s10, %s10400_s22 }
 0x446   : > { %p10409_p5 = por %p10408_p0, %p10407_p12 }
 0x448   : > { %p10410_p7 = pnand %p10409_p5, %p10403_p10 }
 0x44a   : > { %10413 = shalt.err (!%p10410_p7)
}
 0x44b   : > { %s10414_s21 = scalar_lea.hbm %s13408_s16, 4096  ;;  %s10418_s20 = scalar_lea.hbm %s13722_s11, 8192 }
 0x44c   : > { %p10415_p13 = scmp.ne.s32.totalorder %s13408_s16, %s10414_s21  ;;  %p10419_p6 = scmp.lt.u32.totalorder %s13408_s16, %s13722_s11 }
 0x44d   : > { %p10420_p1 = scmp.lt.u32.totalorder %s10418_s20, %s10414_s21  ;;  %p10422_p11 = scmp.lt.u32.totalorder %s10414_s21, %s13408_s16 }
 0x44e   : > { %p10416_p2 = pnand %p10415_p13, %p13720_p4 }
 0x44f   : > { %p10421_p3 = por %p10420_p1, %p10419_p6 }
 0x450   : > { %p10417_p8 = pneg %p10416_p2 }
 0x451   : > { %p10423_p9 = por %p10422_p11, %p10421_p3 }
 0x453   : > { %p10424_p10 = pnand %p10423_p9, %p10417_p8 }
 0x455   : > { %10427 = shalt.err (!%p10424_p10)
}
 0x456   : > { %s13723_s22 = smov 64   ;;  %v7408_v25 = vrot.slane %v7400_v1, %v11259_v54  ;;  %v7415_v4 = vrot.slane %v7401_v38, %v11259_v54  ;;  %v7340_v58 = vrot.slane %v7332_v0, %v11259_v54  ;;  %v7347_v62 = vrot.slane %v7333_v51, %v11259_v54  ;;  %s9058_s26 = sshll.u32 %s12303_s19, 4  ;;  %s13568_s26 = int_to_ptr.vmem [resolvable:$true] %s9058_s26 }
 0x457   : > { %10032 = dma.vmem_to_hbm [thread:$0]  (%p13720_p4), %s13410_s12, 4096, %s13408_s16, %s13430_s23, %s13723_s22, %s13723_s22, %s10549_s30   ;;  %v8308_v3 = vrot.slane %v8300_v24, %v11261_v56  ;;  %v8315_v9 = vrot.slane %v8301_v8, %v11261_v56  ;;  %v8324_v29 = vrot.slane %v8316_v60, %v11261_v56  ;;  %v8331_v33 = vrot.slane %v8317_v61, %v11261_v56 }
 0x458   : > { %v7416_v34 = vcombine.low %v13383_v40, %v7408_v25  ;;  %v7417_v48 = vcombine.high %v13383_v40, %v7408_v25  ;;  %v7432_v5 = vcombine.low %v13386_v42, %v7415_v4  ;;  %v7433_v47 = vcombine.high %v13386_v42, %v7415_v4  ;;  %s13724_s10 = sld [smem:[#allocation39_spill]]  ;;  %s10551_s1 = smov [#allocation19]  }
 0x459   : > { %v8332_v18 = vcombine.low %v8308_v3, %v8324_v29  ;;  %v8333_v52 = vcombine.high %v8308_v3, %v8324_v29  ;;  %v8334_v13 = vcombine.low %v8315_v9, %v8331_v33  ;;  %v8335_v16 = vcombine.high %v8315_v9, %v8331_v33  ;;  %s10432_s9 = sshll.u32 %s10551_s1, 4  ;;  %s10433_s9 = int_to_ptr.vmem [resolvable:$false] %s10432_s9 }
 0x45a   : > { %v7424_v28 = vrot.slane %v7416_v34, %v11261_v56  ;;  %v7431_v49 = vrot.slane %v7417_v48, %v11261_v56  ;;  %v7440_v46 = vrot.slane %v7432_v5, %v11261_v56  ;;  %v7447_v40 = vrot.slane %v7433_v47, %v11261_v56  ;;  %v6483_v34 = vpop.permute.xlu1 %6482  ;;  %v6481_v48 = vpop.permute.xlu0 %6480  ;;  %s10434_s20 = scalar_lea.vmem %s10433_s9, 8192  ;;  %p10435_p7 = scmp.lt.s32.totalorder %s13568_s26, %s10433_s9 }
 0x45b   : > { %v9795_v55 = vpack.c.bf16 %v8332_v18, %v8332_v18  ;;  %v9811_v30 = vpack.c.bf16 %v8333_v52, %v8333_v52  ;;  %v9827_v32 = vpack.c.bf16 %v8334_v13, %v8334_v13  ;;  %v9843_v42 = vpack.c.bf16 %v8335_v16, %v8335_v16 }
 0x45c   : > { %v8472_v45 = vcombine.low %v7424_v28, %v7431_v49  ;;  %v9575_v19 = vcombine.high %v7424_v28, %v7431_v49  ;;  %v8488_v20 = vcombine.low %v7440_v46, %v7447_v40  ;;  %v9576_v41 = vcombine.high %v7440_v46, %v7447_v40 }
 0x45d   : > { %8942 = vst.msk [vmem:[%s12303_s19 + $0x28] sm:$0xf] %vm3379_vm1, %v9795_v55  ;;  %8958 = vst.msk [vmem:[%s12303_s19 + $0x68] sm:$0xf] %vm3379_vm1, %v9811_v30  ;;  %v7348_v14 = vcombine.low %v13349_v15, %v7340_v58  ;;  %v7349_v21 = vcombine.high %v13349_v15, %v7340_v58  ;;  %v7364_v53 = vcombine.low %v13352_v63, %v7347_v62 }
 0x45e   : > { %8974 = vst.msk [vmem:[%s12303_s19 + $0xa8] sm:$0xf] %vm3379_vm1, %v9827_v32  ;;  %8990 = vst.msk [vmem:[%s12303_s19 + $0xe8] sm:$0xf] %vm3379_vm1, %v9843_v42  ;;  %v7365_v2 = vcombine.high %v13352_v63, %v7347_v62  ;;  %v8479_v7 = vrot.slane %v8472_v45, %v11259_v54  ;;  %v8487_v50 = vrot.slane %v9575_v19, %v11259_v54  ;;  %s13566_s21 = scalar_lea.hbm %s13724_s10, %s13030_s29  ;;  %s10428_s29 = scalar_lea.vmem %s13568_s26, 4096 }
 0x45f   : > { %v8495_v35 = vrot.slane %v8488_v20, %v11259_v54  ;;  %v8503_v43 = vrot.slane %v9576_v41, %v11259_v54  ;;  %v7356_v12 = vrot.slane %v7348_v14, %v11261_v56  ;;  %v7363_v11 = vrot.slane %v7349_v21, %v11261_v56  ;;  %p10429_p12 = scmp.ne.s32.totalorder %s13568_s26, %s10428_s29  ;;  %p10436_p13 = scmp.lt.s32.totalorder %s10434_s20, %s10428_s29 }
 0x460   : > { %v7372_v59 = vrot.slane %v7364_v53, %v11261_v56  ;;  %v7379_v15 = vrot.slane %v7365_v2, %v11261_v56  ;;  %v8504_v37 = vcombine.low %v8479_v7, %v8487_v50  ;;  %v8505_v26 = vcombine.high %v8479_v7, %v8487_v50 }
 0x461   : > { %v8520_v31 = vcombine.low %v8495_v35, %v8503_v43  ;;  %v8521_v63 = vcombine.high %v8495_v35, %v8503_v43  ;;  %v8404_v57 = vcombine.low %v7356_v12, %v7363_v11  ;;  %v9573_v23 = vcombine.high %v7356_v12, %v7363_v11  ;;  %p10430_p0 = pnand %p10429_p12, %p13720_p4  ;;  %p10437_p2 = por %p10436_p13, %p10435_p7 }
 0x462   : > { %v8420_v39 = vcombine.low %v7372_v59, %v7379_v15  ;;  %v9574_v22 = vcombine.high %v7372_v59, %v7379_v15  ;;  %v8512_v1 = vrot.slane %v8504_v37, %v11261_v56  ;;  %v8519_v38 = vrot.slane %v8505_v26, %v11261_v56 }
 0x463   : > { %v8528_v0 = vrot.slane %v8520_v31, %v11261_v56  ;;  %v8535_v51 = vrot.slane %v8521_v63, %v11261_v56  ;;  %v8411_v24 = vrot.slane %v8404_v57, %v11259_v54  ;;  %v8419_v8 = vrot.slane %v9573_v23, %v11259_v54  ;;  %p10431_p5 = pneg %p10430_p0 }
 0x464   : > { %v8427_v60 = vrot.slane %v8420_v39, %v11259_v54  ;;  %v8435_v61 = vrot.slane %v9574_v22, %v11259_v54  ;;  %v7536_v46 = vcombine.low %v13216_v10, %v6483_v34  ;;  %v7537_v40 = vcombine.high %v13216_v10, %v6483_v34 }
 0x465   : > { %v8536_v25 = vcombine.low %v8512_v1, %v8528_v0  ;;  %v8537_v4 = vcombine.high %v8512_v1, %v8528_v0  ;;  %v8538_v58 = vcombine.low %v8519_v38, %v8535_v51  ;;  %v8539_v62 = vcombine.high %v8519_v38, %v8535_v51  ;;  %p10438_p8 = pnand %p10437_p2, %p10431_p5 }
 0x466   : > { %v8436_v3 = vcombine.low %v8411_v24, %v8419_v8  ;;  %v8437_v9 = vcombine.high %v8411_v24, %v8419_v8  ;;  %v8452_v29 = vcombine.low %v8427_v60, %v8435_v61  ;;  %v8453_v33 = vcombine.high %v8427_v60, %v8435_v61 }
 0x467   : > { %v9798_v5 = vpack.c.bf16 %v8536_v25, %v8536_v25  ;;  %v9814_v47 = vpack.c.bf16 %v8537_v4, %v8537_v4  ;;  %v9830_v18 = vpack.c.bf16 %v8538_v58, %v8538_v58  ;;  %v9846_v52 = vpack.c.bf16 %v8539_v62, %v8539_v62 }
 0x468   : > { %v8444_v13 = vrot.slane %v8436_v3, %v11261_v56  ;;  %v8451_v16 = vrot.slane %v8437_v9, %v11261_v56  ;;  %v8460_v28 = vrot.slane %v8452_v29, %v11261_v56  ;;  %v8467_v49 = vrot.slane %v8453_v33, %v11261_v56 }
 0x469   : > { %8945 = vst.msk [vmem:[%s12303_s19 + $0x34] sm:$0xf] %vm3379_vm1, %v9798_v5  ;;  %8961 = vst.msk [vmem:[%s12303_s19 + $0x74] sm:$0xf] %vm3379_vm1, %v9814_v47  ;;  %v7468_v55 = vcombine.low %v13170_v17, %v6481_v48  ;;  %v7469_v30 = vcombine.high %v13170_v17, %v6481_v48  ;;  %v7544_v20 = vrot.slane %v7536_v46, %v11259_v54 }
 0x46a   : > { %8977 = vst.msk [vmem:[%s12303_s19 + $0xb4] sm:$0xf] %vm3379_vm1, %v9830_v18  ;;  %8993 = vst.msk [vmem:[%s12303_s19 + $0xf4] sm:$0xf] %vm3379_vm1, %v9846_v52  ;;  %v8468_v32 = vcombine.low %v8444_v13, %v8460_v28  ;;  %v8469_v42 = vcombine.high %v8444_v13, %v8460_v28  ;;  %v8470_v45 = vcombine.low %v8451_v16, %v8467_v49 }
 0x46b   : > { %v8471_v19 = vcombine.high %v8451_v16, %v8467_v49  ;;  %v7551_v41 = vrot.slane %v7537_v40, %v11259_v54  ;;  %v7476_v14 = vrot.slane %v7468_v55, %v11259_v54  ;;  %v7483_v10 = vrot.slane %v7469_v30, %v11259_v54 }
 0x46c   : > { %v9797_v21 = vpack.c.bf16 %v8468_v32, %v8468_v32  ;;  %v9813_v53 = vpack.c.bf16 %v8469_v42, %v8469_v42  ;;  %v9829_v2 = vpack.c.bf16 %v8470_v45, %v8470_v45  ;;  %v7552_v7 = vcombine.low %v13295_v44, %v7544_v20 }
 0x46d   : > { %v9845_v17 = vpack.c.bf16 %v8471_v19, %v8471_v19  ;;  %v7553_v50 = vcombine.high %v13295_v44, %v7544_v20  ;;  %v7568_v35 = vcombine.low %v13298_v36, %v7551_v41  ;;  %v7569_v43 = vcombine.high %v13298_v36, %v7551_v41 }
 0x46e   : > { %8944 = vst.msk [vmem:[%s12303_s19 + $0x30] sm:$0xf] %vm3379_vm1, %v9797_v21  ;;  %8960 = vst.msk [vmem:[%s12303_s19 + $0x70] sm:$0xf] %vm3379_vm1, %v9813_v53  ;;  %v7484_v12 = vcombine.low %v13267_v27, %v7476_v14  ;;  %v7485_v11 = vcombine.high %v13267_v27, %v7476_v14  ;;  %v7500_v59 = vcombine.low %v13270_v6, %v7483_v10 }
 0x46f   : > { %8976 = vst.msk [vmem:[%s12303_s19 + $0xb0] sm:$0xf] %vm3379_vm1, %v9829_v2  ;;  %8992 = vst.msk [vmem:[%s12303_s19 + $0xf0] sm:$0xf] %vm3379_vm1, %v9845_v17  ;;  %v7501_v44 = vcombine.high %v13270_v6, %v7483_v10  ;;  %v7560_v15 = vrot.slane %v7552_v7, %v11261_v56  ;;  %v7567_v36 = vrot.slane %v7553_v50, %v11261_v56 }
 0x470   : > { %v7576_v37 = vrot.slane %v7568_v35, %v11261_v56  ;;  %v7583_v26 = vrot.slane %v7569_v43, %v11261_v56  ;;  %v7492_v31 = vrot.slane %v7484_v12, %v11261_v56  ;;  %v7499_v63 = vrot.slane %v7485_v11, %v11261_v56 }
 0x471   : > { %v7508_v57 = vrot.slane %v7500_v59, %v11261_v56  ;;  %v7515_v27 = vrot.slane %v7501_v44, %v11261_v56  ;;  %v8608_v23 = vcombine.low %v7560_v15, %v7567_v36  ;;  %v9579_v39 = vcombine.high %v7560_v15, %v7567_v36 }
 0x472   : > { %v8624_v22 = vcombine.low %v7576_v37, %v7583_v26  ;;  %v9580_v6 = vcombine.high %v7576_v37, %v7583_v26  ;;  %v8540_v1 = vcombine.low %v7492_v31, %v7499_v63  ;;  %v9577_v38 = vcombine.high %v7492_v31, %v7499_v63 }
 0x473   : > { %v8556_v0 = vcombine.low %v7508_v57, %v7515_v27  ;;  %v9578_v51 = vcombine.high %v7508_v57, %v7515_v27  ;;  %v8615_v24 = vrot.slane %v8608_v23, %v11259_v54  ;;  %v8623_v8 = vrot.slane %v9579_v39, %v11259_v54 }
 0x474   : > { %v8631_v60 = vrot.slane %v8624_v22, %v11259_v54  ;;  %v8639_v61 = vrot.slane %v9580_v6, %v11259_v54  ;;  %v8547_v25 = vrot.slane %v8540_v1, %v11259_v54  ;;  %v8555_v4 = vrot.slane %v9577_v38, %v11259_v54 }
 0x475   : > { %v8563_v58 = vrot.slane %v8556_v0, %v11259_v54  ;;  %v8571_v62 = vrot.slane %v9578_v51, %v11259_v54  ;;  %v8640_v3 = vcombine.low %v8615_v24, %v8623_v8  ;;  %v8641_v9 = vcombine.high %v8615_v24, %v8623_v8 }
 0x476   : > { %v8656_v29 = vcombine.low %v8631_v60, %v8639_v61  ;;  %v8657_v33 = vcombine.high %v8631_v60, %v8639_v61  ;;  %v8572_v34 = vcombine.low %v8547_v25, %v8555_v4  ;;  %v8573_v48 = vcombine.high %v8547_v25, %v8555_v4 }
 0x477   : > { %v8588_v5 = vcombine.low %v8563_v58, %v8571_v62  ;;  %v8589_v47 = vcombine.high %v8563_v58, %v8571_v62  ;;  %v8648_v18 = vrot.slane %v8640_v3, %v11261_v56  ;;  %v8655_v52 = vrot.slane %v8641_v9, %v11261_v56 }
 0x478   : > { %v8664_v13 = vrot.slane %v8656_v29, %v11261_v56  ;;  %v8671_v16 = vrot.slane %v8657_v33, %v11261_v56  ;;  %v8580_v28 = vrot.slane %v8572_v34, %v11261_v56  ;;  %v8587_v54 = vrot.slane %v8573_v48, %v11261_v56 }
 0x479   : > { %v8596_v49 = vrot.slane %v8588_v5, %v11261_v56  ;;  %v8603_v46 = vrot.slane %v8589_v47, %v11261_v56 }
 0x47a   : > { %v8672_v40 = vcombine.low %v8648_v18, %v8664_v13  ;;  %v8673_v55 = vcombine.high %v8648_v18, %v8664_v13  ;;  %v8674_v30 = vcombine.low %v8655_v52, %v8671_v16  ;;  %v8675_v32 = vcombine.high %v8655_v52, %v8671_v16 }
 0x47b   : > { %v8604_v42 = vcombine.low %v8580_v28, %v8596_v49  ;;  %v8605_v45 = vcombine.high %v8580_v28, %v8596_v49  ;;  %v8606_v19 = vcombine.low %v8587_v54, %v8603_v46  ;;  %v8607_v20 = vcombine.high %v8587_v54, %v8603_v46 }
 0x47c   : > { %v9800_v41 = vpack.c.bf16 %v8672_v40, %v8672_v40  ;;  %v9816_v14 = vpack.c.bf16 %v8673_v55, %v8673_v55  ;;  %v9832_v56 = vpack.c.bf16 %v8674_v30, %v8674_v30  ;;  %v9848_v10 = vpack.c.bf16 %v8675_v32, %v8675_v32 }
 0x47d   : > { %v9799_v21 = vpack.c.bf16 %v8604_v42, %v8604_v42  ;;  %v9815_v53 = vpack.c.bf16 %v8605_v45, %v8605_v45  ;;  %v9831_v2 = vpack.c.bf16 %v8606_v19, %v8606_v19  ;;  %v9847_v17 = vpack.c.bf16 %v8607_v20, %v8607_v20 }
 0x47e   : > { %8947 = vst.msk [vmem:[%s12303_s19 + $0x3c] sm:$0xf] %vm3379_vm1, %v9800_v41  ;;  %8963 = vst.msk [vmem:[%s12303_s19 + $0x7c] sm:$0xf] %vm3379_vm1, %v9816_v14 }
 0x47f   : > { %8979 = vst.msk [vmem:[%s12303_s19 + $0xbc] sm:$0xf] %vm3379_vm1, %v9832_v56  ;;  %8995 = vst.msk [vmem:[%s12303_s19 + $0xfc] sm:$0xf] %vm3379_vm1, %v9848_v10 }
 0x480   : > { %8946 = vst.msk [vmem:[%s12303_s19 + $0x38] sm:$0xf] %vm3379_vm1, %v9799_v21  ;;  %8962 = vst.msk [vmem:[%s12303_s19 + $0x78] sm:$0xf] %vm3379_vm1, %v9815_v53 }
 0x481   : > { %8978 = vst.msk [vmem:[%s12303_s19 + $0xb8] sm:$0xf] %vm3379_vm1, %v9831_v2  ;;  %8994 = vst.msk [vmem:[%s12303_s19 + $0xf8] sm:$0xf] %vm3379_vm1, %v9847_v17 }
 0x482   : > { %10441 = shalt.err (!%p10438_p8)
}
 0x483   : > { %s10442_s19 = scalar_lea.hbm %s13566_s21, 4096  ;;  %s10446_s16 = scalar_lea.hbm %s13724_s10, 8192 }
 0x484   : > { %p10443_p6 = scmp.ne.s32.totalorder %s13566_s21, %s10442_s19  ;;  %p10447_p11 = scmp.lt.u32.totalorder %s13566_s21, %s13724_s10 }
 0x485   : > { %p10448_p9 = scmp.lt.u32.totalorder %s10446_s16, %s10442_s19  ;;  %p10450_p12 = scmp.lt.u32.totalorder %s10442_s19, %s13566_s21 }
 0x486   : > { %p10444_p1 = pnand %p10443_p6, %p13720_p4 }
 0x487   : > { %p10449_p10 = por %p10448_p9, %p10447_p11 }
 0x488   : > { %p10445_p3 = pneg %p10444_p1 }
 0x489   : > { %p10451_p0 = por %p10450_p12, %p10449_p10 }
 0x48b   : > { %p10452_p5 = pnand %p10451_p0, %p10445_p3 }
 0x48d   : > { %10455 = shalt.err (!%p10452_p5)
}
 0x48e   : > { %10033 = dma.vmem_to_hbm [thread:$0]  (%p13720_p4), %s13568_s26, 4096, %s13566_s21, %s13430_s23, %s13723_s22, %s13723_s22, %s10549_s30  }
 0x48f PF: > { %s9073_s29 = sand.u32 1, %s10510_s13   ;;  %p13725_p7 = scmp.ne.s32.totalorder %s13687_s8, 0 }
 0x490   : > { %p13726_p13 = scmp.ge.s32.totalorder %s10530_s18, 2  ;;  %s9074_s20 = scalar_lea.sflag [#allocation4], %s9073_s29 }
 0x492   : > { %p10064_p2 = pnand %p13726_p13, %p13725_p7 }
 0x494   : > { %10501 = dma.done.wait (!%p10064_p2), %s9074_s20, 4096  }
 0x495   : > { %10503 = vsyncadd (!%p10064_p2), %s9074_s20, 4294963200  ;;  %s13727_s28 = sadd.s32 4294967294, %s10530_s18  }
 0x496   : > { %s9082_s19 = sand.u32 1, %s13727_s28  }
 0x497   : > { %s9083_s0 = scalar_lea.sflag [#allocation18], %s9082_s19 }
 0x498   : > { %10505 = dma.done.wait (!%p10064_p2), %s9083_s0, 8192  }
 0x499   : > { %10507 = vsyncadd (!%p10064_p2), %s9083_s0, 4294959104  ;;  %s34_s18 = sadd.s32 1, %s10530_s18   ;;  %s13728_s13 = smov %s10514_s14 }
 0x49a   : > { %p31_p4 = scmp.ge.s32.totalorder %s34_s18, 4   ;;  %s13729_s14 = smov %s10518_s15 }
 0x49b   : > { %s13730_s15 = smov %s10855_s24  ;;  %s13731_s16 = smov %s10526_s17 }
 0x49c   : > { %s13732_s17 = smov %s13734_s25  ;;  %33 = sbr.rel (!%p31_p4) target bundleno = 18 (0x12), region = 158 }
 0x4a3   :  { %9097 = vsyncpa [#allocation3], 1 }
 0x4a4   :  { %9099 = vsyncpa [#allocation3 + $0x1], 1 }
 0x4a5   :  { %9100 = vsyncpa [#allocation8], 1 }
 0x4a6   :  { %9101 = vsyncpa [#allocation11], 1 }
 0x4a7   :  { %9102 = vsyncpa [#allocation14], 1 }
 0x4a8   :  { %9103 = vsyncpa [#allocation4], 1 }
 0x4a9   :  { %9105 = vsyncpa [#allocation4 + $0x1], 1 }
 0x4aa   :  { %9106 = vsyncpa [#allocation18], 1 }
 0x4ab   :  { %9108 = vsyncpa [#allocation18 + $0x1], 1 }
 0x4ac   :  { %9109 = vsyncpa [#allocation5], 1 }
 0x4ad   :  { %9111 = vsyncpa [#allocation5 + $0x1], 1 }

// kernel: tpu_custom_call.1
= control target key start
LH: loop header
LB: loop body
LE: loop exit
PB: predicated region body
PF: predicated region fallthrough
CT: control target
= control target key end

     0   :  { %s13636_s0 = inlined_call_operand.hbm [shape: f32[2,2], index: 0, kind: input, shape index: {}]   ;;  %s13637_s1 = inlined_call_operand.hbm [shape: bf16[2,128,32], index: 1, kind: input, shape index: {}]   ;;  %s13638_s2 = inlined_call_operand.hbm [shape: bf16[32,32], index: 2, kind: input, shape index: {}]   ;;  %s13639_s3 = inlined_call_operand.hbm [shape: f32[1,32], index: 3, kind: input, shape index: {}]   ;;  %s13640_s4 = inlined_call_operand.hbm [shape: bf16[32,32], index: 4, kind: input, shape index: {}]   ;;  %s13641_s5 = inlined_call_operand.hbm [shape: f32[1,32], index: 5, kind: input, shape index: {}]   ;;  %s13642_s6 = inlined_call_operand.hbm [shape: bf16[32,32], index: 6, kind: input, shape index: {}]   ;;  %s13643_s7 = inlined_call_operand.hbm [shape: f32[1,32], index: 7, kind: input, shape index: {}]   ;;  %s13644_s8 = inlined_call_operand.hbm [shape: bf16[2,4,128,8], index: 8, kind: output, shape index: {0}]   ;;  %s13645_s9 = inlined_call_operand.hbm [shape: bf16[2,4,128,8], index: 9, kind: output, shape index: {1}]   ;;  %s13646_s10 = inlined_call_operand.hbm [shape: bf16[2,4,128,8], index: 10, kind: output, shape index: {2}]  }
   0x1   :  { %13673 = sst [smem:[#allocation35_spill]] %s13636_s0 }
   0x2   :  { %13674 = sst [smem:[#allocation36_spill]] %s13637_s1 }
   0x3   :  { %13675 = sst [smem:[#allocation37_spill]] %s13644_s8 }
   0x4   :  { %13676 = sst [smem:[#allocation38_spill]] %s13645_s9 }
   0x5   :  { %13677 = sst [smem:[#allocation39_spill]] %s13646_s10 }
   0x6   :  { %16 = vsyncpa [#allocation5], 0 }
   0x7   :  { %17 = vsyncpa [#allocation3], 0 }
   0x8   :  { %19 = vsyncpa [#allocation3 + $0x1], 0 }
   0x9   :  { %20 = vsyncpa [#allocation8], 0 }
   0xa   :  { %21 = vsyncpa [#allocation11], 0 }
   0xb   :  { %22 = vsyncpa [#allocation14], 0 }
   0xc   :  { %23 = vsyncpa [#allocation4], 0 }
   0xd   :  { %25 = vsyncpa [#allocation4 + $0x1], 0 }
   0xe   :  { %26 = vsyncpa [#allocation18], 0 }
   0xf   :  { %28 = vsyncpa [#allocation18 + $0x1], 0  ;;  %s10607_s13 = smov 0   ;;  %s10609_s14 = smov 0  }
  0x10   :  { %s10611_s15 = smov 0   ;;  %s10613_s16 = smov 0  }
  0x11   :  { %s10615_s17 = smov 0   ;;  %s10617_s18 = smov 0  }
  0x12 LB: > { %13678 = sst [smem:[#allocation27_spill]] %s10522_s16  ;;  %s10532_s19 = smov [#allocation7]   ;;  %s10530_s18 = sphi %s10617_s18, %s34_s18   ;;  %s10526_s17 = sphi %s10615_s17, %s13732_s17   ;;  %s10522_s16 = sphi %s10613_s16, %s13731_s16   ;;  %s10518_s15 = sphi %s10611_s15, %s13730_s15   ;;  %s10514_s14 = sphi %s10609_s14, %s13729_s14   ;;  %s10510_s13 = sphi %s10607_s13, %s13728_s13  }
  0x13   : > { %s331_s20 = sshll.u32 %s10532_s19, 4  ;;  %s10638_s21 = sadd.s32 4294967295, %s10530_s18   ;;  %s10643_s20 = int_to_ptr.vmem [resolvable:$true] %s331_s20 }
  0x14   : > { %p9283_p0 = scmp.ge.s32.totalorder %s10530_s18, 1  ;;  %p13651_p1 = scmp.eq.s32.totalorder %s10638_s21, 0 }
  0x15   : > { %p310_p2 = scmp.lt.s32.totalorder %s10530_s18, 3  ;;  %s10533_s23 = smov [#allocation10]  }
  0x16   : > { %s355_s24 = sshll.u32 %s10533_s23, 4  ;;  %s10534_s26 = smov [#allocation13]   ;;  %s10658_s24 = int_to_ptr.vmem [resolvable:$true] %s355_s24 }
  0x17   : > { %p10645_p3 = pnand %p9283_p0, %p310_p2  ;;  %s379_s27 = sshll.u32 %s10534_s26, 4  ;;  %s10660_s27 = int_to_ptr.vmem [resolvable:$true] %s379_s27 }
  0x18   : > { %s10161_s30 = scalar_lea.hbm %s13638_s2, 256 }
  0x19   : > { %s13679_s22 = scalar_select %p10645_p3, 1, 0 }
  0x1a   : > { %p10037_p5 = pneg %p10645_p3  ;;  %p10162_p7 = scmp.ne.s32.totalorder %s13638_s2, %s10161_s30 }
  0x1b   : > { %p10168_p11 = scmp.lt.u32.totalorder %s10161_s30, %s13638_s2 }
  0x1c   : > { %p10654_p6 = pnand %p10037_p5, %p13651_p1 }
  0x1e   : > { %p10670_p8 = pneg %p10654_p6 }
  0x20   : > { %p10164_p9 = pnand %p10670_p8, %p10162_p7 }
  0x22   : > { %p10165_p10 = pneg %p10164_p9 }
  0x24   : > { %p10170_p12 = pnand %p10168_p11, %p10165_p10 }
  0x26   : > { %10173 = shalt.err (!%p10170_p12)
}
  0x27   : > { %s10174_s28 = scalar_lea.vmem %s10643_s20, 256  ;;  %p10182_p5 = scmp.lt.s32.totalorder %s10643_s20, %s10643_s20 }
  0x28   : > { %p10175_p13 = scmp.ne.s32.totalorder %s10643_s20, %s10174_s28  ;;  %p10183_p4 = scmp.lt.s32.totalorder %s10174_s28, %s10174_s28 }
  0x2a   : > { %p10177_p0 = pnand %p10175_p13, %p10670_p8  ;;  %p10184_p7 = por %p10183_p4, %p10182_p5 }
  0x2c   : > { %p10178_p2 = pneg %p10177_p0 }
  0x2e   : > { %p10185_p9 = pnand %p10184_p7, %p10178_p2 }
  0x30   : > { %10188 = shalt.err (!%p10185_p9)
}
  0x31   : > { %s13654_s29 = smov 64   ;;  %s13655_s30 = smov 4  }
  0x32   : > { %10043 = dma.hbm_to_vmem [thread:$0]  (!%p10654_p6), %s13638_s2, 256, %s10643_s20, [#allocation8], %s13654_s29, %s13654_s29, %s13655_s30  }
  0x33   : > { %s10189_s28 = scalar_lea.hbm %s13640_s4, 256 }
  0x34   : > { %p10190_p4 = scmp.ne.s32.totalorder %s13640_s4, %s10189_s28  ;;  %p10196_p12 = scmp.lt.u32.totalorder %s10189_s28, %s13640_s4 }
  0x36   : > { %p10192_p10 = pnand %p10190_p4, %p10670_p8 }
  0x38   : > { %p10193_p11 = pneg %p10192_p10 }
  0x3a   : > { %p10198_p13 = pnand %p10196_p12, %p10193_p11 }
  0x3c   : > { %10201 = shalt.err (!%p10198_p13)
}
  0x3d   : > { %s10202_s20 = scalar_lea.vmem %s10658_s24, 256  ;;  %p10210_p7 = scmp.lt.s32.totalorder %s10658_s24, %s10658_s24 }
  0x3e   : > { %p10203_p0 = scmp.ne.s32.totalorder %s10658_s24, %s10202_s20  ;;  %p10211_p9 = scmp.lt.s32.totalorder %s10202_s20, %s10202_s20 }
  0x40   : > { %p10205_p2 = pnand %p10203_p0, %p10670_p8  ;;  %p10212_p4 = por %p10211_p9, %p10210_p7 }
  0x42   : > { %p10206_p5 = pneg %p10205_p2 }
  0x44   : > { %p10213_p10 = pnand %p10212_p4, %p10206_p5 }
  0x46   : > { %10216 = shalt.err (!%p10213_p10)
}
  0x47   : > { %10049 = dma.hbm_to_vmem [thread:$0]  (!%p10654_p6), %s13640_s4, 256, %s10658_s24, [#allocation11], %s13654_s29, %s13654_s29, %s13655_s30  }
  0x48   : > { %s10217_s11 = scalar_lea.hbm %s13642_s6, 256 }
  0x49   : > { %p10218_p11 = scmp.ne.s32.totalorder %s13642_s6, %s10217_s11  ;;  %p10224_p0 = scmp.lt.u32.totalorder %s10217_s11, %s13642_s6 }
  0x4b   : > { %p10220_p12 = pnand %p10218_p11, %p10670_p8 }
  0x4d   : > { %p10221_p13 = pneg %p10220_p12 }
  0x4f   : > { %p10226_p2 = pnand %p10224_p0, %p10221_p13 }
  0x51   : > { %10229 = shalt.err (!%p10226_p2)
}
  0x52   : > { %s10230_s24 = scalar_lea.vmem %s10660_s27, 256  ;;  %p10238_p4 = scmp.lt.s32.totalorder %s10660_s27, %s10660_s27 }
  0x53   : > { %p10231_p5 = scmp.ne.s32.totalorder %s10660_s27, %s10230_s24  ;;  %p10239_p10 = scmp.lt.s32.totalorder %s10230_s24, %s10230_s24 }
  0x55   : > { %p10233_p7 = pnand %p10231_p5, %p10670_p8  ;;  %p10240_p11 = por %p10239_p10, %p10238_p4 }
  0x57   : > { %p10234_p9 = pneg %p10233_p7 }
  0x59   : > { %p10241_p12 = pnand %p10240_p11, %p10234_p9 }
  0x5b   : > { %10244 = shalt.err (!%p10241_p12)
}
  0x5c   : > { %10055 = dma.hbm_to_vmem [thread:$0]  (!%p10654_p6), %s13642_s6, 256, %s10660_s27, [#allocation14], %s13654_s29, %s13654_s29, %s13655_s30  }
  0x5d   : > { %s13682_s0 = sld [smem:[#allocation35_spill]] }
  0x63   : > { %s10245_s16 = scalar_lea.hbm %s13682_s0, 32 }
  0x64   : > { %p10246_p13 = scmp.ne.s32.totalorder %s13682_s0, %s10245_s16  ;;  %p10252_p5 = scmp.lt.u32.totalorder %s10245_s16, %s13682_s0 }
  0x66   : > { %p10248_p0 = pnand %p10246_p13, %p10670_p8 }
  0x68   : > { %p10249_p2 = pneg %p10248_p0 }
  0x6a   : > { %p10254_p7 = pnand %p10252_p5, %p10249_p2 }
  0x6c   : > { %10257 = shalt.err (!%p10254_p7)
}
  0x6d   : > { %s10537_s28 = smov [#allocation2]   ;;  %s10538_s20 = smov [#allocation9]  }
  0x6e   : > { %10040 = dma.hbm_to_smem (!%p10654_p6), %s13682_s0, 32, %s10537_s28, [#allocation5]  }
  0x6f   : > { %s345_s8 = sshll.u32 %s10538_s20, 4  ;;  %s10539_s9 = smov [#allocation12]   ;;  %s346_s8 = int_to_ptr.vmem [resolvable:$true] %s345_s8 }
  0x70   : > { %s369_s10 = sshll.u32 %s10539_s9, 4  ;;  %s10258_s16 = scalar_lea.hbm %s13639_s3, 16  ;;  %s10762_s10 = int_to_ptr.vmem [resolvable:$true] %s369_s10 }
  0x71   : > { %p10259_p9 = scmp.ne.s32.totalorder %s13639_s3, %s10258_s16  ;;  %p10265_p11 = scmp.lt.u32.totalorder %s10258_s16, %s13639_s3 }
  0x73   : > { %p10261_p4 = pnand %p10259_p9, %p10670_p8 }
  0x75   : > { %p10262_p10 = pneg %p10261_p4 }
  0x77   : > { %p10267_p12 = pnand %p10265_p11, %p10262_p10 }
  0x79   : > { %10270 = shalt.err (!%p10267_p12)
}
  0x7a   : > { %s10271_s24 = scalar_lea.vmem %s346_s8, 16  ;;  %s10278_s20 = scalar_lea.vmem %s346_s8, 32 }
  0x7b   : > { %p10272_p13 = scmp.ne.s32.totalorder %s346_s8, %s10271_s24  ;;  %p10279_p5 = scmp.lt.s32.totalorder %s346_s8, %s346_s8 }
  0x7c   : > { %p10280_p7 = scmp.lt.s32.totalorder %s10278_s20, %s10271_s24 }
  0x7d   : > { %p10274_p0 = pnand %p10272_p13, %p10670_p8 }
  0x7e   : > { %p10281_p1 = por %p10280_p7, %p10279_p5 }
  0x7f   : > { %p10275_p2 = pneg %p10274_p0 }
  0x81   : > { %p10282_p3 = pnand %p10281_p1, %p10275_p2 }
  0x83   : > { %10285 = shalt.err (!%p10282_p3)
}
  0x84   : > { %10046 = dma.hbm_to_vmem [thread:$0]  (!%p10654_p6), %s13639_s3, 16, %s346_s8, [#allocation8]  }
  0x85   : > { %s10286_s23 = scalar_lea.hbm %s13641_s5, 16 }
  0x86   : > { %p10287_p9 = scmp.ne.s32.totalorder %s13641_s5, %s10286_s23  ;;  %p10293_p1 = scmp.lt.u32.totalorder %s10286_s23, %s13641_s5 }
  0x88   : > { %p10289_p4 = pnand %p10287_p9, %p10670_p8 }
  0x8a   : > { %p10290_p10 = pneg %p10289_p4 }
  0x8c   : > { %p10295_p3 = pnand %p10293_p1, %p10290_p10 }
  0x8e   : > { %10298 = shalt.err (!%p10295_p3)
}
  0x8f   : > { %s10299_s8 = scalar_lea.vmem %s10762_s10, 16  ;;  %s10306_s20 = scalar_lea.vmem %s10762_s10, 32 }
  0x90   : > { %p10300_p11 = scmp.ne.s32.totalorder %s10762_s10, %s10299_s8  ;;  %p10307_p0 = scmp.lt.s32.totalorder %s10762_s10, %s10762_s10 }
  0x91   : > { %p10308_p2 = scmp.lt.s32.totalorder %s10306_s20, %s10299_s8 }
  0x92   : > { %p10302_p12 = pnand %p10300_p11, %p10670_p8 }
  0x93   : > { %p10309_p5 = por %p10308_p2, %p10307_p0 }
  0x94   : > { %p10303_p13 = pneg %p10302_p12 }
  0x96   : > { %p10310_p7 = pnand %p10309_p5, %p10303_p13 }
  0x98   : > { %10313 = shalt.err (!%p10310_p7)
}
  0x99   : > { %10052 = dma.hbm_to_vmem [thread:$0]  (!%p10654_p6), %s13641_s5, 16, %s10762_s10, [#allocation11]  }
  0x9a   : > { %s10540_s12 = smov [#allocation15]   ;;  %s10314_s27 = scalar_lea.hbm %s13643_s7, 16 }
  0x9b   : > { %s393_s16 = sshll.u32 %s10540_s12, 4  ;;  %p10315_p9 = scmp.ne.s32.totalorder %s13643_s7, %s10314_s27  ;;  %s394_s16 = int_to_ptr.vmem [resolvable:$true] %s393_s16 }
  0x9c   : > { %p10321_p1 = scmp.lt.u32.totalorder %s10314_s27, %s13643_s7 }
  0x9d   : > { %p10317_p4 = pnand %p10315_p9, %p10670_p8 }
  0x9f   : > { %p10318_p10 = pneg %p10317_p4 }
  0xa1   : > { %p10323_p3 = pnand %p10321_p1, %p10318_p10 }
  0xa3   : > { %10326 = shalt.err (!%p10323_p3)
}
  0xa4   : > { %s10327_s10 = scalar_lea.vmem %s394_s16, 16  ;;  %s10334_s9 = scalar_lea.vmem %s394_s16, 32 }
  0xa5   : > { %p10328_p11 = scmp.ne.s32.totalorder %s394_s16, %s10327_s10  ;;  %p10335_p0 = scmp.lt.s32.totalorder %s394_s16, %s394_s16 }
  0xa6   : > { %p10336_p2 = scmp.lt.s32.totalorder %s10334_s9, %s10327_s10 }
  0xa7   : > { %p10330_p12 = pnand %p10328_p11, %p10670_p8 }
  0xa8   : > { %p10337_p5 = por %p10336_p2, %p10335_p0 }
  0xa9   : > { %p10331_p13 = pneg %p10330_p12 }
  0xab   : > { %p10338_p7 = pnand %p10337_p5, %p10331_p13 }
  0xad   : > { %10341 = shalt.err (!%p10338_p7)
}
  0xae   : > { %10058 = dma.hbm_to_vmem [thread:$0]  (!%p10654_p6), %s13643_s7, 16, %s394_s16, [#allocation14]  }
  0xaf   : > { %s13653_s19 = sadd.s32 4294967294, %s10530_s18   ;;  %s46_s25 = sadd.s32 1, %s10526_s17 }
  0xb0   : > { %s76_s23 = sadd.s32 1, %s10518_s15  ;;  %p48_p8 = scmp.ge.s32.totalorder %s46_s25, 2 }
  0xb1   : > { %p83_p9 = scmp.ne.s32.totalorder %s10518_s15, %s10514_s14  ;;  %p84_p4 = scmp.eq.s32.totalorder %s10530_s18, 0 }
  0xb2   : > { %p89_p10 = scmp.ne.s32.totalorder %s10514_s14, %s10510_s13  ;;  %s13734_s25 = smov (%p48_p8, %s46_s25), 0 }
  0xb3   : > { %p10834_p1 = por %p84_p4, %p83_p9  ;;  %p13684_p3 = scmp.eq.s32.totalorder %s10638_s21, 0 }
  0xb4   : > { %s71_s27 = ssub.s32 %s10526_s17, %s13734_s25  ;;  %p241_p11 = scmp.eq.s32.totalorder %s10638_s21, 1 }
  0xb5   : > { %p10840_p6 = por %p13684_p3, %p89_p10  ;;  %p74_p12 = scmp.eq.s32.totalorder %s71_s27, 0 }
  0xb6   : > { %p247_p13 = scmp.eq.s32.totalorder %s13653_s19, 1  ;;  %p10849_p0 = por %p241_p11, %p83_p9 }
  0xb7   : > { %p10080_p2 = scmp.lt.s32.totalorder %s10530_s18, 2  ;;  %s404_s20 = sand.u32 1, %s10518_s15  }
  0xb8   : > { %s13686_s28 = scalar_select %p10849_p0, 1, 0 }
  0xb9   : > { %s10855_s24 = scalar_select %p74_p12, %s10518_s15, %s76_s23  }
  0xba   : > { %p10857_p5 = por %p247_p13, %p89_p10  ;;  %s9292_s10 = sshll.u32 %s404_s20, 6 }
  0xbb   : > { %s9656_s9 = sshll.u32 %s10526_s17, 10  ;;  %s13688_s1 = sld [smem:[#allocation36_spill]] }
  0xbc   : > { %s13687_s8 = scalar_select %p10857_p5, 1, 0 }
  0xbd   : > { %s408_s19 = scalar_lea.vmem [#allocation6], %s9292_s10  ;;  %p10872_p7 = pnand %p10080_p2, %p10834_p1 }
  0xbe   : > { %s417_s29 = sshll.u32 %s408_s19, 4  ;;  %s10876_s30 = scalar_lea.sflag [#allocation3], %s404_s20  ;;  %s10868_s29 = int_to_ptr.vmem [resolvable:$true] %s417_s29 }
  0xbf   : > { %p10344_p9 = pneg %p10872_p7 }
  0xc1   : > { %s10866_s27 = scalar_lea.hbm %s13688_s1, %s9656_s9  ;;  %s10347_s26 = scalar_lea.hbm %s13688_s1, 2048 }
  0xc2   : > { %s10342_s11 = scalar_lea.hbm %s10866_s27, 1024  ;;  %p10348_p1 = scmp.lt.u32.totalorder %s10866_s27, %s13688_s1 }
  0xc3   : > { %p10343_p8 = scmp.ne.s32.totalorder %s10866_s27, %s10342_s11  ;;  %p10349_p3 = scmp.lt.u32.totalorder %s10347_s26, %s10342_s11 }
  0xc4   : > { %p10351_p12 = scmp.lt.u32.totalorder %s10342_s11, %s10866_s27 }
  0xc5   : > { %p10345_p4 = pnand %p10344_p9, %p10343_p8  ;;  %p10350_p11 = por %p10349_p3, %p10348_p1 }
  0xc7   : > { %p10346_p10 = pneg %p10345_p4  ;;  %p10352_p13 = por %p10351_p12, %p10350_p11 }
  0xc9   : > { %p10353_p2 = pnand %p10352_p13, %p10346_p10 }
  0xcb   : > { %10356 = shalt.err (!%p10353_p2)
}
  0xcc   : > { %s10357_s20 = scalar_lea.vmem %s10868_s29, 1024  ;;  %s10541_s19 = smov [#allocation6]  }
  0xcd   : > { %p10358_p8 = scmp.ne.s32.totalorder %s10868_s29, %s10357_s20  ;;  %s10362_s10 = sshll.u32 %s10541_s19, 4  ;;  %s10363_s10 = int_to_ptr.vmem [resolvable:$false] %s10362_s10 }
  0xce   : > { %s10364_s9 = scalar_lea.vmem %s10363_s10, 2048  ;;  %p10365_p0 = scmp.lt.s32.totalorder %s10868_s29, %s10363_s10 }
  0xcf   : > { %p10360_p4 = pnand %p10358_p8, %p10344_p9  ;;  %p10366_p1 = scmp.lt.s32.totalorder %s10364_s9, %s10357_s20 }
  0xd1   : > { %p10361_p5 = pneg %p10360_p4  ;;  %p10367_p3 = por %p10366_p1, %p10365_p0 }
  0xd3   : > { %p10368_p11 = pnand %p10367_p3, %p10361_p5 }
  0xd5   : > { %10371 = shalt.err (!%p10368_p11)
}
  0xd6   : > { %s13690_s11 = smov 4   ;;  %s13691_s26 = smov 64  }
  0xd7   : > { %10062 = dma.hbm_to_vmem [thread:$0]  (!%p10872_p7), %s10866_s27, 1024, %s10868_s29, %s10876_s30, %s13691_s26, %s13691_s26, %s13690_s11  }
  0xd8   : > { %p13692_p9 = scmp.ne.s32.totalorder %s13679_s22, 0 }
  0xda   : > { %429 = sbr.rel (%p13692_p9) target bundleno = 1167 (0x48f), region = 52 }
  0xe1   : > { %p13693_p10 = scmp.eq.s32.totalorder %s10638_s21, 0 }
  0xe3   : > { %10481 = dma.done.wait (%p13693_p10), [#allocation5], 32   ;;  %p13694_p12 = pmov %p13693_p10 }
  0xe4   : > { %s10914_s12 = sand.u32 1, %s10514_s14  }
  0xe5   : > { %10483 = vsyncadd (%p13694_p12), [#allocation5], 4294967264  ;;  %s9297_s23 = sshll.u32 %s10914_s12, 6  ;;  %s436_s20 = scalar_lea.sflag [#allocation3], %s10914_s12 }
  0xe6   : > { %s10918_s19 = scalar_lea.vmem [#allocation6], %s9297_s23 }
  0xe7   : > { %10485 = dma.done.wait (%p10840_p6), %s436_s20, 1024  }
  0xe8   : > { %10487 = vsyncadd (%p10840_p6), %s436_s20, 4294966272  ;;  %p13695_p0 = pmov %p13693_p10 }
  0xea   : > { %10489 = dma.done.wait (%p13695_p0), [#allocation8], 272   ;;  %p13696_p5 = pmov %p13695_p0 }
  0xeb   : > { %p13697_p7 = pmov %p13695_p0 }
  0xec   : > { %10491 = vsyncadd (%p13696_p5), [#allocation8], 4294967024 }
  0xed   : > { %10493 = dma.done.wait (%p13697_p7), [#allocation11], 272   ;;  %p13698_p13 = pmov %p13695_p0 }
  0xee   : > { %p13699_p2 = pmov %p13695_p0 }
  0xef   : > { %10495 = vsyncadd (%p13698_p13), [#allocation11], 4294967024 }
  0xf0   : > { %10497 = dma.done.wait (%p13699_p2), [#allocation14], 272   ;;  %p13700_p8 = pmov %p13695_p0 }
  0xf2   : > { %10499 = vsyncadd (%p13700_p8), [#allocation14], 4294967024 }
  0xf3   : > { %468 = sfence }
  0xf4   : > { %v10153_v0 = vld [vmem:[#allocation7] sm:$0xff]   ;;  %s13701_s22 = sld [smem:[#allocation27_spill]]  ;;  %v10154_v1 = vld [vmem:[#allocation7 + $0x8] sm:$0xff]   ;;  %v10944_v6 = vld [vmem:[%s10918_s19 + $0x10] sm:$0xff]   ;;  %vm665_vm0 = vcmask 261120   ;;  %s10542_s10 = smov 120  }
  0xf5   : > { %9921 = vmatprep.subr.bf16.mxu0 %v10153_v0  ;;  %9981 = vmatprep.subr.bf16.mxu1 %v10153_v0  ;;  %v9853_v2 = vld [vmem:[%s10918_s19] sm:$0xff]   ;;  %v9884_v4 = vld [vmem:[%s10918_s19 + $0x8] sm:$0xff]   ;;  %v10947_v7 = vld [vmem:[%s10918_s19 + $0x18] sm:$0xff]   ;;  %v9862_v19 = vunpack.c.l.bf16 %v10944_v6  ;;  %v9863_v20 = vunpack.c.h.bf16 %v10944_v6  ;;  %s10543_s9 = smov 112   ;;  %s10544_s11 = smov 104   ;;  %vm3379_vm1 = vcmask 60416  }
  0xf6   : > { %v9887_v3 = vld [vmem:[%s10918_s19 + $0x20] sm:$0xff]   ;;  %9922 = vmatpush3.bf16.msra.mxu0 %v10153_v0  ;;  %9983 = vmatpush3.bf16.msra.mxu1 %v10153_v0  ;;  %v9888_v5 = vld [vmem:[%s10918_s19 + $0x28] sm:$0xff]   ;;  %v10950_v8 = vld [vmem:[%s10918_s19 + $0x30] sm:$0xff]   ;;  %v9854_v9 = vunpack.c.l.bf16 %v9853_v2  ;;  %v9855_v10 = vunpack.c.h.bf16 %v9853_v2  ;;  %v9858_v14 = vunpack.c.l.bf16 %v9884_v4  ;;  %v9859_v15 = vunpack.c.h.bf16 %v9884_v4  ;;  %s11396_s26 = sshll.u32 %s10914_s12, 8  ;;  %p13720_p4 = scmp.ne.s32.totalorder %s13686_s28, 0 }
  0xf7   : > { %9923 = vmatprep.subr.bf16.mxu0 %v10154_v1  ;;  %9982 = vmatprep.subr.bf16.mxu1 %v10154_v1  ;;  %v10952_v11 = vld [vmem:[#allocation10] sm:$0xff]   ;;  %v9870_v12 = vunpack.c.l.bf16 %v9887_v3  ;;  %v9871_v13 = vunpack.c.h.bf16 %v9887_v3  ;;  %v9874_v17 = vunpack.c.l.bf16 %v9888_v5  ;;  %v9875_v18 = vunpack.c.h.bf16 %v9888_v5  ;;  %v10959_v21 = vld [vmem:[#allocation13] sm:$0xff]   ;;  %v10156_v6 = vld [vmem:[#allocation10 + $0x8] sm:$0xff]   ;;  %s11421_s23 = scalar_lea.vmem [#allocation16], %s11396_s26  ;;  %s12188_s20 = scalar_lea.vmem [#allocation17], %s11396_s26 }
  0xf8   : > { %v10955_v16 = vld [vmem:[%s10918_s19 + $0x38] sm:$0xff]   ;;  %v9866_v22 = vunpack.c.l.bf16 %v10947_v7  ;;  %v9867_v23 = vunpack.c.h.bf16 %v10947_v7  ;;  %v9878_v24 = vunpack.c.l.bf16 %v10950_v8  ;;  %v9879_v25 = vunpack.c.h.bf16 %v10950_v8  ;;  %v10158_v7 = vld [vmem:[#allocation13 + $0x8] sm:$0xff]   ;;  %s12303_s19 = scalar_lea.vmem [#allocation19], %s11396_s26 }
  0xf9   : > { %v9882_v28 = vunpack.c.l.bf16 %v10955_v16  ;;  %v9883_v29 = vunpack.c.h.bf16 %v10955_v16 }
  0xfa   : > { %s9307_s29 = sshll.u32 %s13701_s22, 7  ;;  %9924 = vmatpush3.bf16.msra.mxu0 %v10154_v1  ;;  %9984 = vmatpush3.bf16.msra.mxu1 %v10154_v1 }
  0xfb   : > { %s10937_s30 = sld [smem:[#allocation2 + %s9307_s29]]  ;;  %s550_s16 = sadd.s32 1, %s9307_s29  ;;  %9941 = vmatprep.subr.bf16.mxu1 %v10952_v11  ;;  %9961 = vmatprep.subr.bf16.mxu0 %v10959_v21 }
  0xfc   : > { %s551_s27 = sld [smem:[#allocation2 + %s550_s16]]  ;;  %s13030_s29 = sshll.u32 %s13701_s22, 12 }
  0xfd   : > { %s13718_s16 = sld [smem:[#allocation37_spill]] }
 0x101   : > { %v10967_v27 = vstv %s10937_s30 }
 0x102   : > { %v552_v26 = vstv %s551_s27 }
 0x103   : > { %v553_v30 = vmul.f32 %v9854_v9, %v552_v26  ;;  %v554_v31 = vmul.f32 %v9855_v10, %v552_v26  ;;  %v561_v32 = vmul.f32 %v9870_v12, %v552_v26  ;;  %v562_v33 = vmul.f32 %v9871_v13, %v552_v26  ;;  %s13719_s27 = smov %s13718_s16 }
 0x104   : > { %v555_v34 = vmul.f32 %v9858_v14, %v552_v26  ;;  %v556_v35 = vmul.f32 %v9859_v15, %v552_v26  ;;  %v563_v36 = vmul.f32 %v9874_v17, %v552_v26  ;;  %v564_v37 = vmul.f32 %v9875_v18, %v552_v26 }
 0x105   : > { %v9308_v38 = vclamps-f32 %v553_v30, 127.0  ;;  %v9309_v39 = vclamps-f32 %v554_v31, 127.0  ;;  %v9316_v40 = vclamps-f32 %v561_v32, 127.0  ;;  %v9317_v41 = vclamps-f32 %v562_v33, 127.0 }
 0x106   : > { %v9310_v42 = vclamps-f32 %v555_v34, 127.0  ;;  %v9311_v43 = vclamps-f32 %v556_v35, 127.0  ;;  %v9318_v44 = vclamps-f32 %v563_v36, 127.0  ;;  %v9319_v45 = vclamps-f32 %v564_v37, 127.0 }
 0x107   : > { %v9985_v46 = vround.rtne.f32 %v9308_v38  ;;  %v9986_v47 = vround.rtne.f32 %v9309_v39  ;;  %v9993_v48 = vround.rtne.f32 %v9316_v40  ;;  %v9994_v49 = vround.rtne.f32 %v9317_v41 }
 0x108   : > { %v9987_v50 = vround.rtne.f32 %v9310_v42  ;;  %v9988_v51 = vround.rtne.f32 %v9311_v43  ;;  %v9995_v52 = vround.rtne.f32 %v9318_v44  ;;  %v9996_v53 = vround.rtne.f32 %v9319_v45 }
 0x109   : > { %v618_v54 = vmul.f32 %v9985_v46, %v10967_v27  ;;  %v619_v55 = vmul.f32 %v9986_v47, %v10967_v27  ;;  %v626_v56 = vmul.f32 %v9993_v48, %v10967_v27  ;;  %v627_v57 = vmul.f32 %v9994_v49, %v10967_v27 }
 0x10a   : > { %v620_v58 = vmul.f32 %v9987_v50, %v10967_v27  ;;  %v621_v59 = vmul.f32 %v9988_v51, %v10967_v27  ;;  %v628_v60 = vmul.f32 %v9995_v52, %v10967_v27  ;;  %v629_v61 = vmul.f32 %v9996_v53, %v10967_v27 }
 0x10b   : > { %v634_v62 = vpack.c.bf16 %v619_v55, %v618_v54  ;;  %v10980_v63 = vpack.c.bf16 %v627_v57, %v626_v56  ;;  %v557_v0 = vmul.f32 %v9862_v19, %v552_v26  ;;  %v558_v1 = vmul.f32 %v9863_v20, %v552_v26 }
 0x10c   : > { %v635_v2 = vpack.c.bf16 %v621_v59, %v620_v58  ;;  %v10982_v3 = vpack.c.bf16 %v629_v61, %v628_v60  ;;  %v559_v4 = vmul.f32 %v9866_v22, %v552_v26  ;;  %v560_v5 = vmul.f32 %v9867_v23, %v552_v26 }
 0x10d   : > { %9925 = vmatprep.mubr.msk.bf16.mxu0 %vm665_vm0, %v634_v62  ;;  %9933 = vmatprep.mubr.msk.bf16.mxu1 %vm665_vm0, %v10980_v63  ;;  %v9312_v8 = vclamps-f32 %v557_v0, 127.0  ;;  %v9313_v9 = vclamps-f32 %v558_v1, 127.0  ;;  %v565_v10 = vmul.f32 %v9878_v24, %v552_v26  ;;  %v566_v12 = vmul.f32 %v9879_v25, %v552_v26 }
 0x10e   : > { %9926 = vmatmul.mubr.msk.bf16.vlgmr.msra.gmra.mrb[0].mxu0 %vm665_vm0, %v635_v2  ;;  %9934 = vmatmul.mubr.msk.bf16.vlgmr.msra.gmra.mrb[0].mxu1 %vm665_vm0, %v10982_v3  ;;  %v9314_v13 = vclamps-f32 %v559_v4, 127.0  ;;  %v9315_v14 = vclamps-f32 %v560_v5, 127.0  ;;  %v567_v15 = vmul.f32 %v9882_v28, %v552_v26  ;;  %v568_v16 = vmul.f32 %v9883_v29, %v552_v26 }
 0x10f   : > { %v9989_v17 = vround.rtne.f32 %v9312_v8  ;;  %v9990_v18 = vround.rtne.f32 %v9313_v9  ;;  %v9320_v19 = vclamps-f32 %v565_v10, 127.0  ;;  %v9321_v20 = vclamps-f32 %v566_v12, 127.0  ;;  %9942 = vmatpush3.bf16.msra.mxu1 %v10952_v11  ;;  %9962 = vmatpush3.bf16.msra.mxu0 %v10959_v21 }
 0x110   : > { %v9991_v22 = vround.rtne.f32 %v9314_v13  ;;  %v9992_v23 = vround.rtne.f32 %v9315_v14  ;;  %v9322_v24 = vclamps-f32 %v567_v15, 127.0  ;;  %v9323_v25 = vclamps-f32 %v568_v16, 127.0  ;;  %9943 = vmatprep.subr.bf16.mxu1 %v10156_v6  ;;  %9963 = vmatprep.subr.bf16.mxu0 %v10158_v7 }
 0x111   : > { %v622_v30 = vmul.f32 %v9989_v17, %v10967_v27  ;;  %v623_v31 = vmul.f32 %v9990_v18, %v10967_v27  ;;  %v9997_v28 = vround.rtne.f32 %v9320_v19  ;;  %v9998_v26 = vround.rtne.f32 %v9321_v20 }
 0x112   : > { %v624_v29 = vmul.f32 %v9991_v22, %v10967_v27  ;;  %v625_v32 = vmul.f32 %v9992_v23, %v10967_v27  ;;  %v9999_v33 = vround.rtne.f32 %v9322_v24  ;;  %v10000_v11 = vround.rtne.f32 %v9323_v25 }
 0x113   : > { %v636_v34 = vpack.c.bf16 %v623_v31, %v622_v30  ;;  %v630_v21 = vmul.f32 %v9997_v28, %v10967_v27  ;;  %v631_v35 = vmul.f32 %v9998_v26, %v10967_v27  ;;  %9944 = vmatpush3.bf16.msra.mxu1 %v10156_v6  ;;  %9964 = vmatpush3.bf16.msra.mxu0 %v10158_v7  ;;  %v11196_v31 = vld [vmem:[#allocation12] ss:$0 sm:$0xff] }
 0x114   : > { %v637_v36 = vpack.c.bf16 %v625_v32, %v624_v29  ;;  %v632_v37 = vmul.f32 %v9999_v33, %v10967_v27  ;;  %v633_v38 = vmul.f32 %v10000_v11, %v10967_v27  ;;  %v11024_v27 = vld [vmem:[#allocation9] ss:$0 sm:$0xff]  ;;  %v11217_v33 = vld [vmem:[#allocation15] ss:$0 sm:$0xff] }
 0x115   : > { %9929 = vmatprep.mubr.msk.bf16.mxu0 %vm665_vm0, %v636_v34  ;;  %v640_v39 = vpack.c.bf16 %v631_v35, %v630_v21 }
 0x116   : > { %9930 = vmatmul.mubr.msk.bf16.gmra.mrb[4].mxu0 %vm665_vm0, %v637_v36  ;;  %v641_v40 = vpack.c.bf16 %v633_v38, %v632_v37  ;;  %v952_v38 = vlaneseq }
 0x117   : > { %9937 = vmatprep.mubr.msk.bf16.mxu1 %vm665_vm0, %v640_v39  ;;  %9965 = vmatprep.mubr.msk.bf16.mxu0 %vm665_vm0, %v634_v62 }
 0x118   : > { %9938 = vmatmul.mubr.msk.bf16.gmra.mrb[4].mxu1 %vm665_vm0, %v641_v40 }
 0x119   : > { %9945 = vmatprep.mubr.msk.bf16.mxu1 %vm665_vm0, %v634_v62 }
 0x11e   : > { %9966 = vmatmul.mubr.msk.bf16.vlgmr.msra.gmra.mrb[8].mxu0 %vm665_vm0, %v635_v2 }
 0x11f   : > { %9969 = vmatprep.mubr.msk.bf16.mxu0 %vm665_vm0, %v636_v34 }
 0x120   : > { %9946 = vmatmul.mubr.msk.bf16.vlgmr.msra.gmra.mrb[8].mxu1 %vm665_vm0, %v635_v2 }
 0x121   : > { %9949 = vmatprep.mubr.msk.bf16.mxu1 %vm665_vm0, %v636_v34 }
 0x126   : > { %9970 = vmatmul.mubr.msk.bf16.gmra.mrb[12].mxu0 %vm665_vm0, %v637_v36 }
 0x127   : > { %9973 = vmatprep.mubr.msk.bf16.mxu0 %vm665_vm0, %v10980_v63 }
 0x128   : > { %9950 = vmatmul.mubr.msk.bf16.gmra.mrb[12].mxu1 %vm665_vm0, %v637_v36  ;;  %v10545_v36 = vmov 1983009808  }
 0x129   : > { %9953 = vmatprep.mubr.msk.bf16.mxu1 %vm665_vm0, %v10980_v63  ;;  %v950_v37 = vunpack.c.l.s4 %v10545_v36 }
 0x12e   : > { %9974 = vmatmul.mubr.msk.bf16.gmra.mrb[16].mxu0 %vm665_vm0, %v10982_v3 }
 0x12f   : > { %9977 = vmatprep.mubr.msk.bf16.mxu0 %vm665_vm0, %v640_v39 }
 0x130   : > { %9954 = vmatmul.mubr.msk.bf16.gmra.mrb[16].mxu1 %vm665_vm0, %v10982_v3 }
 0x131   : > { %9957 = vmatprep.mubr.msk.bf16.mxu1 %vm665_vm0, %v640_v39  ;;  %v10546_v39 = vmov 1934713408  }
 0x136   : > { %9978 = vmatmul.mubr.msk.bf16.gmra.mrb[20].mxu0 %vm665_vm0, %v641_v40 }
 0x138   : > { %9958 = vmatmul.mubr.msk.bf16.gmra.mrb[20].mxu1 %vm665_vm0, %v641_v40  ;;  %v982_v40 = vunpack.c.l.s4 %v10546_v39 }
 0x1e1   : > { %v9927_v41 = vpop.f32.mrb[0].mxu0  ;;  %v9935_v42 = vpop.f32.mrb[0].mxu1 }
 0x1e2   : > { %v11027_v43 = vadd.f32 %v9927_v41, %v11024_v27  ;;  %v11030_v44 = vadd.f32 %v9935_v42, %v11024_v27  ;;  %v724_v45 = vpop.f32.mrb[1].mxu0  ;;  %v756_v46 = vpop.f32.mrb[1].mxu1  ;;  %v951_v42 = vunpack.c.0.s8 %v950_v37 }
 0x1e3   : > { %v9928_v47 = vpop.f32.mrb[2].mxu0  ;;  %v9936_v48 = vpop.f32.mrb[2].mxu1  ;;  %v11083_v8 = vadd.f32 %v11024_v27, %v724_v45  ;;  %v11092_v10 = vadd.f32 %v11024_v27, %v756_v46  ;;  %v953_v45 = vshrl.u32 %v952_v38, 7  ;;  %v983_v46 = vunpack.c.0.s8 %v982_v40 }
 0x1e4   : > { %823 = vrot.lane.b32.xlu0 %v11030_v44, %s10542_s10  ;;  %v759_v49 = vpop.f32.mrb[3].mxu1  ;;  %807 = vrot.lane.b32.xlu1 %v11027_v43, %s10542_s10  ;;  %v727_v50 = vpop.f32.mrb[3].mxu0  ;;  %v11037_v51 = vadd.f32 %v9928_v47, %v11024_v27  ;;  %v11044_v53 = vadd.f32 %v9936_v48, %v11024_v27 }
 0x1e5   : > { %v11105_v15 = vadd.f32 %v11024_v27, %v759_v49  ;;  %v11114_v17 = vadd.f32 %v11024_v27, %v727_v50 }
 0x1e8   : > { %855 = vrot.lane.b32.xlu0 %v11027_v43, %s10543_s9  ;;  %809 = vrot.lane.b32.xlu1 %v11037_v51, %s10542_s10 }
 0x1e9   : > { %v9931_v52 = vpop.f32.mrb[4].mxu0 }
 0x1ea   : > { %v740_v54 = vpop.f32.mrb[5].mxu0  ;;  %v11139_v22 = vadd.f32 %v9931_v52, %v11024_v27 }
 0x1eb   : > { %v11047_v55 = vadd.f32 %v11024_v27, %v740_v54  ;;  %v9932_v56 = vpop.f32.mrb[6].mxu0  ;;  %v9939_v57 = vpop.f32.mrb[4].mxu1  ;;  %v11259_v54 = vsub.s32 %v951_v42, %v953_v45 }
 0x1ec   : > { %871 = vrot.lane.b32.xlu0 %v11030_v44, %s10543_s9  ;;  %825 = vrot.lane.b32.xlu1 %v11044_v53, %s10542_s10  ;;  %v743_v58 = vpop.f32.mrb[7].mxu0  ;;  %v772_v59 = vpop.f32.mrb[5].mxu1  ;;  %v11142_v23 = vadd.f32 %v9932_v56, %v11024_v27  ;;  %v11151_v25 = vadd.f32 %v9939_v57, %v11024_v27  ;;  %v11261_v56 = vsub.s32 %v983_v46, %v953_v45 }
 0x1ed   : > { %v11054_v60 = vadd.f32 %v11024_v27, %v743_v58  ;;  %v11057_v61 = vadd.f32 %v11024_v27, %v772_v59  ;;  %v9940_v62 = vpop.f32.mrb[6].mxu1 }
 0x1ee   : > { %v775_v63 = vpop.f32.mrb[7].mxu1  ;;  %v11154_v30 = vadd.f32 %v9940_v62, %v11024_v27 }
 0x1ef   : > { %v11060_v0 = vadd.f32 %v11024_v27, %v775_v63 }
 0x1f0   : > { %903 = vrot.lane.b32.xlu0 %v11027_v43, %s10544_s11  ;;  %857 = vrot.lane.b32.xlu1 %v11037_v51, %s10543_s9 }
 0x1f1   : > { %v11066_v1 = vpop.f32.mrb[8].mxu0 }
 0x1f2   : > { %v11068_v2 = vpop.f32.mrb[9].mxu0  ;;  %v11225_v21 = vadd.f32 %v11066_v1, %v11217_v33 }
 0x1f3   : > { %v11070_v3 = vpop.f32.mrb[8].mxu1  ;;  %v11072_v4 = vpop.f32.mrb[10].mxu0  ;;  %v11265_v58 = vadd.f32 %v11217_v33, %v11068_v2 }
 0x1f4   : > { %919 = vrot.lane.b32.xlu0 %v11030_v44, %s10544_s11  ;;  %873 = vrot.lane.b32.xlu1 %v11044_v53, %s10543_s9  ;;  %v11078_v5 = vpop.f32.mrb[9].mxu1  ;;  %v11080_v6 = vpop.f32.mrb[11].mxu0  ;;  %v11204_v28 = vadd.f32 %v11070_v3, %v11196_v31  ;;  %13703 = vst [vmem:[#allocation29_spill] sm:$0xff] %v11225_v21  ;;  %v11229_v35 = vadd.f32 %v11072_v4, %v11217_v33 }
 0x1f5   : > { %v9948_v7 = vpop.f32.mrb[10].mxu1  ;;  %v11247_v47 = vadd.f32 %v11196_v31, %v11078_v5  ;;  %13707 = vst [vmem:[#allocation33_spill] sm:$0xff] %v11265_v58  ;;  %v11269_v59 = vadd.f32 %v11217_v33, %v11080_v6 }
 0x1f6   : > { %v11085_v9 = vpop.f32.mrb[11].mxu1  ;;  %13702 = vst [vmem:[#allocation28_spill] sm:$0xff] %v11204_v28  ;;  %v11207_v26 = vadd.f32 %v9948_v7, %v11196_v31  ;;  %13704 = vst [vmem:[#allocation30_spill] sm:$0xff] %v11229_v35 }
 0x1f7   : > { %13705 = vst [vmem:[#allocation31_spill] sm:$0xff] %v11247_v47  ;;  %v11251_v48 = vadd.f32 %v11196_v31, %v11085_v9  ;;  %13708 = vst [vmem:[#allocation34_spill] sm:$0xff] %v11269_v59 }
 0x1f8   : > { %905 = vrot.lane.b32.xlu1 %v11037_v51, %s10544_s11  ;;  %803 = vrot.lane.b32.xlu0 %v11083_v8, %s10542_s10 }
 0x1f9   : > { %v11128_v18 = vpop.f32.mrb[12].mxu0  ;;  %13706 = vst [vmem:[#allocation32_spill] sm:$0xff] %v11251_v48 }
 0x1fa   : > { %v11130_v19 = vpop.f32.mrb[13].mxu0  ;;  %v11292_v6 = vadd.f32 %v11128_v18, %v11217_v33 }
 0x1fb   : > { %v11094_v12 = vpop.f32.mrb[12].mxu1  ;;  %v11136_v20 = vpop.f32.mrb[14].mxu0 }
 0x1fc   : > { %921 = vrot.lane.b32.xlu1 %v11044_v53, %s10544_s11  ;;  %819 = vrot.lane.b32.xlu0 %v11092_v10, %s10542_s10  ;;  %v11100_v13 = vpop.f32.mrb[13].mxu1  ;;  %v11144_v24 = vpop.f32.mrb[15].mxu0  ;;  %v11276_v3 = vadd.f32 %v11094_v12, %v11196_v31  ;;  %v11301_v12 = vadd.f32 %v11217_v33, %v11130_v19 }
 0x1fd   : > { %v11102_v14 = vpop.f32.mrb[14].mxu1  ;;  %v11280_v4 = vadd.f32 %v11196_v31, %v11100_v13  ;;  %v11305_v13 = vadd.f32 %v11136_v20, %v11217_v33 }
 0x1fe   : > { %v11107_v16 = vpop.f32.mrb[15].mxu1  ;;  %v11284_v2 = vadd.f32 %v11102_v14, %v11196_v31 }
 0x1ff   : > { %v11288_v5 = vadd.f32 %v11196_v31, %v11107_v16 }
 0x200   : > { %821 = vrot.lane.b32.xlu1 %v11105_v15, %s10542_s10  ;;  %851 = vrot.lane.b32.xlu0 %v11083_v8, %s10543_s9 }
 0x201   : > { %v9975_v52 = vpop.f32.mrb[16].mxu0 }
 0x202   : > { %v6309_v57 = vpop.f32.mrb[17].mxu0 }
 0x203   : > { %v9955_v29 = vpop.f32.mrb[16].mxu1  ;;  %v9976_v7 = vpop.f32.mrb[18].mxu0 }
 0x204   : > { %853 = vrot.lane.b32.xlu1 %v11114_v17, %s10543_s9  ;;  %867 = vrot.lane.b32.xlu0 %v11092_v10, %s10543_s9  ;;  %v3533_v32 = vpop.f32.mrb[17].mxu1  ;;  %v6312_v14 = vpop.f32.mrb[19].mxu0  ;;  %v11313_v18 = vadd.f32 %v9955_v29, %v11196_v31 }
 0x205   : > { %v9956_v11 = vpop.f32.mrb[18].mxu1  ;;  %v11316_v36 = vadd.f32 %v11196_v31, %v3533_v32 }
 0x206   : > { %v3536_v34 = vpop.f32.mrb[19].mxu1  ;;  %v11321_v39 = vadd.f32 %v9956_v11, %v11196_v31 }
 0x207   : > { %v11324_v40 = vadd.f32 %v11196_v31, %v3536_v34  ;;  %v11337_v31 = vadd.f32 %v11217_v33, %v6309_v57 }
 0x208   : > { %869 = vrot.lane.b32.xlu1 %v11105_v15, %s10543_s9  ;;  %899 = vrot.lane.b32.xlu0 %v11083_v8, %s10544_s11 }
 0x20c   : > { %901 = vrot.lane.b32.xlu1 %v11114_v17, %s10544_s11  ;;  %915 = vrot.lane.b32.xlu0 %v11092_v10, %s10544_s11 }
 0x210   : > { %917 = vrot.lane.b32.xlu1 %v11105_v15, %s10544_s11  ;;  %805 = vrot.lane.b32.xlu0 %v11114_v17, %s10542_s10 }
 0x214   : > { %817 = vrot.lane.b32.xlu1 %v11142_v23, %s10542_s10  ;;  %815 = vrot.lane.b32.xlu0 %v11139_v22, %s10542_s10 }
 0x218   : > { %833 = vrot.lane.b32.xlu1 %v11154_v30, %s10542_s10  ;;  %831 = vrot.lane.b32.xlu0 %v11151_v25, %s10542_s10 }
 0x21c   : > { %865 = vrot.lane.b32.xlu1 %v11142_v23, %s10543_s9  ;;  %863 = vrot.lane.b32.xlu0 %v11139_v22, %s10543_s9 }
 0x220   : > { %881 = vrot.lane.b32.xlu1 %v11154_v30, %s10543_s9  ;;  %879 = vrot.lane.b32.xlu0 %v11151_v25, %s10543_s9 }
 0x224   : > { %913 = vrot.lane.b32.xlu1 %v11142_v23, %s10544_s11  ;;  %911 = vrot.lane.b32.xlu0 %v11139_v22, %s10544_s11 }
 0x228   : > { %929 = vrot.lane.b32.xlu1 %v11154_v30, %s10544_s11  ;;  %927 = vrot.lane.b32.xlu0 %v11151_v25, %s10544_s11 }
 0x22c   : > { %813 = vrot.lane.b32.xlu1 %v11054_v60, %s10542_s10  ;;  %811 = vrot.lane.b32.xlu0 %v11047_v55, %s10542_s10 }
 0x230   : > { %829 = vrot.lane.b32.xlu1 %v11060_v0, %s10542_s10  ;;  %827 = vrot.lane.b32.xlu0 %v11057_v61, %s10542_s10 }
 0x234   : > { %861 = vrot.lane.b32.xlu1 %v11054_v60, %s10543_s9  ;;  %859 = vrot.lane.b32.xlu0 %v11047_v55, %s10543_s9 }
 0x238   : > { %877 = vrot.lane.b32.xlu1 %v11060_v0, %s10543_s9  ;;  %875 = vrot.lane.b32.xlu0 %v11057_v61, %s10543_s9 }
 0x23c   : > { %909 = vrot.lane.b32.xlu1 %v11054_v60, %s10544_s11  ;;  %907 = vrot.lane.b32.xlu0 %v11047_v55, %s10544_s11 }
 0x240   : > { %925 = vrot.lane.b32.xlu1 %v11060_v0, %s10544_s11  ;;  %923 = vrot.lane.b32.xlu0 %v11057_v61, %s10544_s11 }
 0x244   : > { %3586 = vrot.lane.b32.xlu1 %v11207_v26, %s10542_s10  ;;  %3584 = vrot.lane.b32.xlu0 %v11204_v28, %s10542_s10 }
 0x248   : > { %3634 = vrot.lane.b32.xlu1 %v11207_v26, %s10543_s9  ;;  %3632 = vrot.lane.b32.xlu0 %v11204_v28, %s10543_s9 }
 0x24c   : > { %3682 = vrot.lane.b32.xlu1 %v11207_v26, %s10544_s11  ;;  %3680 = vrot.lane.b32.xlu0 %v11204_v28, %s10544_s11 }
 0x250   : > { %6362 = vrot.lane.b32.xlu1 %v11229_v35, %s10542_s10  ;;  %6360 = vrot.lane.b32.xlu0 %v11225_v21, %s10542_s10 }
 0x254   : > { %6410 = vrot.lane.b32.xlu1 %v11229_v35, %s10543_s9  ;;  %6408 = vrot.lane.b32.xlu0 %v11225_v21, %s10543_s9 }
 0x256   : > { %v11239_v27 = vpop.permute.xlu0 %823  ;;  %v808_v41 = vpop.permute.xlu1 %807 }
 0x258   : > { %6458 = vrot.lane.b32.xlu1 %v11229_v35, %s10544_s11  ;;  %6456 = vrot.lane.b32.xlu0 %v11225_v21, %s10544_s11 }
 0x25a   : > { %v856_v49 = vpop.permute.xlu0 %855  ;;  %v11253_v50 = vpop.permute.xlu1 %809 }
 0x25b   : > { %v1083_v62 = vcombine.low %v11027_v43, %v856_v49  ;;  %v1084_v9 = vcombine.high %v11027_v43, %v856_v49  ;;  %v11310_v43 = vadd.f32 %v11217_v33, %v11144_v24 }
 0x25c   : > { %3582 = vrot.lane.b32.xlu1 %v11251_v48, %s10542_s10  ;;  %3580 = vrot.lane.b32.xlu0 %v11247_v47, %s10542_s10 }
 0x25d   : > { %v1091_v19 = vrot.slane %v1083_v62, %v11259_v54  ;;  %v1098_v32 = vrot.slane %v1084_v9, %v11259_v54 }
 0x25e   : > { %v872_v63 = vpop.permute.xlu0 %871  ;;  %v11272_v1 = vpop.permute.xlu1 %825 }
 0x25f   : > { %v1627_v16 = vcombine.low %v11030_v44, %v872_v63  ;;  %v1628_v37 = vcombine.high %v11030_v44, %v872_v63  ;;  %v11334_v44 = vadd.f32 %v9975_v52, %v11217_v33  ;;  %v11353_v63 = vadd.f32 %v11217_v33, %v6312_v14 }
 0x260   : > { %3630 = vrot.lane.b32.xlu1 %v11251_v48, %s10543_s9  ;;  %3628 = vrot.lane.b32.xlu0 %v11247_v47, %s10543_s9 }
 0x261   : > { %v1635_v11 = vrot.slane %v1627_v16, %v11259_v54  ;;  %v1642_v46 = vrot.slane %v1628_v37, %v11259_v54 }
 0x262   : > { %v904_v38 = vpop.permute.xlu0 %903  ;;  %v858_v20 = vpop.permute.xlu1 %857 }
 0x263   : > { %v1099_v24 = vcombine.low %v808_v41, %v904_v38  ;;  %v1100_v42 = vcombine.high %v808_v41, %v904_v38  ;;  %v1151_v29 = vcombine.low %v11037_v51, %v858_v20  ;;  %v1152_v45 = vcombine.high %v11037_v51, %v858_v20 }
 0x264   : > { %3678 = vrot.lane.b32.xlu1 %v11251_v48, %s10544_s11  ;;  %3676 = vrot.lane.b32.xlu0 %v11247_v47, %s10544_s11  ;;  %v11343_v41 = vadd.f32 %v9976_v7, %v11217_v33 }
 0x265   : > { %v1107_v34 = vrot.slane %v1099_v24, %v11259_v54  ;;  %v1114_v51 = vrot.slane %v1100_v42, %v11259_v54  ;;  %v11347_v49 = vrot.slane %v1151_v29, %v11259_v54  ;;  %v11350_v52 = vrot.slane %v1152_v45, %v11259_v54 }
 0x266   : > { %v920_v62 = vpop.permute.xlu0 %919  ;;  %v874_v57 = vpop.permute.xlu1 %873 }
 0x267   : > { %v1115_v9 = vcombine.low %v1091_v19, %v1107_v34  ;;  %v1116_v16 = vcombine.high %v1091_v19, %v1107_v34  ;;  %v1131_v38 = vcombine.low %v1098_v32, %v1114_v51  ;;  %v1132_v20 = vcombine.high %v1098_v32, %v1114_v51 }
 0x268   : > { %v1643_v7 = vcombine.low %v11239_v27, %v920_v62  ;;  %v1644_v24 = vcombine.high %v11239_v27, %v920_v62  ;;  %v1695_v37 = vcombine.low %v11044_v53, %v874_v57  ;;  %v1696_v42 = vcombine.high %v11044_v53, %v874_v57  ;;  %6358 = vrot.lane.b32.xlu1 %v11269_v59, %s10542_s10 }
 0x269   : > { %v1123_v29 = vrot.slane %v1115_v9, %v11261_v56  ;;  %v1130_v33 = vrot.slane %v1116_v16, %v11261_v56  ;;  %v1139_v14 = vrot.slane %v1131_v38, %v11261_v56  ;;  %v1146_v19 = vrot.slane %v1132_v20, %v11261_v56  ;;  %6356 = vrot.lane.b32.xlu0 %v11265_v58, %s10542_s10 }
 0x26a   : > { %v1651_v27 = vrot.slane %v1643_v7, %v11259_v54  ;;  %v1658_v45 = vrot.slane %v1644_v24, %v11259_v54  ;;  %v11370_v53 = vrot.slane %v1695_v37, %v11259_v54  ;;  %v11373_v32 = vrot.slane %v1696_v42, %v11259_v54  ;;  %v11375_v34 = vpop.permute.xlu1 %905  ;;  %v11377_v51 = vpop.permute.xlu0 %803 }
 0x26b   : > { %v2171_v62 = vcombine.low %v1123_v29, %v1130_v33  ;;  %v9339_v57 = vcombine.high %v1123_v29, %v1130_v33  ;;  %v2187_v9 = vcombine.low %v1139_v14, %v1146_v19  ;;  %v9340_v16 = vcombine.high %v1139_v14, %v1146_v19 }
 0x26c   : > { %v1659_v38 = vcombine.low %v1635_v11, %v1651_v27  ;;  %v1660_v20 = vcombine.high %v1635_v11, %v1651_v27  ;;  %v1675_v7 = vcombine.low %v1642_v46, %v1658_v45  ;;  %v1676_v47 = vcombine.high %v1642_v46, %v1658_v45  ;;  %6406 = vrot.lane.b32.xlu1 %v11269_v59, %s10543_s9 }
 0x26d   : > { %v2178_v24 = vrot.slane %v2171_v62, %v11259_v54  ;;  %v2186_v37 = vrot.slane %v9339_v57, %v11259_v54  ;;  %v2194_v42 = vrot.slane %v2187_v9, %v11259_v54  ;;  %v2202_v48 = vrot.slane %v9340_v16, %v11259_v54  ;;  %6404 = vrot.lane.b32.xlu0 %v11265_v58, %s10543_s9 }
 0x26e   : > { %v1667_v29 = vrot.slane %v1659_v38, %v11261_v56  ;;  %v1674_v11 = vrot.slane %v1660_v20, %v11261_v56  ;;  %v1683_v46 = vrot.slane %v1675_v7, %v11261_v56  ;;  %v1690_v33 = vrot.slane %v1676_v47, %v11261_v56  ;;  %v922_v62 = vpop.permute.xlu1 %921  ;;  %v11391_v57 = vpop.permute.xlu0 %819 }
 0x26f   : > { %v2203_v14 = vcombine.low %v2178_v24, %v2186_v37  ;;  %v2204_v19 = vcombine.high %v2178_v24, %v2186_v37  ;;  %v2219_v27 = vcombine.low %v2194_v42, %v2202_v48  ;;  %v2220_v45 = vcombine.high %v2194_v42, %v2202_v48 }
 0x270   : > { %v2715_v9 = vcombine.low %v1667_v29, %v1674_v11  ;;  %v9355_v16 = vcombine.high %v1667_v29, %v1674_v11  ;;  %v2731_v21 = vcombine.low %v1683_v46, %v1690_v33  ;;  %v9356_v35 = vcombine.high %v1683_v46, %v1690_v33  ;;  %6454 = vrot.lane.b32.xlu1 %v11269_v59, %s10544_s11 }
 0x271   : > { %v2211_v38 = vrot.slane %v2203_v14, %v11261_v56  ;;  %v2218_v47 = vrot.slane %v2204_v19, %v11261_v56  ;;  %v2227_v20 = vrot.slane %v2219_v27, %v11261_v56  ;;  %v2234_v48 = vrot.slane %v2220_v45, %v11261_v56  ;;  %6452 = vrot.lane.b32.xlu0 %v11265_v58, %s10544_s11 }
 0x272   : > { %v2722_v7 = vrot.slane %v2715_v9, %v11259_v54  ;;  %v2730_v24 = vrot.slane %v9355_v16, %v11259_v54  ;;  %v2738_v37 = vrot.slane %v2731_v21, %v11259_v54  ;;  %v2746_v42 = vrot.slane %v9356_v35, %v11259_v54  ;;  %v11410_v28 = vpop.permute.xlu1 %821  ;;  %v11412_v21 = vpop.permute.xlu0 %851 }
 0x273   : > { %v2235_v29 = vcombine.low %v2211_v38, %v2227_v20  ;;  %v2236_v11 = vcombine.high %v2211_v38, %v2227_v20  ;;  %v2237_v46 = vcombine.low %v2218_v47, %v2234_v48  ;;  %v2238_v33 = vcombine.high %v2218_v47, %v2234_v48 }
 0x274   : > { %v2747_v14 = vcombine.low %v2722_v7, %v2730_v24  ;;  %v2748_v19 = vcombine.high %v2722_v7, %v2730_v24  ;;  %v2763_v27 = vcombine.low %v2738_v37, %v2746_v42  ;;  %v2764_v45 = vcombine.high %v2738_v37, %v2746_v42  ;;  %3594 = vrot.lane.b32.xlu1 %v11284_v2, %s10542_s10 }
 0x275   : > { %v9659_v58 = vpack.c.bf16 %v2235_v29, %v2235_v29  ;;  %v9675_v9 = vpack.c.bf16 %v2236_v11, %v2236_v11  ;;  %v9691_v59 = vpack.c.bf16 %v2237_v46, %v2237_v46  ;;  %v9707_v16 = vpack.c.bf16 %v2238_v33, %v2238_v33  ;;  %3592 = vrot.lane.b32.xlu0 %v11276_v3, %s10542_s10 }
 0x276   : > { %v2755_v35 = vrot.slane %v2747_v14, %v11261_v56  ;;  %v2762_v38 = vrot.slane %v2748_v19, %v11261_v56  ;;  %v2771_v47 = vrot.slane %v2763_v27, %v11261_v56  ;;  %v2778_v20 = vrot.slane %v2764_v45, %v11261_v56 }
 0x277   : > { %3382 = vst.msk [vmem:[%s11421_s23 + $0x8] sm:$0xf] %vm3379_vm1, %v9659_v58  ;;  %3398 = vst.msk [vmem:[%s11421_s23 + $0x48] sm:$0xf] %vm3379_vm1, %v9675_v9  ;;  %v1167_v48 = vcombine.low %v11253_v50, %v11375_v34  ;;  %v1168_v7 = vcombine.high %v11253_v50, %v11375_v34  ;;  %v1711_v24 = vcombine.low %v11272_v1, %v922_v62 }
 0x278   : > { %3414 = vst.msk [vmem:[%s11421_s23 + $0x88] sm:$0xf] %vm3379_vm1, %v9691_v59  ;;  %3430 = vst.msk [vmem:[%s11421_s23 + $0xc8] sm:$0xf] %vm3379_vm1, %v9707_v16  ;;  %v1712_v37 = vcombine.high %v11272_v1, %v922_v62  ;;  %v2779_v42 = vcombine.low %v2755_v35, %v2771_v47  ;;  %v2780_v29 = vcombine.high %v2755_v35, %v2771_v47  ;;  %3642 = vrot.lane.b32.xlu1 %v11284_v2, %s10543_s9  ;;  %v11449_v16 = vpop.permute.xlu1 %853  ;;  %v11451_v35 = vpop.permute.xlu0 %867 }
 0x279   : > { %v2781_v11 = vcombine.low %v2762_v38, %v2778_v20  ;;  %v2782_v58 = vcombine.high %v2762_v38, %v2778_v20  ;;  %v1175_v59 = vrot.slane %v1167_v48, %v11259_v54  ;;  %v1182_v46 = vrot.slane %v1168_v7, %v11259_v54  ;;  %3640 = vrot.lane.b32.xlu0 %v11276_v3, %s10543_s9 }
 0x27a   : > { %v1719_v50 = vrot.slane %v1711_v24, %v11259_v54  ;;  %v1726_v34 = vrot.slane %v1712_v37, %v11259_v54  ;;  %v9667_v1 = vpack.c.bf16 %v2779_v42, %v2779_v42  ;;  %v9683_v62 = vpack.c.bf16 %v2780_v29, %v2780_v29 }
 0x27b   : > { %v9699_v33 = vpack.c.bf16 %v2781_v11, %v2781_v11  ;;  %v9715_v14 = vpack.c.bf16 %v2782_v58, %v2782_v58  ;;  %v1183_v19 = vcombine.low %v11347_v49, %v1175_v59  ;;  %v1184_v27 = vcombine.high %v11347_v49, %v1175_v59 }
 0x27c   : > { %v1199_v45 = vcombine.low %v11350_v52, %v1182_v46  ;;  %v1200_v9 = vcombine.high %v11350_v52, %v1182_v46  ;;  %3390 = vst.msk [vmem:[%s11421_s23 + $0x28] sm:$0xf] %vm3379_vm1, %v9667_v1  ;;  %3406 = vst.msk [vmem:[%s11421_s23 + $0x68] sm:$0xf] %vm3379_vm1, %v9683_v62  ;;  %v1727_v38 = vcombine.low %v11370_v53, %v1719_v50  ;;  %3690 = vrot.lane.b32.xlu1 %v11284_v2, %s10544_s11 }
 0x27d   : > { %3422 = vst.msk [vmem:[%s11421_s23 + $0xa8] sm:$0xf] %vm3379_vm1, %v9699_v33  ;;  %3438 = vst.msk [vmem:[%s11421_s23 + $0xe8] sm:$0xf] %vm3379_vm1, %v9715_v14  ;;  %v1728_v49 = vcombine.high %v11370_v53, %v1719_v50  ;;  %v1743_v47 = vcombine.low %v11373_v32, %v1726_v34  ;;  %v1744_v52 = vcombine.high %v11373_v32, %v1726_v34  ;;  %3688 = vrot.lane.b32.xlu0 %v11276_v3, %s10544_s11 }
 0x27e   : > { %v1191_v20 = vrot.slane %v1183_v19, %v11261_v56  ;;  %v1198_v48 = vrot.slane %v1184_v27, %v11261_v56  ;;  %v1207_v7 = vrot.slane %v1199_v45, %v11261_v56  ;;  %v1214_v24 = vrot.slane %v1200_v9, %v11261_v56  ;;  %v11483_v27 = vpop.permute.xlu1 %869  ;;  %v11485_v45 = vpop.permute.xlu0 %899 }
 0x27f   : > { %v1735_v53 = vrot.slane %v1727_v38, %v11261_v56  ;;  %v1742_v37 = vrot.slane %v1728_v49, %v11261_v56  ;;  %v1751_v32 = vrot.slane %v1743_v47, %v11261_v56  ;;  %v1758_v42 = vrot.slane %v1744_v52, %v11261_v56 }
 0x280   : > { %v2239_v29 = vcombine.low %v1191_v20, %v1198_v48  ;;  %v9341_v11 = vcombine.high %v1191_v20, %v1198_v48  ;;  %v2255_v58 = vcombine.low %v1207_v7, %v1214_v24  ;;  %v9342_v59 = vcombine.high %v1207_v7, %v1214_v24  ;;  %6370 = vrot.lane.b32.xlu1 %v11305_v13, %s10542_s10 }
 0x281   : > { %v2783_v46 = vcombine.low %v1735_v53, %v1742_v37  ;;  %v9357_v50 = vcombine.high %v1735_v53, %v1742_v37  ;;  %v2799_v34 = vcombine.low %v1751_v32, %v1758_v42  ;;  %v9358_v1 = vcombine.high %v1751_v32, %v1758_v42  ;;  %6368 = vrot.lane.b32.xlu0 %v11292_v6, %s10542_s10 }
 0x282   : > { %v2246_v62 = vrot.slane %v2239_v29, %v11259_v54  ;;  %v2254_v33 = vrot.slane %v9341_v11, %v11259_v54  ;;  %v2262_v14 = vrot.slane %v2255_v58, %v11259_v54  ;;  %v2270_v19 = vrot.slane %v9342_v59, %v11259_v54 }
 0x283   : > { %v2790_v9 = vrot.slane %v2783_v46, %v11259_v54  ;;  %v2798_v38 = vrot.slane %v9357_v50, %v11259_v54  ;;  %v2806_v49 = vrot.slane %v2799_v34, %v11259_v54  ;;  %v2814_v47 = vrot.slane %v9358_v1, %v11259_v54 }
 0x284   : > { %v2271_v52 = vcombine.low %v2246_v62, %v2254_v33  ;;  %v2272_v20 = vcombine.high %v2246_v62, %v2254_v33  ;;  %v2287_v48 = vcombine.low %v2262_v14, %v2270_v19  ;;  %v2288_v7 = vcombine.high %v2262_v14, %v2270_v19  ;;  %6418 = vrot.lane.b32.xlu1 %v11305_v13, %s10543_s9  ;;  %v902_v19 = vpop.permute.xlu1 %901 }
 0x285   : > { %v2815_v24 = vcombine.low %v2790_v9, %v2798_v38  ;;  %v2816_v53 = vcombine.high %v2790_v9, %v2798_v38  ;;  %v2831_v37 = vcombine.low %v2806_v49, %v2814_v47  ;;  %v2832_v32 = vcombine.high %v2806_v49, %v2814_v47  ;;  %6416 = vrot.lane.b32.xlu0 %v11292_v6, %s10543_s9  ;;  %v916_v9 = vpop.permute.xlu0 %915 }
 0x286   : > { %v2279_v42 = vrot.slane %v2271_v52, %v11261_v56  ;;  %v2286_v29 = vrot.slane %v2272_v20, %v11261_v56  ;;  %v2295_v11 = vrot.slane %v2287_v48, %v11261_v56  ;;  %v2302_v58 = vrot.slane %v2288_v7, %v11261_v56 }
 0x287   : > { %v2823_v59 = vrot.slane %v2815_v24, %v11261_v56  ;;  %v2830_v46 = vrot.slane %v2816_v53, %v11261_v56  ;;  %v2839_v50 = vrot.slane %v2831_v37, %v11261_v56  ;;  %v2846_v34 = vrot.slane %v2832_v32, %v11261_v56 }
 0x288   : > { %v2303_v1 = vcombine.low %v2279_v42, %v2295_v11  ;;  %v2304_v62 = vcombine.high %v2279_v42, %v2295_v11  ;;  %v2305_v33 = vcombine.low %v2286_v29, %v2302_v58  ;;  %v2306_v14 = vcombine.high %v2286_v29, %v2302_v58  ;;  %6466 = vrot.lane.b32.xlu1 %v11305_v13, %s10544_s11 }
 0x289   : > { %v2847_v38 = vcombine.low %v2823_v59, %v2839_v50  ;;  %v2848_v49 = vcombine.high %v2823_v59, %v2839_v50  ;;  %v2849_v47 = vcombine.low %v2830_v46, %v2846_v34  ;;  %v2850_v52 = vcombine.high %v2830_v46, %v2846_v34  ;;  %6464 = vrot.lane.b32.xlu0 %v11292_v6, %s10544_s11 }
 0x28a   : > { %v9660_v20 = vpack.c.bf16 %v2303_v1, %v2303_v1  ;;  %v9676_v48 = vpack.c.bf16 %v2304_v62, %v2304_v62  ;;  %v9692_v7 = vpack.c.bf16 %v2305_v33, %v2305_v33  ;;  %v9708_v24 = vpack.c.bf16 %v2306_v14, %v2306_v14 }
 0x28b   : > { %v9668_v53 = vpack.c.bf16 %v2847_v38, %v2847_v38  ;;  %v9684_v37 = vpack.c.bf16 %v2848_v49, %v2848_v49  ;;  %v9700_v32 = vpack.c.bf16 %v2849_v47, %v2849_v47  ;;  %v9716_v42 = vpack.c.bf16 %v2850_v52, %v2850_v52 }
 0x28c   : > { %3383 = vst.msk [vmem:[%s11421_s23 + $0xc] sm:$0xf] %vm3379_vm1, %v9660_v20  ;;  %3399 = vst.msk [vmem:[%s11421_s23 + $0x4c] sm:$0xf] %vm3379_vm1, %v9676_v48  ;;  %v947_v29 = vcombine.low %v11083_v8, %v11412_v21  ;;  %v948_v11 = vcombine.high %v11083_v8, %v11412_v21  ;;  %v1015_v58 = vcombine.low %v11114_v17, %v11449_v16  ;;  %3590 = vrot.lane.b32.xlu1 %v11288_v5, %s10542_s10 }
 0x28d   : > { %3415 = vst.msk [vmem:[%s11421_s23 + $0x8c] sm:$0xf] %vm3379_vm1, %v9692_v7  ;;  %3431 = vst.msk [vmem:[%s11421_s23 + $0xcc] sm:$0xf] %vm3379_vm1, %v9708_v24  ;;  %v1016_v59 = vcombine.high %v11114_v17, %v11449_v16  ;;  %v1491_v46 = vcombine.low %v11092_v10, %v11451_v35  ;;  %v1492_v8 = vcombine.high %v11092_v10, %v11451_v35  ;;  %v918_v10 = vpop.permute.xlu1 %917  ;;  %v806_v35 = vpop.permute.xlu0 %805  ;;  %3588 = vrot.lane.b32.xlu0 %v11280_v4, %s10542_s10 }
 0x28e   : > { %3391 = vst.msk [vmem:[%s11421_s23 + $0x2c] sm:$0xf] %vm3379_vm1, %v9668_v53  ;;  %3407 = vst.msk [vmem:[%s11421_s23 + $0x6c] sm:$0xf] %vm3379_vm1, %v9684_v37  ;;  %v1559_v21 = vcombine.low %v11105_v15, %v11483_v27  ;;  %v1560_v17 = vcombine.high %v11105_v15, %v11483_v27  ;;  %v955_v16 = vrot.slane %v947_v29, %v11259_v54 }
 0x28f   : > { %3423 = vst.msk [vmem:[%s11421_s23 + $0xac] sm:$0xf] %vm3379_vm1, %v9700_v32  ;;  %3439 = vst.msk [vmem:[%s11421_s23 + $0xec] sm:$0xf] %vm3379_vm1, %v9716_v42  ;;  %v962_v50 = vrot.slane %v948_v11, %v11259_v54  ;;  %v11546_v34 = vrot.slane %v1015_v58, %v11259_v54  ;;  %v11549_v1 = vrot.slane %v1016_v59, %v11259_v54 }
 0x290   : > { %v1499_v15 = vrot.slane %v1491_v46, %v11259_v54  ;;  %v1506_v27 = vrot.slane %v1492_v8, %v11259_v54  ;;  %v11556_v62 = vrot.slane %v1559_v21, %v11259_v54  ;;  %v11559_v33 = vrot.slane %v1560_v17, %v11259_v54  ;;  %3638 = vrot.lane.b32.xlu1 %v11288_v5, %s10543_s9 }
 0x291   : > { %v963_v14 = vcombine.low %v11377_v51, %v11485_v45  ;;  %v964_v38 = vcombine.high %v11377_v51, %v11485_v45  ;;  %v1507_v49 = vcombine.low %v11391_v57, %v916_v9  ;;  %v1508_v47 = vcombine.high %v11391_v57, %v916_v9  ;;  %3636 = vrot.lane.b32.xlu0 %v11280_v4, %s10543_s9 }
 0x292   : > { %v1575_v52 = vcombine.low %v11410_v28, %v918_v10  ;;  %v1576_v20 = vcombine.high %v11410_v28, %v918_v10  ;;  %v1031_v48 = vcombine.low %v806_v35, %v902_v19  ;;  %v1032_v7 = vcombine.high %v806_v35, %v902_v19 }
 0x293   : > { %v971_v24 = vrot.slane %v963_v14, %v11259_v54  ;;  %v978_v53 = vrot.slane %v964_v38, %v11259_v54  ;;  %v1515_v37 = vrot.slane %v1507_v49, %v11259_v54  ;;  %v1522_v51 = vrot.slane %v1508_v47, %v11259_v54 }
 0x294   : > { %v11578_v57 = vrot.slane %v1575_v52, %v11259_v54  ;;  %v11581_v28 = vrot.slane %v1576_v20, %v11259_v54  ;;  %v11584_v45 = vrot.slane %v1031_v48, %v11259_v54  ;;  %v11587_v19 = vrot.slane %v1032_v7, %v11259_v54  ;;  %3686 = vrot.lane.b32.xlu1 %v11288_v5, %s10544_s11  ;;  %v11603_v52 = vpop.permute.xlu0 %815 }
 0x295   : > { %v979_v9 = vcombine.low %v955_v16, %v971_v24  ;;  %v980_v32 = vcombine.high %v955_v16, %v971_v24  ;;  %v995_v42 = vcombine.low %v962_v50, %v978_v53  ;;  %v996_v29 = vcombine.high %v962_v50, %v978_v53  ;;  %3684 = vrot.lane.b32.xlu0 %v11280_v4, %s10544_s11 }
 0x296   : > { %v1523_v11 = vcombine.low %v1499_v15, %v1515_v37  ;;  %v1524_v58 = vcombine.high %v1499_v15, %v1515_v37  ;;  %v1539_v59 = vcombine.low %v1506_v27, %v1522_v51  ;;  %v1540_v46 = vcombine.high %v1506_v27, %v1522_v51  ;;  %v11601_v27 = vpop.permute.xlu1 %817 }
 0x297   : > { %v987_v8 = vrot.slane %v979_v9, %v11261_v56  ;;  %v994_v21 = vrot.slane %v980_v32, %v11261_v56  ;;  %v1003_v17 = vrot.slane %v995_v42, %v11261_v56  ;;  %v1010_v10 = vrot.slane %v996_v29, %v11261_v56  ;;  %v11613_v32 = vpop.f32.mrb[20].mxu1 }
 0x298   : > { %v1531_v16 = vrot.slane %v1523_v11, %v11261_v56  ;;  %v1538_v50 = vrot.slane %v1524_v58, %v11261_v56  ;;  %v1547_v35 = vrot.slane %v1539_v59, %v11261_v56  ;;  %v1554_v15 = vrot.slane %v1540_v46, %v11261_v56  ;;  %6366 = vrot.lane.b32.xlu1 %v11310_v43, %s10542_s10 }
 0x299   : > { %v2035_v14 = vcombine.low %v987_v8, %v994_v21  ;;  %v9335_v38 = vcombine.high %v987_v8, %v994_v21  ;;  %v2051_v49 = vcombine.low %v1003_v17, %v1010_v10  ;;  %v9336_v47 = vcombine.high %v1003_v17, %v1010_v10  ;;  %6364 = vrot.lane.b32.xlu0 %v11301_v12, %s10542_s10  ;;  %v11619_v17 = vpop.f32.mrb[21].mxu1 }
 0x29a   : > { %v2579_v20 = vcombine.low %v1531_v16, %v1538_v50  ;;  %v9351_v48 = vcombine.high %v1531_v16, %v1538_v50  ;;  %v2595_v7 = vcombine.low %v1547_v35, %v1554_v15  ;;  %v9352_v24 = vcombine.high %v1547_v35, %v1554_v15  ;;  %v11621_v15 = vpop.permute.xlu1 %833 }
 0x29b   : > { %v2042_v53 = vrot.slane %v2035_v14, %v11259_v54  ;;  %v2050_v37 = vrot.slane %v9335_v38, %v11259_v54  ;;  %v2058_v51 = vrot.slane %v2051_v49, %v11259_v54  ;;  %v2066_v9 = vrot.slane %v9336_v47, %v11259_v54  ;;  %v11625_v14 = vpop.f32.mrb[22].mxu1 }
 0x29c   : > { %v2586_v42 = vrot.slane %v2579_v20, %v11259_v54  ;;  %v2594_v29 = vrot.slane %v9351_v48, %v11259_v54  ;;  %v2602_v11 = vrot.slane %v2595_v7, %v11259_v54  ;;  %v2610_v58 = vrot.slane %v9352_v24, %v11259_v54  ;;  %6414 = vrot.lane.b32.xlu1 %v11310_v43, %s10543_s9  ;;  %v11631_v48 = vpop.permute.xlu0 %831  ;;  %v11635_v7 = vpop.f32.mrb[23].mxu1 }
 0x29d   : > { %v2067_v59 = vcombine.low %v2042_v53, %v2050_v37  ;;  %v2068_v46 = vcombine.high %v2042_v53, %v2050_v37  ;;  %v2083_v8 = vcombine.low %v2058_v51, %v2066_v9  ;;  %v2084_v21 = vcombine.high %v2058_v51, %v2066_v9  ;;  %6412 = vrot.lane.b32.xlu0 %v11301_v12, %s10543_s9 }
 0x29e   : > { %v2611_v10 = vcombine.low %v2586_v42, %v2594_v29  ;;  %v2612_v16 = vcombine.high %v2586_v42, %v2594_v29  ;;  %v2627_v50 = vcombine.low %v2602_v11, %v2610_v58  ;;  %v2628_v35 = vcombine.high %v2602_v11, %v2610_v58 }
 0x29f   : > { %v2075_v38 = vrot.slane %v2067_v59, %v11261_v56  ;;  %v2082_v49 = vrot.slane %v2068_v46, %v11261_v56  ;;  %v2091_v47 = vrot.slane %v2083_v8, %v11261_v56  ;;  %v2098_v20 = vrot.slane %v2084_v21, %v11261_v56 }
 0x2a0   : > { %v2619_v24 = vrot.slane %v2611_v10, %v11261_v56  ;;  %v2626_v53 = vrot.slane %v2612_v16, %v11261_v56  ;;  %v2635_v37 = vrot.slane %v2627_v50, %v11261_v56  ;;  %v2642_v51 = vrot.slane %v2628_v35, %v11261_v56  ;;  %6462 = vrot.lane.b32.xlu1 %v11310_v43, %s10544_s11 }
 0x2a1   : > { %v2099_v9 = vcombine.low %v2075_v38, %v2091_v47  ;;  %v2100_v42 = vcombine.high %v2075_v38, %v2091_v47  ;;  %v2101_v29 = vcombine.low %v2082_v49, %v2098_v20  ;;  %v2102_v11 = vcombine.high %v2082_v49, %v2098_v20  ;;  %6460 = vrot.lane.b32.xlu0 %v11301_v12, %s10544_s11  ;;  %v11645_v20 = vpop.permute.xlu1 %865 }
 0x2a2   : > { %v2643_v58 = vcombine.low %v2619_v24, %v2635_v37  ;;  %v2644_v59 = vcombine.high %v2619_v24, %v2635_v37  ;;  %v2645_v46 = vcombine.low %v2626_v53, %v2642_v51  ;;  %v2646_v8 = vcombine.high %v2626_v53, %v2642_v51 }
 0x2a3   : > { %v9657_v21 = vpack.c.bf16 %v2099_v9, %v2099_v9  ;;  %v9673_v10 = vpack.c.bf16 %v2100_v42, %v2100_v42  ;;  %v9689_v16 = vpack.c.bf16 %v2101_v29, %v2101_v29  ;;  %v9705_v50 = vpack.c.bf16 %v2102_v11, %v2102_v11  ;;  %v11663_v9 = vpop.permute.xlu0 %863 }
 0x2a4   : > { %v9665_v35 = vpack.c.bf16 %v2643_v58, %v2643_v58  ;;  %v9681_v38 = vpack.c.bf16 %v2644_v59, %v2644_v59  ;;  %v9697_v49 = vpack.c.bf16 %v2645_v46, %v2645_v46  ;;  %v9713_v47 = vpack.c.bf16 %v2646_v8, %v2646_v8  ;;  %3602 = vrot.lane.b32.xlu1 %v11321_v39, %s10542_s10 }
 0x2a5   : > { %3380 = vst.msk [vmem:[%s11421_s23] sm:$0xf] %vm3379_vm1, %v9657_v21  ;;  %3396 = vst.msk [vmem:[%s11421_s23 + $0x40] sm:$0xf] %vm3379_vm1, %v9673_v10  ;;  %v1591_v24 = vcombine.low %v11556_v62, %v11578_v57  ;;  %v1592_v53 = vcombine.high %v11556_v62, %v11578_v57  ;;  %v1607_v37 = vcombine.low %v11559_v33, %v11581_v28  ;;  %3600 = vrot.lane.b32.xlu0 %v11313_v18, %s10542_s10 }
 0x2a6   : > { %3412 = vst.msk [vmem:[%s11421_s23 + $0x80] sm:$0xf] %vm3379_vm1, %v9689_v16  ;;  %3428 = vst.msk [vmem:[%s11421_s23 + $0xc0] sm:$0xf] %vm3379_vm1, %v9705_v50  ;;  %v1608_v51 = vcombine.high %v11559_v33, %v11581_v28  ;;  %v1047_v42 = vcombine.low %v11546_v34, %v11584_v45  ;;  %v1048_v62 = vcombine.high %v11546_v34, %v11584_v45 }
 0x2a7   : > { %3388 = vst.msk [vmem:[%s11421_s23 + $0x20] sm:$0xf] %vm3379_vm1, %v9665_v35  ;;  %3404 = vst.msk [vmem:[%s11421_s23 + $0x60] sm:$0xf] %vm3379_vm1, %v9681_v38  ;;  %v1063_v57 = vcombine.low %v11549_v1, %v11587_v19  ;;  %v1064_v33 = vcombine.high %v11549_v1, %v11587_v19  ;;  %v1599_v28 = vrot.slane %v1591_v24, %v11261_v56  ;;  %v11693_v38 = vpop.permute.xlu1 %881 }
 0x2a8   : > { %3420 = vst.msk [vmem:[%s11421_s23 + $0xa0] sm:$0xf] %vm3379_vm1, %v9697_v49  ;;  %3436 = vst.msk [vmem:[%s11421_s23 + $0xe0] sm:$0xf] %vm3379_vm1, %v9713_v47  ;;  %v1606_v29 = vrot.slane %v1592_v53, %v11261_v56  ;;  %v1615_v11 = vrot.slane %v1607_v37, %v11261_v56  ;;  %v1622_v58 = vrot.slane %v1608_v51, %v11261_v56  ;;  %3650 = vrot.lane.b32.xlu1 %v11321_v39, %s10543_s9  ;;  %v11701_v37 = vpop.permute.xlu0 %879 }
 0x2a9   : > { %v1055_v34 = vrot.slane %v1047_v42, %v11261_v56  ;;  %v1062_v45 = vrot.slane %v1048_v62, %v11261_v56  ;;  %v1071_v1 = vrot.slane %v1063_v57, %v11261_v56  ;;  %v1078_v19 = vrot.slane %v1064_v33, %v11261_v56  ;;  %3648 = vrot.lane.b32.xlu0 %v11313_v18, %s10543_s9 }
 0x2aa   : > { %v2647_v59 = vcombine.low %v1599_v28, %v1606_v29  ;;  %v9353_v46 = vcombine.high %v1599_v28, %v1606_v29  ;;  %v2663_v8 = vcombine.low %v1615_v11, %v1622_v58  ;;  %v9354_v21 = vcombine.high %v1615_v11, %v1622_v58 }
 0x2ab   : > { %v2103_v10 = vcombine.low %v1055_v34, %v1062_v45  ;;  %v9337_v16 = vcombine.high %v1055_v34, %v1062_v45  ;;  %v2119_v50 = vcombine.low %v1071_v1, %v1078_v19  ;;  %v9338_v35 = vcombine.high %v1071_v1, %v1078_v19 }
 0x2ac   : > { %v2654_v49 = vrot.slane %v2647_v59, %v11259_v54  ;;  %v2662_v47 = vrot.slane %v9353_v46, %v11259_v54  ;;  %v2670_v24 = vrot.slane %v2663_v8, %v11259_v54  ;;  %v2678_v53 = vrot.slane %v9354_v21, %v11259_v54  ;;  %3698 = vrot.lane.b32.xlu1 %v11321_v39, %s10544_s11 }
 0x2ad   : > { %v2110_v51 = vrot.slane %v2103_v10, %v11259_v54  ;;  %v2118_v42 = vrot.slane %v9337_v16, %v11259_v54  ;;  %v2126_v62 = vrot.slane %v2119_v50, %v11259_v54  ;;  %v2134_v57 = vrot.slane %v9338_v35, %v11259_v54  ;;  %3696 = vrot.lane.b32.xlu0 %v11313_v18, %s10544_s11  ;;  %v11721_v35 = vpop.permute.xlu1 %913 }
 0x2ae   : > { %v2679_v33 = vcombine.low %v2654_v49, %v2662_v47  ;;  %v2680_v28 = vcombine.high %v2654_v49, %v2662_v47  ;;  %v2695_v29 = vcombine.low %v2670_v24, %v2678_v53  ;;  %v2696_v11 = vcombine.high %v2670_v24, %v2678_v53 }
 0x2af   : > { %v2135_v58 = vcombine.low %v2110_v51, %v2118_v42  ;;  %v2136_v34 = vcombine.high %v2110_v51, %v2118_v42  ;;  %v2151_v45 = vcombine.low %v2126_v62, %v2134_v57  ;;  %v2152_v1 = vcombine.high %v2126_v62, %v2134_v57  ;;  %v912_v51 = vpop.permute.xlu0 %911  ;;  %v11723_v42 = vpop.f32.mrb[20].mxu0 }
 0x2b0   : > { %v2687_v19 = vrot.slane %v2679_v33, %v11261_v56  ;;  %v2694_v59 = vrot.slane %v2680_v28, %v11261_v56  ;;  %v2703_v46 = vrot.slane %v2695_v29, %v11261_v56  ;;  %v2710_v8 = vrot.slane %v2696_v11, %v11261_v56  ;;  %6378 = vrot.lane.b32.xlu1 %v11343_v41, %s10542_s10  ;;  %v11727_v29 = vpop.f32.mrb[21].mxu0 }
 0x2b1   : > { %v2143_v21 = vrot.slane %v2135_v58, %v11261_v56  ;;  %v2150_v10 = vrot.slane %v2136_v34, %v11261_v56  ;;  %v2159_v16 = vrot.slane %v2151_v45, %v11261_v56  ;;  %v2166_v50 = vrot.slane %v2152_v1, %v11261_v56  ;;  %6376 = vrot.lane.b32.xlu0 %v11334_v44, %s10542_s10  ;;  %v11731_v1 = vpop.f32.mrb[22].mxu0 }
 0x2b2   : > { %v2711_v49 = vcombine.low %v2687_v19, %v2703_v46  ;;  %v2712_v47 = vcombine.high %v2687_v19, %v2703_v46  ;;  %v2713_v24 = vcombine.low %v2694_v59, %v2710_v8  ;;  %v2714_v53 = vcombine.high %v2694_v59, %v2710_v8 }
 0x2b3   : > { %v2167_v62 = vcombine.low %v2143_v21, %v2159_v16  ;;  %v2168_v57 = vcombine.high %v2143_v21, %v2159_v16  ;;  %v2169_v33 = vcombine.low %v2150_v10, %v2166_v50  ;;  %v2170_v28 = vcombine.high %v2150_v10, %v2166_v50 }
 0x2b4   : > { %v9666_v11 = vpack.c.bf16 %v2711_v49, %v2711_v49  ;;  %v9682_v58 = vpack.c.bf16 %v2712_v47, %v2712_v47  ;;  %v9698_v34 = vpack.c.bf16 %v2713_v24, %v2713_v24  ;;  %v9714_v45 = vpack.c.bf16 %v2714_v53, %v2714_v53  ;;  %v11749_v49 = vpop.f32.mrb[23].mxu0  ;;  %6426 = vrot.lane.b32.xlu1 %v11343_v41, %s10543_s9 }
 0x2b5   : > { %v9658_v19 = vpack.c.bf16 %v2167_v62, %v2167_v62  ;;  %v9674_v59 = vpack.c.bf16 %v2168_v57, %v2168_v57  ;;  %v9690_v46 = vpack.c.bf16 %v2169_v33, %v2169_v33  ;;  %v9706_v8 = vpack.c.bf16 %v2170_v28, %v2170_v28  ;;  %v930_v57 = vpop.permute.xlu1 %929  ;;  %v928_v33 = vpop.permute.xlu0 %927  ;;  %6424 = vrot.lane.b32.xlu0 %v11334_v44, %s10543_s9 }
 0x2b6   : > { %3389 = vst.msk [vmem:[%s11421_s23 + $0x24] sm:$0xf] %vm3379_vm1, %v9666_v11  ;;  %3405 = vst.msk [vmem:[%s11421_s23 + $0x64] sm:$0xf] %vm3379_vm1, %v9682_v58  ;;  %v1423_v21 = vcombine.low %v11142_v23, %v11645_v20  ;;  %v1424_v10 = vcombine.high %v11142_v23, %v11645_v20  ;;  %v1355_v16 = vcombine.low %v11139_v22, %v11663_v9 }
 0x2b7   : > { %3421 = vst.msk [vmem:[%s11421_s23 + $0xa4] sm:$0xf] %vm3379_vm1, %v9698_v34  ;;  %3437 = vst.msk [vmem:[%s11421_s23 + $0xe4] sm:$0xf] %vm3379_vm1, %v9714_v45  ;;  %v1356_v50 = vcombine.high %v11139_v22, %v11663_v9  ;;  %v1967_v47 = vcombine.low %v11154_v30, %v11693_v38  ;;  %v1968_v23 = vcombine.high %v11154_v30, %v11693_v38 }
 0x2b8   : > { %3381 = vst.msk [vmem:[%s11421_s23 + $0x4] sm:$0xf] %vm3379_vm1, %v9658_v19  ;;  %3397 = vst.msk [vmem:[%s11421_s23 + $0x44] sm:$0xf] %vm3379_vm1, %v9674_v59  ;;  %v1899_v20 = vcombine.low %v11151_v25, %v11701_v37  ;;  %v1900_v22 = vcombine.high %v11151_v25, %v11701_v37  ;;  %v1431_v9 = vrot.slane %v1423_v21, %v11259_v54  ;;  %3598 = vrot.lane.b32.xlu1 %v11324_v40, %s10542_s10 }
 0x2b9   : > { %3413 = vst.msk [vmem:[%s11421_s23 + $0x84] sm:$0xf] %vm3379_vm1, %v9690_v46  ;;  %3429 = vst.msk [vmem:[%s11421_s23 + $0xc4] sm:$0xf] %vm3379_vm1, %v9706_v8  ;;  %v1438_v24 = vrot.slane %v1424_v10, %v11259_v54  ;;  %v1363_v53 = vrot.slane %v1355_v16, %v11259_v54  ;;  %v1370_v62 = vrot.slane %v1356_v50, %v11259_v54  ;;  %3596 = vrot.lane.b32.xlu0 %v11316_v36, %s10542_s10 }
 0x2ba   : > { %v11776_v30 = vrot.slane %v1967_v47, %v11259_v54  ;;  %v11779_v25 = vrot.slane %v1968_v23, %v11259_v54  ;;  %v11782_v38 = vrot.slane %v1899_v20, %v11259_v54  ;;  %v11785_v37 = vrot.slane %v1900_v22, %v11259_v54 }
 0x2bb   : > { %v1439_v28 = vcombine.low %v11601_v27, %v11721_v35  ;;  %v1440_v11 = vcombine.high %v11601_v27, %v11721_v35  ;;  %v1371_v58 = vcombine.low %v11603_v52, %v912_v51  ;;  %v1372_v34 = vcombine.high %v11603_v52, %v912_v51 }
 0x2bc   : > { %v1983_v45 = vcombine.low %v11621_v15, %v930_v57  ;;  %v1984_v19 = vcombine.high %v11621_v15, %v930_v57  ;;  %v1915_v59 = vcombine.low %v11631_v48, %v928_v33  ;;  %v1916_v46 = vcombine.high %v11631_v48, %v928_v33  ;;  %3646 = vrot.lane.b32.xlu1 %v11324_v40, %s10543_s9 }
 0x2bd   : > { %v1447_v8 = vrot.slane %v1439_v28, %v11259_v54  ;;  %v1454_v21 = vrot.slane %v1440_v11, %v11259_v54  ;;  %v1379_v27 = vrot.slane %v1371_v58, %v11259_v54  ;;  %v1386_v35 = vrot.slane %v1372_v34, %v11259_v54  ;;  %3644 = vrot.lane.b32.xlu0 %v11316_v36, %s10543_s9 }
 0x2be   : > { %v11806_v52 = vrot.slane %v1983_v45, %v11259_v54  ;;  %v11809_v15 = vrot.slane %v1984_v19, %v11259_v54  ;;  %v11812_v48 = vrot.slane %v1915_v59, %v11259_v54  ;;  %v11815_v51 = vrot.slane %v1916_v46, %v11259_v54  ;;  %v11829_v46 = vpop.permute.xlu1 %813 }
 0x2bf   : > { %v1455_v10 = vcombine.low %v1431_v9, %v1447_v8  ;;  %v1456_v16 = vcombine.high %v1431_v9, %v1447_v8  ;;  %v1471_v50 = vcombine.low %v1438_v24, %v1454_v21  ;;  %v1472_v47 = vcombine.high %v1438_v24, %v1454_v21  ;;  %v11831_v8 = vpop.permute.xlu0 %811 }
 0x2c0   : > { %v1387_v23 = vcombine.low %v1363_v53, %v1379_v27  ;;  %v1388_v20 = vcombine.high %v1363_v53, %v1379_v27  ;;  %v1403_v22 = vcombine.low %v1370_v62, %v1386_v35  ;;  %v1404_v57 = vcombine.high %v1370_v62, %v1386_v35  ;;  %3694 = vrot.lane.b32.xlu1 %v11324_v40, %s10544_s11 }
 0x2c1   : > { %v1463_v33 = vrot.slane %v1455_v10, %v11261_v56  ;;  %v1470_v28 = vrot.slane %v1456_v16, %v11261_v56  ;;  %v1479_v11 = vrot.slane %v1471_v50, %v11261_v56  ;;  %v1486_v58 = vrot.slane %v1472_v47, %v11261_v56  ;;  %3692 = vrot.lane.b32.xlu0 %v11316_v36, %s10544_s11 }
 0x2c2   : > { %v1395_v9 = vrot.slane %v1387_v23, %v11261_v56  ;;  %v1402_v24 = vrot.slane %v1388_v20, %v11261_v56  ;;  %v1411_v53 = vrot.slane %v1403_v22, %v11261_v56  ;;  %v1418_v62 = vrot.slane %v1404_v57, %v11261_v56 }
 0x2c3   : > { %v2511_v34 = vcombine.low %v1463_v33, %v1470_v28  ;;  %v9349_v45 = vcombine.high %v1463_v33, %v1470_v28  ;;  %v2527_v19 = vcombine.low %v1479_v11, %v1486_v58  ;;  %v9350_v59 = vcombine.high %v1479_v11, %v1486_v58 }
 0x2c4   : > { %v2443_v21 = vcombine.low %v1395_v9, %v1402_v24  ;;  %v9347_v27 = vcombine.high %v1395_v9, %v1402_v24  ;;  %v2459_v35 = vcombine.low %v1411_v53, %v1418_v62  ;;  %v9348_v10 = vcombine.high %v1411_v53, %v1418_v62  ;;  %6374 = vrot.lane.b32.xlu1 %v11353_v63, %s10542_s10 }
 0x2c5   : > { %v2518_v16 = vrot.slane %v2511_v34, %v11259_v54  ;;  %v2526_v50 = vrot.slane %v9349_v45, %v11259_v54  ;;  %v2534_v47 = vrot.slane %v2527_v19, %v11259_v54  ;;  %v2542_v23 = vrot.slane %v9350_v59, %v11259_v54  ;;  %6372 = vrot.lane.b32.xlu0 %v11337_v31, %s10542_s10 }
 0x2c6   : > { %v2450_v20 = vrot.slane %v2443_v21, %v11259_v54  ;;  %v2458_v22 = vrot.slane %v9347_v27, %v11259_v54  ;;  %v2466_v57 = vrot.slane %v2459_v35, %v11259_v54  ;;  %v2474_v33 = vrot.slane %v9348_v10, %v11259_v54  ;;  %v11851_v27 = vpop.permute.xlu1 %829  ;;  %v11853_v35 = vpop.permute.xlu0 %827 }
 0x2c7   : > { %v2543_v28 = vcombine.low %v2518_v16, %v2526_v50  ;;  %v2544_v11 = vcombine.high %v2518_v16, %v2526_v50  ;;  %v2559_v58 = vcombine.low %v2534_v47, %v2542_v23  ;;  %v2560_v9 = vcombine.high %v2534_v47, %v2542_v23 }
 0x2c8   : > { %v2475_v24 = vcombine.low %v2450_v20, %v2458_v22  ;;  %v2476_v53 = vcombine.high %v2450_v20, %v2458_v22  ;;  %v2491_v62 = vcombine.low %v2466_v57, %v2474_v33  ;;  %v2492_v34 = vcombine.high %v2466_v57, %v2474_v33  ;;  %6422 = vrot.lane.b32.xlu1 %v11353_v63, %s10543_s9 }
 0x2c9   : > { %v2551_v45 = vrot.slane %v2543_v28, %v11261_v56  ;;  %v2558_v19 = vrot.slane %v2544_v11, %v11261_v56  ;;  %v2567_v59 = vrot.slane %v2559_v58, %v11261_v56  ;;  %v2574_v21 = vrot.slane %v2560_v9, %v11261_v56  ;;  %6420 = vrot.lane.b32.xlu0 %v11337_v31, %s10543_s9 }
 0x2ca   : > { %v2483_v10 = vrot.slane %v2475_v24, %v11261_v56  ;;  %v2490_v16 = vrot.slane %v2476_v53, %v11261_v56  ;;  %v2499_v50 = vrot.slane %v2491_v62, %v11261_v56  ;;  %v2506_v47 = vrot.slane %v2492_v34, %v11261_v56 }
 0x2cb   : > { %v2575_v23 = vcombine.low %v2551_v45, %v2567_v59  ;;  %v2576_v20 = vcombine.high %v2551_v45, %v2567_v59  ;;  %v2577_v22 = vcombine.low %v2558_v19, %v2574_v21  ;;  %v2578_v57 = vcombine.high %v2558_v19, %v2574_v21 }
 0x2cc   : > { %v2507_v33 = vcombine.low %v2483_v10, %v2499_v50  ;;  %v2508_v28 = vcombine.high %v2483_v10, %v2499_v50  ;;  %v2509_v11 = vcombine.low %v2490_v16, %v2506_v47  ;;  %v2510_v58 = vcombine.high %v2490_v16, %v2506_v47  ;;  %v11881_v47 = vpop.permute.xlu1 %861  ;;  %6470 = vrot.lane.b32.xlu1 %v11353_v63, %s10544_s11 }
 0x2cd   : > { %v9664_v9 = vpack.c.bf16 %v2575_v23, %v2575_v23  ;;  %v9680_v24 = vpack.c.bf16 %v2576_v20, %v2576_v20  ;;  %v9696_v53 = vpack.c.bf16 %v2577_v22, %v2577_v22  ;;  %v9712_v62 = vpack.c.bf16 %v2578_v57, %v2578_v57  ;;  %v11883_v23 = vpop.permute.xlu0 %859  ;;  %6468 = vrot.lane.b32.xlu0 %v11337_v31, %s10544_s11 }
 0x2ce   : > { %v9663_v34 = vpack.c.bf16 %v2507_v33, %v2507_v33  ;;  %v9679_v45 = vpack.c.bf16 %v2508_v28, %v2508_v28  ;;  %v9695_v19 = vpack.c.bf16 %v2509_v11, %v2509_v11  ;;  %v9711_v59 = vpack.c.bf16 %v2510_v58, %v2510_v58 }
 0x2cf   : > { %3387 = vst.msk [vmem:[%s11421_s23 + $0x1c] sm:$0xf] %vm3379_vm1, %v9664_v9  ;;  %3403 = vst.msk [vmem:[%s11421_s23 + $0x5c] sm:$0xf] %vm3379_vm1, %v9680_v24  ;;  %v1999_v21 = vcombine.low %v11776_v30, %v11806_v52  ;;  %v2000_v10 = vcombine.high %v11776_v30, %v11806_v52  ;;  %v2015_v16 = vcombine.low %v11779_v25, %v11809_v15 }
 0x2d0   : > { %3419 = vst.msk [vmem:[%s11421_s23 + $0x9c] sm:$0xf] %vm3379_vm1, %v9696_v53  ;;  %3435 = vst.msk [vmem:[%s11421_s23 + $0xdc] sm:$0xf] %vm3379_vm1, %v9712_v62  ;;  %v2016_v50 = vcombine.high %v11779_v25, %v11809_v15  ;;  %v1931_v30 = vcombine.low %v11782_v38, %v11812_v48  ;;  %v1932_v52 = vcombine.high %v11782_v38, %v11812_v48  ;;  %6474 = vrot.lane.b32.xlu1 %v11343_v41, %s10544_s11 }
 0x2d1   : > { %3386 = vst.msk [vmem:[%s11421_s23 + $0x18] sm:$0xf] %vm3379_vm1, %v9663_v34  ;;  %3402 = vst.msk [vmem:[%s11421_s23 + $0x58] sm:$0xf] %vm3379_vm1, %v9679_v45  ;;  %v1947_v25 = vcombine.low %v11785_v37, %v11815_v51  ;;  %v1948_v15 = vcombine.high %v11785_v37, %v11815_v51  ;;  %v2007_v20 = vrot.slane %v1999_v21, %v11261_v56 }
 0x2d2   : > { %3418 = vst.msk [vmem:[%s11421_s23 + $0x98] sm:$0xf] %vm3379_vm1, %v9695_v19  ;;  %3434 = vst.msk [vmem:[%s11421_s23 + $0xd8] sm:$0xf] %vm3379_vm1, %v9711_v59  ;;  %v2014_v22 = vrot.slane %v2000_v10, %v11261_v56  ;;  %v2023_v57 = vrot.slane %v2015_v16, %v11261_v56  ;;  %v2030_v33 = vrot.slane %v2016_v50, %v11261_v56  ;;  %v11919_v10 = vpop.permute.xlu1 %877  ;;  %v11921_v16 = vpop.permute.xlu0 %875 }
 0x2d3   : > { %v1939_v38 = vrot.slane %v1931_v30, %v11261_v56  ;;  %v1946_v48 = vrot.slane %v1932_v52, %v11261_v56  ;;  %v1955_v37 = vrot.slane %v1947_v25, %v11261_v56  ;;  %v1962_v51 = vrot.slane %v1948_v15, %v11261_v56 }
 0x2d4   : > { %v3055_v28 = vcombine.low %v2007_v20, %v2014_v22  ;;  %v9365_v11 = vcombine.high %v2007_v20, %v2014_v22  ;;  %v3071_v58 = vcombine.low %v2023_v57, %v2030_v33  ;;  %v9366_v9 = vcombine.high %v2023_v57, %v2030_v33 }
 0x2d5   : > { %v2987_v24 = vcombine.low %v1939_v38, %v1946_v48  ;;  %v9363_v53 = vcombine.high %v1939_v38, %v1946_v48  ;;  %v3003_v62 = vcombine.low %v1955_v37, %v1962_v51  ;;  %v9364_v34 = vcombine.high %v1955_v37, %v1962_v51 }
 0x2d6   : > { %v3062_v45 = vrot.slane %v3055_v28, %v11259_v54  ;;  %v3070_v19 = vrot.slane %v9365_v11, %v11259_v54  ;;  %v3078_v59 = vrot.slane %v3071_v58, %v11259_v54  ;;  %v3086_v21 = vrot.slane %v9366_v9, %v11259_v54 }
 0x2d7   : > { %v2994_v50 = vrot.slane %v2987_v24, %v11259_v54  ;;  %v3002_v30 = vrot.slane %v9363_v53, %v11259_v54  ;;  %v3010_v52 = vrot.slane %v3003_v62, %v11259_v54  ;;  %v3018_v25 = vrot.slane %v9364_v34, %v11259_v54 }
 0x2d8   : > { %v3087_v15 = vcombine.low %v3062_v45, %v3070_v19  ;;  %v3088_v20 = vcombine.high %v3062_v45, %v3070_v19  ;;  %v3103_v22 = vcombine.low %v3078_v59, %v3086_v21  ;;  %v3104_v57 = vcombine.high %v3078_v59, %v3086_v21  ;;  %v910_v21 = vpop.permute.xlu1 %909 }
 0x2d9   : > { %v3019_v33 = vcombine.low %v2994_v50, %v3002_v30  ;;  %v3020_v38 = vcombine.high %v2994_v50, %v3002_v30  ;;  %v3035_v48 = vcombine.low %v3010_v52, %v3018_v25  ;;  %v3036_v37 = vcombine.high %v3010_v52, %v3018_v25  ;;  %v908_v50 = vpop.permute.xlu0 %907 }
 0x2da   : > { %v3095_v51 = vrot.slane %v3087_v15, %v11261_v56  ;;  %v3102_v28 = vrot.slane %v3088_v20, %v11261_v56  ;;  %v3111_v11 = vrot.slane %v3103_v22, %v11261_v56  ;;  %v3118_v58 = vrot.slane %v3104_v57, %v11261_v56 }
 0x2db   : > { %v3027_v9 = vrot.slane %v3019_v33, %v11261_v56  ;;  %v3034_v24 = vrot.slane %v3020_v38, %v11261_v56  ;;  %v3043_v53 = vrot.slane %v3035_v48, %v11261_v56  ;;  %v3050_v62 = vrot.slane %v3036_v37, %v11261_v56 }
 0x2dc   : > { %v3119_v34 = vcombine.low %v3095_v51, %v3111_v11  ;;  %v3120_v45 = vcombine.high %v3095_v51, %v3111_v11  ;;  %v3121_v19 = vcombine.low %v3102_v28, %v3118_v58  ;;  %v3122_v59 = vcombine.high %v3102_v28, %v3118_v58 }
 0x2dd   : > { %v3051_v30 = vcombine.low %v3027_v9, %v3043_v53  ;;  %v3052_v52 = vcombine.high %v3027_v9, %v3043_v53  ;;  %v3053_v25 = vcombine.low %v3034_v24, %v3050_v62  ;;  %v3054_v15 = vcombine.high %v3034_v24, %v3050_v62 }
 0x2de   : > { %v9672_v20 = vpack.c.bf16 %v3119_v34, %v3119_v34  ;;  %v9688_v22 = vpack.c.bf16 %v3120_v45, %v3120_v45  ;;  %v9704_v57 = vpack.c.bf16 %v3121_v19, %v3121_v19  ;;  %v9720_v33 = vpack.c.bf16 %v3122_v59, %v3122_v59  ;;  %v926_v45 = vpop.permute.xlu1 %925  ;;  %v924_v19 = vpop.permute.xlu0 %923 }
 0x2df   : > { %v9671_v38 = vpack.c.bf16 %v3051_v30, %v3051_v30  ;;  %v9687_v48 = vpack.c.bf16 %v3052_v52, %v3052_v52  ;;  %v9703_v37 = vpack.c.bf16 %v3053_v25, %v3053_v25  ;;  %v9719_v51 = vpack.c.bf16 %v3054_v15, %v3054_v15 }
 0x2e0   : > { %3395 = vst.msk [vmem:[%s11421_s23 + $0x3c] sm:$0xf] %vm3379_vm1, %v9672_v20  ;;  %3411 = vst.msk [vmem:[%s11421_s23 + $0x7c] sm:$0xf] %vm3379_vm1, %v9688_v22  ;;  %v1287_v28 = vcombine.low %v11054_v60, %v11881_v47  ;;  %v1288_v11 = vcombine.high %v11054_v60, %v11881_v47  ;;  %v1219_v58 = vcombine.low %v11047_v55, %v11883_v23 }
 0x2e1   : > { %3427 = vst.msk [vmem:[%s11421_s23 + $0xbc] sm:$0xf] %vm3379_vm1, %v9704_v57  ;;  %3443 = vst.msk [vmem:[%s11421_s23 + $0xfc] sm:$0xf] %vm3379_vm1, %v9720_v33  ;;  %v1220_v9 = vcombine.high %v11047_v55, %v11883_v23  ;;  %v1831_v24 = vcombine.low %v11060_v0, %v11919_v10  ;;  %v1832_v60 = vcombine.high %v11060_v0, %v11919_v10 }
 0x2e2   : > { %3394 = vst.msk [vmem:[%s11421_s23 + $0x38] sm:$0xf] %vm3379_vm1, %v9671_v38  ;;  %3410 = vst.msk [vmem:[%s11421_s23 + $0x78] sm:$0xf] %vm3379_vm1, %v9687_v48  ;;  %v1763_v47 = vcombine.low %v11057_v61, %v11921_v16  ;;  %v1764_v55 = vcombine.high %v11057_v61, %v11921_v16  ;;  %v1295_v23 = vrot.slane %v1287_v28, %v11259_v54 }
 0x2e3   : > { %3426 = vst.msk [vmem:[%s11421_s23 + $0xb8] sm:$0xf] %vm3379_vm1, %v9703_v37  ;;  %3442 = vst.msk [vmem:[%s11421_s23 + $0xf8] sm:$0xf] %vm3379_vm1, %v9719_v51  ;;  %v1302_v53 = vrot.slane %v1288_v11, %v11259_v54  ;;  %v1227_v62 = vrot.slane %v1219_v58, %v11259_v54  ;;  %v1234_v34 = vrot.slane %v1220_v9, %v11259_v54 }
 0x2e4   : > { %v11972_v59 = vrot.slane %v1831_v24, %v11259_v54  ;;  %v11975_v0 = vrot.slane %v1832_v60, %v11259_v54  ;;  %v11978_v10 = vrot.slane %v1763_v47, %v11259_v54  ;;  %v11981_v61 = vrot.slane %v1764_v55, %v11259_v54 }
 0x2e5   : > { %v1303_v16 = vcombine.low %v11829_v46, %v910_v21  ;;  %v1304_v30 = vcombine.high %v11829_v46, %v910_v21  ;;  %v1235_v52 = vcombine.low %v11831_v8, %v908_v50  ;;  %v1236_v25 = vcombine.high %v11831_v8, %v908_v50 }
 0x2e6   : > { %v1847_v15 = vcombine.low %v11851_v27, %v926_v45  ;;  %v1848_v20 = vcombine.high %v11851_v27, %v926_v45  ;;  %v1779_v22 = vcombine.low %v11853_v35, %v924_v19  ;;  %v1780_v57 = vcombine.high %v11853_v35, %v924_v19 }
 0x2e7   : > { %v1311_v33 = vrot.slane %v1303_v16, %v11259_v54  ;;  %v1318_v38 = vrot.slane %v1304_v30, %v11259_v54  ;;  %v1243_v48 = vrot.slane %v1235_v52, %v11259_v54  ;;  %v1250_v46 = vrot.slane %v1236_v25, %v11259_v54 }
 0x2e8   : > { %v11996_v21 = vrot.slane %v1847_v15, %v11259_v54  ;;  %v11999_v8 = vrot.slane %v1848_v20, %v11259_v54  ;;  %v12002_v27 = vrot.slane %v1779_v22, %v11259_v54  ;;  %v12005_v50 = vrot.slane %v1780_v57, %v11259_v54 }
 0x2e9   : > { %v1319_v35 = vcombine.low %v1295_v23, %v1311_v33  ;;  %v1320_v37 = vcombine.high %v1295_v23, %v1311_v33  ;;  %v1335_v51 = vcombine.low %v1302_v53, %v1318_v38  ;;  %v1336_v28 = vcombine.high %v1302_v53, %v1318_v38 }
 0x2ea   : > { %v1251_v11 = vcombine.low %v1227_v62, %v1243_v48  ;;  %v1252_v58 = vcombine.high %v1227_v62, %v1243_v48  ;;  %v1267_v9 = vcombine.low %v1234_v34, %v1250_v46  ;;  %v1268_v24 = vcombine.high %v1234_v34, %v1250_v46 }
 0x2eb   : > { %v1327_v60 = vrot.slane %v1319_v35, %v11261_v56  ;;  %v1334_v47 = vrot.slane %v1320_v37, %v11261_v56  ;;  %v1343_v55 = vrot.slane %v1335_v51, %v11261_v56  ;;  %v1350_v45 = vrot.slane %v1336_v28, %v11261_v56 }
 0x2ec   : > { %v1259_v19 = vrot.slane %v1251_v11, %v11261_v56  ;;  %v1266_v16 = vrot.slane %v1252_v58, %v11261_v56  ;;  %v1275_v23 = vrot.slane %v1267_v9, %v11261_v56  ;;  %v1282_v53 = vrot.slane %v1268_v24, %v11261_v56 }
 0x2ed   : > { %v2375_v30 = vcombine.low %v1327_v60, %v1334_v47  ;;  %v9345_v62 = vcombine.high %v1327_v60, %v1334_v47  ;;  %v2391_v52 = vcombine.low %v1343_v55, %v1350_v45  ;;  %v9346_v34 = vcombine.high %v1343_v55, %v1350_v45  ;;  %v12023_v45 = vpop.permute.xlu1 %3586 }
 0x2ee   : > { %v2307_v25 = vcombine.low %v1259_v19, %v1266_v16  ;;  %v9343_v15 = vcombine.high %v1259_v19, %v1266_v16  ;;  %v2323_v20 = vcombine.low %v1275_v23, %v1282_v53  ;;  %v9344_v22 = vcombine.high %v1275_v23, %v1282_v53  ;;  %v12025_v19 = vpop.permute.xlu0 %3584 }
 0x2ef   : > { %v2382_v57 = vrot.slane %v2375_v30, %v11259_v54  ;;  %v2390_v33 = vrot.slane %v9345_v62, %v11259_v54  ;;  %v2398_v38 = vrot.slane %v2391_v52, %v11259_v54  ;;  %v2406_v48 = vrot.slane %v9346_v34, %v11259_v54 }
 0x2f0   : > { %v2314_v46 = vrot.slane %v2307_v25, %v11259_v54  ;;  %v2322_v35 = vrot.slane %v9343_v15, %v11259_v54  ;;  %v2330_v37 = vrot.slane %v2323_v20, %v11259_v54  ;;  %v2338_v51 = vrot.slane %v9344_v22, %v11259_v54 }
 0x2f1   : > { %v2407_v28 = vcombine.low %v2382_v57, %v2390_v33  ;;  %v2408_v11 = vcombine.high %v2382_v57, %v2390_v33  ;;  %v2423_v58 = vcombine.low %v2398_v38, %v2406_v48  ;;  %v2424_v9 = vcombine.high %v2398_v38, %v2406_v48 }
 0x2f2   : > { %v2339_v24 = vcombine.low %v2314_v46, %v2322_v35  ;;  %v2340_v60 = vcombine.high %v2314_v46, %v2322_v35  ;;  %v2355_v47 = vcombine.low %v2330_v37, %v2338_v51  ;;  %v2356_v55 = vcombine.high %v2330_v37, %v2338_v51 }
 0x2f3   : > { %v2415_v16 = vrot.slane %v2407_v28, %v11261_v56  ;;  %v2422_v23 = vrot.slane %v2408_v11, %v11261_v56  ;;  %v2431_v53 = vrot.slane %v2423_v58, %v11261_v56  ;;  %v2438_v30 = vrot.slane %v2424_v9, %v11261_v56 }
 0x2f4   : > { %v2347_v62 = vrot.slane %v2339_v24, %v11261_v56  ;;  %v2354_v52 = vrot.slane %v2340_v60, %v11261_v56  ;;  %v2363_v34 = vrot.slane %v2355_v47, %v11261_v56  ;;  %v2370_v25 = vrot.slane %v2356_v55, %v11261_v56  ;;  %v12035_v60 = vpop.permute.xlu1 %3634  ;;  %v12037_v47 = vpop.permute.xlu0 %3632 }
 0x2f5   : > { %v2439_v15 = vcombine.low %v2415_v16, %v2431_v53  ;;  %v2440_v20 = vcombine.high %v2415_v16, %v2431_v53  ;;  %v2441_v22 = vcombine.low %v2422_v23, %v2438_v30  ;;  %v2442_v57 = vcombine.high %v2422_v23, %v2438_v30 }
 0x2f6   : > { %v2371_v33 = vcombine.low %v2347_v62, %v2363_v34  ;;  %v2372_v38 = vcombine.high %v2347_v62, %v2363_v34  ;;  %v2373_v48 = vcombine.low %v2354_v52, %v2370_v25  ;;  %v2374_v46 = vcombine.high %v2354_v52, %v2370_v25 }
 0x2f7   : > { %v9662_v35 = vpack.c.bf16 %v2439_v15, %v2439_v15  ;;  %v9678_v37 = vpack.c.bf16 %v2440_v20, %v2440_v20  ;;  %v9694_v51 = vpack.c.bf16 %v2441_v22, %v2441_v22  ;;  %v9710_v28 = vpack.c.bf16 %v2442_v57, %v2442_v57 }
 0x2f8   : > { %v9661_v11 = vpack.c.bf16 %v2371_v33, %v2371_v33  ;;  %v9677_v58 = vpack.c.bf16 %v2372_v38, %v2372_v38  ;;  %v9693_v9 = vpack.c.bf16 %v2373_v48, %v2373_v48  ;;  %v9709_v24 = vpack.c.bf16 %v2374_v46, %v2374_v46  ;;  %v12079_v46 = vpop.permute.xlu1 %3682 }
 0x2f9   : > { %3385 = vst.msk [vmem:[%s11421_s23 + $0x14] sm:$0xf] %vm3379_vm1, %v9662_v35  ;;  %3401 = vst.msk [vmem:[%s11421_s23 + $0x54] sm:$0xf] %vm3379_vm1, %v9678_v37  ;;  %v1863_v55 = vcombine.low %v11972_v59, %v11996_v21  ;;  %v1864_v16 = vcombine.high %v11972_v59, %v11996_v21  ;;  %v1879_v23 = vcombine.low %v11975_v0, %v11999_v8  ;;  %v12081_v35 = vpop.permute.xlu0 %3680 }
 0x2fa   : > { %3417 = vst.msk [vmem:[%s11421_s23 + $0x94] sm:$0xf] %vm3379_vm1, %v9694_v51  ;;  %3433 = vst.msk [vmem:[%s11421_s23 + $0xd4] sm:$0xf] %vm3379_vm1, %v9710_v28  ;;  %v1880_v53 = vcombine.high %v11975_v0, %v11999_v8  ;;  %v1795_v30 = vcombine.low %v11978_v10, %v12002_v27  ;;  %v1796_v59 = vcombine.high %v11978_v10, %v12002_v27 }
 0x2fb   : > { %3384 = vst.msk [vmem:[%s11421_s23 + $0x10] sm:$0xf] %vm3379_vm1, %v9661_v11  ;;  %3400 = vst.msk [vmem:[%s11421_s23 + $0x50] sm:$0xf] %vm3379_vm1, %v9677_v58  ;;  %v1811_v21 = vcombine.low %v11981_v61, %v12005_v50  ;;  %v1812_v0 = vcombine.high %v11981_v61, %v12005_v50  ;;  %v1871_v8 = vrot.slane %v1863_v55, %v11261_v56 }
 0x2fc   : > { %3416 = vst.msk [vmem:[%s11421_s23 + $0x90] sm:$0xf] %vm3379_vm1, %v9693_v9  ;;  %3432 = vst.msk [vmem:[%s11421_s23 + $0xd0] sm:$0xf] %vm3379_vm1, %v9709_v24  ;;  %v1878_v62 = vrot.slane %v1864_v16, %v11261_v56  ;;  %v1887_v52 = vrot.slane %v1879_v23, %v11261_v56  ;;  %v1894_v34 = vrot.slane %v1880_v53, %v11261_v56 }
 0x2fd   : > { %v1803_v25 = vrot.slane %v1795_v30, %v11261_v56  ;;  %v1810_v15 = vrot.slane %v1796_v59, %v11261_v56  ;;  %v1819_v10 = vrot.slane %v1811_v21, %v11261_v56  ;;  %v1826_v27 = vrot.slane %v1812_v0, %v11261_v56 }
 0x2fe   : > { %v2919_v20 = vcombine.low %v1871_v8, %v1878_v62  ;;  %v9361_v22 = vcombine.high %v1871_v8, %v1878_v62  ;;  %v2935_v57 = vcombine.low %v1887_v52, %v1894_v34  ;;  %v9362_v61 = vcombine.high %v1887_v52, %v1894_v34 }
 0x2ff   : > { %v2851_v50 = vcombine.low %v1803_v25, %v1810_v15  ;;  %v9359_v33 = vcombine.high %v1803_v25, %v1810_v15  ;;  %v2867_v38 = vcombine.low %v1819_v10, %v1826_v27  ;;  %v9360_v48 = vcombine.high %v1819_v10, %v1826_v27 }
 0x300   : > { %v2926_v37 = vrot.slane %v2919_v20, %v11259_v54  ;;  %v2934_v51 = vrot.slane %v9361_v22, %v11259_v54  ;;  %v2942_v28 = vrot.slane %v2935_v57, %v11259_v54  ;;  %v2950_v11 = vrot.slane %v9362_v61, %v11259_v54  ;;  %v12099_v22 = vpop.permute.xlu1 %6362  ;;  %v12101_v57 = vpop.permute.xlu0 %6360 }
 0x301   : > { %v2858_v58 = vrot.slane %v2851_v50, %v11259_v54  ;;  %v2866_v9 = vrot.slane %v9359_v33, %v11259_v54  ;;  %v2874_v24 = vrot.slane %v2867_v38, %v11259_v54  ;;  %v2882_v55 = vrot.slane %v9360_v48, %v11259_v54 }
 0x302   : > { %v2951_v16 = vcombine.low %v2926_v37, %v2934_v51  ;;  %v2952_v23 = vcombine.high %v2926_v37, %v2934_v51  ;;  %v2967_v53 = vcombine.low %v2942_v28, %v2950_v11  ;;  %v2968_v30 = vcombine.high %v2942_v28, %v2950_v11 }
 0x303   : > { %v2883_v59 = vcombine.low %v2858_v58, %v2866_v9  ;;  %v2884_v21 = vcombine.high %v2858_v58, %v2866_v9  ;;  %v2899_v0 = vcombine.low %v2874_v24, %v2882_v55  ;;  %v2900_v8 = vcombine.high %v2874_v24, %v2882_v55 }
 0x304   : > { %v2959_v62 = vrot.slane %v2951_v16, %v11261_v56  ;;  %v2966_v52 = vrot.slane %v2952_v23, %v11261_v56  ;;  %v2975_v34 = vrot.slane %v2967_v53, %v11261_v56  ;;  %v2982_v25 = vrot.slane %v2968_v30, %v11261_v56 }
 0x305   : > { %v2891_v15 = vrot.slane %v2883_v59, %v11261_v56  ;;  %v2898_v10 = vrot.slane %v2884_v21, %v11261_v56  ;;  %v2907_v27 = vrot.slane %v2899_v0, %v11261_v56  ;;  %v2914_v20 = vrot.slane %v2900_v8, %v11261_v56  ;;  %v13709_v21 = vld [vmem:[#allocation28_spill] sm:$0xff] }
 0x306   : > { %v2983_v61 = vcombine.low %v2959_v62, %v2975_v34  ;;  %v2984_v50 = vcombine.high %v2959_v62, %v2975_v34  ;;  %v2985_v33 = vcombine.low %v2966_v52, %v2982_v25  ;;  %v2986_v38 = vcombine.high %v2966_v52, %v2982_v25  ;;  %v12135_v52 = vpop.permute.xlu1 %6410  ;;  %v12137_v34 = vpop.permute.xlu0 %6408 }
 0x307   : > { %v2915_v48 = vcombine.low %v2891_v15, %v2907_v27  ;;  %v2916_v37 = vcombine.high %v2891_v15, %v2907_v27  ;;  %v2917_v51 = vcombine.low %v2898_v10, %v2914_v20  ;;  %v2918_v28 = vcombine.high %v2898_v10, %v2914_v20 }
 0x308   : > { %v9670_v11 = vpack.c.bf16 %v2983_v61, %v2983_v61  ;;  %v9686_v58 = vpack.c.bf16 %v2984_v50, %v2984_v50  ;;  %v9702_v9 = vpack.c.bf16 %v2985_v33, %v2985_v33  ;;  %v9718_v24 = vpack.c.bf16 %v2986_v38, %v2986_v38  ;;  %v13711_v33 = vld [vmem:[#allocation29_spill] sm:$0xff] }
 0x309   : > { %v9669_v55 = vpack.c.bf16 %v2915_v48, %v2915_v48  ;;  %v9685_v16 = vpack.c.bf16 %v2916_v37, %v2916_v37  ;;  %v9701_v23 = vpack.c.bf16 %v2917_v51, %v2917_v51  ;;  %v9717_v53 = vpack.c.bf16 %v2918_v28, %v2918_v28 }
 0x30a   : > { %3393 = vst.msk [vmem:[%s11421_s23 + $0x34] sm:$0xf] %vm3379_vm1, %v9670_v11  ;;  %3409 = vst.msk [vmem:[%s11421_s23 + $0x74] sm:$0xf] %vm3379_vm1, %v9686_v58  ;;  %v3928_v30 = vcombine.low %v11207_v26, %v12035_v60  ;;  %v3929_v59 = vcombine.high %v11207_v26, %v12035_v60  ;;  %v3860_v0 = vcombine.low %v13709_v21, %v12037_v47 }
 0x30b   : > { %3425 = vst.msk [vmem:[%s11421_s23 + $0xb4] sm:$0xf] %vm3379_vm1, %v9702_v9  ;;  %3441 = vst.msk [vmem:[%s11421_s23 + $0xf4] sm:$0xf] %vm3379_vm1, %v9718_v24  ;;  %v3861_v8 = vcombine.high %v13709_v21, %v12037_v47  ;;  %v3944_v62 = vcombine.low %v12023_v45, %v12079_v46  ;;  %v3945_v26 = vcombine.high %v12023_v45, %v12079_v46 }
 0x30c   : > { %3392 = vst.msk [vmem:[%s11421_s23 + $0x30] sm:$0xf] %vm3379_vm1, %v9669_v55  ;;  %3408 = vst.msk [vmem:[%s11421_s23 + $0x70] sm:$0xf] %vm3379_vm1, %v9685_v16  ;;  %v3876_v60 = vcombine.low %v12025_v19, %v12081_v35  ;;  %v3877_v47 = vcombine.high %v12025_v19, %v12081_v35  ;;  %v3936_v25 = vrot.slane %v3928_v30, %v11259_v54  ;;  %v13710_v35 = vld [vmem:[#allocation30_spill] sm:$0xff] }
 0x30d   : > { %3424 = vst.msk [vmem:[%s11421_s23 + $0xb0] sm:$0xf] %vm3379_vm1, %v9701_v23  ;;  %3440 = vst.msk [vmem:[%s11421_s23 + $0xf0] sm:$0xf] %vm3379_vm1, %v9717_v53  ;;  %v3943_v15 = vrot.slane %v3929_v59, %v11259_v54  ;;  %v3868_v10 = vrot.slane %v3860_v0, %v11259_v54  ;;  %v3875_v27 = vrot.slane %v3861_v8, %v11259_v54 }
 0x30e   : > { %v3952_v45 = vrot.slane %v3944_v62, %v11259_v54  ;;  %v3959_v46 = vrot.slane %v3945_v26, %v11259_v54  ;;  %v3884_v20 = vrot.slane %v3876_v60, %v11259_v54  ;;  %v3891_v19 = vrot.slane %v3877_v47, %v11259_v54 }
 0x30f   : > { %v6704_v61 = vcombine.low %v13710_v35, %v12135_v52  ;;  %v6705_v50 = vcombine.high %v13710_v35, %v12135_v52  ;;  %v6636_v38 = vcombine.low %v13711_v33, %v12137_v34  ;;  %v10159_v52 = vld [vmem:[#allocation12] ss:$0 sm:$0xff] }
 0x310   : > { %v3960_v37 = vcombine.low %v3936_v25, %v3952_v45  ;;  %v3961_v51 = vcombine.high %v3936_v25, %v3952_v45  ;;  %v3976_v28 = vcombine.low %v3943_v15, %v3959_v46  ;;  %v3977_v11 = vcombine.high %v3943_v15, %v3959_v46  ;;  %v12163_v25 = vpop.permute.xlu1 %6458  ;;  %v12165_v46 = vpop.permute.xlu0 %6456 }
 0x311   : > { %v3892_v58 = vcombine.low %v3868_v10, %v3884_v20  ;;  %v3893_v9 = vcombine.high %v3868_v10, %v3884_v20  ;;  %v3908_v24 = vcombine.low %v3875_v27, %v3891_v19  ;;  %v3909_v55 = vcombine.high %v3875_v27, %v3891_v19 }
 0x312   : > { %v3968_v16 = vrot.slane %v3960_v37, %v11261_v56  ;;  %v3975_v23 = vrot.slane %v3961_v51, %v11261_v56  ;;  %v3984_v53 = vrot.slane %v3976_v28, %v11261_v56  ;;  %v3991_v30 = vrot.slane %v3977_v11, %v11261_v56 }
 0x313   : > { %v3900_v59 = vrot.slane %v3892_v58, %v11261_v56  ;;  %v3907_v21 = vrot.slane %v3893_v9, %v11261_v56  ;;  %v3916_v0 = vrot.slane %v3908_v24, %v11261_v56  ;;  %v3923_v8 = vrot.slane %v3909_v55, %v11261_v56 }
 0x314   : > { %v5016_v62 = vcombine.low %v3968_v16, %v3975_v23  ;;  %v9448_v26 = vcombine.high %v3968_v16, %v3975_v23  ;;  %v5032_v60 = vcombine.low %v3984_v53, %v3991_v30  ;;  %v9449_v47 = vcombine.high %v3984_v53, %v3991_v30 }
 0x315   : > { %v4948_v15 = vcombine.low %v3900_v59, %v3907_v21  ;;  %v9446_v10 = vcombine.high %v3900_v59, %v3907_v21  ;;  %v4964_v27 = vcombine.low %v3916_v0, %v3923_v8  ;;  %v9447_v45 = vcombine.high %v3916_v0, %v3923_v8 }
 0x316   : > { %v5023_v20 = vrot.slane %v5016_v62, %v11259_v54  ;;  %v5031_v19 = vrot.slane %v9448_v26, %v11259_v54  ;;  %v5039_v37 = vrot.slane %v5032_v60, %v11259_v54  ;;  %v5047_v51 = vrot.slane %v9449_v47, %v11259_v54  ;;  %v12179_v60 = vpop.permute.xlu1 %3582 }
 0x317   : > { %v4955_v28 = vrot.slane %v4948_v15, %v11259_v54  ;;  %v4963_v11 = vrot.slane %v9446_v10, %v11259_v54  ;;  %v4971_v58 = vrot.slane %v4964_v27, %v11259_v54  ;;  %v4979_v9 = vrot.slane %v9447_v45, %v11259_v54  ;;  %v12185_v45 = vpop.permute.xlu0 %3580 }
 0x318   : > { %v5048_v24 = vcombine.low %v5023_v20, %v5031_v19  ;;  %v5049_v55 = vcombine.high %v5023_v20, %v5031_v19  ;;  %v5064_v16 = vcombine.low %v5039_v37, %v5047_v51  ;;  %v5065_v23 = vcombine.high %v5039_v37, %v5047_v51 }
 0x319   : > { %v4980_v53 = vcombine.low %v4955_v28, %v4963_v11  ;;  %v4981_v30 = vcombine.high %v4955_v28, %v4963_v11  ;;  %v4996_v59 = vcombine.low %v4971_v58, %v4979_v9  ;;  %v4997_v21 = vcombine.high %v4971_v58, %v4979_v9 }
 0x31a   : > { %v5056_v0 = vrot.slane %v5048_v24, %v11261_v56  ;;  %v5063_v8 = vrot.slane %v5049_v55, %v11261_v56  ;;  %v5072_v62 = vrot.slane %v5064_v16, %v11261_v56  ;;  %v5079_v26 = vrot.slane %v5065_v23, %v11261_v56 }
 0x31b   : > { %v4988_v47 = vrot.slane %v4980_v53, %v11261_v56  ;;  %v4995_v15 = vrot.slane %v4981_v30, %v11261_v56  ;;  %v5004_v10 = vrot.slane %v4996_v59, %v11261_v56  ;;  %v5011_v27 = vrot.slane %v4997_v21, %v11261_v56 }
 0x31c   : > { %v5080_v20 = vcombine.low %v5056_v0, %v5072_v62  ;;  %v5081_v19 = vcombine.high %v5056_v0, %v5072_v62  ;;  %v5082_v37 = vcombine.low %v5063_v8, %v5079_v26  ;;  %v5083_v51 = vcombine.high %v5063_v8, %v5079_v26 }
 0x31d   : > { %v5012_v28 = vcombine.low %v4988_v47, %v5004_v10  ;;  %v5013_v11 = vcombine.high %v4988_v47, %v5004_v10  ;;  %v5014_v58 = vcombine.low %v4995_v15, %v5011_v27  ;;  %v5015_v9 = vcombine.high %v4995_v15, %v5011_v27  ;;  %v12214_v47 = vpop.permute.xlu1 %3630 }
 0x31e   : > { %v9724_v24 = vpack.c.bf16 %v5080_v20, %v5080_v20  ;;  %v9740_v55 = vpack.c.bf16 %v5081_v19, %v5081_v19  ;;  %v9756_v16 = vpack.c.bf16 %v5082_v37, %v5082_v37  ;;  %v9772_v23 = vpack.c.bf16 %v5083_v51, %v5083_v51 }
 0x31f   : > { %v9723_v53 = vpack.c.bf16 %v5012_v28, %v5012_v28  ;;  %v9739_v30 = vpack.c.bf16 %v5013_v11, %v5013_v11  ;;  %v9755_v59 = vpack.c.bf16 %v5014_v58, %v5014_v58  ;;  %v9771_v48 = vpack.c.bf16 %v5015_v9, %v5015_v9 }
 0x320   : > { %6159 = vst.msk [vmem:[%s12188_s20 + $0xc] sm:$0xf] %vm3379_vm1, %v9724_v24  ;;  %6175 = vst.msk [vmem:[%s12188_s20 + $0x4c] sm:$0xf] %vm3379_vm1, %v9740_v55  ;;  %v6712_v21 = vrot.slane %v6704_v61, %v11259_v54  ;;  %v6719_v0 = vrot.slane %v6705_v50, %v11259_v54  ;;  %v6644_v8 = vrot.slane %v6636_v38, %v11259_v54 }
 0x321   : > { %6191 = vst.msk [vmem:[%s12188_s20 + $0x8c] sm:$0xf] %vm3379_vm1, %v9756_v16  ;;  %6207 = vst.msk [vmem:[%s12188_s20 + $0xcc] sm:$0xf] %vm3379_vm1, %v9772_v23  ;;  %v13712_v62 = vcombine.high %v13711_v33, %v12137_v34  ;;  %v12225_v35 = vadd.f32 %v10159_v52, %v11613_v32  ;;  %v6720_v61 = vcombine.low %v12099_v22, %v12163_v25  ;;  %v12233_v33 = vpop.permute.xlu0 %3628 }
 0x322   : > { %6158 = vst.msk [vmem:[%s12188_s20 + $0x8] sm:$0xf] %vm3379_vm1, %v9723_v53  ;;  %6174 = vst.msk [vmem:[%s12188_s20 + $0x48] sm:$0xf] %vm3379_vm1, %v9739_v30  ;;  %v6721_v34 = vcombine.high %v12099_v22, %v12163_v25  ;;  %v6652_v50 = vcombine.low %v12101_v57, %v12165_v46  ;;  %v6653_v38 = vcombine.high %v12101_v57, %v12165_v46  ;;  %v13713_v57 = vld [vmem:[#allocation32_spill] sm:$0xff] }
 0x323   : > { %v6651_v26 = vrot.slane %v13712_v62, %v11259_v54  ;;  %6190 = vst.msk [vmem:[%s12188_s20 + $0x88] sm:$0xf] %vm3379_vm1, %v9755_v59  ;;  %6206 = vst.msk [vmem:[%s12188_s20 + $0xc8] sm:$0xf] %vm3379_vm1, %v9771_v48  ;;  %v12238_v48 = vadd.f32 %v10159_v52, %v11619_v17  ;;  %v12241_v32 = vadd.f32 %v10159_v52, %v11625_v14  ;;  %3608 = vrot.lane.b32.xlu0 %v12225_v35, %s10542_s10 }
 0x324   : > { %v12244_v15 = vadd.f32 %v10159_v52, %v11635_v7  ;;  %v6728_v10 = vrot.slane %v6720_v61, %v11259_v54  ;;  %v6735_v22 = vrot.slane %v6721_v34, %v11259_v54  ;;  %v6660_v25 = vrot.slane %v6652_v50, %v11259_v54  ;;  %v13714_v7 = vld [vmem:[#allocation31_spill] sm:$0xff]  ;;  %v12274_v61 = vpop.permute.xlu1 %3678 }
 0x325   : > { %v3792_v46 = vcombine.low %v13713_v57, %v12214_v47  ;;  %v6667_v17 = vrot.slane %v6653_v38, %v11259_v54  ;;  %v3793_v14 = vcombine.high %v13713_v57, %v12214_v47  ;;  %v3724_v27 = vcombine.low %v13714_v7, %v12233_v33  ;;  %3610 = vrot.lane.b32.xlu1 %v12241_v32, %s10542_s10  ;;  %v10160_v47 = vld [vmem:[#allocation15] ss:$0 sm:$0xff] }
 0x326   : > { %v6736_v19 = vcombine.low %v6712_v21, %v6728_v10  ;;  %v6737_v37 = vcombine.high %v6712_v21, %v6728_v10  ;;  %v6752_v51 = vcombine.low %v6719_v0, %v6735_v22  ;;  %v6753_v28 = vcombine.high %v6719_v0, %v6735_v22  ;;  %v12276_v22 = vpop.permute.xlu0 %3676 }
 0x327   : > { %v6668_v11 = vcombine.low %v6644_v8, %v6660_v25  ;;  %v6669_v58 = vcombine.high %v6644_v8, %v6660_v25  ;;  %v6684_v9 = vcombine.low %v6651_v26, %v6667_v17  ;;  %v6685_v24 = vcombine.high %v6651_v26, %v6667_v17  ;;  %3656 = vrot.lane.b32.xlu0 %v12225_v35, %s10543_s9 }
 0x328   : > { %v6744_v55 = vrot.slane %v6736_v19, %v11261_v56  ;;  %v6751_v16 = vrot.slane %v6737_v37, %v11261_v56  ;;  %v6760_v23 = vrot.slane %v6752_v51, %v11261_v56  ;;  %v6767_v53 = vrot.slane %v6753_v28, %v11261_v56 }
 0x329   : > { %v6676_v30 = vrot.slane %v6668_v11, %v11261_v56  ;;  %v6683_v59 = vrot.slane %v6669_v58, %v11261_v56  ;;  %v6692_v21 = vrot.slane %v6684_v9, %v11261_v56  ;;  %v6699_v0 = vrot.slane %v6685_v24, %v11261_v56  ;;  %3658 = vrot.lane.b32.xlu1 %v12241_v32, %s10543_s9 }
 0x32a   : > { %v7792_v8 = vcombine.low %v6744_v55, %v6751_v16  ;;  %v9555_v62 = vcombine.high %v6744_v55, %v6751_v16  ;;  %v7808_v26 = vcombine.low %v6760_v23, %v6767_v53  ;;  %v9556_v52 = vcombine.high %v6760_v23, %v6767_v53 }
 0x32b   : > { %v7724_v34 = vcombine.low %v6676_v30, %v6683_v59  ;;  %v9553_v50 = vcombine.high %v6676_v30, %v6683_v59  ;;  %v7740_v38 = vcombine.low %v6692_v21, %v6699_v0  ;;  %v9554_v10 = vcombine.high %v6692_v21, %v6699_v0  ;;  %3704 = vrot.lane.b32.xlu0 %v12225_v35, %s10544_s11 }
 0x32c   : > { %v7799_v25 = vrot.slane %v7792_v8, %v11259_v54  ;;  %v7807_v17 = vrot.slane %v9555_v62, %v11259_v54  ;;  %v7815_v19 = vrot.slane %v7808_v26, %v11259_v54  ;;  %v7823_v37 = vrot.slane %v9556_v52, %v11259_v54  ;;  %v12294_v26 = vpop.permute.xlu1 %6358 }
 0x32d   : > { %v7731_v51 = vrot.slane %v7724_v34, %v11259_v54  ;;  %v7739_v28 = vrot.slane %v9553_v50, %v11259_v54  ;;  %v7747_v11 = vrot.slane %v7740_v38, %v11259_v54  ;;  %v7755_v58 = vrot.slane %v9554_v10, %v11259_v54  ;;  %3706 = vrot.lane.b32.xlu1 %v12241_v32, %s10544_s11  ;;  %v12300_v10 = vpop.permute.xlu0 %6356 }
 0x32e   : > { %v7824_v9 = vcombine.low %v7799_v25, %v7807_v17  ;;  %v7825_v24 = vcombine.high %v7799_v25, %v7807_v17  ;;  %v7840_v55 = vcombine.low %v7815_v19, %v7823_v37  ;;  %v7841_v16 = vcombine.high %v7815_v19, %v7823_v37 }
 0x32f   : > { %v7756_v23 = vcombine.low %v7731_v51, %v7739_v28  ;;  %v7757_v53 = vcombine.high %v7731_v51, %v7739_v28  ;;  %v7772_v30 = vcombine.low %v7747_v11, %v7755_v58  ;;  %v7773_v59 = vcombine.high %v7747_v11, %v7755_v58 }
 0x330   : > { %v7832_v21 = vrot.slane %v7824_v9, %v11261_v56  ;;  %v7839_v0 = vrot.slane %v7825_v24, %v11261_v56  ;;  %v7848_v8 = vrot.slane %v7840_v55, %v11261_v56  ;;  %v7855_v62 = vrot.slane %v7841_v16, %v11261_v56 }
 0x331   : > { %v7764_v52 = vrot.slane %v7756_v23, %v11261_v56  ;;  %v7771_v34 = vrot.slane %v7757_v53, %v11261_v56  ;;  %v7780_v50 = vrot.slane %v7772_v30, %v11261_v56  ;;  %v7787_v38 = vrot.slane %v7773_v59, %v11261_v56 }
 0x332   : > { %v7856_v25 = vcombine.low %v7832_v21, %v7848_v8  ;;  %v7857_v17 = vcombine.high %v7832_v21, %v7848_v8  ;;  %v7858_v19 = vcombine.low %v7839_v0, %v7855_v62  ;;  %v7859_v37 = vcombine.high %v7839_v0, %v7855_v62 }
 0x333   : > { %v7788_v51 = vcombine.low %v7764_v52, %v7780_v50  ;;  %v7789_v28 = vcombine.high %v7764_v52, %v7780_v50  ;;  %v7790_v11 = vcombine.low %v7771_v34, %v7787_v38  ;;  %v7791_v58 = vcombine.high %v7771_v34, %v7787_v38  ;;  %v12329_v52 = vpop.permute.xlu1 %6406 }
 0x334   : > { %v9788_v9 = vpack.c.bf16 %v7856_v25, %v7856_v25  ;;  %v9804_v24 = vpack.c.bf16 %v7857_v17, %v7857_v17  ;;  %v9820_v55 = vpack.c.bf16 %v7858_v19, %v7858_v19  ;;  %v9836_v16 = vpack.c.bf16 %v7859_v37, %v7859_v37 }
 0x335   : > { %v9787_v23 = vpack.c.bf16 %v7788_v51, %v7788_v51  ;;  %v9803_v53 = vpack.c.bf16 %v7789_v28, %v7789_v28  ;;  %v9819_v30 = vpack.c.bf16 %v7790_v11, %v7790_v11  ;;  %v9835_v20 = vpack.c.bf16 %v7791_v58, %v7791_v58 }
 0x336   : > { %8935 = vst.msk [vmem:[%s12303_s19 + $0xc] sm:$0xf] %vm3379_vm1, %v9788_v9  ;;  %8951 = vst.msk [vmem:[%s12303_s19 + $0x4c] sm:$0xf] %vm3379_vm1, %v9804_v24  ;;  %v3800_v59 = vrot.slane %v3792_v46, %v11259_v54  ;;  %v3807_v21 = vrot.slane %v3793_v14, %v11259_v54  ;;  %v3732_v0 = vrot.slane %v3724_v27, %v11259_v54 }
 0x337   : > { %8967 = vst.msk [vmem:[%s12303_s19 + $0x8c] sm:$0xf] %vm3379_vm1, %v9820_v55  ;;  %8983 = vst.msk [vmem:[%s12303_s19 + $0xcc] sm:$0xf] %vm3379_vm1, %v9836_v16  ;;  %v13715_v8 = vcombine.high %v13714_v7, %v12233_v33  ;;  %v12340_v57 = vadd.f32 %v10160_v47, %v11723_v42  ;;  %v3808_v46 = vcombine.low %v12179_v60, %v12274_v61  ;;  %v12348_v7 = vpop.permute.xlu0 %6404 }
 0x338   : > { %8934 = vst.msk [vmem:[%s12303_s19 + $0x8] sm:$0xf] %vm3379_vm1, %v9787_v23  ;;  %8950 = vst.msk [vmem:[%s12303_s19 + $0x48] sm:$0xf] %vm3379_vm1, %v9803_v53  ;;  %v3809_v33 = vcombine.high %v12179_v60, %v12274_v61  ;;  %v3740_v14 = vcombine.low %v12185_v45, %v12276_v22  ;;  %v3741_v27 = vcombine.high %v12185_v45, %v12276_v22  ;;  %v13716_v45 = vld [vmem:[#allocation34_spill] sm:$0xff] }
 0x339   : > { %v3739_v62 = vrot.slane %v13715_v8, %v11259_v54  ;;  %8966 = vst.msk [vmem:[%s12303_s19 + $0x88] sm:$0xf] %vm3379_vm1, %v9819_v30  ;;  %8982 = vst.msk [vmem:[%s12303_s19 + $0xc8] sm:$0xf] %vm3379_vm1, %v9835_v20  ;;  %v12353_v20 = vadd.f32 %v10160_v47, %v11727_v29  ;;  %v12356_v42 = vadd.f32 %v10160_v47, %v11731_v1  ;;  %6384 = vrot.lane.b32.xlu0 %v12340_v57, %s10542_s10 }
 0x33a   : > { %v12359_v34 = vadd.f32 %v10160_v47, %v11749_v49  ;;  %v3816_v50 = vrot.slane %v3808_v46, %v11259_v54  ;;  %v3823_v60 = vrot.slane %v3809_v33, %v11259_v54  ;;  %v3748_v61 = vrot.slane %v3740_v14, %v11259_v54  ;;  %v13717_v49 = vld [vmem:[#allocation33_spill] sm:$0xff] }
 0x33b   : > { %v6568_v22 = vcombine.low %v13716_v45, %v12329_v52  ;;  %v3755_v29 = vrot.slane %v3741_v27, %v11259_v54  ;;  %v6569_v1 = vcombine.high %v13716_v45, %v12329_v52  ;;  %v6500_v38 = vcombine.low %v13717_v49, %v12348_v7  ;;  %6386 = vrot.lane.b32.xlu1 %v12356_v42, %s10542_s10  ;;  %v12389_v8 = vpop.permute.xlu0 %6452 }
 0x33c   : > { %v6501_v25 = vcombine.high %v13717_v49, %v12348_v7  ;;  %v3824_v17 = vcombine.low %v3800_v59, %v3816_v50  ;;  %v3825_v19 = vcombine.high %v3800_v59, %v3816_v50  ;;  %v3840_v37 = vcombine.low %v3807_v21, %v3823_v60 }
 0x33d   : > { %v3841_v51 = vcombine.high %v3807_v21, %v3823_v60  ;;  %v3756_v28 = vcombine.low %v3732_v0, %v3748_v61  ;;  %v3757_v11 = vcombine.high %v3732_v0, %v3748_v61  ;;  %v3772_v58 = vcombine.low %v3739_v62, %v3755_v29  ;;  %6432 = vrot.lane.b32.xlu0 %v12340_v57, %s10543_s9  ;;  %v12387_v0 = vpop.permute.xlu1 %6454 }
 0x33e   : > { %v3773_v9 = vcombine.high %v3739_v62, %v3755_v29  ;;  %v3832_v24 = vrot.slane %v3824_v17, %v11261_v56  ;;  %v3839_v55 = vrot.slane %v3825_v19, %v11261_v56  ;;  %v3848_v16 = vrot.slane %v3840_v37, %v11261_v56 }
 0x33f   : > { %v3855_v23 = vrot.slane %v3841_v51, %v11261_v56  ;;  %v3764_v53 = vrot.slane %v3756_v28, %v11261_v56  ;;  %v3771_v30 = vrot.slane %v3757_v11, %v11261_v56  ;;  %v3780_v59 = vrot.slane %v3772_v58, %v11261_v56  ;;  %6434 = vrot.lane.b32.xlu1 %v12356_v42, %s10543_s9 }
 0x340   : > { %v3787_v21 = vrot.slane %v3773_v9, %v11261_v56  ;;  %v4880_v62 = vcombine.low %v3832_v24, %v3839_v55  ;;  %v9444_v47 = vcombine.high %v3832_v24, %v3839_v55  ;;  %v6584_v52 = vcombine.low %v12294_v26, %v12387_v0 }
 0x341   : > { %v4896_v46 = vcombine.low %v3848_v16, %v3855_v23  ;;  %v9445_v33 = vcombine.high %v3848_v16, %v3855_v23  ;;  %v4812_v14 = vcombine.low %v3764_v53, %v3771_v30  ;;  %v9442_v27 = vcombine.high %v3764_v53, %v3771_v30  ;;  %3604 = vrot.lane.b32.xlu0 %v12238_v48, %s10542_s10 }
 0x342   : > { %v4828_v50 = vcombine.low %v3780_v59, %v3787_v21  ;;  %v9443_v60 = vcombine.high %v3780_v59, %v3787_v21  ;;  %v4887_v61 = vrot.slane %v4880_v62, %v11259_v54  ;;  %v4895_v29 = vrot.slane %v9444_v47, %v11259_v54  ;;  %v12405_v59 = vpop.permute.xlu1 %3594  ;;  %v12407_v21 = vpop.permute.xlu0 %3592 }
 0x343   : > { %v4903_v17 = vrot.slane %v4896_v46, %v11259_v54  ;;  %v4911_v19 = vrot.slane %v9445_v33, %v11259_v54  ;;  %v4819_v37 = vrot.slane %v4812_v14, %v11259_v54  ;;  %v4827_v51 = vrot.slane %v9442_v27, %v11259_v54  ;;  %3606 = vrot.lane.b32.xlu1 %v12244_v15, %s10542_s10 }
 0x344   : > { %v4835_v28 = vrot.slane %v4828_v50, %v11259_v54  ;;  %v4843_v11 = vrot.slane %v9443_v60, %v11259_v54  ;;  %v4912_v58 = vcombine.low %v4887_v61, %v4895_v29  ;;  %v4913_v9 = vcombine.high %v4887_v61, %v4895_v29 }
 0x345   : > { %v4928_v24 = vcombine.low %v4903_v17, %v4911_v19  ;;  %v4929_v55 = vcombine.high %v4903_v17, %v4911_v19  ;;  %v4844_v16 = vcombine.low %v4819_v37, %v4827_v51  ;;  %v4845_v23 = vcombine.high %v4819_v37, %v4827_v51  ;;  %3652 = vrot.lane.b32.xlu0 %v12238_v48, %s10543_s9 }
 0x346   : > { %v4860_v53 = vcombine.low %v4835_v28, %v4843_v11  ;;  %v4861_v30 = vcombine.high %v4835_v28, %v4843_v11  ;;  %v4920_v62 = vrot.slane %v4912_v58, %v11261_v56  ;;  %v4927_v47 = vrot.slane %v4913_v9, %v11261_v56 }
 0x347   : > { %v4936_v46 = vrot.slane %v4928_v24, %v11261_v56  ;;  %v4943_v33 = vrot.slane %v4929_v55, %v11261_v56  ;;  %v4852_v14 = vrot.slane %v4844_v16, %v11261_v56  ;;  %v4859_v27 = vrot.slane %v4845_v23, %v11261_v56  ;;  %3654 = vrot.lane.b32.xlu1 %v12244_v15, %s10543_s9 }
 0x348   : > { %v4868_v50 = vrot.slane %v4860_v53, %v11261_v56  ;;  %v4875_v60 = vrot.slane %v4861_v30, %v11261_v56  ;;  %v6585_v45 = vcombine.high %v12294_v26, %v12387_v0  ;;  %v6517_v7 = vcombine.high %v12300_v10, %v12389_v8 }
 0x349   : > { %v4944_v61 = vcombine.low %v4920_v62, %v4936_v46  ;;  %v4945_v29 = vcombine.high %v4920_v62, %v4936_v46  ;;  %v4946_v17 = vcombine.low %v4927_v47, %v4943_v33  ;;  %v4947_v19 = vcombine.high %v4927_v47, %v4943_v33  ;;  %3700 = vrot.lane.b32.xlu0 %v12238_v48, %s10544_s11  ;;  %v3643_v62 = vpop.permute.xlu1 %3642  ;;  %v3641_v47 = vpop.permute.xlu0 %3640 }
 0x34a   : > { %v4876_v37 = vcombine.low %v4852_v14, %v4868_v50  ;;  %v4877_v51 = vcombine.high %v4852_v14, %v4868_v50  ;;  %v4878_v28 = vcombine.low %v4859_v27, %v4875_v60  ;;  %v4879_v11 = vcombine.high %v4859_v27, %v4875_v60 }
 0x34b   : > { %v9722_v58 = vpack.c.bf16 %v4944_v61, %v4944_v61  ;;  %v9738_v9 = vpack.c.bf16 %v4945_v29, %v4945_v29  ;;  %v9754_v24 = vpack.c.bf16 %v4946_v17, %v4946_v17  ;;  %v9770_v55 = vpack.c.bf16 %v4947_v19, %v4947_v19  ;;  %3702 = vrot.lane.b32.xlu1 %v12244_v15, %s10544_s11 }
 0x34c   : > { %v9721_v16 = vpack.c.bf16 %v4876_v37, %v4876_v37  ;;  %v9737_v23 = vpack.c.bf16 %v4877_v51, %v4877_v51  ;;  %v9753_v53 = vpack.c.bf16 %v4878_v28, %v4878_v28  ;;  %v9769_v30 = vpack.c.bf16 %v4879_v11, %v4879_v11 }
 0x34d   : > { %6157 = vst.msk [vmem:[%s12188_s20 + $0x4] sm:$0xf] %vm3379_vm1, %v9722_v58  ;;  %6173 = vst.msk [vmem:[%s12188_s20 + $0x44] sm:$0xf] %vm3379_vm1, %v9738_v9  ;;  %v6576_v46 = vrot.slane %v6568_v22, %v11259_v54  ;;  %v6583_v33 = vrot.slane %v6569_v1, %v11259_v54  ;;  %v6508_v14 = vrot.slane %v6500_v38, %v11259_v54  ;;  %6380 = vrot.lane.b32.xlu0 %v12353_v20, %s10542_s10 }
 0x34e   : > { %6189 = vst.msk [vmem:[%s12188_s20 + $0x84] sm:$0xf] %vm3379_vm1, %v9754_v24  ;;  %6205 = vst.msk [vmem:[%s12188_s20 + $0xc4] sm:$0xf] %vm3379_vm1, %v9770_v55  ;;  %v6515_v27 = vrot.slane %v6501_v25, %v11259_v54  ;;  %v6516_v22 = vcombine.low %v12300_v10, %v12389_v8  ;;  %v4200_v1 = vcombine.low %v11284_v2, %v3643_v62 }
 0x34f   : > { %6156 = vst.msk [vmem:[%s12188_s20] sm:$0xf] %vm3379_vm1, %v9721_v16  ;;  %6172 = vst.msk [vmem:[%s12188_s20 + $0x40] sm:$0xf] %vm3379_vm1, %v9737_v23  ;;  %v4201_v49 = vcombine.high %v11284_v2, %v3643_v62  ;;  %v4132_v38 = vcombine.low %v11276_v3, %v3641_v47  ;;  %v4133_v25 = vcombine.high %v11276_v3, %v3641_v47  ;;  %6382 = vrot.lane.b32.xlu1 %v12359_v34, %s10542_s10  ;;  %v12495_v16 = vpop.permute.xlu1 %3690  ;;  %v12497_v23 = vpop.permute.xlu0 %3688  ;;  %s13044_s10 = scalar_lea.hbm %s13718_s16, %s13030_s29 }
 0x350   : > { %6188 = vst.msk [vmem:[%s12188_s20 + $0x80] sm:$0xf] %vm3379_vm1, %v9753_v53  ;;  %6204 = vst.msk [vmem:[%s12188_s20 + $0xc0] sm:$0xf] %vm3379_vm1, %v9769_v30  ;;  %v6592_v50 = vrot.slane %v6584_v52, %v11259_v54  ;;  %v6599_v26 = vrot.slane %v6585_v45, %v11259_v54  ;;  %v6524_v0 = vrot.slane %v6516_v22, %v11259_v54 }
 0x351   : > { %v6531_v60 = vrot.slane %v6517_v7, %v11259_v54  ;;  %v12478_v2 = vrot.slane %v4200_v1, %v11259_v54  ;;  %v12481_v10 = vrot.slane %v4201_v49, %v11259_v54  ;;  %v12484_v3 = vrot.slane %v4132_v38, %v11259_v54  ;;  %6428 = vrot.lane.b32.xlu0 %v12353_v20, %s10543_s9 }
 0x352   : > { %v12487_v8 = vrot.slane %v4133_v25, %v11259_v54  ;;  %v6600_v61 = vcombine.low %v6576_v46, %v6592_v50  ;;  %v6601_v29 = vcombine.high %v6576_v46, %v6592_v50  ;;  %v6616_v17 = vcombine.low %v6583_v33, %v6599_v26 }
 0x353   : > { %v6617_v19 = vcombine.high %v6583_v33, %v6599_v26  ;;  %v6532_v37 = vcombine.low %v6508_v14, %v6524_v0  ;;  %v6533_v51 = vcombine.high %v6508_v14, %v6524_v0  ;;  %v6548_v28 = vcombine.low %v6515_v27, %v6531_v60  ;;  %6430 = vrot.lane.b32.xlu1 %v12359_v34, %s10543_s9  ;;  %s9022_s9 = sshll.u32 %s11421_s23, 4  ;;  %s10547_s23 = smov [#allocation16]   ;;  %s13051_s9 = int_to_ptr.vmem [resolvable:$true] %s9022_s9 }
 0x354   : > { %v6549_v11 = vcombine.high %v6515_v27, %v6531_v60  ;;  %v6608_v58 = vrot.slane %v6600_v61, %v11261_v56  ;;  %v6615_v9 = vrot.slane %v6601_v29, %v11261_v56  ;;  %v6624_v24 = vrot.slane %v6616_v17, %v11261_v56  ;;  %s10372_s26 = scalar_lea.vmem %s13051_s9, 4096  ;;  %s10376_s22 = sshll.u32 %s10547_s23, 4  ;;  %s10377_s22 = int_to_ptr.vmem [resolvable:$false] %s10376_s22 }
 0x355   : > { %v6631_v55 = vrot.slane %v6617_v19, %v11261_v56  ;;  %v6540_v53 = vrot.slane %v6532_v37, %v11261_v56  ;;  %v6547_v30 = vrot.slane %v6533_v51, %v11261_v56  ;;  %v6556_v62 = vrot.slane %v6548_v28, %v11261_v56  ;;  %6472 = vrot.lane.b32.xlu0 %v11334_v44, %s10544_s11  ;;  %v12517_v37 = vpop.permute.xlu1 %6370  ;;  %v12519_v51 = vpop.permute.xlu0 %6368  ;;  %p10373_p6 = scmp.ne.s32.totalorder %s13051_s9, %s10372_s26  ;;  %s10378_s30 = scalar_lea.vmem %s10377_s22, 8192 }
 0x356   : > { %v6563_v47 = vrot.slane %v6549_v11, %v11261_v56  ;;  %v7656_v46 = vcombine.low %v6608_v58, %v6615_v9  ;;  %v9551_v33 = vcombine.high %v6608_v58, %v6615_v9  ;;  %p10379_p11 = scmp.lt.s32.totalorder %s13051_s9, %s10377_s22  ;;  %p10380_p9 = scmp.lt.s32.totalorder %s10378_s30, %s10372_s26 }
 0x357   : > { %v7672_v14 = vcombine.low %v6624_v24, %v6631_v55  ;;  %v9552_v27 = vcombine.high %v6624_v24, %v6631_v55  ;;  %v7588_v52 = vcombine.low %v6540_v53, %v6547_v30  ;;  %v9549_v45 = vcombine.high %v6540_v53, %v6547_v30  ;;  %6478 = vrot.lane.b32.xlu1 %v12359_v34, %s10544_s11  ;;  %p10374_p1 = pnand %p10373_p6, %p13720_p4 }
 0x358   : > { %v7604_v22 = vcombine.low %v6556_v62, %v6563_v47  ;;  %v9550_v7 = vcombine.high %v6556_v62, %v6563_v47  ;;  %v7663_v1 = vrot.slane %v7656_v46, %v11259_v54  ;;  %v7671_v49 = vrot.slane %v9551_v33, %v11259_v54  ;;  %p10381_p10 = por %p10380_p9, %p10379_p11 }
 0x359   : > { %v7679_v38 = vrot.slane %v7672_v14, %v11259_v54  ;;  %v7687_v25 = vrot.slane %v9552_v27, %v11259_v54  ;;  %v7595_v50 = vrot.slane %v7588_v52, %v11259_v54  ;;  %v7603_v26 = vrot.slane %v9549_v45, %v11259_v54  ;;  %6476 = vrot.lane.b32.xlu0 %v12353_v20, %s10544_s11  ;;  %p10375_p3 = pneg %p10374_p1 }
 0x35a   : > { %v7611_v0 = vrot.slane %v7604_v22, %v11259_v54  ;;  %v7619_v60 = vrot.slane %v9550_v7, %v11259_v54  ;;  %v7688_v61 = vcombine.low %v7663_v1, %v7671_v49  ;;  %v7689_v29 = vcombine.high %v7663_v1, %v7671_v49 }
 0x35b   : > { %v7704_v17 = vcombine.low %v7679_v38, %v7687_v25  ;;  %v7705_v19 = vcombine.high %v7679_v38, %v7687_v25  ;;  %v7620_v28 = vcombine.low %v7595_v50, %v7603_v26  ;;  %v7621_v11 = vcombine.high %v7595_v50, %v7603_v26  ;;  %6482 = vrot.lane.b32.xlu1 %v12356_v42, %s10544_s11  ;;  %p10382_p12 = pnand %p10381_p10, %p10375_p3 }
 0x35c   : > { %v7636_v58 = vcombine.low %v7611_v0, %v7619_v60  ;;  %v7637_v9 = vcombine.high %v7611_v0, %v7619_v60  ;;  %v7696_v24 = vrot.slane %v7688_v61, %v11261_v56  ;;  %v7703_v55 = vrot.slane %v7689_v29, %v11261_v56  ;;  %v6419_v0 = vpop.permute.xlu1 %6418  ;;  %v6417_v60 = vpop.permute.xlu0 %6416 }
 0x35d   : > { %v7712_v53 = vrot.slane %v7704_v17, %v11261_v56  ;;  %v7719_v30 = vrot.slane %v7705_v19, %v11261_v56  ;;  %v7628_v62 = vrot.slane %v7620_v28, %v11261_v56  ;;  %v7635_v47 = vrot.slane %v7621_v11, %v11261_v56  ;;  %6480 = vrot.lane.b32.xlu0 %v12340_v57, %s10544_s11 }
 0x35e   : > { %v7644_v46 = vrot.slane %v7636_v58, %v11261_v56  ;;  %v7651_v33 = vrot.slane %v7637_v9, %v11261_v56  ;;  %v4216_v28 = vcombine.low %v12405_v59, %v12495_v16  ;;  %v4217_v11 = vcombine.high %v12405_v59, %v12495_v16 }
 0x35f   : > { %v7720_v14 = vcombine.low %v7696_v24, %v7712_v53  ;;  %v7721_v27 = vcombine.high %v7696_v24, %v7712_v53  ;;  %v7722_v52 = vcombine.low %v7703_v55, %v7719_v30  ;;  %v7723_v45 = vcombine.high %v7703_v55, %v7719_v30 }
 0x360   : > { %v7652_v22 = vcombine.low %v7628_v62, %v7644_v46  ;;  %v7653_v7 = vcombine.high %v7628_v62, %v7644_v46  ;;  %v7654_v1 = vcombine.low %v7635_v47, %v7651_v33  ;;  %v7655_v49 = vcombine.high %v7635_v47, %v7651_v33 }
 0x361   : > { %v9786_v38 = vpack.c.bf16 %v7720_v14, %v7720_v14  ;;  %v9802_v25 = vpack.c.bf16 %v7721_v27, %v7721_v27  ;;  %v9818_v50 = vpack.c.bf16 %v7722_v52, %v7722_v52  ;;  %v9834_v26 = vpack.c.bf16 %v7723_v45, %v7723_v45 }
 0x362   : > { %v9785_v61 = vpack.c.bf16 %v7652_v22, %v7652_v22  ;;  %v9801_v29 = vpack.c.bf16 %v7653_v7, %v7653_v7  ;;  %v9817_v17 = vpack.c.bf16 %v7654_v1, %v7654_v1  ;;  %v9833_v19 = vpack.c.bf16 %v7655_v49, %v7655_v49  ;;  %v12587_v1 = vpop.permute.xlu1 %6466  ;;  %v12589_v49 = vpop.permute.xlu0 %6464 }
 0x363   : > { %8933 = vst.msk [vmem:[%s12303_s19 + $0x4] sm:$0xf] %vm3379_vm1, %v9786_v38  ;;  %8949 = vst.msk [vmem:[%s12303_s19 + $0x44] sm:$0xf] %vm3379_vm1, %v9802_v25  ;;  %v4148_v58 = vcombine.low %v12407_v21, %v12497_v23  ;;  %v4149_v9 = vcombine.high %v12407_v21, %v12497_v23  ;;  %v6976_v24 = vcombine.low %v11305_v13, %v6419_v0 }
 0x364   : > { %8965 = vst.msk [vmem:[%s12303_s19 + $0x84] sm:$0xf] %vm3379_vm1, %v9818_v50  ;;  %8981 = vst.msk [vmem:[%s12303_s19 + $0xc4] sm:$0xf] %vm3379_vm1, %v9834_v26  ;;  %v6977_v55 = vcombine.high %v11305_v13, %v6419_v0  ;;  %v6908_v59 = vcombine.low %v11292_v6, %v6417_v60  ;;  %v6909_v16 = vcombine.high %v11292_v6, %v6417_v60 }
 0x365   : > { %8932 = vst.msk [vmem:[%s12303_s19] sm:$0xf] %vm3379_vm1, %v9785_v61  ;;  %8948 = vst.msk [vmem:[%s12303_s19 + $0x40] sm:$0xf] %vm3379_vm1, %v9801_v29  ;;  %v4224_v53 = vrot.slane %v4216_v28, %v11259_v54  ;;  %v4231_v21 = vrot.slane %v4217_v11, %v11259_v54  ;;  %v4156_v23 = vrot.slane %v4148_v58, %v11259_v54 }
 0x366   : > { %8964 = vst.msk [vmem:[%s12303_s19 + $0x80] sm:$0xf] %vm3379_vm1, %v9817_v17  ;;  %8980 = vst.msk [vmem:[%s12303_s19 + $0xc0] sm:$0xf] %vm3379_vm1, %v9833_v19  ;;  %v4163_v30 = vrot.slane %v4149_v9, %v11259_v54  ;;  %v12568_v62 = vrot.slane %v6976_v24, %v11259_v54  ;;  %v12571_v47 = vrot.slane %v6977_v55, %v11259_v54 }
 0x367   : > { %v12574_v13 = vrot.slane %v6908_v59, %v11259_v54  ;;  %v12577_v46 = vrot.slane %v6909_v16, %v11259_v54  ;;  %v4232_v6 = vcombine.low %v12478_v2, %v4224_v53  ;;  %v4233_v33 = vcombine.high %v12478_v2, %v4224_v53 }
 0x368   : > { %v4248_v14 = vcombine.low %v12481_v10, %v4231_v21  ;;  %v4249_v27 = vcombine.high %v12481_v10, %v4231_v21  ;;  %v4164_v52 = vcombine.low %v12484_v3, %v4156_v23  ;;  %v4165_v45 = vcombine.high %v12484_v3, %v4156_v23  ;;  %v12607_v23 = vpop.permute.xlu1 %3590 }
 0x369   : > { %v4180_v22 = vcombine.low %v12487_v8, %v4163_v30  ;;  %v4181_v7 = vcombine.high %v12487_v8, %v4163_v30  ;;  %v4240_v38 = vrot.slane %v4232_v6, %v11261_v56  ;;  %v4247_v2 = vrot.slane %v4233_v33, %v11261_v56  ;;  %v12609_v30 = vpop.permute.xlu0 %3588 }
 0x36a   : > { %v4256_v25 = vrot.slane %v4248_v14, %v11261_v56  ;;  %v4263_v10 = vrot.slane %v4249_v27, %v11261_v56  ;;  %v4172_v50 = vrot.slane %v4164_v52, %v11261_v56  ;;  %v4179_v3 = vrot.slane %v4165_v45, %v11261_v56 }
 0x36b   : > { %v4188_v26 = vrot.slane %v4180_v22, %v11261_v56  ;;  %v4195_v8 = vrot.slane %v4181_v7, %v11261_v56  ;;  %v5288_v0 = vcombine.low %v4240_v38, %v4247_v2  ;;  %v9456_v60 = vcombine.high %v4240_v38, %v4247_v2 }
 0x36c   : > { %v5304_v61 = vcombine.low %v4256_v25, %v4263_v10  ;;  %v9457_v29 = vcombine.high %v4256_v25, %v4263_v10  ;;  %v5220_v17 = vcombine.low %v4172_v50, %v4179_v3  ;;  %v9454_v19 = vcombine.high %v4172_v50, %v4179_v3 }
 0x36d   : > { %v5236_v28 = vcombine.low %v4188_v26, %v4195_v8  ;;  %v9455_v11 = vcombine.high %v4188_v26, %v4195_v8  ;;  %v5295_v58 = vrot.slane %v5288_v0, %v11259_v54  ;;  %v5303_v9 = vrot.slane %v9456_v60, %v11259_v54 }
 0x36e   : > { %v5311_v24 = vrot.slane %v5304_v61, %v11259_v54  ;;  %v5319_v55 = vrot.slane %v9457_v29, %v11259_v54  ;;  %v5227_v59 = vrot.slane %v5220_v17, %v11259_v54  ;;  %v5235_v16 = vrot.slane %v9454_v19, %v11259_v54 }
 0x36f   : > { %v5243_v53 = vrot.slane %v5236_v28, %v11259_v54  ;;  %v5251_v21 = vrot.slane %v9455_v11, %v11259_v54  ;;  %v5320_v6 = vcombine.low %v5295_v58, %v5303_v9  ;;  %v5321_v33 = vcombine.high %v5295_v58, %v5303_v9  ;;  %v3639_v58 = vpop.permute.xlu1 %3638  ;;  %v3637_v9 = vpop.permute.xlu0 %3636 }
 0x370   : > { %v5336_v14 = vcombine.low %v5311_v24, %v5319_v55  ;;  %v5337_v27 = vcombine.high %v5311_v24, %v5319_v55  ;;  %v5252_v52 = vcombine.low %v5227_v59, %v5235_v16  ;;  %v5253_v45 = vcombine.high %v5227_v59, %v5235_v16 }
 0x371   : > { %v5268_v22 = vcombine.low %v5243_v53, %v5251_v21  ;;  %v5269_v7 = vcombine.high %v5243_v53, %v5251_v21  ;;  %v5328_v38 = vrot.slane %v5320_v6, %v11261_v56  ;;  %v5335_v2 = vrot.slane %v5321_v33, %v11261_v56 }
 0x372   : > { %v5344_v25 = vrot.slane %v5336_v14, %v11261_v56  ;;  %v5351_v10 = vrot.slane %v5337_v27, %v11261_v56  ;;  %v5260_v50 = vrot.slane %v5252_v52, %v11261_v56  ;;  %v5267_v3 = vrot.slane %v5253_v45, %v11261_v56 }
 0x373   : > { %v5276_v26 = vrot.slane %v5268_v22, %v11261_v56  ;;  %v5283_v8 = vrot.slane %v5269_v7, %v11261_v56  ;;  %v6992_v14 = vcombine.low %v12517_v37, %v12587_v1  ;;  %v6993_v27 = vcombine.high %v12517_v37, %v12587_v1 }
 0x374   : > { %v5352_v0 = vcombine.low %v5328_v38, %v5344_v25  ;;  %v5353_v60 = vcombine.high %v5328_v38, %v5344_v25  ;;  %v5354_v61 = vcombine.low %v5335_v2, %v5351_v10  ;;  %v5355_v29 = vcombine.high %v5335_v2, %v5351_v10 }
 0x375   : > { %v5284_v17 = vcombine.low %v5260_v50, %v5276_v26  ;;  %v5285_v19 = vcombine.high %v5260_v50, %v5276_v26  ;;  %v5286_v28 = vcombine.low %v5267_v3, %v5283_v8  ;;  %v5287_v11 = vcombine.high %v5267_v3, %v5283_v8  ;;  %v12665_v3 = vpop.permute.xlu0 %3684 }
 0x376   : > { %v9728_v24 = vpack.c.bf16 %v5352_v0, %v5352_v0  ;;  %v9744_v55 = vpack.c.bf16 %v5353_v60, %v5353_v60  ;;  %v9760_v59 = vpack.c.bf16 %v5354_v61, %v5354_v61  ;;  %v9776_v16 = vpack.c.bf16 %v5355_v29, %v5355_v29 }
 0x377   : > { %v9727_v53 = vpack.c.bf16 %v5284_v17, %v5284_v17  ;;  %v9743_v21 = vpack.c.bf16 %v5285_v19, %v5285_v19  ;;  %v9759_v6 = vpack.c.bf16 %v5286_v28, %v5286_v28  ;;  %v9775_v33 = vpack.c.bf16 %v5287_v11, %v5287_v11 }
 0x378   : > { %6163 = vst.msk [vmem:[%s12188_s20 + $0x1c] sm:$0xf] %vm3379_vm1, %v9728_v24  ;;  %6179 = vst.msk [vmem:[%s12188_s20 + $0x5c] sm:$0xf] %vm3379_vm1, %v9744_v55  ;;  %v6924_v52 = vcombine.low %v12519_v51, %v12589_v49  ;;  %v6925_v45 = vcombine.high %v12519_v51, %v12589_v49  ;;  %v4064_v22 = vcombine.low %v11288_v5, %v3639_v58 }
 0x379   : > { %6195 = vst.msk [vmem:[%s12188_s20 + $0x9c] sm:$0xf] %vm3379_vm1, %v9760_v59  ;;  %6211 = vst.msk [vmem:[%s12188_s20 + $0xdc] sm:$0xf] %vm3379_vm1, %v9776_v16  ;;  %v4065_v7 = vcombine.high %v11288_v5, %v3639_v58  ;;  %v3996_v37 = vcombine.low %v11280_v4, %v3637_v9  ;;  %v3997_v1 = vcombine.high %v11280_v4, %v3637_v9  ;;  %v12663_v4 = vpop.permute.xlu1 %3686 }
 0x37a   : > { %6162 = vst.msk [vmem:[%s12188_s20 + $0x18] sm:$0xf] %vm3379_vm1, %v9727_v53  ;;  %6178 = vst.msk [vmem:[%s12188_s20 + $0x58] sm:$0xf] %vm3379_vm1, %v9743_v21  ;;  %v7000_v38 = vrot.slane %v6992_v14, %v11259_v54  ;;  %v7007_v51 = vrot.slane %v6993_v27, %v11259_v54  ;;  %v6932_v49 = vrot.slane %v6924_v52, %v11259_v54  ;;  %v12685_v27 = vpop.permute.xlu0 %6364 }
 0x37b   : > { %6194 = vst.msk [vmem:[%s12188_s20 + $0x98] sm:$0xf] %vm3379_vm1, %v9759_v6  ;;  %6210 = vst.msk [vmem:[%s12188_s20 + $0xd8] sm:$0xf] %vm3379_vm1, %v9775_v33  ;;  %v6939_v2 = vrot.slane %v6925_v45, %v11259_v54  ;;  %v12652_v25 = vrot.slane %v4064_v22, %v11259_v54  ;;  %v12655_v10 = vrot.slane %v4065_v7, %v11259_v54 }
 0x37c   : > { %v12658_v5 = vrot.slane %v3996_v37, %v11259_v54  ;;  %v12661_v50 = vrot.slane %v3997_v1, %v11259_v54  ;;  %v7008_v26 = vcombine.low %v12568_v62, %v7000_v38  ;;  %v7009_v8 = vcombine.high %v12568_v62, %v7000_v38 }
 0x37d   : > { %v7024_v0 = vcombine.low %v12571_v47, %v7007_v51  ;;  %v7025_v60 = vcombine.high %v12571_v47, %v7007_v51  ;;  %v6940_v61 = vcombine.low %v12574_v13, %v6932_v49  ;;  %v6941_v29 = vcombine.high %v12574_v13, %v6932_v49  ;;  %v12683_v14 = vpop.permute.xlu1 %6366 }
 0x37e   : > { %v6956_v17 = vcombine.low %v12577_v46, %v6939_v2  ;;  %v6957_v19 = vcombine.high %v12577_v46, %v6939_v2  ;;  %v7016_v28 = vrot.slane %v7008_v26, %v11261_v56  ;;  %v7023_v11 = vrot.slane %v7009_v8, %v11261_v56 }
 0x37f   : > { %v7032_v58 = vrot.slane %v7024_v0, %v11261_v56  ;;  %v7039_v62 = vrot.slane %v7025_v60, %v11261_v56  ;;  %v6948_v9 = vrot.slane %v6940_v61, %v11261_v56  ;;  %v6955_v47 = vrot.slane %v6941_v29, %v11261_v56 }
 0x380   : > { %v6964_v24 = vrot.slane %v6956_v17, %v11261_v56  ;;  %v6971_v13 = vrot.slane %v6957_v19, %v11261_v56  ;;  %v8064_v55 = vcombine.low %v7016_v28, %v7023_v11  ;;  %v9563_v59 = vcombine.high %v7016_v28, %v7023_v11 }
 0x381   : > { %v8080_v16 = vcombine.low %v7032_v58, %v7039_v62  ;;  %v9564_v46 = vcombine.high %v7032_v58, %v7039_v62  ;;  %v7996_v53 = vcombine.low %v6948_v9, %v6955_v47  ;;  %v9561_v21 = vcombine.high %v6948_v9, %v6955_v47 }
 0x382   : > { %v8012_v6 = vcombine.low %v6964_v24, %v6971_v13  ;;  %v9562_v33 = vcombine.high %v6964_v24, %v6971_v13  ;;  %v8071_v52 = vrot.slane %v8064_v55, %v11259_v54  ;;  %v8079_v45 = vrot.slane %v9563_v59, %v11259_v54  ;;  %v6415_v24 = vpop.permute.xlu1 %6414  ;;  %v6413_v13 = vpop.permute.xlu0 %6412 }
 0x383   : > { %v8087_v22 = vrot.slane %v8080_v16, %v11259_v54  ;;  %v8095_v7 = vrot.slane %v9564_v46, %v11259_v54  ;;  %v8003_v37 = vrot.slane %v7996_v53, %v11259_v54  ;;  %v8011_v1 = vrot.slane %v9561_v21, %v11259_v54 }
 0x384   : > { %v8019_v38 = vrot.slane %v8012_v6, %v11259_v54  ;;  %v8027_v51 = vrot.slane %v9562_v33, %v11259_v54  ;;  %v8096_v49 = vcombine.low %v8071_v52, %v8079_v45  ;;  %v8097_v2 = vcombine.high %v8071_v52, %v8079_v45 }
 0x385   : > { %v8112_v26 = vcombine.low %v8087_v22, %v8095_v7  ;;  %v8113_v8 = vcombine.high %v8087_v22, %v8095_v7  ;;  %v8028_v0 = vcombine.low %v8003_v37, %v8011_v1  ;;  %v8029_v60 = vcombine.high %v8003_v37, %v8011_v1 }
 0x386   : > { %v8044_v61 = vcombine.low %v8019_v38, %v8027_v51  ;;  %v8045_v29 = vcombine.high %v8019_v38, %v8027_v51  ;;  %v8104_v17 = vrot.slane %v8096_v49, %v11261_v56  ;;  %v8111_v19 = vrot.slane %v8097_v2, %v11261_v56 }
 0x387   : > { %v8120_v28 = vrot.slane %v8112_v26, %v11261_v56  ;;  %v8127_v11 = vrot.slane %v8113_v8, %v11261_v56  ;;  %v8036_v58 = vrot.slane %v8028_v0, %v11261_v56  ;;  %v8043_v62 = vrot.slane %v8029_v60, %v11261_v56 }
 0x388   : > { %v8052_v9 = vrot.slane %v8044_v61, %v11261_v56  ;;  %v8059_v47 = vrot.slane %v8045_v29, %v11261_v56  ;;  %v4080_v49 = vcombine.low %v12607_v23, %v12663_v4  ;;  %v4081_v2 = vcombine.high %v12607_v23, %v12663_v4  ;;  %v12731_v61 = vpop.permute.xlu1 %6462  ;;  %v12733_v29 = vpop.permute.xlu0 %6460 }
 0x389   : > { %v8128_v55 = vcombine.low %v8104_v17, %v8120_v28  ;;  %v8129_v59 = vcombine.high %v8104_v17, %v8120_v28  ;;  %v8130_v16 = vcombine.low %v8111_v19, %v8127_v11  ;;  %v8131_v46 = vcombine.high %v8111_v19, %v8127_v11 }
 0x38a   : > { %v8060_v53 = vcombine.low %v8036_v58, %v8052_v9  ;;  %v8061_v21 = vcombine.high %v8036_v58, %v8052_v9  ;;  %v8062_v6 = vcombine.low %v8043_v62, %v8059_v47  ;;  %v8063_v33 = vcombine.high %v8043_v62, %v8059_v47 }
 0x38b   : > { %v9792_v52 = vpack.c.bf16 %v8128_v55, %v8128_v55  ;;  %v9808_v45 = vpack.c.bf16 %v8129_v59, %v8129_v59  ;;  %v9824_v22 = vpack.c.bf16 %v8130_v16, %v8130_v16  ;;  %v9840_v7 = vpack.c.bf16 %v8131_v46, %v8131_v46 }
 0x38c   : > { %v9791_v37 = vpack.c.bf16 %v8060_v53, %v8060_v53  ;;  %v9807_v1 = vpack.c.bf16 %v8061_v21, %v8061_v21  ;;  %v9823_v38 = vpack.c.bf16 %v8062_v6, %v8062_v6  ;;  %v9839_v51 = vpack.c.bf16 %v8063_v33, %v8063_v33  ;;  %v12767_v33 = vpop.permute.xlu1 %3602 }
 0x38d   : > { %8939 = vst.msk [vmem:[%s12303_s19 + $0x1c] sm:$0xf] %vm3379_vm1, %v9792_v52  ;;  %8955 = vst.msk [vmem:[%s12303_s19 + $0x5c] sm:$0xf] %vm3379_vm1, %v9808_v45  ;;  %v4012_v26 = vcombine.low %v12609_v30, %v12665_v3  ;;  %v4013_v8 = vcombine.high %v12609_v30, %v12665_v3  ;;  %v6840_v0 = vcombine.low %v11310_v43, %v6415_v24  ;;  %v12769_v52 = vpop.permute.xlu0 %3600 }
 0x38e   : > { %8971 = vst.msk [vmem:[%s12303_s19 + $0x9c] sm:$0xf] %vm3379_vm1, %v9824_v22  ;;  %8987 = vst.msk [vmem:[%s12303_s19 + $0xdc] sm:$0xf] %vm3379_vm1, %v9840_v7  ;;  %v6841_v60 = vcombine.high %v11310_v43, %v6415_v24  ;;  %v6772_v23 = vcombine.low %v11301_v12, %v6413_v13  ;;  %v6773_v4 = vcombine.high %v11301_v12, %v6413_v13 }
 0x38f   : > { %8938 = vst.msk [vmem:[%s12303_s19 + $0x18] sm:$0xf] %vm3379_vm1, %v9791_v37  ;;  %8954 = vst.msk [vmem:[%s12303_s19 + $0x58] sm:$0xf] %vm3379_vm1, %v9807_v1  ;;  %v4088_v30 = vrot.slane %v4080_v49, %v11259_v54  ;;  %v4095_v3 = vrot.slane %v4081_v2, %v11259_v54  ;;  %v4020_v17 = vrot.slane %v4012_v26, %v11259_v54 }
 0x390   : > { %8970 = vst.msk [vmem:[%s12303_s19 + $0x98] sm:$0xf] %vm3379_vm1, %v9823_v38  ;;  %8986 = vst.msk [vmem:[%s12303_s19 + $0xd8] sm:$0xf] %vm3379_vm1, %v9839_v51  ;;  %v4027_v19 = vrot.slane %v4013_v8, %v11259_v54  ;;  %v12740_v28 = vrot.slane %v6840_v0, %v11259_v54  ;;  %v12743_v43 = vrot.slane %v6841_v60, %v11259_v54 }
 0x391   : > { %v12746_v12 = vrot.slane %v6772_v23, %v11259_v54  ;;  %v12749_v11 = vrot.slane %v6773_v4, %v11259_v54  ;;  %v4096_v58 = vcombine.low %v12652_v25, %v4088_v30  ;;  %v4097_v62 = vcombine.high %v12652_v25, %v4088_v30 }
 0x392   : > { %v4112_v9 = vcombine.low %v12655_v10, %v4095_v3  ;;  %v4113_v47 = vcombine.high %v12655_v10, %v4095_v3  ;;  %v4028_v24 = vcombine.low %v12658_v5, %v4020_v17  ;;  %v4029_v13 = vcombine.high %v12658_v5, %v4020_v17 }
 0x393   : > { %v4044_v55 = vcombine.low %v12661_v50, %v4027_v19  ;;  %v4045_v59 = vcombine.high %v12661_v50, %v4027_v19  ;;  %v4104_v16 = vrot.slane %v4096_v58, %v11261_v56  ;;  %v4111_v46 = vrot.slane %v4097_v62, %v11261_v56 }
 0x394   : > { %v4120_v53 = vrot.slane %v4112_v9, %v11261_v56  ;;  %v4127_v25 = vrot.slane %v4113_v47, %v11261_v56  ;;  %v4036_v21 = vrot.slane %v4028_v24, %v11261_v56  ;;  %v4043_v10 = vrot.slane %v4029_v13, %v11261_v56  ;;  %v3651_v24 = vpop.permute.xlu1 %3650  ;;  %v3649_v13 = vpop.permute.xlu0 %3648 }
 0x395   : > { %v4052_v6 = vrot.slane %v4044_v55, %v11261_v56  ;;  %v4059_v5 = vrot.slane %v4045_v59, %v11261_v56  ;;  %v5152_v50 = vcombine.low %v4104_v16, %v4111_v46  ;;  %v9452_v45 = vcombine.high %v4104_v16, %v4111_v46 }
 0x396   : > { %v5168_v22 = vcombine.low %v4120_v53, %v4127_v25  ;;  %v9453_v7 = vcombine.high %v4120_v53, %v4127_v25  ;;  %v5084_v37 = vcombine.low %v4036_v21, %v4043_v10  ;;  %v9450_v1 = vcombine.high %v4036_v21, %v4043_v10 }
 0x397   : > { %v5100_v38 = vcombine.low %v4052_v6, %v4059_v5  ;;  %v9451_v51 = vcombine.high %v4052_v6, %v4059_v5  ;;  %v5159_v49 = vrot.slane %v5152_v50, %v11259_v54  ;;  %v5167_v2 = vrot.slane %v9452_v45, %v11259_v54 }
 0x398   : > { %v5175_v26 = vrot.slane %v5168_v22, %v11259_v54  ;;  %v5183_v8 = vrot.slane %v9453_v7, %v11259_v54  ;;  %v5091_v0 = vrot.slane %v5084_v37, %v11259_v54  ;;  %v5099_v60 = vrot.slane %v9450_v1, %v11259_v54 }
 0x399   : > { %v5107_v23 = vrot.slane %v5100_v38, %v11259_v54  ;;  %v5115_v4 = vrot.slane %v9451_v51, %v11259_v54  ;;  %v5184_v30 = vcombine.low %v5159_v49, %v5167_v2  ;;  %v5185_v3 = vcombine.high %v5159_v49, %v5167_v2 }
 0x39a   : > { %v5200_v17 = vcombine.low %v5175_v26, %v5183_v8  ;;  %v5201_v19 = vcombine.high %v5175_v26, %v5183_v8  ;;  %v5116_v58 = vcombine.low %v5091_v0, %v5099_v60  ;;  %v5117_v62 = vcombine.high %v5091_v0, %v5099_v60 }
 0x39b   : > { %v5132_v9 = vcombine.low %v5107_v23, %v5115_v4  ;;  %v5133_v47 = vcombine.high %v5107_v23, %v5115_v4  ;;  %v5192_v55 = vrot.slane %v5184_v30, %v11261_v56  ;;  %v5199_v59 = vrot.slane %v5185_v3, %v11261_v56  ;;  %v12787_v23 = vpop.permute.xlu1 %3698  ;;  %v12789_v4 = vpop.permute.xlu0 %3696 }
 0x39c   : > { %v5208_v16 = vrot.slane %v5200_v17, %v11261_v56  ;;  %v5215_v46 = vrot.slane %v5201_v19, %v11261_v56  ;;  %v5124_v53 = vrot.slane %v5116_v58, %v11261_v56  ;;  %v5131_v25 = vrot.slane %v5117_v62, %v11261_v56 }
 0x39d   : > { %v5140_v21 = vrot.slane %v5132_v9, %v11261_v56  ;;  %v5147_v10 = vrot.slane %v5133_v47, %v11261_v56  ;;  %v6856_v30 = vcombine.low %v12683_v14, %v12731_v61  ;;  %v6857_v3 = vcombine.high %v12683_v14, %v12731_v61 }
 0x39e   : > { %v5216_v6 = vcombine.low %v5192_v55, %v5208_v16  ;;  %v5217_v5 = vcombine.high %v5192_v55, %v5208_v16  ;;  %v5218_v50 = vcombine.low %v5199_v59, %v5215_v46  ;;  %v5219_v45 = vcombine.high %v5199_v59, %v5215_v46 }
 0x39f   : > { %v5148_v22 = vcombine.low %v5124_v53, %v5140_v21  ;;  %v5149_v7 = vcombine.high %v5124_v53, %v5140_v21  ;;  %v5150_v37 = vcombine.low %v5131_v25, %v5147_v10  ;;  %v5151_v1 = vcombine.high %v5131_v25, %v5147_v10 }
 0x3a0   : > { %v9726_v38 = vpack.c.bf16 %v5216_v6, %v5216_v6  ;;  %v9742_v51 = vpack.c.bf16 %v5217_v5, %v5217_v5  ;;  %v9758_v49 = vpack.c.bf16 %v5218_v50, %v5218_v50  ;;  %v9774_v2 = vpack.c.bf16 %v5219_v45, %v5219_v45  ;;  %v12843_v6 = vpop.permute.xlu1 %6378  ;;  %v12845_v5 = vpop.permute.xlu0 %6376 }
 0x3a1   : > { %v9725_v26 = vpack.c.bf16 %v5148_v22, %v5148_v22  ;;  %v9741_v8 = vpack.c.bf16 %v5149_v7, %v5149_v7  ;;  %v9757_v0 = vpack.c.bf16 %v5150_v37, %v5150_v37  ;;  %v9773_v60 = vpack.c.bf16 %v5151_v1, %v5151_v1 }
 0x3a2   : > { %6161 = vst.msk [vmem:[%s12188_s20 + $0x14] sm:$0xf] %vm3379_vm1, %v9726_v38  ;;  %6177 = vst.msk [vmem:[%s12188_s20 + $0x54] sm:$0xf] %vm3379_vm1, %v9742_v51  ;;  %v6788_v17 = vcombine.low %v12685_v27, %v12733_v29  ;;  %v6789_v19 = vcombine.high %v12685_v27, %v12733_v29  ;;  %v4472_v58 = vcombine.low %v11321_v39, %v3651_v24 }
 0x3a3   : > { %6193 = vst.msk [vmem:[%s12188_s20 + $0x94] sm:$0xf] %vm3379_vm1, %v9758_v49  ;;  %6209 = vst.msk [vmem:[%s12188_s20 + $0xd4] sm:$0xf] %vm3379_vm1, %v9774_v2  ;;  %v4473_v62 = vcombine.high %v11321_v39, %v3651_v24  ;;  %v4404_v14 = vcombine.low %v11313_v18, %v3649_v13  ;;  %v4405_v61 = vcombine.high %v11313_v18, %v3649_v13 }
 0x3a4   : > { %6160 = vst.msk [vmem:[%s12188_s20 + $0x10] sm:$0xf] %vm3379_vm1, %v9725_v26  ;;  %6176 = vst.msk [vmem:[%s12188_s20 + $0x50] sm:$0xf] %vm3379_vm1, %v9741_v8  ;;  %v6864_v9 = vrot.slane %v6856_v30, %v11259_v54  ;;  %v6871_v27 = vrot.slane %v6857_v3, %v11259_v54  ;;  %v6796_v29 = vrot.slane %v6788_v17, %v11259_v54 }
 0x3a5   : > { %6192 = vst.msk [vmem:[%s12188_s20 + $0x90] sm:$0xf] %vm3379_vm1, %v9757_v0  ;;  %6208 = vst.msk [vmem:[%s12188_s20 + $0xd0] sm:$0xf] %vm3379_vm1, %v9773_v60  ;;  %v6803_v47 = vrot.slane %v6789_v19, %v11259_v54  ;;  %v12824_v55 = vrot.slane %v4472_v58, %v11259_v54  ;;  %v12827_v59 = vrot.slane %v4473_v62, %v11259_v54 }
 0x3a6   : > { %v12830_v39 = vrot.slane %v4404_v14, %v11259_v54  ;;  %v12833_v24 = vrot.slane %v4405_v61, %v11259_v54  ;;  %v6872_v18 = vcombine.low %v12740_v28, %v6864_v9  ;;  %v6873_v13 = vcombine.high %v12740_v28, %v6864_v9  ;;  %v6427_v14 = vpop.permute.xlu1 %6426  ;;  %v6425_v61 = vpop.permute.xlu0 %6424 }
 0x3a7   : > { %v6888_v16 = vcombine.low %v12743_v43, %v6871_v27  ;;  %v6889_v46 = vcombine.high %v12743_v43, %v6871_v27  ;;  %v6804_v53 = vcombine.low %v12746_v12, %v6796_v29  ;;  %v6805_v25 = vcombine.high %v12746_v12, %v6796_v29 }
 0x3a8   : > { %v6820_v21 = vcombine.low %v12749_v11, %v6803_v47  ;;  %v6821_v10 = vcombine.high %v12749_v11, %v6803_v47  ;;  %v6880_v50 = vrot.slane %v6872_v18, %v11261_v56  ;;  %v6887_v28 = vrot.slane %v6873_v13, %v11261_v56 }
 0x3a9   : > { %v6896_v45 = vrot.slane %v6888_v16, %v11261_v56  ;;  %v6903_v43 = vrot.slane %v6889_v46, %v11261_v56  ;;  %v6812_v22 = vrot.slane %v6804_v53, %v11261_v56  ;;  %v6819_v12 = vrot.slane %v6805_v25, %v11261_v56 }
 0x3aa   : > { %v6828_v7 = vrot.slane %v6820_v21, %v11261_v56  ;;  %v6835_v11 = vrot.slane %v6821_v10, %v11261_v56  ;;  %v7928_v37 = vcombine.low %v6880_v50, %v6887_v28  ;;  %v9559_v1 = vcombine.high %v6880_v50, %v6887_v28 }
 0x3ab   : > { %v7944_v38 = vcombine.low %v6896_v45, %v6903_v43  ;;  %v9560_v51 = vcombine.high %v6896_v45, %v6903_v43  ;;  %v7860_v49 = vcombine.low %v6812_v22, %v6819_v12  ;;  %v9557_v2 = vcombine.high %v6812_v22, %v6819_v12 }
 0x3ac   : > { %v7876_v26 = vcombine.low %v6828_v7, %v6835_v11  ;;  %v9558_v8 = vcombine.high %v6828_v7, %v6835_v11  ;;  %v7935_v0 = vrot.slane %v7928_v37, %v11259_v54  ;;  %v7943_v60 = vrot.slane %v9559_v1, %v11259_v54 }
 0x3ad   : > { %v7951_v30 = vrot.slane %v7944_v38, %v11259_v54  ;;  %v7959_v3 = vrot.slane %v9560_v51, %v11259_v54  ;;  %v7867_v17 = vrot.slane %v7860_v49, %v11259_v54  ;;  %v7875_v19 = vrot.slane %v9557_v2, %v11259_v54  ;;  %v12871_v49 = vpop.permute.xlu1 %3598  ;;  %v12873_v2 = vpop.permute.xlu0 %3596 }
 0x3ae   : > { %v7883_v58 = vrot.slane %v7876_v26, %v11259_v54  ;;  %v7891_v62 = vrot.slane %v9558_v8, %v11259_v54  ;;  %v7960_v9 = vcombine.low %v7935_v0, %v7943_v60  ;;  %v7961_v27 = vcombine.high %v7935_v0, %v7943_v60 }
 0x3af   : > { %v7976_v29 = vcombine.low %v7951_v30, %v7959_v3  ;;  %v7977_v47 = vcombine.high %v7951_v30, %v7959_v3  ;;  %v7892_v18 = vcombine.low %v7867_v17, %v7875_v19  ;;  %v7893_v13 = vcombine.high %v7867_v17, %v7875_v19 }
 0x3b0   : > { %v7908_v16 = vcombine.low %v7883_v58, %v7891_v62  ;;  %v7909_v46 = vcombine.high %v7883_v58, %v7891_v62  ;;  %v7968_v53 = vrot.slane %v7960_v9, %v11261_v56  ;;  %v7975_v25 = vrot.slane %v7961_v27, %v11261_v56 }
 0x3b1   : > { %v7984_v21 = vrot.slane %v7976_v29, %v11261_v56  ;;  %v7991_v10 = vrot.slane %v7977_v47, %v11261_v56  ;;  %v7900_v50 = vrot.slane %v7892_v18, %v11261_v56  ;;  %v7907_v28 = vrot.slane %v7893_v13, %v11261_v56 }
 0x3b2   : > { %v7916_v45 = vrot.slane %v7908_v16, %v11261_v56  ;;  %v7923_v43 = vrot.slane %v7909_v46, %v11261_v56  ;;  %v4488_v58 = vcombine.low %v12767_v33, %v12787_v23  ;;  %v4489_v62 = vcombine.high %v12767_v33, %v12787_v23 }
 0x3b3   : > { %v7992_v22 = vcombine.low %v7968_v53, %v7984_v21  ;;  %v7993_v12 = vcombine.high %v7968_v53, %v7984_v21  ;;  %v7994_v7 = vcombine.low %v7975_v25, %v7991_v10  ;;  %v7995_v11 = vcombine.high %v7975_v25, %v7991_v10 }
 0x3b4   : > { %v7924_v37 = vcombine.low %v7900_v50, %v7916_v45  ;;  %v7925_v1 = vcombine.high %v7900_v50, %v7916_v45  ;;  %v7926_v38 = vcombine.low %v7907_v28, %v7923_v43  ;;  %v7927_v51 = vcombine.high %v7907_v28, %v7923_v43 }
 0x3b5   : > { %v9790_v26 = vpack.c.bf16 %v7992_v22, %v7992_v22  ;;  %v9806_v8 = vpack.c.bf16 %v7993_v12, %v7993_v12  ;;  %v9822_v0 = vpack.c.bf16 %v7994_v7, %v7994_v7  ;;  %v9838_v60 = vpack.c.bf16 %v7995_v11, %v7995_v11 }
 0x3b6   : > { %v9789_v30 = vpack.c.bf16 %v7924_v37, %v7924_v37  ;;  %v9805_v3 = vpack.c.bf16 %v7925_v1, %v7925_v1  ;;  %v9821_v17 = vpack.c.bf16 %v7926_v38, %v7926_v38  ;;  %v9837_v19 = vpack.c.bf16 %v7927_v51, %v7927_v51 }
 0x3b7   : > { %8937 = vst.msk [vmem:[%s12303_s19 + $0x14] sm:$0xf] %vm3379_vm1, %v9790_v26  ;;  %8953 = vst.msk [vmem:[%s12303_s19 + $0x54] sm:$0xf] %vm3379_vm1, %v9806_v8  ;;  %v4420_v9 = vcombine.low %v12769_v52, %v12789_v4  ;;  %v4421_v27 = vcombine.high %v12769_v52, %v12789_v4  ;;  %v7248_v29 = vcombine.low %v11343_v41, %v6427_v14 }
 0x3b8   : > { %8969 = vst.msk [vmem:[%s12303_s19 + $0x94] sm:$0xf] %vm3379_vm1, %v9822_v0  ;;  %8985 = vst.msk [vmem:[%s12303_s19 + $0xd4] sm:$0xf] %vm3379_vm1, %v9838_v60  ;;  %v7249_v47 = vcombine.high %v11343_v41, %v6427_v14  ;;  %v7180_v33 = vcombine.low %v11334_v44, %v6425_v61  ;;  %v7181_v23 = vcombine.high %v11334_v44, %v6425_v61  ;;  %v12919_v44 = vpop.permute.xlu1 %3646  ;;  %v12921_v61 = vpop.permute.xlu0 %3644 }
 0x3b9   : > { %8936 = vst.msk [vmem:[%s12303_s19 + $0x10] sm:$0xf] %vm3379_vm1, %v9789_v30  ;;  %8952 = vst.msk [vmem:[%s12303_s19 + $0x50] sm:$0xf] %vm3379_vm1, %v9805_v3  ;;  %v4496_v18 = vrot.slane %v4488_v58, %v11259_v54  ;;  %v4503_v52 = vrot.slane %v4489_v62, %v11259_v54  ;;  %v4428_v4 = vrot.slane %v4420_v9, %v11259_v54 }
 0x3ba   : > { %8968 = vst.msk [vmem:[%s12303_s19 + $0x90] sm:$0xf] %vm3379_vm1, %v9821_v17  ;;  %8984 = vst.msk [vmem:[%s12303_s19 + $0xd0] sm:$0xf] %vm3379_vm1, %v9837_v19  ;;  %v4435_v13 = vrot.slane %v4421_v27, %v11259_v54  ;;  %v12908_v16 = vrot.slane %v7248_v29, %v11259_v54  ;;  %v12911_v46 = vrot.slane %v7249_v47, %v11259_v54 }
 0x3bb   : > { %v12914_v41 = vrot.slane %v7180_v33, %v11259_v54  ;;  %v12917_v14 = vrot.slane %v7181_v23, %v11259_v54  ;;  %v4504_v53 = vcombine.low %v12824_v55, %v4496_v18  ;;  %v4505_v25 = vcombine.high %v12824_v55, %v4496_v18 }
 0x3bc   : > { %v4520_v21 = vcombine.low %v12827_v59, %v4503_v52  ;;  %v4521_v10 = vcombine.high %v12827_v59, %v4503_v52  ;;  %v4436_v50 = vcombine.low %v12830_v39, %v4428_v4  ;;  %v4437_v28 = vcombine.high %v12830_v39, %v4428_v4  ;;  %v12939_v30 = vpop.permute.xlu1 %3694  ;;  %v12941_v3 = vpop.permute.xlu0 %3692 }
 0x3bd   : > { %v4452_v45 = vcombine.low %v12833_v24, %v4435_v13  ;;  %v4453_v43 = vcombine.high %v12833_v24, %v4435_v13  ;;  %v4512_v22 = vrot.slane %v4504_v53, %v11261_v56  ;;  %v4519_v12 = vrot.slane %v4505_v25, %v11261_v56 }
 0x3be   : > { %v4528_v7 = vrot.slane %v4520_v21, %v11261_v56  ;;  %v4535_v55 = vrot.slane %v4521_v10, %v11261_v56  ;;  %v4444_v11 = vrot.slane %v4436_v50, %v11261_v56  ;;  %v4451_v59 = vrot.slane %v4437_v28, %v11261_v56 }
 0x3bf   : > { %v4460_v37 = vrot.slane %v4452_v45, %v11261_v56  ;;  %v4467_v39 = vrot.slane %v4453_v43, %v11261_v56  ;;  %v5560_v1 = vcombine.low %v4512_v22, %v4519_v12  ;;  %v9464_v38 = vcombine.high %v4512_v22, %v4519_v12 }
 0x3c0   : > { %v5576_v51 = vcombine.low %v4528_v7, %v4535_v55  ;;  %v9465_v24 = vcombine.high %v4528_v7, %v4535_v55  ;;  %v5492_v26 = vcombine.low %v4444_v11, %v4451_v59  ;;  %v9462_v8 = vcombine.high %v4444_v11, %v4451_v59  ;;  %v12959_v7 = vpop.permute.xlu1 %6374  ;;  %v12961_v55 = vpop.permute.xlu0 %6372 }
 0x3c1   : > { %v5508_v0 = vcombine.low %v4460_v37, %v4467_v39  ;;  %v9463_v60 = vcombine.high %v4460_v37, %v4467_v39  ;;  %v5567_v17 = vrot.slane %v5560_v1, %v11259_v54  ;;  %v5575_v19 = vrot.slane %v9464_v38, %v11259_v54 }
 0x3c2   : > { %v5583_v58 = vrot.slane %v5576_v51, %v11259_v54  ;;  %v5591_v62 = vrot.slane %v9465_v24, %v11259_v54  ;;  %v5499_v9 = vrot.slane %v5492_v26, %v11259_v54  ;;  %v5507_v27 = vrot.slane %v9462_v8, %v11259_v54 }
 0x3c3   : > { %v5515_v29 = vrot.slane %v5508_v0, %v11259_v54  ;;  %v5523_v47 = vrot.slane %v9463_v60, %v11259_v54  ;;  %v5592_v33 = vcombine.low %v5567_v17, %v5575_v19  ;;  %v5593_v23 = vcombine.high %v5567_v17, %v5575_v19 }
 0x3c4   : > { %v5608_v18 = vcombine.low %v5583_v58, %v5591_v62  ;;  %v5609_v52 = vcombine.high %v5583_v58, %v5591_v62  ;;  %v5524_v4 = vcombine.low %v5499_v9, %v5507_v27  ;;  %v5525_v13 = vcombine.high %v5499_v9, %v5507_v27 }
 0x3c5   : > { %v5540_v53 = vcombine.low %v5515_v29, %v5523_v47  ;;  %v5541_v25 = vcombine.high %v5515_v29, %v5523_v47  ;;  %v5600_v21 = vrot.slane %v5592_v33, %v11261_v56  ;;  %v5607_v10 = vrot.slane %v5593_v23, %v11261_v56  ;;  %v12997_v23 = vpop.permute.xlu0 %6420 }
 0x3c6   : > { %v5616_v50 = vrot.slane %v5608_v18, %v11261_v56  ;;  %v5623_v28 = vrot.slane %v5609_v52, %v11261_v56  ;;  %v5532_v45 = vrot.slane %v5524_v4, %v11261_v56  ;;  %v5539_v43 = vrot.slane %v5525_v13, %v11261_v56 }
 0x3c7   : > { %v5548_v22 = vrot.slane %v5540_v53, %v11261_v56  ;;  %v5555_v12 = vrot.slane %v5541_v25, %v11261_v56  ;;  %v4336_v9 = vcombine.low %v11324_v40, %v12919_v44  ;;  %v4337_v27 = vcombine.high %v11324_v40, %v12919_v44 }
 0x3c8   : > { %v5624_v11 = vcombine.low %v5600_v21, %v5616_v50  ;;  %v5625_v59 = vcombine.high %v5600_v21, %v5616_v50  ;;  %v5626_v37 = vcombine.low %v5607_v10, %v5623_v28  ;;  %v5627_v39 = vcombine.high %v5607_v10, %v5623_v28 }
 0x3c9   : > { %v5556_v1 = vcombine.low %v5532_v45, %v5548_v22  ;;  %v5557_v38 = vcombine.high %v5532_v45, %v5548_v22  ;;  %v5558_v51 = vcombine.low %v5539_v43, %v5555_v12  ;;  %v5559_v24 = vcombine.high %v5539_v43, %v5555_v12 }
 0x3ca   : > { %v9732_v26 = vpack.c.bf16 %v5624_v11, %v5624_v11  ;;  %v9748_v8 = vpack.c.bf16 %v5625_v59, %v5625_v59  ;;  %v9764_v0 = vpack.c.bf16 %v5626_v37, %v5626_v37  ;;  %v9780_v60 = vpack.c.bf16 %v5627_v39, %v5627_v39 }
 0x3cb   : > { %v9731_v17 = vpack.c.bf16 %v5556_v1, %v5556_v1  ;;  %v9747_v19 = vpack.c.bf16 %v5557_v38, %v5557_v38  ;;  %v9763_v58 = vpack.c.bf16 %v5558_v51, %v5558_v51  ;;  %v9779_v62 = vpack.c.bf16 %v5559_v24, %v5559_v24 }
 0x3cc   : > { %6167 = vst.msk [vmem:[%s12188_s20 + $0x2c] sm:$0xf] %vm3379_vm1, %v9732_v26  ;;  %6183 = vst.msk [vmem:[%s12188_s20 + $0x6c] sm:$0xf] %vm3379_vm1, %v9748_v8  ;;  %v4268_v29 = vcombine.low %v11316_v36, %v12921_v61  ;;  %v4269_v47 = vcombine.high %v11316_v36, %v12921_v61  ;;  %v4352_v33 = vcombine.low %v12871_v49, %v12939_v30  ;;  %v12995_v61 = vpop.permute.xlu1 %6422 }
 0x3cd   : > { %6199 = vst.msk [vmem:[%s12188_s20 + $0xac] sm:$0xf] %vm3379_vm1, %v9764_v0  ;;  %6215 = vst.msk [vmem:[%s12188_s20 + $0xec] sm:$0xf] %vm3379_vm1, %v9780_v60  ;;  %v4353_v40 = vcombine.high %v12871_v49, %v12939_v30  ;;  %v4284_v44 = vcombine.low %v12873_v2, %v12941_v3  ;;  %v4285_v36 = vcombine.high %v12873_v2, %v12941_v3  ;;  %v13023_v0 = vpop.permute.xlu0 %6468 }
 0x3ce   : > { %6166 = vst.msk [vmem:[%s12188_s20 + $0x28] sm:$0xf] %vm3379_vm1, %v9731_v17  ;;  %6182 = vst.msk [vmem:[%s12188_s20 + $0x68] sm:$0xf] %vm3379_vm1, %v9747_v19  ;;  %v4344_v18 = vrot.slane %v4336_v9, %v11259_v54  ;;  %v4351_v52 = vrot.slane %v4337_v27, %v11259_v54  ;;  %v4276_v4 = vrot.slane %v4268_v29, %v11259_v54 }
 0x3cf   : > { %6198 = vst.msk [vmem:[%s12188_s20 + $0xa8] sm:$0xf] %vm3379_vm1, %v9763_v58  ;;  %6214 = vst.msk [vmem:[%s12188_s20 + $0xe8] sm:$0xf] %vm3379_vm1, %v9779_v62  ;;  %v4283_v13 = vrot.slane %v4269_v47, %v11259_v54  ;;  %v4360_v49 = vrot.slane %v4352_v33, %v11259_v54  ;;  %v4367_v30 = vrot.slane %v4353_v40, %v11259_v54 }
 0x3d0   : > { %v4292_v53 = vrot.slane %v4284_v44, %v11259_v54  ;;  %v4299_v2 = vrot.slane %v4285_v36, %v11259_v54  ;;  %v7112_v3 = vcombine.low %v11353_v63, %v12995_v61  ;;  %v7113_v25 = vcombine.high %v11353_v63, %v12995_v61 }
 0x3d1   : > { %v7044_v21 = vcombine.low %v11337_v31, %v12997_v23  ;;  %v7045_v10 = vcombine.high %v11337_v31, %v12997_v23  ;;  %v4368_v50 = vcombine.low %v4344_v18, %v4360_v49  ;;  %v4369_v28 = vcombine.high %v4344_v18, %v4360_v49 }
 0x3d2   : > { %v4384_v45 = vcombine.low %v4351_v52, %v4367_v30  ;;  %v4385_v43 = vcombine.high %v4351_v52, %v4367_v30  ;;  %v4300_v22 = vcombine.low %v4276_v4, %v4292_v53  ;;  %v4301_v12 = vcombine.high %v4276_v4, %v4292_v53 }
 0x3d3   : > { %v4316_v11 = vcombine.low %v4283_v13, %v4299_v2  ;;  %v4317_v59 = vcombine.high %v4283_v13, %v4299_v2  ;;  %v4376_v37 = vrot.slane %v4368_v50, %v11261_v56  ;;  %v4383_v39 = vrot.slane %v4369_v28, %v11261_v56 }
 0x3d4   : > { %v4392_v1 = vrot.slane %v4384_v45, %v11261_v56  ;;  %v4399_v38 = vrot.slane %v4385_v43, %v11261_v56  ;;  %v4308_v51 = vrot.slane %v4300_v22, %v11261_v56  ;;  %v4315_v24 = vrot.slane %v4301_v12, %v11261_v56  ;;  %v13036_v43 = vpop.permute.xlu1 %6470  ;;  %v13038_v22 = vpop.permute.xlu0 %3608 }
 0x3d5   : > { %v4324_v26 = vrot.slane %v4316_v11, %v11261_v56  ;;  %v4331_v8 = vrot.slane %v4317_v59, %v11261_v56  ;;  %v5424_v60 = vcombine.low %v4376_v37, %v4383_v39  ;;  %v9460_v17 = vcombine.high %v4376_v37, %v4383_v39 }
 0x3d6   : > { %v5440_v19 = vcombine.low %v4392_v1, %v4399_v38  ;;  %v9461_v58 = vcombine.high %v4392_v1, %v4399_v38  ;;  %v5356_v62 = vcombine.low %v4308_v51, %v4315_v24  ;;  %v9458_v9 = vcombine.high %v4308_v51, %v4315_v24 }
 0x3d7   : > { %v5372_v27 = vcombine.low %v4324_v26, %v4331_v8  ;;  %v9459_v29 = vcombine.high %v4324_v26, %v4331_v8  ;;  %v5431_v47 = vrot.slane %v5424_v60, %v11259_v54  ;;  %v5439_v33 = vrot.slane %v9460_v17, %v11259_v54 }
 0x3d8   : > { %v5447_v40 = vrot.slane %v5440_v19, %v11259_v54  ;;  %v5455_v44 = vrot.slane %v9461_v58, %v11259_v54  ;;  %v5363_v36 = vrot.slane %v5356_v62, %v11259_v54  ;;  %v5371_v18 = vrot.slane %v9458_v9, %v11259_v54 }
 0x3d9   : > { %v5379_v52 = vrot.slane %v5372_v27, %v11259_v54  ;;  %v5387_v4 = vrot.slane %v9459_v29, %v11259_v54  ;;  %v5456_v13 = vcombine.low %v5431_v47, %v5439_v33  ;;  %v5457_v49 = vcombine.high %v5431_v47, %v5439_v33 }
 0x3da   : > { %v5472_v30 = vcombine.low %v5447_v40, %v5455_v44  ;;  %v5473_v53 = vcombine.high %v5447_v40, %v5455_v44  ;;  %v5388_v2 = vcombine.low %v5363_v36, %v5371_v18  ;;  %v5389_v50 = vcombine.high %v5363_v36, %v5371_v18 }
 0x3db   : > { %v5404_v28 = vcombine.low %v5379_v52, %v5387_v4  ;;  %v5405_v45 = vcombine.high %v5379_v52, %v5387_v4  ;;  %v5464_v12 = vrot.slane %v5456_v13, %v11261_v56  ;;  %v5471_v11 = vrot.slane %v5457_v49, %v11261_v56 }
 0x3dc   : > { %v5480_v59 = vrot.slane %v5472_v30, %v11261_v56  ;;  %v5487_v37 = vrot.slane %v5473_v53, %v11261_v56  ;;  %v5396_v39 = vrot.slane %v5388_v2, %v11261_v56  ;;  %v5403_v1 = vrot.slane %v5389_v50, %v11261_v56 }
 0x3dd   : > { %v5412_v38 = vrot.slane %v5404_v28, %v11261_v56  ;;  %v5419_v51 = vrot.slane %v5405_v45, %v11261_v56 }
 0x3de   : > { %10385 = shalt.err (!%p10382_p12)
}
 0x3df   : > { %s10386_s16 = scalar_lea.hbm %s13044_s10, 4096  ;;  %s10390_s23 = scalar_lea.hbm %s13719_s27, 8192 }
 0x3e0   : > { %p10387_p0 = scmp.ne.s32.totalorder %s13044_s10, %s10386_s16  ;;  %p10391_p13 = scmp.lt.u32.totalorder %s13044_s10, %s13719_s27 }
 0x3e1   : > { %p10392_p2 = scmp.lt.u32.totalorder %s10390_s23, %s10386_s16  ;;  %p10394_p6 = scmp.lt.u32.totalorder %s10386_s16, %s13044_s10 }
 0x3e2   : > { %p10388_p5 = pnand %p10387_p0, %p13720_p4 }
 0x3e3   : > { %p10393_p8 = por %p10392_p2, %p10391_p13 }
 0x3e4   : > { %p10389_p7 = pneg %p10388_p5 }
 0x3e5   : > { %p10395_p1 = por %p10394_p6, %p10393_p8 }
 0x3e7   : > { %p10396_p3 = pnand %p10395_p1, %p10389_p7 }
 0x3e9   : > { %10399 = shalt.err (!%p10396_p3)
}
 0x3ea   : > { %s13671_s26 = smov 64   ;;  %s10549_s30 = smov 4   ;;  %v5488_v24 = vcombine.low %v5464_v12, %v5480_v59  ;;  %v5489_v26 = vcombine.high %v5464_v12, %v5480_v59  ;;  %v5490_v8 = vcombine.low %v5471_v11, %v5487_v37  ;;  %v5491_v60 = vcombine.high %v5471_v11, %v5487_v37  ;;  %v6475_v18 = vpop.permute.xlu1 %6474  ;;  %v3657_v52 = vpop.permute.xlu0 %3656 }
 0x3eb   : > { %s13721_s0 = scalar_lea.sflag [#allocation4], %s10914_s12  ;;  %v5420_v17 = vcombine.low %v5396_v39, %v5412_v38  ;;  %v5421_v19 = vcombine.high %v5396_v39, %v5412_v38  ;;  %v5422_v58 = vcombine.low %v5403_v1, %v5419_v51  ;;  %v5423_v62 = vcombine.high %v5403_v1, %v5419_v51  ;;  %s9001_s1 = sand.u32 1, %s10638_s21  }
 0x3ec   : > { %10031 = dma.vmem_to_hbm [thread:$0]  (%p13720_p4), %s13051_s9, 4096, %s13044_s10, %s13721_s0, %s13671_s26, %s13671_s26, %s10549_s30   ;;  %v9730_v9 = vpack.c.bf16 %v5488_v24, %v5488_v24  ;;  %v9746_v27 = vpack.c.bf16 %v5489_v26, %v5489_v26  ;;  %v9762_v29 = vpack.c.bf16 %v5490_v8, %v5490_v8  ;;  %v9778_v47 = vpack.c.bf16 %v5491_v60, %v5491_v60 }
 0x3ed   : > { %v9729_v33 = vpack.c.bf16 %v5420_v17, %v5420_v17  ;;  %v9745_v40 = vpack.c.bf16 %v5421_v19, %v5421_v19  ;;  %v9761_v44 = vpack.c.bf16 %v5422_v58, %v5422_v58  ;;  %v9777_v36 = vpack.c.bf16 %v5423_v62, %v5423_v62  ;;  %s9040_s12 = sshll.u32 %s12188_s20, 4  ;;  %s13722_s11 = sld [smem:[#allocation38_spill]]  ;;  %s13410_s12 = int_to_ptr.vmem [resolvable:$true] %s9040_s12 }
 0x3ee   : > { %6165 = vst.msk [vmem:[%s12188_s20 + $0x24] sm:$0xf] %vm3379_vm1, %v9730_v9  ;;  %6181 = vst.msk [vmem:[%s12188_s20 + $0x64] sm:$0xf] %vm3379_vm1, %v9746_v27  ;;  %v7120_v4 = vrot.slane %v7112_v3, %v11259_v54  ;;  %v7127_v13 = vrot.slane %v7113_v25, %v11259_v54  ;;  %v7052_v49 = vrot.slane %v7044_v21, %v11259_v54  ;;  %v13148_v26 = vpop.permute.xlu1 %3610  ;;  %s13430_s23 = scalar_lea.sflag [#allocation18], %s9001_s1  ;;  %s10400_s22 = scalar_lea.vmem %s13410_s12, 4096 }
 0x3ef   : > { %6197 = vst.msk [vmem:[%s12188_s20 + $0xa4] sm:$0xf] %vm3379_vm1, %v9762_v29  ;;  %6213 = vst.msk [vmem:[%s12188_s20 + $0xe4] sm:$0xf] %vm3379_vm1, %v9778_v47  ;;  %v7059_v30 = vrot.slane %v7045_v10, %v11259_v54  ;;  %v7128_v63 = vcombine.low %v12959_v7, %v13036_v43  ;;  %v7129_v61 = vcombine.high %v12959_v7, %v13036_v43  ;;  %p10401_p11 = scmp.ne.s32.totalorder %s13410_s12, %s10400_s22 }
 0x3f0   : > { %6164 = vst.msk [vmem:[%s12188_s20 + $0x20] sm:$0xf] %vm3379_vm1, %v9729_v33  ;;  %6180 = vst.msk [vmem:[%s12188_s20 + $0x60] sm:$0xf] %vm3379_vm1, %v9745_v40  ;;  %v7060_v3 = vcombine.low %v12961_v55, %v13023_v0  ;;  %v7061_v31 = vcombine.high %v12961_v55, %v13023_v0  ;;  %v7264_v23 = vcombine.low %v12843_v6, %v6475_v18 }
 0x3f1   : > { %6196 = vst.msk [vmem:[%s12188_s20 + $0xa0] sm:$0xf] %vm3379_vm1, %v9761_v44  ;;  %6212 = vst.msk [vmem:[%s12188_s20 + $0xe0] sm:$0xf] %vm3379_vm1, %v9777_v36  ;;  %v7265_v25 = vcombine.high %v12843_v6, %v6475_v18  ;;  %v4676_v21 = vcombine.low %v12225_v35, %v3657_v52  ;;  %v4677_v10 = vcombine.high %v12225_v35, %v3657_v52  ;;  %p10402_p9 = pnand %p10401_p11, %p13720_p4 }
 0x3f2   : > { %v7136_v53 = vrot.slane %v7128_v63, %v11259_v54  ;;  %v7143_v2 = vrot.slane %v7129_v61, %v11259_v54  ;;  %v7068_v7 = vrot.slane %v7060_v3, %v11259_v54  ;;  %v7075_v50 = vrot.slane %v7061_v31, %v11259_v54  ;;  %v3705_v63 = vpop.permute.xlu0 %3704 }
 0x3f3   : > { %v13133_v28 = vrot.slane %v7264_v23, %v11259_v54  ;;  %v13136_v55 = vrot.slane %v7265_v25, %v11259_v54  ;;  %v13139_v6 = vrot.slane %v4676_v21, %v11259_v54  ;;  %v13142_v0 = vrot.slane %v4677_v10, %v11259_v54  ;;  %v3659_v25 = vpop.permute.xlu1 %3658  ;;  %s13408_s16 = scalar_lea.hbm %s13722_s11, %s13030_s29  ;;  %p10403_p10 = pneg %p10402_p9 }
 0x3f4   : > { %v7144_v35 = vcombine.low %v7120_v4, %v7136_v53  ;;  %v7145_v45 = vcombine.high %v7120_v4, %v7136_v53  ;;  %v7160_v43 = vcombine.low %v7127_v13, %v7143_v2  ;;  %v7161_v12 = vcombine.high %v7127_v13, %v7143_v2 }
 0x3f5   : > { %v7076_v11 = vcombine.low %v7052_v49, %v7068_v7  ;;  %v7077_v59 = vcombine.high %v7052_v49, %v7068_v7  ;;  %v7092_v37 = vcombine.low %v7059_v30, %v7075_v50  ;;  %v7093_v39 = vcombine.high %v7059_v30, %v7075_v50 }
 0x3f6   : > { %v7152_v1 = vrot.slane %v7144_v35, %v11261_v56  ;;  %v7159_v38 = vrot.slane %v7145_v45, %v11261_v56  ;;  %v7168_v51 = vrot.slane %v7160_v43, %v11261_v56  ;;  %v7175_v24 = vrot.slane %v7161_v12, %v11261_v56 }
 0x3f7   : > { %v7084_v8 = vrot.slane %v7076_v11, %v11261_v56  ;;  %v7091_v60 = vrot.slane %v7077_v59, %v11261_v56  ;;  %v7100_v17 = vrot.slane %v7092_v37, %v11261_v56  ;;  %v7107_v19 = vrot.slane %v7093_v39, %v11261_v56 }
 0x3f8   : > { %v8200_v58 = vcombine.low %v7152_v1, %v7159_v38  ;;  %v9567_v62 = vcombine.high %v7152_v1, %v7159_v38  ;;  %v8216_v9 = vcombine.low %v7168_v51, %v7175_v24  ;;  %v9568_v27 = vcombine.high %v7168_v51, %v7175_v24 }
 0x3f9   : > { %v8132_v29 = vcombine.low %v7084_v8, %v7091_v60  ;;  %v9565_v47 = vcombine.high %v7084_v8, %v7091_v60  ;;  %v8148_v33 = vcombine.low %v7100_v17, %v7107_v19  ;;  %v9566_v40 = vcombine.high %v7100_v17, %v7107_v19  ;;  %v13170_v17 = vpop.permute.xlu0 %6384 }
 0x3fa   : > { %v8207_v44 = vrot.slane %v8200_v58, %v11259_v54  ;;  %v8215_v36 = vrot.slane %v9567_v62, %v11259_v54  ;;  %v8223_v18 = vrot.slane %v8216_v9, %v11259_v54  ;;  %v8231_v52 = vrot.slane %v9568_v27, %v11259_v54  ;;  %v13172_v27 = vpop.permute.xlu1 %3706 }
 0x3fb   : > { %v8139_v4 = vrot.slane %v8132_v29, %v11259_v54  ;;  %v8147_v13 = vrot.slane %v9565_v47, %v11259_v54  ;;  %v8155_v49 = vrot.slane %v8148_v33, %v11259_v54  ;;  %v8163_v30 = vrot.slane %v9566_v40, %v11259_v54 }
 0x3fc   : > { %v8232_v61 = vcombine.low %v8207_v44, %v8215_v36  ;;  %v8233_v3 = vcombine.high %v8207_v44, %v8215_v36  ;;  %v8248_v31 = vcombine.low %v8223_v18, %v8231_v52  ;;  %v8249_v23 = vcombine.high %v8223_v18, %v8231_v52 }
 0x3fd   : > { %v8164_v21 = vcombine.low %v8139_v4, %v8147_v13  ;;  %v8165_v10 = vcombine.high %v8139_v4, %v8147_v13  ;;  %v8180_v53 = vcombine.low %v8155_v49, %v8163_v30  ;;  %v8181_v2 = vcombine.high %v8155_v49, %v8163_v30 }
 0x3fe   : > { %v8240_v7 = vrot.slane %v8232_v61, %v11261_v56  ;;  %v8247_v50 = vrot.slane %v8233_v3, %v11261_v56  ;;  %v8256_v35 = vrot.slane %v8248_v31, %v11261_v56  ;;  %v8263_v45 = vrot.slane %v8249_v23, %v11261_v56  ;;  %v13214_v23 = vpop.permute.xlu0 %6432 }
 0x3ff   : > { %v8172_v43 = vrot.slane %v8164_v21, %v11261_v56  ;;  %v8179_v12 = vrot.slane %v8165_v10, %v11261_v56  ;;  %v8188_v11 = vrot.slane %v8180_v53, %v11261_v56  ;;  %v8195_v59 = vrot.slane %v8181_v2, %v11261_v56  ;;  %v13216_v10 = vpop.permute.xlu1 %6386 }
 0x400   : > { %v8264_v37 = vcombine.low %v8240_v7, %v8256_v35  ;;  %v8265_v39 = vcombine.high %v8240_v7, %v8256_v35  ;;  %v8266_v1 = vcombine.low %v8247_v50, %v8263_v45  ;;  %v8267_v38 = vcombine.high %v8247_v50, %v8263_v45 }
 0x401   : > { %v8196_v51 = vcombine.low %v8172_v43, %v8188_v11  ;;  %v8197_v24 = vcombine.high %v8172_v43, %v8188_v11  ;;  %v8198_v8 = vcombine.low %v8179_v12, %v8195_v59  ;;  %v8199_v60 = vcombine.high %v8179_v12, %v8195_v59 }
 0x402   : > { %v9794_v19 = vpack.c.bf16 %v8264_v37, %v8264_v37  ;;  %v9810_v58 = vpack.c.bf16 %v8265_v39, %v8265_v39  ;;  %v9826_v62 = vpack.c.bf16 %v8266_v1, %v8266_v1  ;;  %v9842_v9 = vpack.c.bf16 %v8267_v38, %v8267_v38 }
 0x403   : > { %v9793_v29 = vpack.c.bf16 %v8196_v51, %v8196_v51  ;;  %v9809_v47 = vpack.c.bf16 %v8197_v24, %v8197_v24  ;;  %v9825_v33 = vpack.c.bf16 %v8198_v8, %v8198_v8  ;;  %v9841_v40 = vpack.c.bf16 %v8199_v60, %v8199_v60 }
 0x404   : > { %8941 = vst.msk [vmem:[%s12303_s19 + $0x24] sm:$0xf] %vm3379_vm1, %v9794_v19  ;;  %8957 = vst.msk [vmem:[%s12303_s19 + $0x64] sm:$0xf] %vm3379_vm1, %v9810_v58  ;;  %v7280_v44 = vcombine.low %v12908_v16, %v13133_v28  ;;  %v7281_v36 = vcombine.high %v12908_v16, %v13133_v28  ;;  %v7296_v18 = vcombine.low %v12911_v46, %v13136_v55  ;;  %v13230_v19 = vpop.permute.xlu0 %3604 }
 0x405   : > { %8973 = vst.msk [vmem:[%s12303_s19 + $0xa4] sm:$0xf] %vm3379_vm1, %v9826_v62  ;;  %8989 = vst.msk [vmem:[%s12303_s19 + $0xe4] sm:$0xf] %vm3379_vm1, %v9842_v9  ;;  %v7297_v52 = vcombine.high %v12911_v46, %v13136_v55  ;;  %v4744_v4 = vcombine.low %v12241_v32, %v3659_v25  ;;  %v4745_v13 = vcombine.high %v12241_v32, %v3659_v25 }
 0x406   : > { %8940 = vst.msk [vmem:[%s12303_s19 + $0x20] sm:$0xf] %vm3379_vm1, %v9793_v29  ;;  %8956 = vst.msk [vmem:[%s12303_s19 + $0x60] sm:$0xf] %vm3379_vm1, %v9809_v47  ;;  %v4692_v16 = vcombine.low %v13038_v22, %v3705_v63  ;;  %v4693_v28 = vcombine.high %v13038_v22, %v3705_v63  ;;  %v7288_v49 = vrot.slane %v7280_v44, %v11261_v56  ;;  %v13236_v47 = vpop.permute.xlu1 %6434 }
 0x407   : > { %8972 = vst.msk [vmem:[%s12303_s19 + $0xa0] sm:$0xf] %vm3379_vm1, %v9825_v33  ;;  %8988 = vst.msk [vmem:[%s12303_s19 + $0xe0] sm:$0xf] %vm3379_vm1, %v9841_v40  ;;  %v7295_v46 = vrot.slane %v7281_v36, %v11261_v56  ;;  %v7304_v55 = vrot.slane %v7296_v18, %v11261_v56  ;;  %v7311_v30 = vrot.slane %v7297_v52, %v11261_v56 }
 0x408   : > { %v13207_v61 = vrot.slane %v4744_v4, %v11259_v54  ;;  %v13210_v3 = vrot.slane %v4745_v13, %v11259_v54  ;;  %v4700_v32 = vrot.slane %v4692_v16, %v11259_v54  ;;  %v4707_v31 = vrot.slane %v4693_v28, %v11259_v54 }
 0x409   : > { %v8336_v22 = vcombine.low %v7288_v49, %v7295_v46  ;;  %v9571_v63 = vcombine.high %v7288_v49, %v7295_v46  ;;  %v8352_v25 = vcombine.low %v7304_v55, %v7311_v30  ;;  %v9572_v21 = vcombine.high %v7304_v55, %v7311_v30 }
 0x40a   : > { %v4708_v53 = vcombine.low %v13139_v6, %v4700_v32  ;;  %v4709_v2 = vcombine.high %v13139_v6, %v4700_v32  ;;  %v4724_v7 = vcombine.low %v13142_v0, %v4707_v31  ;;  %v4725_v50 = vcombine.high %v13142_v0, %v4707_v31 }
 0x40b   : > { %v8343_v35 = vrot.slane %v8336_v22, %v11259_v54  ;;  %v8351_v45 = vrot.slane %v9571_v63, %v11259_v54  ;;  %v8359_v43 = vrot.slane %v8352_v25, %v11259_v54  ;;  %v8367_v12 = vrot.slane %v9572_v21, %v11259_v54 }
 0x40c   : > { %v4716_v11 = vrot.slane %v4708_v53, %v11261_v56  ;;  %v4723_v59 = vrot.slane %v4709_v2, %v11261_v56  ;;  %v4732_v37 = vrot.slane %v4724_v7, %v11261_v56  ;;  %v4739_v6 = vrot.slane %v4725_v50, %v11261_v56  ;;  %v3653_v53 = vpop.permute.xlu0 %3652 }
 0x40d   : > { %v8368_v39 = vcombine.low %v8343_v35, %v8351_v45  ;;  %v8369_v1 = vcombine.high %v8343_v35, %v8351_v45  ;;  %v8384_v38 = vcombine.low %v8359_v43, %v8367_v12  ;;  %v8385_v0 = vcombine.high %v8359_v43, %v8367_v12  ;;  %v13262_v45 = vpop.permute.xlu1 %3606 }
 0x40e   : > { %v5764_v51 = vcombine.low %v4716_v11, %v4723_v59  ;;  %v9470_v24 = vcombine.high %v4716_v11, %v4723_v59  ;;  %v5780_v8 = vcombine.low %v4732_v37, %v4739_v6  ;;  %v9471_v60 = vcombine.high %v4732_v37, %v4739_v6 }
 0x40f   : > { %v8376_v58 = vrot.slane %v8368_v39, %v11261_v56  ;;  %v8383_v62 = vrot.slane %v8369_v1, %v11261_v56  ;;  %v8392_v9 = vrot.slane %v8384_v38, %v11261_v56  ;;  %v8399_v29 = vrot.slane %v8385_v0, %v11261_v56 }
 0x410   : > { %v5771_v33 = vrot.slane %v5764_v51, %v11259_v54  ;;  %v5779_v40 = vrot.slane %v9470_v24, %v11259_v54  ;;  %v5787_v44 = vrot.slane %v5780_v8, %v11259_v54  ;;  %v5795_v36 = vrot.slane %v9471_v60, %v11259_v54 }
 0x411   : > { %v8400_v18 = vcombine.low %v8376_v58, %v8392_v9  ;;  %v8401_v52 = vcombine.high %v8376_v58, %v8392_v9  ;;  %v8402_v4 = vcombine.low %v8383_v62, %v8399_v29  ;;  %v8403_v13 = vcombine.high %v8383_v62, %v8399_v29  ;;  %v3701_v62 = vpop.permute.xlu0 %3700 }
 0x412   : > { %v5796_v16 = vcombine.low %v5771_v33, %v5779_v40  ;;  %v5797_v28 = vcombine.high %v5771_v33, %v5779_v40  ;;  %v5812_v49 = vcombine.low %v5787_v44, %v5795_v36  ;;  %v5813_v46 = vcombine.high %v5787_v44, %v5795_v36  ;;  %v3655_v40 = vpop.permute.xlu1 %3654 }
 0x413   : > { %v9796_v55 = vpack.c.bf16 %v8400_v18, %v8400_v18  ;;  %v9812_v30 = vpack.c.bf16 %v8401_v52, %v8401_v52  ;;  %v9828_v32 = vpack.c.bf16 %v8402_v4, %v8402_v4  ;;  %v9844_v31 = vpack.c.bf16 %v8403_v13, %v8403_v13 }
 0x414   : > { %v5804_v22 = vrot.slane %v5796_v16, %v11261_v56  ;;  %v5811_v63 = vrot.slane %v5797_v28, %v11261_v56  ;;  %v5820_v25 = vrot.slane %v5812_v49, %v11261_v56  ;;  %v5827_v21 = vrot.slane %v5813_v46, %v11261_v56 }
 0x415   : > { %8943 = vst.msk [vmem:[%s12303_s19 + $0x2c] sm:$0xf] %vm3379_vm1, %v9796_v55  ;;  %8959 = vst.msk [vmem:[%s12303_s19 + $0x6c] sm:$0xf] %vm3379_vm1, %v9812_v30  ;;  %v4760_v2 = vcombine.low %v13148_v26, %v13172_v27  ;;  %v4761_v7 = vcombine.high %v13148_v26, %v13172_v27  ;;  %v7452_v50 = vcombine.low %v12340_v57, %v13214_v23 }
 0x416   : > { %8975 = vst.msk [vmem:[%s12303_s19 + $0xac] sm:$0xf] %vm3379_vm1, %v9828_v32  ;;  %8991 = vst.msk [vmem:[%s12303_s19 + $0xec] sm:$0xf] %vm3379_vm1, %v9844_v31  ;;  %v7453_v35 = vcombine.high %v12340_v57, %v13214_v23  ;;  %v5828_v43 = vcombine.low %v5804_v22, %v5820_v25  ;;  %v5829_v12 = vcombine.high %v5804_v22, %v5820_v25  ;;  %v13318_v25 = vpop.permute.xlu0 %6380 }
 0x417   : > { %v5830_v11 = vcombine.low %v5811_v63, %v5827_v21  ;;  %v5831_v59 = vcombine.high %v5811_v63, %v5827_v21  ;;  %v4768_v37 = vrot.slane %v4760_v2, %v11259_v54  ;;  %v4775_v26 = vrot.slane %v4761_v7, %v11259_v54 }
 0x418   : > { %v13267_v27 = vrot.slane %v7452_v50, %v11259_v54  ;;  %v13270_v6 = vrot.slane %v7453_v35, %v11259_v54  ;;  %v9735_v57 = vpack.c.bf16 %v5828_v43, %v5828_v43  ;;  %v9751_v23 = vpack.c.bf16 %v5829_v12, %v5829_v12 }
 0x419   : > { %v9767_v39 = vpack.c.bf16 %v5830_v11, %v5830_v11  ;;  %v9783_v1 = vpack.c.bf16 %v5831_v59, %v5831_v59  ;;  %v4776_v38 = vcombine.low %v13207_v61, %v4768_v37  ;;  %v4777_v0 = vcombine.high %v13207_v61, %v4768_v37 }
 0x41a   : > { %v4792_v51 = vcombine.low %v13210_v3, %v4775_v26  ;;  %v4793_v24 = vcombine.high %v13210_v3, %v4775_v26  ;;  %6170 = vst.msk [vmem:[%s12188_s20 + $0x38] sm:$0xf] %vm3379_vm1, %v9735_v57  ;;  %6186 = vst.msk [vmem:[%s12188_s20 + $0x78] sm:$0xf] %vm3379_vm1, %v9751_v23  ;;  %v7520_v8 = vcombine.low %v12356_v42, %v13236_v47  ;;  %v3703_v26 = vpop.permute.xlu1 %3702 }
 0x41b   : > { %6202 = vst.msk [vmem:[%s12188_s20 + $0xb8] sm:$0xf] %vm3379_vm1, %v9767_v39  ;;  %6218 = vst.msk [vmem:[%s12188_s20 + $0xf8] sm:$0xf] %vm3379_vm1, %v9783_v1  ;;  %v7521_v60 = vcombine.high %v12356_v42, %v13236_v47  ;;  %v4540_v61 = vcombine.low %v12238_v48, %v3653_v53  ;;  %v4541_v58 = vcombine.high %v12238_v48, %v3653_v53 }
 0x41c   : > { %v4784_v3 = vrot.slane %v4776_v38, %v11261_v56  ;;  %v4791_v9 = vrot.slane %v4777_v0, %v11261_v56  ;;  %v4800_v29 = vrot.slane %v4792_v51, %v11261_v56  ;;  %v4807_v33 = vrot.slane %v4793_v24, %v11261_v56 }
 0x41d   : > { %v13295_v44 = vrot.slane %v7520_v8, %v11259_v54  ;;  %v13298_v36 = vrot.slane %v7521_v60, %v11259_v54  ;;  %v4548_v42 = vrot.slane %v4540_v61, %v11259_v54  ;;  %v4555_v48 = vrot.slane %v4541_v58, %v11259_v54 }
 0x41e   : > { %v5832_v47 = vcombine.low %v4784_v3, %v4791_v9  ;;  %v9472_v18 = vcombine.high %v4784_v3, %v4791_v9  ;;  %v5848_v52 = vcombine.low %v4800_v29, %v4807_v33  ;;  %v9473_v4 = vcombine.high %v4800_v29, %v4807_v33 }
 0x41f   : > { %v4608_v13 = vcombine.low %v12244_v15, %v3655_v40  ;;  %v4609_v16 = vcombine.high %v12244_v15, %v3655_v40  ;;  %v4556_v28 = vcombine.low %v13230_v19, %v3701_v62  ;;  %v4557_v49 = vcombine.high %v13230_v19, %v3701_v62  ;;  %v6429_v62 = vpop.permute.xlu0 %6428 }
 0x420   : > { %v5839_v46 = vrot.slane %v5832_v47, %v11259_v54  ;;  %v5847_v55 = vrot.slane %v9472_v18, %v11259_v54  ;;  %v5855_v30 = vrot.slane %v5848_v52, %v11259_v54  ;;  %v5863_v32 = vrot.slane %v9473_v4, %v11259_v54  ;;  %v13342_v4 = vpop.permute.xlu1 %6382 }
 0x421   : > { %v13311_v31 = vrot.slane %v4608_v13, %v11259_v54  ;;  %v13314_v22 = vrot.slane %v4609_v16, %v11259_v54  ;;  %v4564_v15 = vrot.slane %v4556_v28, %v11259_v54  ;;  %v4571_v63 = vrot.slane %v4557_v49, %v11259_v54 }
 0x422   : > { %v5864_v19 = vcombine.low %v5839_v46, %v5847_v55  ;;  %v5865_v21 = vcombine.high %v5839_v46, %v5847_v55  ;;  %v5880_v53 = vcombine.low %v5855_v30, %v5863_v32  ;;  %v5881_v2 = vcombine.high %v5855_v30, %v5863_v32 }
 0x423   : > { %v4572_v7 = vcombine.low %v4548_v42, %v4564_v15  ;;  %v4573_v50 = vcombine.high %v4548_v42, %v4564_v15  ;;  %v4588_v35 = vcombine.low %v4555_v48, %v4571_v63  ;;  %v4589_v43 = vcombine.high %v4555_v48, %v4571_v63 }
 0x424   : > { %v5872_v12 = vrot.slane %v5864_v19, %v11261_v56  ;;  %v5879_v11 = vrot.slane %v5865_v21, %v11261_v56  ;;  %v5888_v59 = vrot.slane %v5880_v53, %v11261_v56  ;;  %v5895_v37 = vrot.slane %v5881_v2, %v11261_v56 }
 0x425   : > { %v4580_v57 = vrot.slane %v4572_v7, %v11261_v56  ;;  %v4587_v23 = vrot.slane %v4573_v50, %v11261_v56  ;;  %v4596_v39 = vrot.slane %v4588_v35, %v11261_v56  ;;  %v4603_v1 = vrot.slane %v4589_v43, %v11261_v56 }
 0x426   : > { %v5896_v38 = vcombine.low %v5872_v12, %v5888_v59  ;;  %v5897_v0 = vcombine.high %v5872_v12, %v5888_v59  ;;  %v5898_v51 = vcombine.low %v5879_v11, %v5895_v37  ;;  %v5899_v24 = vcombine.high %v5879_v11, %v5895_v37 }
 0x427   : > { %v5628_v8 = vcombine.low %v4580_v57, %v4587_v23  ;;  %v9466_v60 = vcombine.high %v4580_v57, %v4587_v23  ;;  %v5644_v61 = vcombine.low %v4596_v39, %v4603_v1  ;;  %v9467_v58 = vcombine.high %v4596_v39, %v4603_v1  ;;  %v6431_v57 = vpop.permute.xlu1 %6430  ;;  %v6473_v23 = vpop.permute.xlu0 %6472 }
 0x428   : > { %v9736_v3 = vpack.c.bf16 %v5896_v38, %v5896_v38  ;;  %v9752_v9 = vpack.c.bf16 %v5897_v0, %v5897_v0  ;;  %v9768_v29 = vpack.c.bf16 %v5898_v51, %v5898_v51  ;;  %v9784_v33 = vpack.c.bf16 %v5899_v24, %v5899_v24 }
 0x429   : > { %v5635_v40 = vrot.slane %v5628_v8, %v11259_v54  ;;  %v5643_v42 = vrot.slane %v9466_v60, %v11259_v54  ;;  %v5651_v48 = vrot.slane %v5644_v61, %v11259_v54  ;;  %v5659_v47 = vrot.slane %v9467_v58, %v11259_v54 }
 0x42a   : > { %6171 = vst.msk [vmem:[%s12188_s20 + $0x3c] sm:$0xf] %vm3379_vm1, %v9736_v3  ;;  %6187 = vst.msk [vmem:[%s12188_s20 + $0x7c] sm:$0xf] %vm3379_vm1, %v9752_v9  ;;  %v4624_v18 = vcombine.low %v13262_v45, %v3703_v26  ;;  %v4625_v52 = vcombine.high %v13262_v45, %v3703_v26  ;;  %v7316_v13 = vcombine.low %v12353_v20, %v6429_v62 }
 0x42b   : > { %6203 = vst.msk [vmem:[%s12188_s20 + $0xbc] sm:$0xf] %vm3379_vm1, %v9768_v29  ;;  %6219 = vst.msk [vmem:[%s12188_s20 + $0xfc] sm:$0xf] %vm3379_vm1, %v9784_v33  ;;  %v7317_v16 = vcombine.high %v12353_v20, %v6429_v62  ;;  %v5660_v28 = vcombine.low %v5635_v40, %v5643_v42  ;;  %v5661_v49 = vcombine.high %v5635_v40, %v5643_v42 }
 0x42c   : > { %v5676_v46 = vcombine.low %v5651_v48, %v5659_v47  ;;  %v5677_v55 = vcombine.high %v5651_v48, %v5659_v47  ;;  %v4632_v30 = vrot.slane %v4624_v18, %v11259_v54  ;;  %v4639_v32 = vrot.slane %v4625_v52, %v11259_v54 }
 0x42d   : > { %v13349_v15 = vrot.slane %v7316_v13, %v11259_v54  ;;  %v13352_v63 = vrot.slane %v7317_v16, %v11259_v54  ;;  %v5668_v45 = vrot.slane %v5660_v28, %v11261_v56  ;;  %v5675_v19 = vrot.slane %v5661_v49, %v11261_v56 }
 0x42e   : > { %v5684_v20 = vrot.slane %v5676_v46, %v11261_v56  ;;  %v5691_v21 = vrot.slane %v5677_v55, %v11261_v56  ;;  %v4640_v53 = vcombine.low %v13311_v31, %v4632_v30  ;;  %v4641_v2 = vcombine.high %v13311_v31, %v4632_v30 }
 0x42f   : > { %v4656_v7 = vcombine.low %v13314_v22, %v4639_v32  ;;  %v4657_v50 = vcombine.high %v13314_v22, %v4639_v32  ;;  %v7384_v60 = vcombine.low %v12359_v34, %v6431_v57  ;;  %v7385_v61 = vcombine.high %v12359_v34, %v6431_v57 }
 0x430   : > { %v5692_v35 = vcombine.low %v5668_v45, %v5684_v20  ;;  %v5693_v43 = vcombine.high %v5668_v45, %v5684_v20  ;;  %v5694_v12 = vcombine.low %v5675_v19, %v5691_v21  ;;  %v5695_v11 = vcombine.high %v5675_v19, %v5691_v21 }
 0x431   : > { %v4648_v59 = vrot.slane %v4640_v53, %v11261_v56  ;;  %v4655_v37 = vrot.slane %v4641_v2, %v11261_v56  ;;  %v4664_v26 = vrot.slane %v4656_v7, %v11261_v56  ;;  %v4671_v31 = vrot.slane %v4657_v50, %v11261_v56 }
 0x432   : > { %v9733_v39 = vpack.c.bf16 %v5692_v35, %v5692_v35  ;;  %v9749_v22 = vpack.c.bf16 %v5693_v43, %v5693_v43  ;;  %v9765_v1 = vpack.c.bf16 %v5694_v12, %v5694_v12  ;;  %v9781_v38 = vpack.c.bf16 %v5695_v11, %v5695_v11  ;;  %v6479_v12 = vpop.permute.xlu1 %6478  ;;  %v6477_v11 = vpop.permute.xlu0 %6476 }
 0x433   : > { %v5696_v0 = vcombine.low %v4648_v59, %v4655_v37  ;;  %v9468_v51 = vcombine.high %v4648_v59, %v4655_v37  ;;  %v5712_v24 = vcombine.low %v4664_v26, %v4671_v31  ;;  %v9469_v8 = vcombine.high %v4664_v26, %v4671_v31 }
 0x434   : > { %6168 = vst.msk [vmem:[%s12188_s20 + $0x30] sm:$0xf] %vm3379_vm1, %v9733_v39  ;;  %6184 = vst.msk [vmem:[%s12188_s20 + $0x70] sm:$0xf] %vm3379_vm1, %v9749_v22  ;;  %v7196_v58 = vcombine.low %v12845_v5, %v6473_v23  ;;  %v7197_v62 = vcombine.high %v12845_v5, %v6473_v23  ;;  %v13383_v40 = vrot.slane %v7384_v60, %v11259_v54 }
 0x435   : > { %6200 = vst.msk [vmem:[%s12188_s20 + $0xb0] sm:$0xf] %vm3379_vm1, %v9765_v1  ;;  %6216 = vst.msk [vmem:[%s12188_s20 + $0xf0] sm:$0xf] %vm3379_vm1, %v9781_v38  ;;  %v5703_v3 = vrot.slane %v5696_v0, %v11259_v54  ;;  %v5711_v9 = vrot.slane %v9468_v51, %v11259_v54  ;;  %v5719_v29 = vrot.slane %v5712_v24, %v11259_v54 }
 0x436   : > { %v5727_v33 = vrot.slane %v9469_v8, %v11259_v54  ;;  %v13386_v42 = vrot.slane %v7385_v61, %v11259_v54  ;;  %v7204_v34 = vrot.slane %v7196_v58, %v11259_v54  ;;  %v7211_v48 = vrot.slane %v7197_v62, %v11259_v54 }
 0x437   : > { %v5728_v5 = vcombine.low %v5703_v3, %v5711_v9  ;;  %v5729_v47 = vcombine.high %v5703_v3, %v5711_v9  ;;  %v7400_v1 = vcombine.low %v13342_v4, %v6479_v12  ;;  %v7401_v38 = vcombine.high %v13342_v4, %v6479_v12 }
 0x438   : > { %v5744_v18 = vcombine.low %v5719_v29, %v5727_v33  ;;  %v5745_v52 = vcombine.high %v5719_v29, %v5727_v33  ;;  %v7212_v13 = vcombine.low %v12914_v41, %v7204_v34  ;;  %v7213_v16 = vcombine.high %v12914_v41, %v7204_v34 }
 0x439   : > { %v7228_v28 = vcombine.low %v12917_v14, %v7211_v48  ;;  %v7229_v49 = vcombine.high %v12917_v14, %v7211_v48  ;;  %v5736_v46 = vrot.slane %v5728_v5, %v11261_v56  ;;  %v5743_v55 = vrot.slane %v5729_v47, %v11261_v56 }
 0x43a   : > { %v5752_v30 = vrot.slane %v5744_v18, %v11261_v56  ;;  %v5759_v32 = vrot.slane %v5745_v52, %v11261_v56  ;;  %v7220_v45 = vrot.slane %v7212_v13, %v11261_v56  ;;  %v7227_v19 = vrot.slane %v7213_v16, %v11261_v56 }
 0x43b   : > { %v7236_v20 = vrot.slane %v7228_v28, %v11261_v56  ;;  %v7243_v41 = vrot.slane %v7229_v49, %v11261_v56  ;;  %v7332_v0 = vcombine.low %v13318_v25, %v6477_v11  ;;  %v7333_v51 = vcombine.high %v13318_v25, %v6477_v11 }
 0x43c   : > { %v5760_v14 = vcombine.low %v5736_v46, %v5752_v30  ;;  %v5761_v21 = vcombine.high %v5736_v46, %v5752_v30  ;;  %v5762_v53 = vcombine.low %v5743_v55, %v5759_v32  ;;  %v5763_v2 = vcombine.high %v5743_v55, %v5759_v32 }
 0x43d   : > { %v8268_v7 = vcombine.low %v7220_v45, %v7227_v19  ;;  %v9569_v50 = vcombine.high %v7220_v45, %v7227_v19  ;;  %v8284_v35 = vcombine.low %v7236_v20, %v7243_v41  ;;  %v9570_v43 = vcombine.high %v7236_v20, %v7243_v41 }
 0x43e   : > { %v9734_v59 = vpack.c.bf16 %v5760_v14, %v5760_v14  ;;  %v9750_v37 = vpack.c.bf16 %v5761_v21, %v5761_v21  ;;  %v9766_v26 = vpack.c.bf16 %v5762_v53, %v5762_v53  ;;  %v9782_v31 = vpack.c.bf16 %v5763_v2, %v5763_v2 }
 0x43f   : > { %v8275_v57 = vrot.slane %v8268_v7, %v11259_v54  ;;  %v8283_v23 = vrot.slane %v9569_v50, %v11259_v54  ;;  %v8291_v39 = vrot.slane %v8284_v35, %v11259_v54  ;;  %v8299_v22 = vrot.slane %v9570_v43, %v11259_v54 }
 0x440   : > { %6169 = vst.msk [vmem:[%s12188_s20 + $0x34] sm:$0xf] %vm3379_vm1, %v9734_v59  ;;  %6185 = vst.msk [vmem:[%s12188_s20 + $0x74] sm:$0xf] %vm3379_vm1, %v9750_v37 }
 0x441   : > { %6201 = vst.msk [vmem:[%s12188_s20 + $0xb4] sm:$0xf] %vm3379_vm1, %v9766_v26  ;;  %6217 = vst.msk [vmem:[%s12188_s20 + $0xf4] sm:$0xf] %vm3379_vm1, %v9782_v31  ;;  %v8300_v24 = vcombine.low %v8275_v57, %v8283_v23  ;;  %v8301_v8 = vcombine.high %v8275_v57, %v8283_v23  ;;  %v8316_v60 = vcombine.low %v8291_v39, %v8299_v22  ;;  %s10550_s20 = smov [#allocation17]  }
 0x442   : > { %v8317_v61 = vcombine.high %v8291_v39, %v8299_v22  ;;  %s10404_s0 = sshll.u32 %s10550_s20, 4  ;;  %s10405_s0 = int_to_ptr.vmem [resolvable:$false] %s10404_s0 }
 0x443   : > { %s10406_s10 = scalar_lea.vmem %s10405_s0, 8192  ;;  %p10407_p12 = scmp.lt.s32.totalorder %s13410_s12, %s10405_s0 }
 0x444   : > { %p10408_p0 = scmp.lt.s32.totalorder %s10406_s10, %s10400_s22 }
 0x446   : > { %p10409_p5 = por %p10408_p0, %p10407_p12 }
 0x448   : > { %p10410_p7 = pnand %p10409_p5, %p10403_p10 }
 0x44a   : > { %10413 = shalt.err (!%p10410_p7)
}
 0x44b   : > { %s10414_s21 = scalar_lea.hbm %s13408_s16, 4096  ;;  %s10418_s20 = scalar_lea.hbm %s13722_s11, 8192 }
 0x44c   : > { %p10415_p13 = scmp.ne.s32.totalorder %s13408_s16, %s10414_s21  ;;  %p10419_p6 = scmp.lt.u32.totalorder %s13408_s16, %s13722_s11 }
 0x44d   : > { %p10420_p1 = scmp.lt.u32.totalorder %s10418_s20, %s10414_s21  ;;  %p10422_p11 = scmp.lt.u32.totalorder %s10414_s21, %s13408_s16 }
 0x44e   : > { %p10416_p2 = pnand %p10415_p13, %p13720_p4 }
 0x44f   : > { %p10421_p3 = por %p10420_p1, %p10419_p6 }
 0x450   : > { %p10417_p8 = pneg %p10416_p2 }
 0x451   : > { %p10423_p9 = por %p10422_p11, %p10421_p3 }
 0x453   : > { %p10424_p10 = pnand %p10423_p9, %p10417_p8 }
 0x455   : > { %10427 = shalt.err (!%p10424_p10)
}
 0x456   : > { %s13723_s22 = smov 64   ;;  %v7408_v25 = vrot.slane %v7400_v1, %v11259_v54  ;;  %v7415_v4 = vrot.slane %v7401_v38, %v11259_v54  ;;  %v7340_v58 = vrot.slane %v7332_v0, %v11259_v54  ;;  %v7347_v62 = vrot.slane %v7333_v51, %v11259_v54  ;;  %s9058_s26 = sshll.u32 %s12303_s19, 4  ;;  %s13568_s26 = int_to_ptr.vmem [resolvable:$true] %s9058_s26 }
 0x457   : > { %10032 = dma.vmem_to_hbm [thread:$0]  (%p13720_p4), %s13410_s12, 4096, %s13408_s16, %s13430_s23, %s13723_s22, %s13723_s22, %s10549_s30   ;;  %v8308_v3 = vrot.slane %v8300_v24, %v11261_v56  ;;  %v8315_v9 = vrot.slane %v8301_v8, %v11261_v56  ;;  %v8324_v29 = vrot.slane %v8316_v60, %v11261_v56  ;;  %v8331_v33 = vrot.slane %v8317_v61, %v11261_v56 }
 0x458   : > { %v7416_v34 = vcombine.low %v13383_v40, %v7408_v25  ;;  %v7417_v48 = vcombine.high %v13383_v40, %v7408_v25  ;;  %v7432_v5 = vcombine.low %v13386_v42, %v7415_v4  ;;  %v7433_v47 = vcombine.high %v13386_v42, %v7415_v4  ;;  %s13724_s10 = sld [smem:[#allocation39_spill]]  ;;  %s10551_s1 = smov [#allocation19]  }
 0x459   : > { %v8332_v18 = vcombine.low %v8308_v3, %v8324_v29  ;;  %v8333_v52 = vcombine.high %v8308_v3, %v8324_v29  ;;  %v8334_v13 = vcombine.low %v8315_v9, %v8331_v33  ;;  %v8335_v16 = vcombine.high %v8315_v9, %v8331_v33  ;;  %s10432_s9 = sshll.u32 %s10551_s1, 4  ;;  %s10433_s9 = int_to_ptr.vmem [resolvable:$false] %s10432_s9 }
 0x45a   : > { %v7424_v28 = vrot.slane %v7416_v34, %v11261_v56  ;;  %v7431_v49 = vrot.slane %v7417_v48, %v11261_v56  ;;  %v7440_v46 = vrot.slane %v7432_v5, %v11261_v56  ;;  %v7447_v40 = vrot.slane %v7433_v47, %v11261_v56  ;;  %v6483_v34 = vpop.permute.xlu1 %6482  ;;  %v6481_v48 = vpop.permute.xlu0 %6480  ;;  %s10434_s20 = scalar_lea.vmem %s10433_s9, 8192  ;;  %p10435_p7 = scmp.lt.s32.totalorder %s13568_s26, %s10433_s9 }
 0x45b   : > { %v9795_v55 = vpack.c.bf16 %v8332_v18, %v8332_v18  ;;  %v9811_v30 = vpack.c.bf16 %v8333_v52, %v8333_v52  ;;  %v9827_v32 = vpack.c.bf16 %v8334_v13, %v8334_v13  ;;  %v9843_v42 = vpack.c.bf16 %v8335_v16, %v8335_v16 }
 0x45c   : > { %v8472_v45 = vcombine.low %v7424_v28, %v7431_v49  ;;  %v9575_v19 = vcombine.high %v7424_v28, %v7431_v49  ;;  %v8488_v20 = vcombine.low %v7440_v46, %v7447_v40  ;;  %v9576_v41 = vcombine.high %v7440_v46, %v7447_v40 }
 0x45d   : > { %8942 = vst.msk [vmem:[%s12303_s19 + $0x28] sm:$0xf] %vm3379_vm1, %v9795_v55  ;;  %8958 = vst.msk [vmem:[%s12303_s19 + $0x68] sm:$0xf] %vm3379_vm1, %v9811_v30  ;;  %v7348_v14 = vcombine.low %v13349_v15, %v7340_v58  ;;  %v7349_v21 = vcombine.high %v13349_v15, %v7340_v58  ;;  %v7364_v53 = vcombine.low %v13352_v63, %v7347_v62 }
 0x45e   : > { %8974 = vst.msk [vmem:[%s12303_s19 + $0xa8] sm:$0xf] %vm3379_vm1, %v9827_v32  ;;  %8990 = vst.msk [vmem:[%s12303_s19 + $0xe8] sm:$0xf] %vm3379_vm1, %v9843_v42  ;;  %v7365_v2 = vcombine.high %v13352_v63, %v7347_v62  ;;  %v8479_v7 = vrot.slane %v8472_v45, %v11259_v54  ;;  %v8487_v50 = vrot.slane %v9575_v19, %v11259_v54  ;;  %s13566_s21 = scalar_lea.hbm %s13724_s10, %s13030_s29  ;;  %s10428_s29 = scalar_lea.vmem %s13568_s26, 4096 }
 0x45f   : > { %v8495_v35 = vrot.slane %v8488_v20, %v11259_v54  ;;  %v8503_v43 = vrot.slane %v9576_v41, %v11259_v54  ;;  %v7356_v12 = vrot.slane %v7348_v14, %v11261_v56  ;;  %v7363_v11 = vrot.slane %v7349_v21, %v11261_v56  ;;  %p10429_p12 = scmp.ne.s32.totalorder %s13568_s26, %s10428_s29  ;;  %p10436_p13 = scmp.lt.s32.totalorder %s10434_s20, %s10428_s29 }
 0x460   : > { %v7372_v59 = vrot.slane %v7364_v53, %v11261_v56  ;;  %v7379_v15 = vrot.slane %v7365_v2, %v11261_v56  ;;  %v8504_v37 = vcombine.low %v8479_v7, %v8487_v50  ;;  %v8505_v26 = vcombine.high %v8479_v7, %v8487_v50 }
 0x461   : > { %v8520_v31 = vcombine.low %v8495_v35, %v8503_v43  ;;  %v8521_v63 = vcombine.high %v8495_v35, %v8503_v43  ;;  %v8404_v57 = vcombine.low %v7356_v12, %v7363_v11  ;;  %v9573_v23 = vcombine.high %v7356_v12, %v7363_v11  ;;  %p10430_p0 = pnand %p10429_p12, %p13720_p4  ;;  %p10437_p2 = por %p10436_p13, %p10435_p7 }
 0x462   : > { %v8420_v39 = vcombine.low %v7372_v59, %v7379_v15  ;;  %v9574_v22 = vcombine.high %v7372_v59, %v7379_v15  ;;  %v8512_v1 = vrot.slane %v8504_v37, %v11261_v56  ;;  %v8519_v38 = vrot.slane %v8505_v26, %v11261_v56 }
 0x463   : > { %v8528_v0 = vrot.slane %v8520_v31, %v11261_v56  ;;  %v8535_v51 = vrot.slane %v8521_v63, %v11261_v56  ;;  %v8411_v24 = vrot.slane %v8404_v57, %v11259_v54  ;;  %v8419_v8 = vrot.slane %v9573_v23, %v11259_v54  ;;  %p10431_p5 = pneg %p10430_p0 }
 0x464   : > { %v8427_v60 = vrot.slane %v8420_v39, %v11259_v54  ;;  %v8435_v61 = vrot.slane %v9574_v22, %v11259_v54  ;;  %v7536_v46 = vcombine.low %v13216_v10, %v6483_v34  ;;  %v7537_v40 = vcombine.high %v13216_v10, %v6483_v34 }
 0x465   : > { %v8536_v25 = vcombine.low %v8512_v1, %v8528_v0  ;;  %v8537_v4 = vcombine.high %v8512_v1, %v8528_v0  ;;  %v8538_v58 = vcombine.low %v8519_v38, %v8535_v51  ;;  %v8539_v62 = vcombine.high %v8519_v38, %v8535_v51  ;;  %p10438_p8 = pnand %p10437_p2, %p10431_p5 }
 0x466   : > { %v8436_v3 = vcombine.low %v8411_v24, %v8419_v8  ;;  %v8437_v9 = vcombine.high %v8411_v24, %v8419_v8  ;;  %v8452_v29 = vcombine.low %v8427_v60, %v8435_v61  ;;  %v8453_v33 = vcombine.high %v8427_v60, %v8435_v61 }
 0x467   : > { %v9798_v5 = vpack.c.bf16 %v8536_v25, %v8536_v25  ;;  %v9814_v47 = vpack.c.bf16 %v8537_v4, %v8537_v4  ;;  %v9830_v18 = vpack.c.bf16 %v8538_v58, %v8538_v58  ;;  %v9846_v52 = vpack.c.bf16 %v8539_v62, %v8539_v62 }
 0x468   : > { %v8444_v13 = vrot.slane %v8436_v3, %v11261_v56  ;;  %v8451_v16 = vrot.slane %v8437_v9, %v11261_v56  ;;  %v8460_v28 = vrot.slane %v8452_v29, %v11261_v56  ;;  %v8467_v49 = vrot.slane %v8453_v33, %v11261_v56 }
 0x469   : > { %8945 = vst.msk [vmem:[%s12303_s19 + $0x34] sm:$0xf] %vm3379_vm1, %v9798_v5  ;;  %8961 = vst.msk [vmem:[%s12303_s19 + $0x74] sm:$0xf] %vm3379_vm1, %v9814_v47  ;;  %v7468_v55 = vcombine.low %v13170_v17, %v6481_v48  ;;  %v7469_v30 = vcombine.high %v13170_v17, %v6481_v48  ;;  %v7544_v20 = vrot.slane %v7536_v46, %v11259_v54 }
 0x46a   : > { %8977 = vst.msk [vmem:[%s12303_s19 + $0xb4] sm:$0xf] %vm3379_vm1, %v9830_v18  ;;  %8993 = vst.msk [vmem:[%s12303_s19 + $0xf4] sm:$0xf] %vm3379_vm1, %v9846_v52  ;;  %v8468_v32 = vcombine.low %v8444_v13, %v8460_v28  ;;  %v8469_v42 = vcombine.high %v8444_v13, %v8460_v28  ;;  %v8470_v45 = vcombine.low %v8451_v16, %v8467_v49 }
 0x46b   : > { %v8471_v19 = vcombine.high %v8451_v16, %v8467_v49  ;;  %v7551_v41 = vrot.slane %v7537_v40, %v11259_v54  ;;  %v7476_v14 = vrot.slane %v7468_v55, %v11259_v54  ;;  %v7483_v10 = vrot.slane %v7469_v30, %v11259_v54 }
 0x46c   : > { %v9797_v21 = vpack.c.bf16 %v8468_v32, %v8468_v32  ;;  %v9813_v53 = vpack.c.bf16 %v8469_v42, %v8469_v42  ;;  %v9829_v2 = vpack.c.bf16 %v8470_v45, %v8470_v45  ;;  %v7552_v7 = vcombine.low %v13295_v44, %v7544_v20 }
 0x46d   : > { %v9845_v17 = vpack.c.bf16 %v8471_v19, %v8471_v19  ;;  %v7553_v50 = vcombine.high %v13295_v44, %v7544_v20  ;;  %v7568_v35 = vcombine.low %v13298_v36, %v7551_v41  ;;  %v7569_v43 = vcombine.high %v13298_v36, %v7551_v41 }
 0x46e   : > { %8944 = vst.msk [vmem:[%s12303_s19 + $0x30] sm:$0xf] %vm3379_vm1, %v9797_v21  ;;  %8960 = vst.msk [vmem:[%s12303_s19 + $0x70] sm:$0xf] %vm3379_vm1, %v9813_v53  ;;  %v7484_v12 = vcombine.low %v13267_v27, %v7476_v14  ;;  %v7485_v11 = vcombine.high %v13267_v27, %v7476_v14  ;;  %v7500_v59 = vcombine.low %v13270_v6, %v7483_v10 }
 0x46f   : > { %8976 = vst.msk [vmem:[%s12303_s19 + $0xb0] sm:$0xf] %vm3379_vm1, %v9829_v2  ;;  %8992 = vst.msk [vmem:[%s12303_s19 + $0xf0] sm:$0xf] %vm3379_vm1, %v9845_v17  ;;  %v7501_v44 = vcombine.high %v13270_v6, %v7483_v10  ;;  %v7560_v15 = vrot.slane %v7552_v7, %v11261_v56  ;;  %v7567_v36 = vrot.slane %v7553_v50, %v11261_v56 }
 0x470   : > { %v7576_v37 = vrot.slane %v7568_v35, %v11261_v56  ;;  %v7583_v26 = vrot.slane %v7569_v43, %v11261_v56  ;;  %v7492_v31 = vrot.slane %v7484_v12, %v11261_v56  ;;  %v7499_v63 = vrot.slane %v7485_v11, %v11261_v56 }
 0x471   : > { %v7508_v57 = vrot.slane %v7500_v59, %v11261_v56  ;;  %v7515_v27 = vrot.slane %v7501_v44, %v11261_v56  ;;  %v8608_v23 = vcombine.low %v7560_v15, %v7567_v36  ;;  %v9579_v39 = vcombine.high %v7560_v15, %v7567_v36 }
 0x472   : > { %v8624_v22 = vcombine.low %v7576_v37, %v7583_v26  ;;  %v9580_v6 = vcombine.high %v7576_v37, %v7583_v26  ;;  %v8540_v1 = vcombine.low %v7492_v31, %v7499_v63  ;;  %v9577_v38 = vcombine.high %v7492_v31, %v7499_v63 }
 0x473   : > { %v8556_v0 = vcombine.low %v7508_v57, %v7515_v27  ;;  %v9578_v51 = vcombine.high %v7508_v57, %v7515_v27  ;;  %v8615_v24 = vrot.slane %v8608_v23, %v11259_v54  ;;  %v8623_v8 = vrot.slane %v9579_v39, %v11259_v54 }
 0x474   : > { %v8631_v60 = vrot.slane %v8624_v22, %v11259_v54  ;;  %v8639_v61 = vrot.slane %v9580_v6, %v11259_v54  ;;  %v8547_v25 = vrot.slane %v8540_v1, %v11259_v54  ;;  %v8555_v4 = vrot.slane %v9577_v38, %v11259_v54 }
 0x475   : > { %v8563_v58 = vrot.slane %v8556_v0, %v11259_v54  ;;  %v8571_v62 = vrot.slane %v9578_v51, %v11259_v54  ;;  %v8640_v3 = vcombine.low %v8615_v24, %v8623_v8  ;;  %v8641_v9 = vcombine.high %v8615_v24, %v8623_v8 }
 0x476   : > { %v8656_v29 = vcombine.low %v8631_v60, %v8639_v61  ;;  %v8657_v33 = vcombine.high %v8631_v60, %v8639_v61  ;;  %v8572_v34 = vcombine.low %v8547_v25, %v8555_v4  ;;  %v8573_v48 = vcombine.high %v8547_v25, %v8555_v4 }
 0x477   : > { %v8588_v5 = vcombine.low %v8563_v58, %v8571_v62  ;;  %v8589_v47 = vcombine.high %v8563_v58, %v8571_v62  ;;  %v8648_v18 = vrot.slane %v8640_v3, %v11261_v56  ;;  %v8655_v52 = vrot.slane %v8641_v9, %v11261_v56 }
 0x478   : > { %v8664_v13 = vrot.slane %v8656_v29, %v11261_v56  ;;  %v8671_v16 = vrot.slane %v8657_v33, %v11261_v56  ;;  %v8580_v28 = vrot.slane %v8572_v34, %v11261_v56  ;;  %v8587_v54 = vrot.slane %v8573_v48, %v11261_v56 }
 0x479   : > { %v8596_v49 = vrot.slane %v8588_v5, %v11261_v56  ;;  %v8603_v46 = vrot.slane %v8589_v47, %v11261_v56 }
 0x47a   : > { %v8672_v40 = vcombine.low %v8648_v18, %v8664_v13  ;;  %v8673_v55 = vcombine.high %v8648_v18, %v8664_v13  ;;  %v8674_v30 = vcombine.low %v8655_v52, %v8671_v16  ;;  %v8675_v32 = vcombine.high %v8655_v52, %v8671_v16 }
 0x47b   : > { %v8604_v42 = vcombine.low %v8580_v28, %v8596_v49  ;;  %v8605_v45 = vcombine.high %v8580_v28, %v8596_v49  ;;  %v8606_v19 = vcombine.low %v8587_v54, %v8603_v46  ;;  %v8607_v20 = vcombine.high %v8587_v54, %v8603_v46 }
 0x47c   : > { %v9800_v41 = vpack.c.bf16 %v8672_v40, %v8672_v40  ;;  %v9816_v14 = vpack.c.bf16 %v8673_v55, %v8673_v55  ;;  %v9832_v56 = vpack.c.bf16 %v8674_v30, %v8674_v30  ;;  %v9848_v10 = vpack.c.bf16 %v8675_v32, %v8675_v32 }
 0x47d   : > { %v9799_v21 = vpack.c.bf16 %v8604_v42, %v8604_v42  ;;  %v9815_v53 = vpack.c.bf16 %v8605_v45, %v8605_v45  ;;  %v9831_v2 = vpack.c.bf16 %v8606_v19, %v8606_v19  ;;  %v9847_v17 = vpack.c.bf16 %v8607_v20, %v8607_v20 }
 0x47e   : > { %8947 = vst.msk [vmem:[%s12303_s19 + $0x3c] sm:$0xf] %vm3379_vm1, %v9800_v41  ;;  %8963 = vst.msk [vmem:[%s12303_s19 + $0x7c] sm:$0xf] %vm3379_vm1, %v9816_v14 }
 0x47f   : > { %8979 = vst.msk [vmem:[%s12303_s19 + $0xbc] sm:$0xf] %vm3379_vm1, %v9832_v56  ;;  %8995 = vst.msk [vmem:[%s12303_s19 + $0xfc] sm:$0xf] %vm3379_vm1, %v9848_v10 }
 0x480   : > { %8946 = vst.msk [vmem:[%s12303_s19 + $0x38] sm:$0xf] %vm3379_vm1, %v9799_v21  ;;  %8962 = vst.msk [vmem:[%s12303_s19 + $0x78] sm:$0xf] %vm3379_vm1, %v9815_v53 }
 0x481   : > { %8978 = vst.msk [vmem:[%s12303_s19 + $0xb8] sm:$0xf] %vm3379_vm1, %v9831_v2  ;;  %8994 = vst.msk [vmem:[%s12303_s19 + $0xf8] sm:$0xf] %vm3379_vm1, %v9847_v17 }
 0x482   : > { %10441 = shalt.err (!%p10438_p8)
}
 0x483   : > { %s10442_s19 = scalar_lea.hbm %s13566_s21, 4096  ;;  %s10446_s16 = scalar_lea.hbm %s13724_s10, 8192 }
 0x484   : > { %p10443_p6 = scmp.ne.s32.totalorder %s13566_s21, %s10442_s19  ;;  %p10447_p11 = scmp.lt.u32.totalorder %s13566_s21, %s13724_s10 }
 0x485   : > { %p10448_p9 = scmp.lt.u32.totalorder %s10446_s16, %s10442_s19  ;;  %p10450_p12 = scmp.lt.u32.totalorder %s10442_s19, %s13566_s21 }
 0x486   : > { %p10444_p1 = pnand %p10443_p6, %p13720_p4 }
 0x487   : > { %p10449_p10 = por %p10448_p9, %p10447_p11 }
 0x488   : > { %p10445_p3 = pneg %p10444_p1 }
 0x489   : > { %p10451_p0 = por %p10450_p12, %p10449_p10 }
 0x48b   : > { %p10452_p5 = pnand %p10451_p0, %p10445_p3 }
 0x48d   : > { %10455 = shalt.err (!%p10452_p5)
}
 0x48e   : > { %10033 = dma.vmem_to_hbm [thread:$0]  (%p13720_p4), %s13568_s26, 4096, %s13566_s21, %s13430_s23, %s13723_s22, %s13723_s22, %s10549_s30  }
 0x48f PF: > { %s9073_s29 = sand.u32 1, %s10510_s13   ;;  %p13725_p7 = scmp.ne.s32.totalorder %s13687_s8, 0 }
 0x490   : > { %p13726_p13 = scmp.ge.s32.totalorder %s10530_s18, 2  ;;  %s9074_s20 = scalar_lea.sflag [#allocation4], %s9073_s29 }
 0x492   : > { %p10064_p2 = pnand %p13726_p13, %p13725_p7 }
 0x494   : > { %10501 = dma.done.wait (!%p10064_p2), %s9074_s20, 4096  }
 0x495   : > { %10503 = vsyncadd (!%p10064_p2), %s9074_s20, 4294963200  ;;  %s13727_s28 = sadd.s32 4294967294, %s10530_s18  }
 0x496   : > { %s9082_s19 = sand.u32 1, %s13727_s28  }
 0x497   : > { %s9083_s0 = scalar_lea.sflag [#allocation18], %s9082_s19 }
 0x498   : > { %10505 = dma.done.wait (!%p10064_p2), %s9083_s0, 8192  }
 0x499   : > { %10507 = vsyncadd (!%p10064_p2), %s9083_s0, 4294959104  ;;  %s34_s18 = sadd.s32 1, %s10530_s18   ;;  %s13728_s13 = smov %s10514_s14 }
 0x49a   : > { %p31_p4 = scmp.ge.s32.totalorder %s34_s18, 4   ;;  %s13729_s14 = smov %s10518_s15 }
 0x49b   : > { %s13730_s15 = smov %s10855_s24  ;;  %s13731_s16 = smov %s10526_s17 }
 0x49c   : > { %s13732_s17 = smov %s13734_s25  ;;  %33 = sbr.rel (!%p31_p4) target bundleno = 18 (0x12), region = 158 }
 0x4a3   :  { %9097 = vsyncpa [#allocation3], 1 }
 0x4a4   :  { %9099 = vsyncpa [#allocation3 + $0x1], 1 }
 0x4a5   :  { %9100 = vsyncpa [#allocation8], 1 }
 0x4a6   :  { %9101 = vsyncpa [#allocation11], 1 }
 0x4a7   :  { %9102 = vsyncpa [#allocation14], 1 }
 0x4a8   :  { %9103 = vsyncpa [#allocation4], 1 }
 0x4a9   :  { %9105 = vsyncpa [#allocation4 + $0x1], 1 }
 0x4aa   :  { %9106 = vsyncpa [#allocation18], 1 }
 0x4ab   :  { %9108 = vsyncpa [#allocation18 + $0x1], 1 }
 0x4ac   :  { %9109 = vsyncpa [#allocation5], 1 }
 0x4ad   :  { %9111 = vsyncpa [#allocation5 + $0x1], 1 }

</bundles_post_ra>
